<compile_context>
chip_gen: v7x
topology: tpu7x:2x2x1
jax: 0.10.0
libtpu: 0.0.40
codegen_flags: <defaults>
</compile_context>

<pallas_src>
import jax
import jax.numpy as jnp
from jax.experimental import pallas as pl
from jax.experimental.pallas import tpu as pltpu

EPS = 1e-5


def _reflect_pad1_store(xp_ref, t):
    """Store ReflectionPad2d(1) of t (H, W, C) into xp_ref ((H+2, W+2, C))."""
    H, W = t.shape[0], t.shape[1]
    xp_ref[1:H + 1, 1:W + 1, :] = t
    xp_ref[0:1, 1:W + 1, :] = t[1:2]                    # top row    <- row 1
    xp_ref[H + 1:H + 2, 1:W + 1, :] = t[H - 2:H - 1]    # bottom row <- row H-2
    xp_ref[:, 0:1, :] = xp_ref[:, 2:3, :]               # left col  (+ corners)
    xp_ref[:, W + 1:W + 2, :] = xp_ref[:, W - 1:W, :]   # right col (+ corners)


def _conv3x3_instnorm_centered(xp_ref, g_ref, acc_ref, w_ref, b_ref):
    """3x3 valid conv (+bias) on the reflect-padded activation in xp_ref,
    followed by InstanceNorm2d (affine=False) centering.

    On return acc_ref holds the *centered* conv output (H*W, C) in f32 and
    the per-channel inverse std (1, C) is returned; the caller applies the
    scale fused with its epilogue (ReLU / residual add).

    xp_ref : (H+2, W+2, C)  compute dtype  padded activation (VMEM scratch)
    g_ref  : ((H+2)*W, 3C)  compute dtype  dx-folded im2col buffer
    acc_ref: (H*W, C)       f32            conv accumulator / centered output
    w_ref  : (3, 3C, C)     compute dtype  weights, (dx, Cin) folded into K
    b_ref  : (1, C)         f32            bias
    """
    Hp2, Wp2, C = xp_ref.shape
    H, W = Hp2 - 2, Wp2 - 2
    HW = H * W

    # dx-folded im2col buffer: G[y*W + x, dx*C:(dx+1)*C] = xp[y, x + dx, :].
    # Built ONCE per conv (3 shifted copies) instead of once per dy (9).
    for dx in range(3):
        g_ref[:, dx * C:(dx + 1) * C] = (
            xp_ref[:, dx:dx + W, :].reshape((H + 2) * W, C))

    # Bias as the accumulator init (mathematically cancelled by InstanceNorm;
    # kept for parity with the PyTorch conv -> IN sequence).
    acc_ref[...] = jnp.broadcast_to(b_ref[...], (HW, C))

    # One (H*W, 3C) x (3C, C) MXU matmul per dy; the LHS is a contiguous row
    # slice of G (no per-dy im2col rebuild, no copy).
    for dy in range(3):
        acc_ref[...] += jnp.dot(g_ref[dy * W:dy * W + HW, :], w_ref[dy],
                                preferred_element_type=jnp.float32)

    # InstanceNorm2d statistics: two-pass (mean, then centered sum of
    # squares) for numerical robustness; centering done in place in VMEM.
    inv_n = 1.0 / float(HW)
    mean = jnp.sum(acc_ref[...], axis=0, keepdims=True) * inv_n
    acc_ref[...] = acc_ref[...] - mean
    var = jnp.sum(acc_ref[...] * acc_ref[...], axis=0, keepdims=True) * inv_n
    return jax.lax.rsqrt(var + EPS)


def _resnet_block_kernel(x_ref, w1_ref, b1_ref, w2_ref, b2_ref, o_ref,
                         xp_ref, g_ref, acc_ref):
    H, W, C = x_ref.shape

    # Stage 1: reflect-pad(x) -> conv1 -> InstanceNorm -> ReLU.
    _reflect_pad1_store(xp_ref, x_ref[...].astype(xp_ref.dtype))
    inv_std1 = _conv3x3_instnorm_centered(xp_ref, g_ref, acc_ref,
                                          w1_ref, b1_ref)
    y1 = jnp.maximum(acc_ref[...] * inv_std1, 0.0)          # (H*W, C) f32
    # (dropout disabled: use_dropout=False in the CycleGAN generator)

    # Stage 2: reflect-pad(y1) -> conv2 -> InstanceNorm.  xp_ref / g_ref are
    # reused; all stage-1 reads of them are program-ordered before these
    # stores.
    _reflect_pad1_store(xp_ref, y1.reshape(H, W, C).astype(xp_ref.dtype))
    inv_std2 = _conv3x3_instnorm_centered(xp_ref, g_ref, acc_ref,
                                          w2_ref, b2_ref)

    # Residual add: the x block is still resident in VMEM -> re-read it here
    # instead of keeping a full-image value live across both conv stages.
    y2 = (acc_ref[...] * inv_std2).reshape(H, W, C)
    # TODO(synk): for tiny C (e.g. the C=4 demo) pad C to 128 (or fold W into
    # the lane axis) so this store and the dx*C lane slices are unmasked;
    # production C=256 is already lane-aligned.
    o_ref[...] = (x_ref[...].astype(jnp.float32) + y2).astype(o_ref.dtype)


def _fold_weight(w_oihw, compute_dtype):
    """PyTorch OIHW (Cout, Cin, 3, 3) -> (3, 3*Cin, Cout); the (dx, Cin) pair
    is flattened dx-major into the contraction dim, matching G's columns."""
    w = jnp.transpose(w_oihw, (2, 3, 1, 0))            # (dy, dx, Cin, Cout)
    kdy, kdx, cin, cout = w.shape
    return w.reshape(kdy, kdx * cin, cout).astype(compute_dtype)


def _vmem_limit_bytes(H, W, C, x_bytes, cdt_bytes):
    """Rough per-grid-step footprint (double-buffered I/O blocks + weights +
    scratch + temporaries), clamped to [32 MiB, 64 MiB] so the request is
    legal on every generation (v7x physical VMEM is 64 MiB)."""
    io_blocks = 2 * 2 * H * W * C * x_bytes                        # x + out
    weights = 2 * 2 * (9 * C * C * cdt_bytes + C * 4)              # w1/w2 + b
    scratch = ((H + 2) * (W + 2) * C + (H + 2) * W * 3 * C) * cdt_bytes \
        + H * W * C * 4
    temps = 3 * H * W * C * 4                                      # y1/y2/...
    est = io_blocks + weights + scratch + temps + (1 << 20)
    return int(min(max(est, 32 * 1024 * 1024), 64 * 1024 * 1024))


def resnet_block_forward_nhwc(x_nhwc, w1, b1, w2, b2,
                              compute_dtype=jnp.bfloat16):
    """Fused ResnetBlock forward on NHWC activations (preferred: keep
    activations NHWC across chained blocks; transpose only at the network
    boundary).  w*: (C, C, 3, 3) PyTorch OIHW; b*: (C,).  `compute_dtype` is
    the MXU operand dtype (bf16 default; accumulation, InstanceNorm and the
    residual stay f32).  HBM I/O dtype follows x (pass bf16 x for bf16 I/O)."""
    B, H, W, C = x_nhwc.shape
    w1f = _fold_weight(w1, compute_dtype)
    w2f = _fold_weight(w2, compute_dtype)
    b1r = b1.reshape(1, C).astype(jnp.float32)
    b2r = b2.reshape(1, C).astype(jnp.float32)

    x_bytes = jnp.dtype(x_nhwc.dtype).itemsize
    cdt_bytes = jnp.dtype(compute_dtype).itemsize
    flops = 2 * (2 * H * W * 9 * C * C) * B                 # two 3x3 convs
    bytes_accessed = (2 * B * H * W * C * x_bytes            # x + out
                      + 2 * 9 * C * C * cdt_bytes + 2 * C * 4)

    return pl.pallas_call(
        _resnet_block_kernel,
        out_shape=jax.ShapeDtypeStruct((B, H, W, C), x_nhwc.dtype),
        grid_spec=pltpu.PrefetchScalarGridSpec(
            num_scalar_prefetch=0,
            grid=(B,),
            in_specs=[
                pl.BlockSpec((None, H, W, C), lambda b: (b, 0, 0, 0)),  # x
                pl.BlockSpec((3, 3 * C, C), lambda b: (0, 0, 0)),       # w1
                pl.BlockSpec((1, C), lambda b: (0, 0)),                 # b1
                pl.BlockSpec((3, 3 * C, C), lambda b: (0, 0, 0)),       # w2
                pl.BlockSpec((1, C), lambda b: (0, 0)),                 # b2
            ],
            out_specs=pl.BlockSpec((None, H, W, C), lambda b: (b, 0, 0, 0)),
            scratch_shapes=[
                pltpu.VMEM((H + 2, W + 2, C), compute_dtype),       # padded act
                pltpu.VMEM(((H + 2) * W, 3 * C), compute_dtype),    # im2col G
                pltpu.VMEM((H * W, C), jnp.float32),                # conv acc
            ],
        ),
        compiler_params=pltpu.CompilerParams(
            dimension_semantics=("parallel",),
            vmem_limit_bytes=_vmem_limit_bytes(H, W, C, x_bytes, cdt_bytes)),
        cost_estimate=pl.CostEstimate(
            flops=flops, transcendentals=2 * C * B,
            bytes_accessed=bytes_accessed),
    )(x_nhwc, w1f, b1r, w2f, b2r)


def resnet_block_forward(x_nchw, w1, b1, w2, b2, compute_dtype=jnp.bfloat16):
    """PyTorch-layout entry point: x (B, C, H, W).  The NCHW<->NHWC
    transposes are full HBM round trips; when chaining blocks call
    resnet_block_forward_nhwc directly and transpose once at the boundary."""
    x = jnp.transpose(x_nchw, (0, 2, 3, 1))            # NCHW -> NHWC (glue)
    out = resnet_block_forward_nhwc(x, w1, b1, w2, b2, compute_dtype)
    return jnp.transpose(out, (0, 3, 1, 2))            # NHWC -> NCHW


def _reference(x_nchw, w1, b1, w2, b2, compute_dtype=jnp.float32):
    """Pure-JAX reference. `compute_dtype` mirrors the kernel's MXU operand
    dtype so the bf16 path can also be checked tightly."""
    def conv_in(x, w, b):
        xp = jnp.pad(x, ((0, 0), (0, 0), (1, 1), (1, 1)), mode="reflect")
        y = jax.lax.conv_general_dilated(
            xp.astype(compute_dtype), w.astype(compute_dtype),
            window_strides=(1, 1), padding="VALID",
            dimension_numbers=("NCHW", "OIHW", "NCHW"),
            preferred_element_type=jnp.float32)
        y = y + b[None, :, None, None].astype(jnp.float32)
        mean = jnp.mean(y, axis=(2, 3), keepdims=True)
        var = jnp.mean((y - mean) ** 2, axis=(2, 3), keepdims=True)
        return (y - mean) * jax.lax.rsqrt(var + EPS)

    h = jax.nn.relu(conv_in(x_nchw, w1, b1))
    return x_nchw + conv_in(h, w2, b2)


if __name__ == "__main__":
    B, C, H, W = 2, 4, 16, 16   # dim = 4 (demo; production CycleGAN is 256)
    key = jax.random.PRNGKey(0)
    kx, kw1, kb1, kw2, kb2 = jax.random.split(key, 5)

    x = jax.random.normal(kx, (B, C, H, W), jnp.float32)
    w1 = jax.random.normal(kw1, (C, C, 3, 3), jnp.float32) * 0.1
    b1 = jax.random.normal(kb1, (C,), jnp.float32) * 0.1
    w2 = jax.random.normal(kw2, (C, C, 3, 3), jnp.float32) * 0.1
    b2 = jax.random.normal(kb2, (C,), jnp.float32) * 0.1

    fwd = jax.jit(resnet_block_forward, static_argnames=("compute_dtype",))

    # Default (bf16 MXU operand) path.
    out = jax.block_until_ready(fwd(x, w1, b1, w2, b2))
    assert out.shape == (B, C, H, W)

    # Structural check vs a reference using the same bf16 operands.
    ref_bf16 = _reference(x, w1, b1, w2, b2, compute_dtype=jnp.bfloat16)
    assert jnp.allclose(out, ref_bf16, atol=1e-2, rtol=1e-2), \
        "mismatch vs bf16-operand reference"

    # Fidelity vs the pure-f32 (PyTorch-exact) reference; loose tolerance
    # accounts only for bf16 MXU operand rounding (documented divergence).
    ref_f32 = _reference(x, w1, b1, w2, b2, compute_dtype=jnp.float32)
    assert jnp.allclose(out, ref_f32, atol=1e-1, rtol=1e-1), \
        "mismatch vs f32 reference (bf16 kernel)"

    # Exactness: the f32-operand kernel variant matches PyTorch semantics.
    out_f32 = jax.block_until_ready(
        fwd(x, w1, b1, w2, b2, compute_dtype=jnp.float32))
    assert jnp.allclose(out_f32, ref_f32, atol=1e-3, rtol=1e-3), \
        "mismatch vs f32 reference (f32 kernel)"

    print("KERNEL_OK")
</pallas_src>

<mosaic_0001>
module attributes {stable_mosaic.version = 11 : i64} {
  func.func @_resnet_block_kernel(%arg0: i32, %arg1: memref<1x16x16x4xf32, #tpu.memory_space<vmem>>, %arg2: memref<3x12x4xbf16, #tpu.memory_space<vmem>>, %arg3: memref<1x4xf32, #tpu.memory_space<vmem>>, %arg4: memref<3x12x4xbf16, #tpu.memory_space<vmem>>, %arg5: memref<1x4xf32, #tpu.memory_space<vmem>>, %arg6: memref<1x16x16x4xf32, #tpu.memory_space<vmem>>, %arg7: memref<18x18x4xbf16, #tpu.memory_space<vmem>>, %arg8: memref<288x12xbf16, #tpu.memory_space<vmem>>, %arg9: memref<256x4xf32, #tpu.memory_space<vmem>>) attributes {dimension_semantics = [#tpu.dimension_semantics<parallel>], iteration_bounds = array<i64: 2>, scalar_prefetch = 0 : i64, scratch_operands = 3 : i64, tpu.core_type = #tpu.core_type<tc>, window_params = [{transform_indices = @transform_0, window_bounds = array<i64: 1, 16, 16, 4>}, {pipeline_mode = #tpu.pipeline_mode<synchronous>, transform_indices = @transform_1, window_bounds = array<i64: 3, 12, 4>}, {pipeline_mode = #tpu.pipeline_mode<synchronous>, transform_indices = @transform_2, window_bounds = array<i64: 1, 4>}, {pipeline_mode = #tpu.pipeline_mode<synchronous>, transform_indices = @transform_3, window_bounds = array<i64: 3, 12, 4>}, {pipeline_mode = #tpu.pipeline_mode<synchronous>, transform_indices = @transform_4, window_bounds = array<i64: 1, 4>}, {transform_indices = @transform_5, window_bounds = array<i64: 1, 16, 16, 4>}]} {
    %c0 = arith.constant 0 : index
    %c0_0 = arith.constant 0 : index
    %c0_1 = arith.constant 0 : index
    %c0_2 = arith.constant 0 : index
    %0 = vector.load %arg1[%c0, %c0_0, %c0_1, %c0_2] : memref<1x16x16x4xf32, #tpu.memory_space<vmem>>, vector<1x16x16x4xf32>
    %1 = vector.shape_cast %0 : vector<1x16x16x4xf32> to vector<16x16x4xf32>
    %2 = arith.truncf %1 : vector<16x16x4xf32> to vector<16x16x4xbf16>
    %c1 = arith.constant 1 : index
    %c1_3 = arith.constant 1 : index
    %c0_4 = arith.constant 0 : index
    %3 = vector.load %arg7[%c1, %c1_3, %c0_4] : memref<18x18x4xbf16, #tpu.memory_space<vmem>>, vector<16x16x4xbf16>
    tpu.vector_store %arg7[%c1, %c1_3, %c0_4], %2 {strides = array<i32>} : memref<18x18x4xbf16, #tpu.memory_space<vmem>>, vector<16x16x4xbf16>,
    %4 = vector.extract_strided_slice %2 {offsets = [1, 0, 0], sizes = [1, 16, 4], strides = [1, 1, 1]} : vector<16x16x4xbf16> to vector<1x16x4xbf16>
    %c0_5 = arith.constant 0 : index
    %c1_6 = arith.constant 1 : index
    %c0_7 = arith.constant 0 : index
    %5 = vector.load %arg7[%c0_5, %c1_6, %c0_7] : memref<18x18x4xbf16, #tpu.memory_space<vmem>>, vector<1x16x4xbf16>
    tpu.vector_store %arg7[%c0_5, %c1_6, %c0_7], %4 {strides = array<i32>} : memref<18x18x4xbf16, #tpu.memory_space<vmem>>, vector<1x16x4xbf16>,
    %6 = vector.extract_strided_slice %2 {offsets = [14, 0, 0], sizes = [1, 16, 4], strides = [1, 1, 1]} : vector<16x16x4xbf16> to vector<1x16x4xbf16>
    %c17 = arith.constant 17 : index
    %c1_8 = arith.constant 1 : index
    %c0_9 = arith.constant 0 : index
    %7 = vector.load %arg7[%c17, %c1_8, %c0_9] : memref<18x18x4xbf16, #tpu.memory_space<vmem>>, vector<1x16x4xbf16>
    tpu.vector_store %arg7[%c17, %c1_8, %c0_9], %6 {strides = array<i32>} : memref<18x18x4xbf16, #tpu.memory_space<vmem>>, vector<1x16x4xbf16>,
    %c0_10 = arith.constant 0 : index
    %c2 = arith.constant 2 : index
    %c0_11 = arith.constant 0 : index
    %8 = vector.load %arg7[%c0_10, %c2, %c0_11] : memref<18x18x4xbf16, #tpu.memory_space<vmem>>, vector<18x1x4xbf16>
    %c0_12 = arith.constant 0 : index
    %c0_13 = arith.constant 0 : index
    %c0_14 = arith.constant 0 : index
    %9 = vector.load %arg7[%c0_12, %c0_13, %c0_14] : memref<18x18x4xbf16, #tpu.memory_space<vmem>>, vector<18x1x4xbf16>
    tpu.vector_store %arg7[%c0_12, %c0_13, %c0_14], %8 {strides = array<i32>} : memref<18x18x4xbf16, #tpu.memory_space<vmem>>, vector<18x1x4xbf16>,
    %c0_15 = arith.constant 0 : index
    %c15 = arith.constant 15 : index
    %c0_16 = arith.constant 0 : index
    %10 = vector.load %arg7[%c0_15, %c15, %c0_16] : memref<18x18x4xbf16, #tpu.memory_space<vmem>>, vector<18x1x4xbf16>
    %c0_17 = arith.constant 0 : index
    %c17_18 = arith.constant 17 : index
    %c0_19 = arith.constant 0 : index
    %11 = vector.load %arg7[%c0_17, %c17_18, %c0_19] : memref<18x18x4xbf16, #tpu.memory_space<vmem>>, vector<18x1x4xbf16>
    tpu.vector_store %arg7[%c0_17, %c17_18, %c0_19], %10 {strides = array<i32>} : memref<18x18x4xbf16, #tpu.memory_space<vmem>>, vector<18x1x4xbf16>,
    %c0_20 = arith.constant 0 : index
    %c0_21 = arith.constant 0 : index
    %c0_22 = arith.constant 0 : index
    %12 = vector.load %arg7[%c0_20, %c0_21, %c0_22] : memref<18x18x4xbf16, #tpu.memory_space<vmem>>, vector<18x16x4xbf16>
    %13 = vector.shape_cast %12 : vector<18x16x4xbf16> to vector<288x4xbf16>
    %c0_23 = arith.constant 0 : index
    %c0_24 = arith.constant 0 : index
    %14 = vector.load %arg8[%c0_23, %c0_24] : memref<288x12xbf16, #tpu.memory_space<vmem>>, vector<288x4xbf16>
    tpu.vector_store %arg8[%c0_23, %c0_24], %13 {strides = array<i32>} : memref<288x12xbf16, #tpu.memory_space<vmem>>, vector<288x4xbf16>,
    %c0_25 = arith.constant 0 : index
    %c1_26 = arith.constant 1 : index
    %c0_27 = arith.constant 0 : index
    %15 = vector.load %arg7[%c0_25, %c1_26, %c0_27] : memref<18x18x4xbf16, #tpu.memory_space<vmem>>, vector<18x16x4xbf16>
    %16 = vector.shape_cast %15 : vector<18x16x4xbf16> to vector<288x4xbf16>
    %c0_28 = arith.constant 0 : index
    %c4 = arith.constant 4 : index
    %17 = vector.load %arg8[%c0_28, %c4] : memref<288x12xbf16, #tpu.memory_space<vmem>>, vector<288x4xbf16>
    tpu.vector_store %arg8[%c0_28, %c4], %16 {strides = array<i32>} : memref<288x12xbf16, #tpu.memory_space<vmem>>, vector<288x4xbf16>,
    %c0_29 = arith.constant 0 : index
    %c2_30 = arith.constant 2 : index
    %c0_31 = arith.constant 0 : index
    %18 = vector.load %arg7[%c0_29, %c2_30, %c0_31] : memref<18x18x4xbf16, #tpu.memory_space<vmem>>, vector<18x16x4xbf16>
    %19 = vector.shape_cast %18 : vector<18x16x4xbf16> to vector<288x4xbf16>
    %c0_32 = arith.constant 0 : index
    %c8 = arith.constant 8 : index
    %20 = vector.load %arg8[%c0_32, %c8] : memref<288x12xbf16, #tpu.memory_space<vmem>>, vector<288x4xbf16>
    tpu.vector_store %arg8[%c0_32, %c8], %19 {strides = array<i32>} : memref<288x12xbf16, #tpu.memory_space<vmem>>, vector<288x4xbf16>,
    %c0_33 = arith.constant 0 : index
    %c0_34 = arith.constant 0 : index
    %21 = vector.load %arg3[%c0_33, %c0_34] : memref<1x4xf32, #tpu.memory_space<vmem>>, vector<1x4xf32>
    %22 = vector.shape_cast %21 : vector<1x4xf32> to vector<1x4xf32>
    %23 = vector.broadcast %22 : vector<1x4xf32> to vector<256x4xf32>
    %c0_35 = arith.constant 0 : index
    %c0_36 = arith.constant 0 : index
    %24 = vector.load %arg9[%c0_35, %c0_36] : memref<256x4xf32, #tpu.memory_space<vmem>>, vector<256x4xf32>
    tpu.vector_store %arg9[%c0_35, %c0_36], %23 {strides = array<i32>} : memref<256x4xf32, #tpu.memory_space<vmem>>, vector<256x4xf32>,
    %c0_37 = arith.constant 0 : index
    %c0_38 = arith.constant 0 : index
    %25 = vector.load %arg9[%c0_37, %c0_38] : memref<256x4xf32, #tpu.memory_space<vmem>>, vector<256x4xf32>
    %c0_39 = arith.constant 0 : index
    %c0_40 = arith.constant 0 : index
    %26 = vector.load %arg8[%c0_39, %c0_40] : memref<288x12xbf16, #tpu.memory_space<vmem>>, vector<256x12xbf16>
    %c0_41 = arith.constant 0 : index
    %c0_42 = arith.constant 0 : index
    %c0_43 = arith.constant 0 : index
    %27 = vector.load %arg2[%c0_41, %c0_42, %c0_43] : memref<3x12x4xbf16, #tpu.memory_space<vmem>>, vector<1x12x4xbf16>
    %28 = vector.shape_cast %27 : vector<1x12x4xbf16> to vector<12x4xbf16>
    %cst = arith.constant dense<0.000000e+00> : vector<256x4xf32>
    %29 = tpu.matmul %26, %28, %cst {dimension_numbers = #tpu.dot_dimension_numbers<[1], [0], [0], [1], [0, 0, 1, 1], [], []>} : vector<256x12xbf16>, vector<12x4xbf16>, vector<256x4xf32> -> vector<256x4xf32>
    %30 = arith.addf %25, %29 : vector<256x4xf32>
    %c0_44 = arith.constant 0 : index
    %c0_45 = arith.constant 0 : index
    %31 = vector.load %arg9[%c0_44, %c0_45] : memref<256x4xf32, #tpu.memory_space<vmem>>, vector<256x4xf32>
    tpu.vector_store %arg9[%c0_44, %c0_45], %30 {strides = array<i32>} : memref<256x4xf32, #tpu.memory_space<vmem>>, vector<256x4xf32>,
    %c0_46 = arith.constant 0 : index
    %c0_47 = arith.constant 0 : index
    %32 = vector.load %arg9[%c0_46, %c0_47] : memref<256x4xf32, #tpu.memory_space<vmem>>, vector<256x4xf32>
    %c16 = arith.constant 16 : index
    %c0_48 = arith.constant 0 : index
    %33 = vector.load %arg8[%c16, %c0_48] : memref<288x12xbf16, #tpu.memory_space<vmem>>, vector<256x12xbf16>
    %c1_49 = arith.constant 1 : index
    %c0_50 = arith.constant 0 : index
    %c0_51 = arith.constant 0 : index
    %34 = vector.load %arg2[%c1_49, %c0_50, %c0_51] : memref<3x12x4xbf16, #tpu.memory_space<vmem>>, vector<1x12x4xbf16>
    %35 = vector.shape_cast %34 : vector<1x12x4xbf16> to vector<12x4xbf16>
    %cst_52 = arith.constant dense<0.000000e+00> : vector<256x4xf32>
    %36 = tpu.matmul %33, %35, %cst_52 {dimension_numbers = #tpu.dot_dimension_numbers<[1], [0], [0], [1], [0, 0, 1, 1], [], []>} : vector<256x12xbf16>, vector<12x4xbf16>, vector<256x4xf32> -> vector<256x4xf32>
    %37 = arith.addf %32, %36 : vector<256x4xf32>
    %c0_53 = arith.constant 0 : index
    %c0_54 = arith.constant 0 : index
    %38 = vector.load %arg9[%c0_53, %c0_54] : memref<256x4xf32, #tpu.memory_space<vmem>>, vector<256x4xf32>
    tpu.vector_store %arg9[%c0_53, %c0_54], %37 {strides = array<i32>} : memref<256x4xf32, #tpu.memory_space<vmem>>, vector<256x4xf32>,
    %c0_55 = arith.constant 0 : index
    %c0_56 = arith.constant 0 : index
    %39 = vector.load %arg9[%c0_55, %c0_56] : memref<256x4xf32, #tpu.memory_space<vmem>>, vector<256x4xf32>
    %c32 = arith.constant 32 : index
    %c0_57 = arith.constant 0 : index
    %40 = vector.load %arg8[%c32, %c0_57] : memref<288x12xbf16, #tpu.memory_space<vmem>>, vector<256x12xbf16>
    %c2_58 = arith.constant 2 : index
    %c0_59 = arith.constant 0 : index
    %c0_60 = arith.constant 0 : index
    %41 = vector.load %arg2[%c2_58, %c0_59, %c0_60] : memref<3x12x4xbf16, #tpu.memory_space<vmem>>, vector<1x12x4xbf16>
    %42 = vector.shape_cast %41 : vector<1x12x4xbf16> to vector<12x4xbf16>
    %cst_61 = arith.constant dense<0.000000e+00> : vector<256x4xf32>
    %43 = tpu.matmul %40, %42, %cst_61 {dimension_numbers = #tpu.dot_dimension_numbers<[1], [0], [0], [1], [0, 0, 1, 1], [], []>} : vector<256x12xbf16>, vector<12x4xbf16>, vector<256x4xf32> -> vector<256x4xf32>
    %44 = arith.addf %39, %43 : vector<256x4xf32>
    %c0_62 = arith.constant 0 : index
    %c0_63 = arith.constant 0 : index
    %45 = vector.load %arg9[%c0_62, %c0_63] : memref<256x4xf32, #tpu.memory_space<vmem>>, vector<256x4xf32>
    tpu.vector_store %arg9[%c0_62, %c0_63], %44 {strides = array<i32>} : memref<256x4xf32, #tpu.memory_space<vmem>>, vector<256x4xf32>,
    %c0_64 = arith.constant 0 : index
    %c0_65 = arith.constant 0 : index
    %46 = vector.load %arg9[%c0_64, %c0_65] : memref<256x4xf32, #tpu.memory_space<vmem>>, vector<256x4xf32>
    %cst_66 = arith.constant dense<0.000000e+00> : vector<4xf32>
    %47 = vector.multi_reduction <add>, %46, %cst_66 [0] : vector<256x4xf32> to vector<4xf32>
    %48 = vector.shape_cast %47 : vector<4xf32> to vector<1x4xf32>
    %cst_67 = arith.constant 3.906250e-03 : f32
    %49 = vector.broadcast %cst_67 : f32 to vector<1x4xf32>
    %50 = arith.mulf %48, %49 : vector<1x4xf32>
    %c0_68 = arith.constant 0 : index
    %c0_69 = arith.constant 0 : index
    %51 = vector.load %arg9[%c0_68, %c0_69] : memref<256x4xf32, #tpu.memory_space<vmem>>, vector<256x4xf32>
    %52 = vector.broadcast %50 : vector<1x4xf32> to vector<256x4xf32>
    %53 = arith.subf %51, %52 : vector<256x4xf32>
    %c0_70 = arith.constant 0 : index
    %c0_71 = arith.constant 0 : index
    %54 = vector.load %arg9[%c0_70, %c0_71] : memref<256x4xf32, #tpu.memory_space<vmem>>, vector<256x4xf32>
    tpu.vector_store %arg9[%c0_70, %c0_71], %53 {strides = array<i32>} : memref<256x4xf32, #tpu.memory_space<vmem>>, vector<256x4xf32>,
    %c0_72 = arith.constant 0 : index
    %c0_73 = arith.constant 0 : index
    %55 = vector.load %arg9[%c0_72, %c0_73] : memref<256x4xf32, #tpu.memory_space<vmem>>, vector<256x4xf32>
    %c0_74 = arith.constant 0 : index
    %c0_75 = arith.constant 0 : index
    %56 = vector.load %arg9[%c0_74, %c0_75] : memref<256x4xf32, #tpu.memory_space<vmem>>, vector<256x4xf32>
    %57 = arith.mulf %55, %56 : vector<256x4xf32>
    %cst_76 = arith.constant dense<0.000000e+00> : vector<4xf32>
    %58 = vector.multi_reduction <add>, %57, %cst_76 [0] : vector<256x4xf32> to vector<4xf32>
    %59 = vector.shape_cast %58 : vector<4xf32> to vector<1x4xf32>
    %cst_77 = arith.constant 3.906250e-03 : f32
    %60 = vector.broadcast %cst_77 : f32 to vector<1x4xf32>
    %61 = arith.mulf %59, %60 : vector<1x4xf32>
    %cst_78 = arith.constant 9.99999974E-6 : f32
    %62 = vector.broadcast %cst_78 : f32 to vector<1x4xf32>
    %63 = arith.addf %61, %62 : vector<1x4xf32>
    %64 = math.rsqrt %63 : vector<1x4xf32>
    %c0_79 = arith.constant 0 : index
    %c0_80 = arith.constant 0 : index
    %65 = vector.load %arg9[%c0_79, %c0_80] : memref<256x4xf32, #tpu.memory_space<vmem>>, vector<256x4xf32>
    %66 = vector.broadcast %64 : vector<1x4xf32> to vector<256x4xf32>
    %67 = arith.mulf %65, %66 : vector<256x4xf32>
    %cst_81 = arith.constant 0.000000e+00 : f32
    %68 = vector.broadcast %cst_81 : f32 to vector<256x4xf32>
    %69 = arith.maximumf %67, %68 : vector<256x4xf32>
    %70 = vector.shape_cast %69 : vector<256x4xf32> to vector<16x16x4xf32>
    %71 = arith.truncf %70 : vector<16x16x4xf32> to vector<16x16x4xbf16>
    %c1_82 = arith.constant 1 : index
    %c1_83 = arith.constant 1 : index
    %c0_84 = arith.constant 0 : index
    %72 = vector.load %arg7[%c1_82, %c1_83, %c0_84] : memref<18x18x4xbf16, #tpu.memory_space<vmem>>, vector<16x16x4xbf16>
    tpu.vector_store %arg7[%c1_82, %c1_83, %c0_84], %71 {strides = array<i32>} : memref<18x18x4xbf16, #tpu.memory_space<vmem>>, vector<16x16x4xbf16>,
    %73 = vector.extract_strided_slice %71 {offsets = [1, 0, 0], sizes = [1, 16, 4], strides = [1, 1, 1]} : vector<16x16x4xbf16> to vector<1x16x4xbf16>
    %c0_85 = arith.constant 0 : index
    %c1_86 = arith.constant 1 : index
    %c0_87 = arith.constant 0 : index
    %74 = vector.load %arg7[%c0_85, %c1_86, %c0_87] : memref<18x18x4xbf16, #tpu.memory_space<vmem>>, vector<1x16x4xbf16>
    tpu.vector_store %arg7[%c0_85, %c1_86, %c0_87], %73 {strides = array<i32>} : memref<18x18x4xbf16, #tpu.memory_space<vmem>>, vector<1x16x4xbf16>,
    %75 = vector.extract_strided_slice %71 {offsets = [14, 0, 0], sizes = [1, 16, 4], strides = [1, 1, 1]} : vector<16x16x4xbf16> to vector<1x16x4xbf16>
    %c17_88 = arith.constant 17 : index
    %c1_89 = arith.constant 1 : index
    %c0_90 = arith.constant 0 : index
    %76 = vector.load %arg7[%c17_88, %c1_89, %c0_90] : memref<18x18x4xbf16, #tpu.memory_space<vmem>>, vector<1x16x4xbf16>
    tpu.vector_store %arg7[%c17_88, %c1_89, %c0_90], %75 {strides = array<i32>} : memref<18x18x4xbf16, #tpu.memory_space<vmem>>, vector<1x16x4xbf16>,
    %c0_91 = arith.constant 0 : index
    %c2_92 = arith.constant 2 : index
    %c0_93 = arith.constant 0 : index
    %77 = vector.load %arg7[%c0_91, %c2_92, %c0_93] : memref<18x18x4xbf16, #tpu.memory_space<vmem>>, vector<18x1x4xbf16>
    %c0_94 = arith.constant 0 : index
    %c0_95 = arith.constant 0 : index
    %c0_96 = arith.constant 0 : index
    %78 = vector.load %arg7[%c0_94, %c0_95, %c0_96] : memref<18x18x4xbf16, #tpu.memory_space<vmem>>, vector<18x1x4xbf16>
    tpu.vector_store %arg7[%c0_94, %c0_95, %c0_96], %77 {strides = array<i32>} : memref<18x18x4xbf16, #tpu.memory_space<vmem>>, vector<18x1x4xbf16>,
    %c0_97 = arith.constant 0 : index
    %c15_98 = arith.constant 15 : index
    %c0_99 = arith.constant 0 : index
    %79 = vector.load %arg7[%c0_97, %c15_98, %c0_99] : memref<18x18x4xbf16, #tpu.memory_space<vmem>>, vector<18x1x4xbf16>
    %c0_100 = arith.constant 0 : index
    %c17_101 = arith.constant 17 : index
    %c0_102 = arith.constant 0 : index
    %80 = vector.load %arg7[%c0_100, %c17_101, %c0_102] : memref<18x18x4xbf16, #tpu.memory_space<vmem>>, vector<18x1x4xbf16>
    tpu.vector_store %arg7[%c0_100, %c17_101, %c0_102], %79 {strides = array<i32>} : memref<18x18x4xbf16, #tpu.memory_space<vmem>>, vector<18x1x4xbf16>,
    %c0_103 = arith.constant 0 : index
    %c0_104 = arith.constant 0 : index
    %c0_105 = arith.constant 0 : index
    %81 = vector.load %arg7[%c0_103, %c0_104, %c0_105] : memref<18x18x4xbf16, #tpu.memory_space<vmem>>, vector<18x16x4xbf16>
    %82 = vector.shape_cast %81 : vector<18x16x4xbf16> to vector<288x4xbf16>
    %c0_106 = arith.constant 0 : index
    %c0_107 = arith.constant 0 : index
    %83 = vector.load %arg8[%c0_106, %c0_107] : memref<288x12xbf16, #tpu.memory_space<vmem>>, vector<288x4xbf16>
    tpu.vector_store %arg8[%c0_106, %c0_107], %82 {strides = array<i32>} : memref<288x12xbf16, #tpu.memory_space<vmem>>, vector<288x4xbf16>,
    %c0_108 = arith.constant 0 : index
    %c1_109 = arith.constant 1 : index
    %c0_110 = arith.constant 0 : index
    %84 = vector.load %arg7[%c0_108, %c1_109, %c0_110] : memref<18x18x4xbf16, #tpu.memory_space<vmem>>, vector<18x16x4xbf16>
    %85 = vector.shape_cast %84 : vector<18x16x4xbf16> to vector<288x4xbf16>
    %c0_111 = arith.constant 0 : index
    %c4_112 = arith.constant 4 : index
    %86 = vector.load %arg8[%c0_111, %c4_112] : memref<288x12xbf16, #tpu.memory_space<vmem>>, vector<288x4xbf16>
    tpu.vector_store %arg8[%c0_111, %c4_112], %85 {strides = array<i32>} : memref<288x12xbf16, #tpu.memory_space<vmem>>, vector<288x4xbf16>,
    %c0_113 = arith.constant 0 : index
    %c2_114 = arith.constant 2 : index
    %c0_115 = arith.constant 0 : index
    %87 = vector.load %arg7[%c0_113, %c2_114, %c0_115] : memref<18x18x4xbf16, #tpu.memory_space<vmem>>, vector<18x16x4xbf16>
    %88 = vector.shape_cast %87 : vector<18x16x4xbf16> to vector<288x4xbf16>
    %c0_116 = arith.constant 0 : index
    %c8_117 = arith.constant 8 : index
    %89 = vector.load %arg8[%c0_116, %c8_117] : memref<288x12xbf16, #tpu.memory_space<vmem>>, vector<288x4xbf16>
    tpu.vector_store %arg8[%c0_116, %c8_117], %88 {strides = array<i32>} : memref<288x12xbf16, #tpu.memory_space<vmem>>, vector<288x4xbf16>,
    %c0_118 = arith.constant 0 : index
    %c0_119 = arith.constant 0 : index
    %90 = vector.load %arg5[%c0_118, %c0_119] : memref<1x4xf32, #tpu.memory_space<vmem>>, vector<1x4xf32>
    %91 = vector.shape_cast %90 : vector<1x4xf32> to vector<1x4xf32>
    %92 = vector.broadcast %91 : vector<1x4xf32> to vector<256x4xf32>
    %c0_120 = arith.constant 0 : index
    %c0_121 = arith.constant 0 : index
    %93 = vector.load %arg9[%c0_120, %c0_121] : memref<256x4xf32, #tpu.memory_space<vmem>>, vector<256x4xf32>
    tpu.vector_store %arg9[%c0_120, %c0_121], %92 {strides = array<i32>} : memref<256x4xf32, #tpu.memory_space<vmem>>, vector<256x4xf32>,
    %c0_122 = arith.constant 0 : index
    %c0_123 = arith.constant 0 : index
    %94 = vector.load %arg9[%c0_122, %c0_123] : memref<256x4xf32, #tpu.memory_space<vmem>>, vector<256x4xf32>
    %c0_124 = arith.constant 0 : index
    %c0_125 = arith.constant 0 : index
    %95 = vector.load %arg8[%c0_124, %c0_125] : memref<288x12xbf16, #tpu.memory_space<vmem>>, vector<256x12xbf16>
    %c0_126 = arith.constant 0 : index
    %c0_127 = arith.constant 0 : index
    %c0_128 = arith.constant 0 : index
    %96 = vector.load %arg4[%c0_126, %c0_127, %c0_128] : memref<3x12x4xbf16, #tpu.memory_space<vmem>>, vector<1x12x4xbf16>
    %97 = vector.shape_cast %96 : vector<1x12x4xbf16> to vector<12x4xbf16>
    %cst_129 = arith.constant dense<0.000000e+00> : vector<256x4xf32>
    %98 = tpu.matmul %95, %97, %cst_129 {dimension_numbers = #tpu.dot_dimension_numbers<[1], [0], [0], [1], [0, 0, 1, 1], [], []>} : vector<256x12xbf16>, vector<12x4xbf16>, vector<256x4xf32> -> vector<256x4xf32>
    %99 = arith.addf %94, %98 : vector<256x4xf32>
    %c0_130 = arith.constant 0 : index
    %c0_131 = arith.constant 0 : index
    %100 = vector.load %arg9[%c0_130, %c0_131] : memref<256x4xf32, #tpu.memory_space<vmem>>, vector<256x4xf32>
    tpu.vector_store %arg9[%c0_130, %c0_131], %99 {strides = array<i32>} : memref<256x4xf32, #tpu.memory_space<vmem>>, vector<256x4xf32>,
    %c0_132 = arith.constant 0 : index
    %c0_133 = arith.constant 0 : index
    %101 = vector.load %arg9[%c0_132, %c0_133] : memref<256x4xf32, #tpu.memory_space<vmem>>, vector<256x4xf32>
    %c16_134 = arith.constant 16 : index
    %c0_135 = arith.constant 0 : index
    %102 = vector.load %arg8[%c16_134, %c0_135] : memref<288x12xbf16, #tpu.memory_space<vmem>>, vector<256x12xbf16>
    %c1_136 = arith.constant 1 : index
    %c0_137 = arith.constant 0 : index
    %c0_138 = arith.constant 0 : index
    %103 = vector.load %arg4[%c1_136, %c0_137, %c0_138] : memref<3x12x4xbf16, #tpu.memory_space<vmem>>, vector<1x12x4xbf16>
    %104 = vector.shape_cast %103 : vector<1x12x4xbf16> to vector<12x4xbf16>
    %cst_139 = arith.constant dense<0.000000e+00> : vector<256x4xf32>
    %105 = tpu.matmul %102, %104, %cst_139 {dimension_numbers = #tpu.dot_dimension_numbers<[1], [0], [0], [1], [0, 0, 1, 1], [], []>} : vector<256x12xbf16>, vector<12x4xbf16>, vector<256x4xf32> -> vector<256x4xf32>
    %106 = arith.addf %101, %105 : vector<256x4xf32>
    %c0_140 = arith.constant 0 : index
    %c0_141 = arith.constant 0 : index
    %107 = vector.load %arg9[%c0_140, %c0_141] : memref<256x4xf32, #tpu.memory_space<vmem>>, vector<256x4xf32>
    tpu.vector_store %arg9[%c0_140, %c0_141], %106 {strides = array<i32>} : memref<256x4xf32, #tpu.memory_space<vmem>>, vector<256x4xf32>,
    %c0_142 = arith.constant 0 : index
    %c0_143 = arith.constant 0 : index
    %108 = vector.load %arg9[%c0_142, %c0_143] : memref<256x4xf32, #tpu.memory_space<vmem>>, vector<256x4xf32>
    %c32_144 = arith.constant 32 : index
    %c0_145 = arith.constant 0 : index
    %109 = vector.load %arg8[%c32_144, %c0_145] : memref<288x12xbf16, #tpu.memory_space<vmem>>, vector<256x12xbf16>
    %c2_146 = arith.constant 2 : index
    %c0_147 = arith.constant 0 : index
    %c0_148 = arith.constant 0 : index
    %110 = vector.load %arg4[%c2_146, %c0_147, %c0_148] : memref<3x12x4xbf16, #tpu.memory_space<vmem>>, vector<1x12x4xbf16>
    %111 = vector.shape_cast %110 : vector<1x12x4xbf16> to vector<12x4xbf16>
    %cst_149 = arith.constant dense<0.000000e+00> : vector<256x4xf32>
    %112 = tpu.matmul %109, %111, %cst_149 {dimension_numbers = #tpu.dot_dimension_numbers<[1], [0], [0], [1], [0, 0, 1, 1], [], []>} : vector<256x12xbf16>, vector<12x4xbf16>, vector<256x4xf32> -> vector<256x4xf32>
    %113 = arith.addf %108, %112 : vector<256x4xf32>
    %c0_150 = arith.constant 0 : index
    %c0_151 = arith.constant 0 : index
    %114 = vector.load %arg9[%c0_150, %c0_151] : memref<256x4xf32, #tpu.memory_space<vmem>>, vector<256x4xf32>
    tpu.vector_store %arg9[%c0_150, %c0_151], %113 {strides = array<i32>} : memref<256x4xf32, #tpu.memory_space<vmem>>, vector<256x4xf32>,
    %c0_152 = arith.constant 0 : index
    %c0_153 = arith.constant 0 : index
    %115 = vector.load %arg9[%c0_152, %c0_153] : memref<256x4xf32, #tpu.memory_space<vmem>>, vector<256x4xf32>
    %cst_154 = arith.constant dense<0.000000e+00> : vector<4xf32>
    %116 = vector.multi_reduction <add>, %115, %cst_154 [0] : vector<256x4xf32> to vector<4xf32>
    %117 = vector.shape_cast %116 : vector<4xf32> to vector<1x4xf32>
    %cst_155 = arith.constant 3.906250e-03 : f32
    %118 = vector.broadcast %cst_155 : f32 to vector<1x4xf32>
    %119 = arith.mulf %117, %118 : vector<1x4xf32>
    %c0_156 = arith.constant 0 : index
    %c0_157 = arith.constant 0 : index
    %120 = vector.load %arg9[%c0_156, %c0_157] : memref<256x4xf32, #tpu.memory_space<vmem>>, vector<256x4xf32>
    %121 = vector.broadcast %119 : vector<1x4xf32> to vector<256x4xf32>
    %122 = arith.subf %120, %121 : vector<256x4xf32>
    %c0_158 = arith.constant 0 : index
    %c0_159 = arith.constant 0 : index
    %123 = vector.load %arg9[%c0_158, %c0_159] : memref<256x4xf32, #tpu.memory_space<vmem>>, vector<256x4xf32>
    tpu.vector_store %arg9[%c0_158, %c0_159], %122 {strides = array<i32>} : memref<256x4xf32, #tpu.memory_space<vmem>>, vector<256x4xf32>,
    %c0_160 = arith.constant 0 : index
    %c0_161 = arith.constant 0 : index
    %124 = vector.load %arg9[%c0_160, %c0_161] : memref<256x4xf32, #tpu.memory_space<vmem>>, vector<256x4xf32>
    %c0_162 = arith.constant 0 : index
    %c0_163 = arith.constant 0 : index
    %125 = vector.load %arg9[%c0_162, %c0_163] : memref<256x4xf32, #tpu.memory_space<vmem>>, vector<256x4xf32>
    %126 = arith.mulf %124, %125 : vector<256x4xf32>
    %cst_164 = arith.constant dense<0.000000e+00> : vector<4xf32>
    %127 = vector.multi_reduction <add>, %126, %cst_164 [0] : vector<256x4xf32> to vector<4xf32>
    %128 = vector.shape_cast %127 : vector<4xf32> to vector<1x4xf32>
    %cst_165 = arith.constant 3.906250e-03 : f32
    %129 = vector.broadcast %cst_165 : f32 to vector<1x4xf32>
    %130 = arith.mulf %128, %129 : vector<1x4xf32>
    %cst_166 = arith.constant 9.99999974E-6 : f32
    %131 = vector.broadcast %cst_166 : f32 to vector<1x4xf32>
    %132 = arith.addf %130, %131 : vector<1x4xf32>
    %133 = math.rsqrt %132 : vector<1x4xf32>
    %c0_167 = arith.constant 0 : index
    %c0_168 = arith.constant 0 : index
    %134 = vector.load %arg9[%c0_167, %c0_168] : memref<256x4xf32, #tpu.memory_space<vmem>>, vector<256x4xf32>
    %135 = vector.broadcast %133 : vector<1x4xf32> to vector<256x4xf32>
    %136 = arith.mulf %134, %135 : vector<256x4xf32>
    %137 = vector.shape_cast %136 : vector<256x4xf32> to vector<16x16x4xf32>
    %c0_169 = arith.constant 0 : index
    %c0_170 = arith.constant 0 : index
    %c0_171 = arith.constant 0 : index
    %c0_172 = arith.constant 0 : index
    %138 = vector.load %arg1[%c0_169, %c0_170, %c0_171, %c0_172] : memref<1x16x16x4xf32, #tpu.memory_space<vmem>>, vector<1x16x16x4xf32>
    %139 = vector.shape_cast %138 : vector<1x16x16x4xf32> to vector<16x16x4xf32>
    %140 = arith.addf %139, %137 : vector<16x16x4xf32>
    %c0_173 = arith.constant 0 : index
    %c0_174 = arith.constant 0 : index
    %c0_175 = arith.constant 0 : index
    %c0_176 = arith.constant 0 : index
    %141 = vector.load %arg6[%c0_173, %c0_174, %c0_175, %c0_176] : memref<1x16x16x4xf32, #tpu.memory_space<vmem>>, vector<1x16x16x4xf32>
    %142 = vector.shape_cast %141 : vector<1x16x16x4xf32> to vector<16x16x4xf32>
    %143 = vector.shape_cast %140 : vector<16x16x4xf32> to vector<1x16x16x4xf32>
    tpu.vector_store %arg6[%c0_173, %c0_174, %c0_175, %c0_176], %143 {strides = array<i32>} : memref<1x16x16x4xf32, #tpu.memory_space<vmem>>, vector<1x16x16x4xf32>,
    return
  }
  func.func @transform_0(%arg0: i32) -> (i32, i32, i32, i32) {
    %c0_i32 = arith.constant 0 : i32
    %c0_i32_0 = arith.constant 0 : i32
    %c0_i32_1 = arith.constant 0 : i32
    %c0_i32_2 = arith.constant 0 : i32
    return %arg0, %c0_i32, %c0_i32_0, %c0_i32_1 : i32, i32, i32, i32
  }
  func.func @transform_1(%arg0: i32) -> (i32, i32, i32) {
    %c0_i32 = arith.constant 0 : i32
    %c0_i32_0 = arith.constant 0 : i32
    %c0_i32_1 = arith.constant 0 : i32
    %c0_i32_2 = arith.constant 0 : i32
    return %c0_i32, %c0_i32_0, %c0_i32_1 : i32, i32, i32
  }
  func.func @transform_2(%arg0: i32) -> (i32, i32) {
    %c0_i32 = arith.constant 0 : i32
    %c0_i32_0 = arith.constant 0 : i32
    %c0_i32_1 = arith.constant 0 : i32
    return %c0_i32, %c0_i32_0 : i32, i32
  }
  func.func @transform_3(%arg0: i32) -> (i32, i32, i32) {
    %c0_i32 = arith.constant 0 : i32
    %c0_i32_0 = arith.constant 0 : i32
    %c0_i32_1 = arith.constant 0 : i32
    %c0_i32_2 = arith.constant 0 : i32
    return %c0_i32, %c0_i32_0, %c0_i32_1 : i32, i32, i32
  }
  func.func @transform_4(%arg0: i32) -> (i32, i32) {
    %c0_i32 = arith.constant 0 : i32
    %c0_i32_0 = arith.constant 0 : i32
    %c0_i32_1 = arith.constant 0 : i32
    return %c0_i32, %c0_i32_0 : i32, i32
  }
  func.func @transform_5(%arg0: i32) -> (i32, i32, i32, i32) {
    %c0_i32 = arith.constant 0 : i32
    %c0_i32_0 = arith.constant 0 : i32
    %c0_i32_1 = arith.constant 0 : i32
    %c0_i32_2 = arith.constant 0 : i32
    return %arg0, %c0_i32, %c0_i32_0, %c0_i32_1 : i32, i32, i32, i32
  }
}

</mosaic_0001>

<bundles_post_ra>
// kernel: resnet_block_forward.1
= control target key start
LH: loop header
LB: loop body
LE: loop exit
PB: predicated region body
PF: predicated region fallthrough
CT: control target
= control target key end

     0   :  { %s8007_s18 = smov 0   ;;  %s11492_s0 = inlined_call_operand.vmem [shape: f32[2,16,16,4], index: 0, kind: input, shape index: {}]   ;;  %s11493_s1 = inlined_call_operand.vmem [shape: bf16[3,12,4], index: 1, kind: input, shape index: {}]   ;;  %s11494_s2 = inlined_call_operand.vmem [shape: f32[1,4], index: 2, kind: input, shape index: {}]   ;;  %s11495_s3 = inlined_call_operand.vmem [shape: bf16[3,12,4], index: 3, kind: input, shape index: {}]   ;;  %s11496_s4 = inlined_call_operand.vmem [shape: f32[1,4], index: 4, kind: input, shape index: {}]   ;;  %s11497_s5 = inlined_call_operand.vmem [shape: f32[2,16,16,4], index: 5, kind: output, shape index: {}]  }
   0x1 LB: > { %s7128_s19 = sadd.s32 4294967295, %s7973_s18   ;;  %p7132_p0 = scmp.ge.s32.totalorder %s7973_s18, 1  ;;  %s7973_s18 = sphi %s8007_s18, %s15_s18  }
   0x2   : > { %p187_p1 = scmp.lt.s32.totalorder %s7973_s18, 3 }
   0x4   : > { %p188_p2 = pnand %p7132_p0, %p187_p1 }
   0x6   : > { %191 = sbr.rel (%p188_p2) target bundleno = 1560 (0x618), region = 40 }
   0xd   : > { %p215_p3 = scmp.lt.s32.totalorder %s7128_s19, 1  ;;  %vm354_vm0 = vsmask.f32 256  ;;  %vm355_vm1 = vsmask.f32 4368  ;;  %vm678_vm2 = vcmask 27648  }
   0xe   : > { %vm679_vm3 = vsmask.f32 7938  ;;  %vm686_vm4 = vcmask 24576   ;;  %vm8036_vm5 = vmor %vm354_vm0, %vm355_vm1  ;;  %v11520_v16 = vmov 0  ;;  %v796_v17 = vld [vmem:[#allocation2] sm:$0xf] }
   0xf   : > { %s11647_s19 = smov (!%p215_p3, %s7128_s19), 1  ;;  %v11521_v16 = vsel %vm8036_vm5, 4294967295, %v11520_v16  ;;  %v800_v18 = vld [vmem:[#allocation2 + $0x8] sm:$0x1]  ;;  %vm8042_vm6 = vmand %vm678_vm2, %vm679_vm3  ;;  %v11523_v25 = vmov 0  ;;  %vm1987_vm8 = vcmask 1042432  }
  0x10   : > { %s7531_s20 = sshll.u32 %s11647_s19, 8  ;;  %11522 = vst [vmem:[#allocation5_spill] sm:$0xff] %v11521_v16  ;;  %v11524_v25 = vsel %vm8042_vm6, 4294967295, %v11523_v25  ;;  %v681_v26 = vld [vmem:[#allocation2 + $0xc] sm:$0xf]  ;;  %vm8049_vm7 = vmand %vm686_vm4, %vm354_vm0  ;;  %vm1988_vm9 = vcmask 1046532  }
  0x11   : > { %s8023_s23 = scalar_lea.vmem %s11492_s0, %s7531_s20  ;;  %11525 = vst [vmem:[#allocation6_spill] sm:$0xff] %v11524_v25  ;;  %v691_v32 = vld [vmem:[#allocation2 + $0x18] sm:$0xf]  ;;  %v688_v39 = vld [vmem:[#allocation2 + $0x14] sm:$0x1]  ;;  %vm8084_vm10 = vmand %vm686_vm4, %vm679_vm3  ;;  %s7975_s24 = smov 8  }
  0x12   : > { %v228_v0 = vld [vmem:[%s8023_s23 + $0x10] sm:$0xff]  ;;  %v229_v1 = vld [vmem:[%s8023_s23 + $0x18] sm:$0xff]  ;;  %v226_v4 = vld [vmem:[%s8023_s23] sm:$0xff]  ;;  %vm1317_vm11 = vsmask.f32 3328  ;;  %s7976_s25 = smov 4   ;;  %s11373_s27 = scalar_lea.vmem %s11497_s5, %s7531_s20 }
  0x13   : > { %v7535_v2 = vpack.c.bf16 %v228_v0, %v228_v0  ;;  %v7536_v3 = vpack.c.bf16 %v229_v1, %v229_v1  ;;  %v227_v5 = vld [vmem:[%s8023_s23 + $0x8] sm:$0xff]  ;;  %v230_v6 = vld [vmem:[%s8023_s23 + $0x20] sm:$0xff]  ;;  %v7533_v7 = vpack.c.bf16 %v226_v4, %v226_v4  ;;  %v232_v15 = vld [vmem:[%s8023_s23 + $0x30] sm:$0xff]  ;;  %vm1318_vm12 = vsmask.f32 7440 }
  0x14   : > { %v7534_v8 = vpack.c.bf16 %v227_v5, %v227_v5  ;;  %v231_v9 = vld [vmem:[%s8023_s23 + $0x28] sm:$0xff]  ;;  %v8031_v10 = vpack.c.bf16 %v230_v6, %v230_v6  ;;  %v7539_v34 = vpack.c.bf16 %v232_v15, %v232_v15  ;;  %v695_v40 = vld [vmem:[#allocation2 + $0x20] sm:$0x1]  ;;  %v233_v45 = vld [vmem:[%s8023_s23 + $0x38] sm:$0xff]  ;;  %v11528_v15 = vmov 0 }
  0x15   : > { %v375_v11 = vshrl.u32 %v7535_v2, 16  ;;  %v378_v12 = vshll.u32 %v7535_v2, 16  ;;  %v383_v13 = vshrl.u32 %v7536_v3, 16  ;;  %v386_v14 = vshll.u32 %v7536_v3, 16  ;;  %v234_v50 = vld [vmem:[%s8023_s23 + $0x40] sm:$0xff]  ;;  %v235_v51 = vld [vmem:[%s8023_s23 + $0x48] sm:$0xff]  ;;  %vm8123_vm13 = vmor %vm1987_vm8, %vm1988_vm9 }
  0x16   : > { %v358_v19 = vshrl.u32 %v7533_v7, 16  ;;  %v361_v20 = vshll.u32 %v7533_v7, 16  ;;  %v366_v21 = vshrl.u32 %v7534_v8, 16  ;;  %v369_v22 = vshll.u32 %v7534_v8, 16  ;;  %v698_v60 = vld [vmem:[#allocation2 + $0x24] sm:$0xf]  ;;  %vm8140_vm14 = vmor %vm1317_vm11, %vm1318_vm12 }
  0x17   : > { %v377_v23 = vrot.slane %v375_v11, 7  ;;  %v385_v24 = vrot.slane %v383_v13, 7  ;;  %v7538_v27 = vpack.c.bf16 %v231_v9, %v231_v9  ;;  %v392_v28 = vshrl.u32 %v8031_v10, 16  ;;  %v702_v5 = vld [vmem:[#allocation2 + $0x2c] sm:$0x1] }
  0x18   : > { %v360_v30 = vrot.slane %v358_v19, 7  ;;  %v368_v31 = vrot.slane %v366_v21, 7  ;;  %v395_v33 = vshll.u32 %v8031_v10, 16  ;;  %v7540_v59 = vpack.c.bf16 %v233_v45, %v233_v45  ;;  %v7966_v29 = vld [vmem:[%s11495_s3 + $0x8] sm:$0x3f]  }
  0x19   : > { %v380_v35 = vor.u32 %v378_v12, %v377_v23  ;;  %v381_v36 = vrot.slane %v377_v23, 4  ;;  %v388_v37 = vor.u32 %v386_v14, %v385_v24  ;;  %v390_v38 = vrot.slane %v385_v24, 4  ;;  %v705_v14 = vld [vmem:[#allocation2 + $0x30] sm:$0xf] }
  0x1a   : > { %v363_v41 = vor.u32 %v361_v20, %v360_v30  ;;  %v364_v42 = vrot.slane %v360_v30, 4  ;;  %v371_v43 = vor.u32 %v369_v22, %v368_v31  ;;  %v373_v44 = vrot.slane %v368_v31, 4 }
  0x1b   : > { %v389_v46 = vsel %vm8036_vm5, %v381_v36, %v388_v37  ;;  %v797_v47 = vsel %vm8042_vm6, %v380_v35, %v796_v17  ;;  %v801_v48 = vsel %vm8049_vm7, %v390_v38, %v800_v18  ;;  %v692_v49 = vsel %vm8042_vm6, %v380_v35, %v691_v32 }
  0x1c   : > { %694 = vst.msk [vmem:[#allocation2 + $0x1c] sm:$0xf] %vm678_vm2, %v389_v46  ;;  %798 = vst [vmem:[#allocation2] sm:$0xf] %v797_v47  ;;  %v372_v52 = vsel %vm8036_vm5, %v364_v42, %v371_v43  ;;  %v682_v53 = vsel %vm8042_vm6, %v363_v41, %v681_v26  ;;  %v689_v54 = vsel %vm8049_vm7, %v373_v44, %v688_v39  ;;  %v394_v56 = vrot.slane %v392_v28, 7 }
  0x1d   : > { %799 = vst.msk [vmem:[#allocation2 + $0x4] sm:$0xf] %vm678_vm2, %v389_v46  ;;  %802 = vst [vmem:[#allocation2 + $0x8] sm:$0x1] %v801_v48  ;;  %v696_v55 = vsel %vm8049_vm7, %v390_v38, %v695_v40  ;;  %v400_v57 = vshrl.u32 %v7538_v27, 16  ;;  %v403_v58 = vshll.u32 %v7538_v27, 16  ;;  %v7541_v63 = vpack.c.bf16 %v234_v50, %v234_v50 }
  0x1e   : > { %693 = vst [vmem:[#allocation2 + $0x18] sm:$0xf] %v692_v49  ;;  %683 = vst [vmem:[#allocation2 + $0xc] sm:$0xf] %v682_v53  ;;  %v409_v61 = vshrl.u32 %v7539_v34, 16  ;;  %v412_v62 = vshll.u32 %v7539_v34, 16  ;;  %v8076_v0 = vpack.c.bf16 %v235_v51, %v235_v51  ;;  %v397_v1 = vor.u32 %v395_v33, %v394_v56 }
  0x1f   : > { %685 = vst.msk [vmem:[#allocation2 + $0x10] sm:$0xf] %vm678_vm2, %v372_v52  ;;  %690 = vst [vmem:[#allocation2 + $0x14] sm:$0x1] %v689_v54  ;;  %v398_v2 = vrot.slane %v394_v56, 4  ;;  %v402_v3 = vrot.slane %v400_v57, 7 }
  0x20   : > { %697 = vst [vmem:[#allocation2 + $0x20] sm:$0x1] %v696_v55  ;;  %v417_v4 = vshrl.u32 %v7540_v59, 16  ;;  %v411_v6 = vrot.slane %v409_v61, 7  ;;  %v420_v7 = vshll.u32 %v7540_v59, 16  ;;  %v426_v8 = vshrl.u32 %v7541_v63, 16 }
  0x21   : > { %v429_v9 = vshll.u32 %v7541_v63, 16  ;;  %v405_v10 = vor.u32 %v403_v58, %v402_v3  ;;  %v407_v11 = vrot.slane %v402_v3, 4  ;;  %v699_v12 = vsel %vm8042_vm6, %v397_v1, %v698_v60  ;;  %v712_v28 = vld [vmem:[#allocation2 + $0x3c] sm:$0xf]  ;;  %v709_v41 = vld [vmem:[#allocation2 + $0x38] sm:$0x1] }
  0x22   : > { %v8080_v13 = vrot.slane %v417_v4, 7  ;;  %v11529_v15 = vsel %vm8084_vm10, 4294967295, %v11528_v15  ;;  %700 = vst [vmem:[#allocation2 + $0x24] sm:$0xf] %v699_v12  ;;  %v414_v17 = vor.u32 %v412_v62, %v411_v6  ;;  %v415_v18 = vrot.slane %v411_v6, 4 }
  0x23   : > { %11530 = vst [vmem:[#allocation7_spill] sm:$0xff] %v11529_v15  ;;  %v8088_v19 = vrot.slane %v426_v8, 7  ;;  %v434_v20 = vshrl.u32 %v8076_v0, 16  ;;  %v811_v21 = vld [vmem:[#allocation2] sm:$0x2]  ;;  %v406_v24 = vsel %vm8036_vm5, %v398_v2, %v405_v10  ;;  %v703_v26 = vsel %vm8049_vm7, %v407_v11, %v702_v5 }
  0x24   : > { %v901_v22 = vld [vmem:[#allocation2] sm:$0x1]  ;;  %v955_v23 = vld [vmem:[#allocation2 + $0x4] sm:$0x8]  ;;  %v422_v27 = vor.u32 %v420_v7, %v8080_v13  ;;  %v7169_v30 = vrot.slane %v811_v21, 9  ;;  %v706_v34 = vsel %vm8042_vm6, %v414_v17, %v705_v14  ;;  %v424_v52 = vrot.slane %v8080_v13, 4 }
  0x25   : > { %v7187_v31 = vrot.slane %v955_v23, 11  ;;  %v1046_v32 = vld [vmem:[#allocation2 + $0x8] sm:$0x1]  ;;  %v1264_v33 = vld [vmem:[#allocation2 + $0x4] sm:$0xf]  ;;  %v431_v35 = vor.u32 %v429_v9, %v8088_v19  ;;  %v11531_v8 = vmov 0 }
  0x26   : > { %701 = vst.msk [vmem:[#allocation2 + $0x28] sm:$0xf] %vm678_vm2, %v406_v24  ;;  %704 = vst [vmem:[#allocation2 + $0x2c] sm:$0x1] %v703_v26  ;;  %v1330_v36 = vshll.u32 %v1264_v33, 16  ;;  %v1334_v37 = vshrl.u32 %v1264_v33, 16  ;;  %v423_v40 = vsel %vm8036_vm5, %v415_v18, %v422_v27  ;;  %v902_v42 = vsel %vm8049_vm7, %v7169_v30, %v901_v22 }
  0x27   : > { %v1879_v38 = vld [vmem:[#allocation2] sm:$0xe]  ;;  %v1880_v39 = vld [vmem:[#allocation2 + $0x4] sm:$0xf]  ;;  %707 = vst [vmem:[#allocation2 + $0x30] sm:$0xf] %v706_v34  ;;  %v1047_v43 = vsel %vm8084_vm10, %v7187_v31, %v1046_v32  ;;  %v713_v57 = vsel %vm8042_vm6, %v431_v35, %v712_v28  ;;  %v710_v6 = vsel %vm8049_vm7, %v424_v52, %v709_v41 }
  0x28   : > { %v7241_v44 = vrot.slane %v1879_v38, 9  ;;  %v1992_v45 = vrot.slane %v1880_v39, 5  ;;  %v812_v46 = vld [vmem:[#allocation2 + $0xc] sm:$0x2]  ;;  %v904_v47 = vld [vmem:[#allocation2 + $0xc] sm:$0x1] }
  0x29   : > { %708 = vst.msk [vmem:[#allocation2 + $0x34] sm:$0xf] %vm678_vm2, %v423_v40  ;;  %903 = vst [vmem:[#allocation2] sm:$0x1] %v902_v42  ;;  %v8107_v48 = vrot.slane %v1330_v36, 5  ;;  %v1336_v49 = vrot.slane %v1334_v37, 4 }
  0x2a   : > { %1048 = vst [vmem:[#allocation2 + $0x8] sm:$0x1] %v1047_v43  ;;  %v7170_v50 = vrot.slane %v812_v46, 9  ;;  %v956_v51 = vld [vmem:[#allocation2 + $0x10] sm:$0x8]  ;;  %v1994_v53 = vrot.slane %v1992_v45, 4  ;;  %v1993_v31 = vsel %vm8123_vm13, %v7241_v44, %v1992_v45 }
  0x2b   : > { %v7188_v54 = vrot.slane %v956_v51, 11  ;;  %v1049_v55 = vld [vmem:[#allocation2 + $0x14] sm:$0x1]  ;;  %v1267_v56 = vld [vmem:[#allocation2 + $0x10] sm:$0xf]  ;;  %v1337_v58 = vor.u32 %v1336_v49, %v8107_v48  ;;  %v11532_v8 = vsel %vm8123_vm13, 4294967295, %v11531_v8 }
  0x2c   : > { %v905_v59 = vsel %vm8049_vm7, %v7170_v50, %v904_v47  ;;  %v1354_v60 = vshll.u32 %v1267_v56, 16  ;;  %v1358_v61 = vshrl.u32 %v1267_v56, 16  ;;  %v1882_v62 = vld [vmem:[#allocation2 + $0xc] sm:$0xe]  ;;  %v1883_v63 = vld [vmem:[#allocation2 + $0x10] sm:$0xf] }
  0x2d   : > { %714 = vst [vmem:[#allocation2 + $0x3c] sm:$0xf] %v713_v57  ;;  %906 = vst [vmem:[#allocation2 + $0xc] sm:$0x1] %v905_v59  ;;  %v1050_v1 = vsel %vm8084_vm10, %v7188_v54, %v1049_v55  ;;  %v7242_v2 = vrot.slane %v1882_v62, 9  ;;  %v1999_v3 = vrot.slane %v1883_v63, 5 }
  0x2e   : > { %v813_v4 = vld [vmem:[#allocation2 + $0x18] sm:$0x2]  ;;  %v907_v5 = vld [vmem:[#allocation2 + $0x18] sm:$0x1]  ;;  %v8119_v7 = vrot.slane %v1337_v58, 4  ;;  %11533 = vst [vmem:[#allocation8_spill] sm:$0xff] %v11532_v8 }
  0x2f   : > { %1051 = vst [vmem:[#allocation2 + $0x14] sm:$0x1] %v1050_v1  ;;  %v8127_v9 = vrot.slane %v1354_v60, 5  ;;  %v1360_v10 = vrot.slane %v1358_v61, 4  ;;  %v7171_v11 = vrot.slane %v813_v4, 9  ;;  %v2001_v13 = vrot.slane %v1999_v3, 4 }
  0x30   : > { %v957_v12 = vld [vmem:[#allocation2 + $0x1c] sm:$0x8]  ;;  %711 = vst [vmem:[#allocation2 + $0x38] sm:$0x1] %v710_v6  ;;  %v1052_v17 = vld [vmem:[#allocation2 + $0x20] sm:$0x1]  ;;  %v2000_v32 = vsel %vm8123_vm13, %v7242_v2, %v1999_v3 }
  0x31   : > { %v7189_v14 = vrot.slane %v957_v12, 11  ;;  %v1270_v18 = vld [vmem:[#allocation2 + $0x1c] sm:$0xf]  ;;  %v1361_v21 = vor.u32 %v1360_v10, %v8127_v9  ;;  %v908_v22 = vsel %vm8049_vm7, %v7171_v11, %v907_v5  ;;  %v814_v26 = vld [vmem:[#allocation2 + $0x24] sm:$0x2]  ;;  %v11534_v39 = vmov 0 }
  0x32   : > { %v1378_v23 = vshll.u32 %v1270_v18, 16  ;;  %v1382_v24 = vshrl.u32 %v1270_v18, 16  ;;  %v1263_v27 = vld [vmem:[#allocation2] sm:$0xf]  ;;  %v1265_v28 = vld [vmem:[#allocation2 + $0x8] sm:$0x1] }
  0x33   : > { %v1881_v30 = vld [vmem:[#allocation2 + $0x8] sm:$0x1]  ;;  %909 = vst [vmem:[#allocation2 + $0x18] sm:$0x1] %v908_v22  ;;  %v1053_v33 = vsel %vm8084_vm10, %v7189_v14, %v1052_v17  ;;  %v1321_v34 = vshrl.u32 %v1263_v27, 16  ;;  %v1324_v35 = vshll.u32 %v1263_v27, 16 }
  0x34   : > { %v1340_v36 = vshll.u32 %v1265_v28, 16  ;;  %v1995_v37 = vrot.slane %v1881_v30, 5  ;;  %1054 = vst [vmem:[#allocation2 + $0x20] sm:$0x1] %v1053_v33  ;;  %v910_v38 = vld [vmem:[#allocation2 + $0x24] sm:$0x1] }
  0x35   : > { %v11535_v39 = vsel %vm8140_vm14, 4294967295, %v11534_v39  ;;  %v8144_v40 = vrot.slane %v1361_v21, 4  ;;  %v8146_v41 = vrot.slane %v1378_v23, 5  ;;  %v1384_v42 = vrot.slane %v1382_v24, 4  ;;  %v958_v44 = vld [vmem:[#allocation2 + $0x28] sm:$0x8] }
  0x36   : > { %11536 = vst [vmem:[#allocation9_spill] sm:$0xff] %v11535_v39  ;;  %v7172_v43 = vrot.slane %v814_v26, 9  ;;  %v1323_v45 = vrot.slane %v1321_v34, 4  ;;  %v1326_v46 = vrot.slane %v1324_v35, 5  ;;  %v1342_v47 = vrot.slane %v1340_v36, 5 }
  0x37   : > { %v1996_v49 = vsel %vm8123_vm13, %v1994_v53, %v1995_v37  ;;  %v1266_v50 = vld [vmem:[#allocation2 + $0xc] sm:$0xf]  ;;  %v1268_v52 = vld [vmem:[#allocation2 + $0x14] sm:$0x1]  ;;  %v1385_v57 = vor.u32 %v1384_v42, %v8146_v41  ;;  %v1273_v3 = vld [vmem:[#allocation2 + $0x28] sm:$0xf] }
  0x38   : > { %v7259_v51 = vcombine.low %v1993_v31, %v1996_v49  ;;  %v1345_v54 = vshrl.u32 %v1266_v50, 16  ;;  %v1348_v55 = vshll.u32 %v1266_v50, 16  ;;  %v1884_v56 = vld [vmem:[#allocation2 + $0x14] sm:$0x1]  ;;  %v1327_v58 = vor.u32 %v1326_v46, %v1323_v45  ;;  %v1055_v62 = vld [vmem:[#allocation2 + $0x2c] sm:$0x1] }
  0x39   : > { %v1343_v59 = vsel %vm8140_vm14, %v8119_v7, %v1342_v47  ;;  %v1364_v60 = vshll.u32 %v1268_v52, 16  ;;  %v2002_v61 = vrot.slane %v1884_v56, 5  ;;  %v8155_v1 = vrot.slane %v1385_v57, 4  ;;  %v1885_v21 = vld [vmem:[#allocation2 + $0x18] sm:$0xe]  ;;  %v236_v56 = vld [vmem:[%s8023_s23 + $0x50] sm:$0xff] }
  0x3a   : > { %2170 = vrot.lane.b32.xlu1 %v7259_v51, %s7975_s24  ;;  %v1347_v53 = vrot.slane %v1345_v54, 4  ;;  %v1350_v63 = vrot.slane %v1348_v55, 5  ;;  %v911_v2 = vsel %vm8049_vm7, %v7172_v43, %v910_v38  ;;  %v1328_v4 = vrot.slane %v1327_v58, 4  ;;  %v1269_v7 = vld [vmem:[#allocation2 + $0x18] sm:$0xf] }
  0x3b   : > { %v1366_v5 = vrot.slane %v1364_v60, 5  ;;  %v2003_v6 = vsel %vm8123_vm13, %v2001_v13, %v2002_v61  ;;  %912 = vst [vmem:[#allocation2 + $0x24] sm:$0x1] %v911_v2  ;;  %v7190_v10 = vrot.slane %v958_v44, 11  ;;  %v1271_v14 = vld [vmem:[#allocation2 + $0x20] sm:$0x1] }
  0x3c   : > { %v1351_v11 = vor.u32 %v1350_v63, %v1347_v53  ;;  %v7260_v12 = vcombine.low %v2000_v32, %v2003_v6  ;;  %v1369_v17 = vshrl.u32 %v1269_v7, 16  ;;  %v1372_v18 = vshll.u32 %v1269_v7, 16  ;;  %v1886_v26 = vld [vmem:[#allocation2 + $0x1c] sm:$0xf]  ;;  %v1887_v27 = vld [vmem:[#allocation2 + $0x20] sm:$0x1] }
  0x3d   : > { %v1333_v22 = vsel %vm8140_vm14, %v1328_v4, %v8107_v48  ;;  %v1367_v23 = vsel %vm8140_vm14, %v8144_v40, %v1366_v5  ;;  %v1388_v24 = vshll.u32 %v1271_v14, 16  ;;  %v1056_v13 = vsel %vm8084_vm10, %v7190_v10, %v1055_v62  ;;  %v1888_v36 = vld [vmem:[#allocation2 + $0x24] sm:$0xe]  ;;  %v1889_v43 = vld [vmem:[#allocation2 + $0x28] sm:$0xf] }
  0x3e   : > { %v7223_v28 = vcombine.low %v1333_v22, %v1343_v59  ;;  %v1352_v30 = vrot.slane %v1351_v11, 4  ;;  %2172 = vrot.lane.b32.xlu1 %v7260_v12, %s7975_s24  ;;  %v1371_v31 = vrot.slane %v1369_v17, 4  ;;  %v1374_v32 = vrot.slane %v1372_v18, 5  ;;  %1057 = vst [vmem:[#allocation2 + $0x2c] sm:$0x1] %v1056_v13 }
  0x3f   : > { %v1390_v33 = vrot.slane %v1388_v24, 5  ;;  %v1402_v34 = vshll.u32 %v1273_v3, 16  ;;  %v1406_v48 = vshrl.u32 %v1273_v3, 16  ;;  %v7243_v35 = vrot.slane %v1885_v21, 9  ;;  %v815_v49 = vld [vmem:[#allocation2 + $0x30] sm:$0x2] }
  0x40   : > { %1806 = vrot.lane.b32.xlu0 %v7223_v28, %s7976_s25  ;;  %v1357_v37 = vsel %vm8140_vm14, %v1352_v30, %v8127_v9  ;;  %v1375_v38 = vor.u32 %v1374_v32, %v1371_v31  ;;  %v2006_v40 = vrot.slane %v1886_v26, 5  ;;  %v2009_v42 = vrot.slane %v1887_v27, 5  ;;  %v959_v50 = vld [vmem:[#allocation2 + $0x34] sm:$0x8]  ;;  %v913_v63 = vld [vmem:[#allocation2 + $0x30] sm:$0x1] }
  0x41   : > { %v7224_v44 = vcombine.low %v1357_v37, %v1367_v23  ;;  %v1391_v45 = vsel %vm8140_vm14, %v8155_v1, %v1390_v33  ;;  %v1404_v46 = vrot.slane %v1402_v34, 5  ;;  %v1408_v47 = vrot.slane %v1406_v48, 4  ;;  %v1058_v2 = vld [vmem:[#allocation2 + $0x38] sm:$0x1]  ;;  %v1276_v7 = vld [vmem:[#allocation2 + $0x34] sm:$0xf] }
  0x42   : > { %v1376_v51 = vrot.slane %v1375_v38, 4  ;;  %v1272_v52 = vld [vmem:[#allocation2 + $0x24] sm:$0xf]  ;;  %v2007_v54 = vsel %vm8123_vm13, %v7243_v35, %v2006_v40  ;;  %v2008_v9 = vrot.slane %v2006_v40, 4  ;;  %v7244_v55 = vrot.slane %v1888_v36, 9  ;;  %v237_v30 = vld [vmem:[%s8023_s23 + $0x58] sm:$0xff] }
  0x43   : > { %v1393_v57 = vshrl.u32 %v1272_v52, 16  ;;  %v1396_v58 = vshll.u32 %v1272_v52, 16  ;;  %v1409_v59 = vor.u32 %v1408_v47, %v1404_v46  ;;  %v2013_v60 = vrot.slane %v1889_v43, 5  ;;  %v816_v28 = vld [vmem:[#allocation2 + $0x3c] sm:$0x2] }
  0x44   : > { %1808 = vrot.lane.b32.xlu0 %v7224_v44, %s7976_s25  ;;  %v1381_v61 = vsel %vm8140_vm14, %v1376_v51, %v8146_v41  ;;  %v2010_v62 = vsel %vm8123_vm13, %v2008_v9, %v2009_v42  ;;  %v7173_v53 = vrot.slane %v815_v49, 9  ;;  %v7191_v1 = vrot.slane %v959_v50, 11  ;;  %v1892_v48 = vld [vmem:[#allocation2 + $0x34] sm:$0xf]  ;;  %v716_v40 = vld [vmem:[#allocation2 + $0x44] sm:$0x1] }
  0x45   : > { %v7225_v3 = vcombine.low %v1381_v61, %v1391_v45  ;;  %v1274_v4 = vld [vmem:[#allocation2 + $0x2c] sm:$0x1]  ;;  %v1395_v5 = vrot.slane %v1393_v57, 4  ;;  %v1398_v6 = vrot.slane %v1396_v58, 5  ;;  %v8186_v10 = vpack.c.bf16 %v236_v56, %v236_v56  ;;  %v916_v42 = vld [vmem:[#allocation2 + $0x3c] sm:$0x1] }
  0x46   : > { %v1410_v11 = vrot.slane %v1409_v59, 4  ;;  %v1412_v12 = vshll.u32 %v1274_v4, 16  ;;  %v7261_v14 = vcombine.low %v2007_v54, %v2010_v62  ;;  %v1890_v17 = vld [vmem:[#allocation2 + $0x2c] sm:$0x1]  ;;  %v2015_v41 = vrot.slane %v2013_v60, 4  ;;  %v238_v51 = vld [vmem:[%s8023_s23 + $0x60] sm:$0xff] }
  0x47   : > { %v1399_v18 = vor.u32 %v1398_v6, %v1395_v5  ;;  %v2016_v21 = vrot.slane %v1890_v17, 5  ;;  %v914_v22 = vsel %vm8049_vm7, %v7173_v53, %v913_v63  ;;  %v1059_v23 = vsel %vm8084_vm10, %v7191_v1, %v1058_v2  ;;  %v1891_v44 = vld [vmem:[#allocation2 + $0x30] sm:$0xe]  ;;  %v719_v5 = vld [vmem:[#allocation2 + $0x48] sm:$0xf] }
  0x48   : > { %1810 = vrot.lane.b32.xlu0 %v7225_v3, %s7976_s25  ;;  %v1414_v24 = vrot.slane %v1412_v12, 5  ;;  %v2014_v13 = vsel %vm8123_vm13, %v7244_v55, %v2013_v60  ;;  %915 = vst [vmem:[#allocation2 + $0x30] sm:$0x1] %v914_v22  ;;  %1060 = vst [vmem:[#allocation2 + $0x38] sm:$0x1] %v1059_v23  ;;  %v1426_v26 = vshll.u32 %v1276_v7, 16  ;;  %v7544_v50 = vpack.c.bf16 %v237_v30, %v237_v30 }
  0x49   : > { %v1430_v27 = vshrl.u32 %v1276_v7, 16  ;;  %v1400_v31 = vrot.slane %v1399_v18, 4  ;;  %v432_v32 = vrot.slane %v8088_v19, 4  ;;  %v436_v33 = vrot.slane %v434_v20, 7  ;;  %v239_v55 = vld [vmem:[%s8023_s23 + $0x68] sm:$0xff]  ;;  %v240_v60 = vld [vmem:[%s8023_s23 + $0x70] sm:$0xff] }
  0x4a   : > { %v437_v34 = vshll.u32 %v8076_v0, 16  ;;  %v1415_v35 = vsel %vm8140_vm14, %v1410_v11, %v1414_v24  ;;  %v2017_v36 = vsel %vm8123_vm13, %v2015_v41, %v2016_v21  ;;  %v8204_v37 = vrot.slane %v1426_v26, 5 }
  0x4b   : > { %v1432_v38 = vrot.slane %v1430_v27, 4  ;;  %v1405_v19 = vsel %vm8140_vm14, %v1400_v31, %v1404_v46  ;;  %v441_v43 = vrot.slane %v436_v33, 4  ;;  %v7174_v0 = vrot.slane %v816_v28, 9 }
  0x4c   : > { %v439_v20 = vor.u32 %v437_v34, %v436_v33  ;;  %v7226_v45 = vcombine.low %v1405_v19, %v1415_v35  ;;  %2174 = vrot.lane.b32.xlu0 %v7261_v14, %s7975_s24  ;;  %v2020_v49 = vrot.slane %v1892_v48, 5  ;;  %v7262_v52 = vcombine.low %v2014_v13, %v2017_v36  ;;  %v723_v35 = vld [vmem:[#allocation2 + $0x50] sm:$0x1] }
  0x4d   : > { %v1433_v47 = vor.u32 %v1432_v38, %v8204_v37  ;;  %v717_v46 = vsel %vm8049_vm7, %v441_v43, %v716_v40  ;;  %v917_v9 = vsel %vm8049_vm7, %v7174_v0, %v916_v42  ;;  %v7245_v57 = vrot.slane %v1891_v44, 9 }
  0x4e   : > { %v440_v54 = vsel %vm8036_vm5, %v432_v32, %v439_v20  ;;  %1812 = vrot.lane.b32.xlu1 %v7226_v45, %s7976_s25  ;;  %718 = vst [vmem:[#allocation2 + $0x44] sm:$0x1] %v717_v46  ;;  %918 = vst [vmem:[#allocation2 + $0x3c] sm:$0x1] %v917_v9  ;;  %v2022_v58 = vrot.slane %v2020_v49, 4  ;;  %v443_v59 = vshrl.u32 %v8186_v10, 16  ;;  %v8222_v63 = vpack.c.bf16 %v238_v51, %v238_v51 }
  0x4f   : > { %v1434_v56 = vrot.slane %v1433_v47, 4  ;;  %715 = vst.msk [vmem:[#allocation2 + $0x40] sm:$0xf] %vm678_vm2, %v440_v54  ;;  %v1275_v61 = vld [vmem:[#allocation2 + $0x30] sm:$0xf]  ;;  %v446_v7 = vshll.u32 %v8186_v10, 16  ;;  %v7546_v18 = vpack.c.bf16 %v239_v55, %v239_v55  ;;  %v8226_v24 = vpack.c.bf16 %v240_v60, %v240_v60 }
  0x50   : > { %v1277_v62 = vld [vmem:[#allocation2 + $0x38] sm:$0x1]  ;;  %v1417_v1 = vshrl.u32 %v1275_v61, 16  ;;  %v1420_v2 = vshll.u32 %v1275_v61, 16  ;;  %v445_v6 = vrot.slane %v443_v59, 7  ;;  %v451_v11 = vshrl.u32 %v7544_v50, 16 }
  0x51   : > { %v1893_v53 = vld [vmem:[#allocation2 + $0x38] sm:$0x1]  ;;  %v1436_v3 = vshll.u32 %v1277_v62, 16  ;;  %v454_v12 = vshll.u32 %v7544_v50, 16  ;;  %v2021_v26 = vsel %vm8123_vm13, %v7245_v57, %v2020_v49  ;;  %v460_v27 = vshrl.u32 %v8222_v63, 16 }
  0x52   : > { %v2023_v4 = vrot.slane %v1893_v53, 5  ;;  %2176 = vrot.lane.b32.xlu1 %v7262_v52, %s7975_s24  ;;  %v1419_v14 = vrot.slane %v1417_v1, 4  ;;  %v1422_v17 = vrot.slane %v1420_v2, 5  ;;  %v448_v21 = vor.u32 %v446_v7, %v445_v6  ;;  %v8238_v20 = vld [vmem:[#allocation2 + $0x3c] sm:$0xe] }
  0x53   : > { %v1438_v41 = vrot.slane %v1436_v3, 5  ;;  %v449_v22 = vrot.slane %v445_v6, 4  ;;  %v453_v23 = vrot.slane %v451_v11, 7  ;;  %v463_v10 = vshll.u32 %v8222_v63, 16  ;;  %v726_v59 = vld [vmem:[#allocation2 + $0x54] sm:$0xf] }
  0x54   : > { %v1423_v13 = vor.u32 %v1422_v17, %v1419_v14  ;;  %v2024_v33 = vsel %vm8123_vm13, %v2022_v58, %v2023_v4  ;;  %v720_v48 = vsel %vm8042_vm6, %v448_v21, %v719_v5  ;;  %v468_v58 = vshrl.u32 %v7546_v18, 16  ;;  %v730_v4 = vld [vmem:[#allocation2 + $0x5c] sm:$0x1] }
  0x55   : > { %v1439_v28 = vsel %vm8140_vm14, %v1434_v56, %v1438_v41  ;;  %v1061_v31 = vld [vmem:[#allocation2 + $0x44] sm:$0x1]  ;;  %v1278_v32 = vld [vmem:[#allocation2 + $0x3c] sm:$0xf]  ;;  %v456_v34 = vor.u32 %v454_v12, %v453_v23  ;;  %721 = vst [vmem:[#allocation2 + $0x48] sm:$0xf] %v720_v48  ;;  %v7263_v61 = vcombine.low %v2021_v26, %v2024_v33 }
  0x56   : > { %v960_v30 = vld [vmem:[#allocation2 + $0x40] sm:$0x8]  ;;  %v1424_v36 = vrot.slane %v1423_v13, 4  ;;  %v1441_v42 = vshrl.u32 %v1278_v32, 16  ;;  %v1444_v19 = vshll.u32 %v1278_v32, 16  ;;  %v458_v47 = vrot.slane %v453_v23, 4 }
  0x57   : > { %v7192_v38 = vrot.slane %v960_v30, 11  ;;  %v1279_v40 = vld [vmem:[#allocation2 + $0x40] sm:$0xf]  ;;  %v457_v45 = vsel %vm8036_vm5, %v449_v22, %v456_v34  ;;  %v7246_v62 = vrot.slane %v8238_v20, 9  ;;  %v471_v53 = vshll.u32 %v7546_v18, 16  ;;  %v241_v5 = vld [vmem:[%s8023_s23 + $0x78] sm:$0xff] }
  0x58   : > { %v1450_v43 = vshll.u32 %v1279_v40, 16  ;;  %v1454_v0 = vshrl.u32 %v1279_v40, 16  ;;  %v8240_v44 = vld [vmem:[#allocation2 + $0x40] sm:$0xf]  ;;  %v1429_v49 = vsel %vm8140_vm14, %v1424_v36, %v8204_v37  ;;  %v1443_v51 = vrot.slane %v1441_v42, 4 }
  0x59   : > { %v1062_v50 = vsel %vm8084_vm10, %v7192_v38, %v1061_v31  ;;  %v1446_v52 = vrot.slane %v1444_v19, 5  ;;  %722 = vst.msk [vmem:[#allocation2 + $0x4c] sm:$0xf] %vm678_vm2, %v457_v45  ;;  %v7227_v54 = vcombine.low %v1429_v49, %v1439_v28  ;;  %v2027_v55 = vrot.slane %v8240_v44, 5  ;;  %v242_v36 = vld [vmem:[%s8023_s23 + $0x80] sm:$0xff] }
  0x5a   : > { %1063 = vst [vmem:[#allocation2 + $0x44] sm:$0x1] %v1062_v50  ;;  %v8250_v46 = vrot.slane %v1450_v43, 5  ;;  %v1456_v9 = vrot.slane %v1454_v0, 4  ;;  %v724_v57 = vsel %vm8049_vm7, %v458_v47, %v723_v35  ;;  %v462_v37 = vrot.slane %v460_v27, 7 }
  0x5b   : > { %v1447_v56 = vor.u32 %v1446_v52, %v1443_v51  ;;  %1814 = vrot.lane.b32.xlu0 %v7227_v54, %s7976_s25  ;;  %725 = vst [vmem:[#allocation2 + $0x50] sm:$0x1] %v724_v57  ;;  %v2029_v63 = vrot.slane %v2027_v55, 4  ;;  %v470_v3 = vrot.slane %v468_v58, 7  ;;  %v477_v21 = vshrl.u32 %v8226_v24, 16 }
  0x5c   : > { %v1457_v60 = vor.u32 %v1456_v9, %v8250_v46  ;;  %v465_v1 = vor.u32 %v463_v10, %v462_v37  ;;  %v466_v2 = vrot.slane %v462_v37, 4  ;;  %v817_v11 = vld [vmem:[#allocation2 + $0x48] sm:$0x2]  ;;  %v919_v12 = vld [vmem:[#allocation2 + $0x48] sm:$0x1]  ;;  %v7548_v26 = vpack.c.bf16 %v241_v5, %v241_v5 }
  0x5d   : > { %v1448_v6 = vrot.slane %v1447_v56, 4  ;;  %v7175_v14 = vrot.slane %v817_v11, 9  ;;  %v473_v17 = vor.u32 %v471_v53, %v470_v3  ;;  %v475_v41 = vrot.slane %v470_v3, 4  ;;  %v8263_v13 = vld [vmem:[#allocation2 + $0x48] sm:$0xe] }
  0x5e   : > { %v1458_v7 = vrot.slane %v1457_v60, 4  ;;  %v727_v18 = vsel %vm8042_vm6, %v465_v1, %v726_v59  ;;  %v479_v19 = vrot.slane %v477_v21, 7  ;;  %v2028_v45 = vsel %vm8123_vm13, %v7246_v62, %v2027_v55  ;;  %v733_v9 = vld [vmem:[#allocation2 + $0x60] sm:$0xf] }
  0x5f   : > { %2178 = vrot.lane.b32.xlu0 %v7263_v61, %s7975_s24  ;;  %v920_v28 = vsel %vm8049_vm7, %v7175_v14, %v919_v12  ;;  %v474_v32 = vsel %vm8036_vm5, %v466_v2, %v473_v17  ;;  %728 = vst [vmem:[#allocation2 + $0x54] sm:$0xf] %v727_v18  ;;  %v731_v35 = vsel %vm8049_vm7, %v475_v41, %v730_v4  ;;  %v7247_v47 = vrot.slane %v8263_v13, 9 }
  0x60   : > { %v961_v22 = vld [vmem:[#allocation2 + $0x4c] sm:$0x8]  ;;  %921 = vst [vmem:[#allocation2 + $0x48] sm:$0x1] %v920_v28  ;;  %729 = vst.msk [vmem:[#allocation2 + $0x58] sm:$0xf] %vm678_vm2, %v474_v32  ;;  %v1453_v20 = vsel %vm8140_vm14, %v1448_v6, %v8250_v46  ;;  %v8286_v50 = vpack.c.bf16 %v242_v36, %v242_v36 }
  0x61   : > { %v1282_v23 = vld [vmem:[#allocation2 + $0x4c] sm:$0xf]  ;;  %v1280_v27 = vld [vmem:[#allocation2 + $0x44] sm:$0x1]  ;;  %v7193_v30 = vrot.slane %v961_v22, 11  ;;  %v480_v49 = vshll.u32 %v8226_v24, 16 }
  0x62   : > { %v1896_v10 = vld [vmem:[#allocation2 + $0x44] sm:$0x1]  ;;  %v1474_v31 = vshll.u32 %v1282_v23, 16  ;;  %v1460_v33 = vshll.u32 %v1280_v27, 16  ;;  %v1478_v48 = vshrl.u32 %v1282_v23, 16  ;;  %v485_v46 = vshrl.u32 %v7548_v26, 16 }
  0x63   : > { %v2030_v34 = vrot.slane %v1896_v10, 5  ;;  %v1064_v38 = vld [vmem:[#allocation2 + $0x50] sm:$0x1]  ;;  %732 = vst [vmem:[#allocation2 + $0x5c] sm:$0x1] %v731_v35  ;;  %v482_v57 = vor.u32 %v480_v49, %v479_v19  ;;  %v488_v37 = vshll.u32 %v7548_v26, 16 }
  0x64   : > { %v8273_v40 = vrot.slane %v1474_v31, 5  ;;  %v8275_v42 = vld [vmem:[#allocation2 + $0x4c] sm:$0xf]  ;;  %v1462_v43 = vrot.slane %v1460_v33, 5  ;;  %v1065_v0 = vsel %vm8084_vm10, %v7193_v30, %v1064_v38  ;;  %v1480_v44 = vrot.slane %v1478_v48, 4 }
  0x65   : > { %1066 = vst [vmem:[#allocation2 + $0x50] sm:$0x1] %v1065_v0  ;;  %v2031_v52 = vsel %vm8123_vm13, %v2029_v63, %v2030_v34  ;;  %v2034_v54 = vrot.slane %v8275_v42, 5  ;;  %v483_v24 = vrot.slane %v479_v19, 4  ;;  %v487_v60 = vrot.slane %v485_v46, 7  ;;  %v243_v26 = vld [vmem:[%s8023_s23 + $0x88] sm:$0xff] }
  0x66   : > { %v1463_v51 = vsel %vm8140_vm14, %v1458_v7, %v1462_v43  ;;  %v1481_v55 = vor.u32 %v1480_v44, %v8273_v40  ;;  %v818_v58 = vld [vmem:[#allocation2 + $0x54] sm:$0x2]  ;;  %v922_v59 = vld [vmem:[#allocation2 + $0x54] sm:$0x1]  ;;  %v7264_v61 = vcombine.low %v2028_v45, %v2031_v52  ;;  %v734_v63 = vsel %vm8042_vm6, %v482_v57, %v733_v9  ;;  %v737_v31 = vld [vmem:[#allocation2 + $0x68] sm:$0x1] }
  0x67   : > { %v7228_v56 = vcombine.low %v1453_v20, %v1463_v51  ;;  %v1281_v62 = vld [vmem:[#allocation2 + $0x48] sm:$0xf]  ;;  %v7176_v53 = vrot.slane %v818_v58, 9  ;;  %v962_v1 = vld [vmem:[#allocation2 + $0x58] sm:$0x8]  ;;  %v494_v2 = vshrl.u32 %v8286_v50, 16  ;;  %v490_v7 = vor.u32 %v488_v37, %v487_v60 }
  0x68   : > { %v1465_v3 = vshrl.u32 %v1281_v62, 16  ;;  %v1468_v4 = vshll.u32 %v1281_v62, 16  ;;  %v7194_v5 = vrot.slane %v962_v1, 11  ;;  %735 = vst [vmem:[#allocation2 + $0x60] sm:$0xf] %v734_v63  ;;  %v1482_v11 = vrot.slane %v1481_v55, 4 }
  0x69   : > { %1816 = vrot.lane.b32.xlu1 %v7228_v56, %s7976_s25  ;;  %v923_v12 = vsel %vm8049_vm7, %v7176_v53, %v922_v59  ;;  %v1285_v14 = vld [vmem:[#allocation2 + $0x58] sm:$0xf]  ;;  %v2036_v17 = vrot.slane %v2034_v54, 4  ;;  %v8307_v32 = vrot.slane %v494_v2, 7  ;;  %v8311_v35 = vld [vmem:[#allocation2 + $0x54] sm:$0xe]  ;;  %v491_v36 = vsel %vm8036_vm5, %v483_v24, %v490_v7 }
  0x6a   : > { %v1067_v6 = vld [vmem:[#allocation2 + $0x5c] sm:$0x1]  ;;  %v8300_v41 = vld [vmem:[#allocation2 + $0x58] sm:$0xf]  ;;  %v1467_v22 = vrot.slane %v1465_v3, 4  ;;  %v1470_v23 = vrot.slane %v1468_v4, 5  ;;  %v2035_v19 = vsel %vm8123_vm13, %v7247_v47, %v2034_v54  ;;  %v7550_v20 = vpack.c.bf16 %v243_v26, %v243_v26 }
  0x6b   : > { %924 = vst [vmem:[#allocation2 + $0x54] sm:$0x1] %v923_v12  ;;  %v1068_v18 = vsel %vm8084_vm10, %v7194_v5, %v1067_v6  ;;  %v1498_v13 = vshll.u32 %v1285_v14, 16  ;;  %v1502_v10 = vshrl.u32 %v1285_v14, 16  ;;  %v2041_v30 = vrot.slane %v8300_v41, 5  ;;  %v245_v62 = vld [vmem:[%s8023_s23 + $0x98] sm:$0xff] }
  0x6c   : > { %v1283_v21 = vld [vmem:[#allocation2 + $0x50] sm:$0x1]  ;;  %1069 = vst [vmem:[#allocation2 + $0x5c] sm:$0x1] %v1068_v18  ;;  %v1471_v33 = vor.u32 %v1470_v23, %v1467_v22  ;;  %736 = vst.msk [vmem:[#allocation2 + $0x64] sm:$0xf] %vm678_vm2, %v491_v36 }
  0x6d   : > { %2180 = vrot.lane.b32.xlu1 %v7264_v61, %s7975_s24  ;;  %v1484_v27 = vshll.u32 %v1283_v21, 16  ;;  %v1899_v28 = vld [vmem:[#allocation2 + $0x50] sm:$0x1]  ;;  %v8309_v34 = vrot.slane %v1498_v13, 5  ;;  %v1504_v42 = vrot.slane %v1502_v10, 4  ;;  %v492_v45 = vrot.slane %v487_v60, 4 }
  0x6e   : > { %v2037_v48 = vrot.slane %v1899_v28, 5  ;;  %v740_v43 = vld [vmem:[#allocation2 + $0x6c] sm:$0xf]  ;;  %v1472_v0 = vrot.slane %v1471_v33, 4  ;;  %v497_v49 = vshll.u32 %v8286_v50, 16  ;;  %v7248_v47 = vrot.slane %v8311_v35, 9 }
  0x6f   : > { %v1486_v38 = vrot.slane %v1484_v27, 5  ;;  %v1505_v52 = vor.u32 %v1504_v42, %v8309_v34  ;;  %v2043_v54 = vrot.slane %v2041_v30, 4  ;;  %v819_v46 = vld [vmem:[#allocation2 + $0x60] sm:$0x2]  ;;  %v925_v9 = vld [vmem:[#allocation2 + $0x60] sm:$0x1]  ;;  %v738_v50 = vsel %vm8049_vm7, %v492_v45, %v737_v31 }
  0x70   : > { %v2038_v44 = vsel %vm8123_vm13, %v2036_v17, %v2037_v48  ;;  %v1477_v56 = vsel %vm8140_vm14, %v1472_v0, %v8273_v40  ;;  %v7177_v55 = vrot.slane %v819_v46, 9  ;;  %v499_v57 = vor.u32 %v497_v49, %v8307_v32  ;;  %739 = vst [vmem:[#allocation2 + $0x68] sm:$0x1] %v738_v50  ;;  %v244_v61 = vld [vmem:[%s8023_s23 + $0x90] sm:$0xff]  ;;  %v246_v10 = vld [vmem:[%s8023_s23 + $0xa0] sm:$0xff]  ;;  %v247_v48 = vld [vmem:[%s8023_s23 + $0xa8] sm:$0xff] }
  0x71   : > { %v1487_v51 = vsel %vm8140_vm14, %v1482_v11, %v1486_v38  ;;  %v7265_v59 = vcombine.low %v2035_v19, %v2038_v44  ;;  %v502_v24 = vshrl.u32 %v7550_v20, 16  ;;  %v505_v60 = vshll.u32 %v7550_v20, 16  ;;  %v744_v21 = vld [vmem:[#allocation2 + $0x74] sm:$0x1]  ;;  %v1903_v19 = vld [vmem:[#allocation2 + $0x60] sm:$0xe] }
  0x72   : > { %v7229_v37 = vcombine.low %v1477_v56, %v1487_v51  ;;  %v1284_v58 = vld [vmem:[#allocation2 + $0x54] sm:$0xf]  ;;  %v926_v40 = vsel %vm8049_vm7, %v7177_v55, %v925_v9  ;;  %v741_v3 = vsel %vm8042_vm6, %v499_v57, %v740_v43  ;;  %v1506_v4 = vrot.slane %v1505_v52, 4 }
  0x73   : > { %v1286_v53 = vld [vmem:[#allocation2 + $0x5c] sm:$0x1]  ;;  %v1489_v1 = vshrl.u32 %v1284_v58, 16  ;;  %v1492_v63 = vshll.u32 %v1284_v58, 16  ;;  %927 = vst [vmem:[#allocation2 + $0x60] sm:$0x1] %v926_v40  ;;  %v7551_v22 = vpack.c.bf16 %v244_v61, %v244_v61  ;;  %v2042_v36 = vsel %vm8123_vm13, %v7248_v47, %v2041_v30 }
  0x74   : > { %v1902_v2 = vld [vmem:[#allocation2 + $0x5c] sm:$0x1]  ;;  %1818 = vrot.lane.b32.xlu0 %v7229_v37, %s7976_s25  ;;  %v1508_v5 = vshll.u32 %v1286_v53, 16  ;;  %v500_v6 = vrot.slane %v8307_v32, 4  ;;  %v504_v7 = vrot.slane %v502_v24, 7  ;;  %v8344_v32 = vpack.c.bf16 %v245_v62, %v245_v62 }
  0x75   : > { %742 = vst [vmem:[#allocation2 + $0x6c] sm:$0xf] %v741_v3  ;;  %v1491_v11 = vrot.slane %v1489_v1, 4  ;;  %v1494_v12 = vrot.slane %v1492_v63, 5  ;;  %v963_v14 = vld [vmem:[#allocation2 + $0x64] sm:$0x8]  ;;  %v8370_v56 = vpack.c.bf16 %v246_v10, %v246_v10  ;;  %v8372_v50 = vpack.c.bf16 %v247_v48, %v247_v48 }
  0x76   : > { %v1288_v17 = vld [vmem:[#allocation2 + $0x64] sm:$0xf]  ;;  %v1510_v23 = vrot.slane %v1508_v5, 5  ;;  %v2044_v18 = vrot.slane %v1902_v2, 5  ;;  %v7195_v13 = vrot.slane %v963_v14, 11  ;;  %v507_v33 = vor.u32 %v505_v60, %v504_v7  ;;  %v248_v2 = vld [vmem:[%s8023_s23 + $0xb0] sm:$0xff] }
  0x77   : > { %v1522_v26 = vshll.u32 %v1288_v17, 16  ;;  %v8341_v27 = vld [vmem:[#allocation2 + $0x64] sm:$0xf]  ;;  %v1495_v28 = vor.u32 %v1494_v12, %v1491_v11  ;;  %v1526_v31 = vshrl.u32 %v1288_v17, 16  ;;  %v509_v42 = vrot.slane %v504_v7, 4  ;;  %v249_v40 = vld [vmem:[%s8023_s23 + $0xb8] sm:$0xff] }
  0x78   : > { %v1511_v35 = vsel %vm8140_vm14, %v1506_v4, %v1510_v23  ;;  %2182 = vrot.lane.b32.xlu0 %v7265_v59, %s7975_s24  ;;  %v1070_v43 = vld [vmem:[#allocation2 + $0x68] sm:$0x1]  ;;  %v508_v44 = vsel %vm8036_vm5, %v500_v6, %v507_v33  ;;  %v511_v45 = vshrl.u32 %v7551_v22, 16  ;;  %v2045_v49 = vsel %vm8123_vm13, %v2043_v54, %v2044_v18  ;;  %v747_v59 = vld [vmem:[#allocation2 + $0x78] sm:$0xf] }
  0x79   : > { %v8354_v38 = vrot.slane %v1522_v26, 5  ;;  %v1496_v20 = vrot.slane %v1495_v28, 4  ;;  %v1528_v0 = vrot.slane %v1526_v31, 4  ;;  %v1071_v41 = vsel %vm8084_vm10, %v7195_v13, %v1070_v43  ;;  %743 = vst.msk [vmem:[#allocation2 + $0x70] sm:$0xf] %vm678_vm2, %v508_v44 }
  0x7a   : > { %v745_v30 = vsel %vm8049_vm7, %v509_v42, %v744_v21  ;;  %v2048_v51 = vrot.slane %v8341_v27, 5  ;;  %1072 = vst [vmem:[#allocation2 + $0x68] sm:$0x1] %v1071_v41  ;;  %v1287_v47 = vld [vmem:[#allocation2 + $0x60] sm:$0xf]  ;;  %v7266_v24 = vcombine.low %v2042_v36, %v2045_v49  ;;  %v513_v60 = vrot.slane %v511_v45, 7 }
  0x7b   : > { %v1501_v52 = vsel %vm8140_vm14, %v1496_v20, %v8309_v34  ;;  %v1529_v46 = vor.u32 %v1528_v0, %v8354_v38  ;;  %746 = vst [vmem:[#allocation2 + $0x74] sm:$0x1] %v745_v30  ;;  %v1513_v57 = vshrl.u32 %v1287_v47, 16  ;;  %v1516_v37 = vshll.u32 %v1287_v47, 16  ;;  %v751_v0 = vld [vmem:[#allocation2 + $0x80] sm:$0x1] }
  0x7c   : > { %v820_v54 = vld [vmem:[#allocation2 + $0x6c] sm:$0x2]  ;;  %v928_v9 = vld [vmem:[#allocation2 + $0x6c] sm:$0x1]  ;;  %v7230_v55 = vcombine.low %v1501_v52, %v1511_v35  ;;  %v7249_v34 = vrot.slane %v1903_v19, 9  ;;  %v514_v61 = vshll.u32 %v7551_v22, 16  ;;  %v8386_v18 = vpack.c.bf16 %v248_v2, %v248_v2 }
  0x7d   : > { %v7178_v58 = vrot.slane %v820_v54, 9  ;;  %v1515_v62 = vrot.slane %v1513_v57, 4  ;;  %v1518_v53 = vrot.slane %v1516_v37, 5  ;;  %v519_v63 = vshrl.u32 %v8344_v32, 16  ;;  %v754_v37 = vld [vmem:[#allocation2 + $0x84] sm:$0xf] }
  0x7e   : > { %1820 = vrot.lane.b32.xlu1 %v7230_v55, %s7976_s25  ;;  %v1530_v3 = vrot.slane %v1529_v46, 4  ;;  %v2050_v4 = vrot.slane %v2048_v51, 4  ;;  %v516_v5 = vor.u32 %v514_v61, %v513_v60  ;;  %v522_v6 = vshll.u32 %v8344_v32, 16 }
  0x7f   : > { %v929_v1 = vsel %vm8049_vm7, %v7178_v58, %v928_v9  ;;  %v1519_v7 = vor.u32 %v1518_v53, %v1515_v62  ;;  %v517_v11 = vrot.slane %v513_v60, 4  ;;  %v521_v12 = vrot.slane %v519_v63, 7 }
  0x80   : > { %930 = vst [vmem:[#allocation2 + $0x6c] sm:$0x1] %v929_v1  ;;  %v528_v14 = vshrl.u32 %v8370_v56, 16  ;;  %v964_v17 = vld [vmem:[#allocation2 + $0x70] sm:$0x8]  ;;  %v748_v23 = vsel %vm8042_vm6, %v516_v5, %v747_v59  ;;  %v8388_v13 = vpack.c.bf16 %v249_v40, %v249_v40  ;;  %v8393_v31 = vsel %vm8123_vm13, %v7249_v34, %v2048_v51 }
  0x81   : > { %v1291_v21 = vld [vmem:[#allocation2 + $0x70] sm:$0xf]  ;;  %v1289_v26 = vld [vmem:[#allocation2 + $0x68] sm:$0x1]  ;;  %v1520_v27 = vrot.slane %v1519_v7, 4  ;;  %v7196_v10 = vrot.slane %v964_v17, 11  ;;  %v524_v33 = vor.u32 %v522_v6, %v521_v12 }
  0x82   : > { %v8382_v22 = vld [vmem:[#allocation2 + $0x70] sm:$0xf]  ;;  %2184 = vrot.lane.b32.xlu1 %v7266_v24, %s7975_s24  ;;  %v1073_v28 = vld [vmem:[#allocation2 + $0x74] sm:$0x1]  ;;  %749 = vst [vmem:[#allocation2 + $0x78] sm:$0xf] %v748_v23 }
  0x83   : > { %v1532_v32 = vshll.u32 %v1289_v26, 16  ;;  %v1546_v48 = vshll.u32 %v1291_v21, 16  ;;  %v1550_v35 = vshrl.u32 %v1291_v21, 16  ;;  %v1905_v36 = vld [vmem:[#allocation2 + $0x68] sm:$0x1]  ;;  %v531_v42 = vshll.u32 %v8370_v56, 16 }
  0x84   : > { %v1074_v19 = vsel %vm8084_vm10, %v7196_v10, %v1073_v28  ;;  %v2051_v20 = vrot.slane %v1905_v36, 5  ;;  %v525_v43 = vsel %vm8036_vm5, %v517_v11, %v524_v33  ;;  %v536_v44 = vshrl.u32 %v8372_v50, 16  ;;  %v1906_v51 = vld [vmem:[#allocation2 + $0x6c] sm:$0xe]  ;;  %v758_v11 = vld [vmem:[#allocation2 + $0x8c] sm:$0x1] }
  0x85   : > { %v1525_v45 = vsel %vm8140_vm14, %v1520_v27, %v8354_v38  ;;  %v1534_v49 = vrot.slane %v1532_v32, 5  ;;  %1075 = vst [vmem:[#allocation2 + $0x74] sm:$0x1] %v1074_v19  ;;  %v8404_v41 = vrot.slane %v1546_v48, 5  ;;  %v1552_v30 = vrot.slane %v1550_v35, 4 }
  0x86   : > { %750 = vst.msk [vmem:[#allocation2 + $0x7c] sm:$0xf] %vm678_vm2, %v525_v43  ;;  %v2052_v47 = vsel %vm8123_vm13, %v2050_v4, %v2051_v20  ;;  %v2055_v46 = vrot.slane %v8382_v22, 5  ;;  %v526_v54 = vrot.slane %v521_v12, 4  ;;  %v530_v9 = vrot.slane %v528_v14, 7 }
  0x87   : > { %v1290_v52 = vld [vmem:[#allocation2 + $0x6c] sm:$0xf]  ;;  %v1535_v56 = vsel %vm8140_vm14, %v1530_v3, %v1534_v49  ;;  %v1553_v57 = vor.u32 %v1552_v30, %v8404_v41  ;;  %v7250_v59 = vrot.slane %v1906_v51, 9  ;;  %v7267_v62 = vcombine.low %v8393_v31, %v2052_v47 }
  0x88   : > { %v1537_v38 = vshrl.u32 %v1290_v52, 16  ;;  %v1540_v55 = vshll.u32 %v1290_v52, 16  ;;  %v7231_v58 = vcombine.low %v1525_v45, %v1535_v56  ;;  %v752_v24 = vsel %vm8049_vm7, %v526_v54, %v751_v0  ;;  %v250_v0 = vld [vmem:[%s8023_s23 + $0xc0] sm:$0xff] }
  0x89   : > { %v533_v34 = vor.u32 %v531_v42, %v530_v9  ;;  %753 = vst [vmem:[#allocation2 + $0x80] sm:$0x1] %v752_v24  ;;  %v821_v53 = vld [vmem:[#allocation2 + $0x78] sm:$0x2]  ;;  %v534_v1 = vrot.slane %v530_v9, 4  ;;  %v538_v40 = vrot.slane %v536_v44, 7  ;;  %v8423_v21 = vsel %vm8123_vm13, %v7250_v59, %v2055_v46 }
  0x8a   : > { %v1539_v60 = vrot.slane %v1537_v38, 4  ;;  %v1542_v61 = vrot.slane %v1540_v55, 5  ;;  %1822 = vrot.lane.b32.xlu0 %v7231_v58, %s7976_s25  ;;  %v7179_v63 = vrot.slane %v821_v53, 9  ;;  %v931_v2 = vld [vmem:[#allocation2 + $0x78] sm:$0x1]  ;;  %v539_v3 = vshll.u32 %v8372_v50, 16 }
  0x8b   : > { %v755_v4 = vsel %vm8042_vm6, %v533_v34, %v754_v37  ;;  %v1554_v6 = vrot.slane %v1553_v57, 4  ;;  %v2057_v7 = vrot.slane %v2055_v46, 4  ;;  %v545_v12 = vshrl.u32 %v8386_v18, 16  ;;  %v1909_v52 = vld [vmem:[#allocation2 + $0x78] sm:$0xe]  ;;  %v251_v24 = vld [vmem:[%s8023_s23 + $0xc8] sm:$0xff] }
  0x8c   : > { %v1543_v5 = vor.u32 %v1542_v61, %v1539_v60  ;;  %756 = vst [vmem:[#allocation2 + $0x84] sm:$0xf] %v755_v4  ;;  %v1292_v14 = vld [vmem:[#allocation2 + $0x74] sm:$0x1]  ;;  %v932_v22 = vsel %vm8049_vm7, %v7179_v63, %v931_v2  ;;  %v541_v23 = vor.u32 %v539_v3, %v538_v40  ;;  %v543_v35 = vrot.slane %v538_v40, 4 }
  0x8d   : > { %v1908_v17 = vld [vmem:[#allocation2 + $0x74] sm:$0x1]  ;;  %v965_v50 = vld [vmem:[#allocation2 + $0x7c] sm:$0x8]  ;;  %v1556_v27 = vshll.u32 %v1292_v14, 16  ;;  %v548_v20 = vshll.u32 %v8386_v18, 16  ;;  %v8450_v38 = vpack.c.bf16 %v250_v0, %v250_v0 }
  0x8e   : > { %v1544_v26 = vrot.slane %v1543_v5, 4  ;;  %v2058_v10 = vrot.slane %v1908_v17, 5  ;;  %933 = vst [vmem:[#allocation2 + $0x78] sm:$0x1] %v932_v22  ;;  %v7197_v28 = vrot.slane %v965_v50, 11  ;;  %2186 = vrot.lane.b32.xlu0 %v7267_v62, %s7975_s24  ;;  %v542_v48 = vsel %vm8036_vm5, %v534_v1, %v541_v23  ;;  %v252_v34 = vld [vmem:[%s8023_s23 + $0xd0] sm:$0xff] }
  0x8f   : > { %v1294_v31 = vld [vmem:[#allocation2 + $0x7c] sm:$0xf]  ;;  %v1558_v19 = vrot.slane %v1556_v27, 5  ;;  %757 = vst.msk [vmem:[#allocation2 + $0x88] sm:$0xf] %vm678_vm2, %v542_v48  ;;  %v553_v43 = vshrl.u32 %v8388_v13, 16  ;;  %v759_v51 = vsel %vm8049_vm7, %v543_v35, %v758_v11  ;;  %v8466_v14 = vpack.c.bf16 %v252_v34, %v252_v34 }
  0x90   : > { %v1570_v33 = vshll.u32 %v1294_v31, 16  ;;  %v1574_v32 = vshrl.u32 %v1294_v31, 16  ;;  %v8430_v36 = vld [vmem:[#allocation2 + $0x7c] sm:$0xf]  ;;  %v1549_v42 = vsel %vm8140_vm14, %v1544_v26, %v8404_v41  ;;  %v2059_v44 = vsel %vm8123_vm13, %v2057_v7, %v2058_v10  ;;  %v1076_v45 = vld [vmem:[#allocation2 + $0x80] sm:$0x1] }
  0x91   : > { %v1559_v41 = vsel %vm8140_vm14, %v1554_v6, %v1558_v19  ;;  %v1077_v18 = vsel %vm8084_vm10, %v7197_v28, %v1076_v45  ;;  %760 = vst [vmem:[#allocation2 + $0x8c] sm:$0x1] %v759_v51  ;;  %v2062_v47 = vrot.slane %v8430_v36, 5  ;;  %v547_v46 = vrot.slane %v545_v12, 7  ;;  %v761_v59 = vld [vmem:[#allocation2 + $0x90] sm:$0xf] }
  0x92   : > { %v8441_v49 = vrot.slane %v1570_v33, 5  ;;  %v1576_v30 = vrot.slane %v1574_v32, 4  ;;  %v7232_v54 = vcombine.low %v1549_v42, %v1559_v41  ;;  %1078 = vst [vmem:[#allocation2 + $0x80] sm:$0x1] %v1077_v18  ;;  %v7268_v55 = vcombine.low %v8423_v21, %v2059_v44  ;;  %v765_v11 = vld [vmem:[#allocation2 + $0x98] sm:$0x1] }
  0x93   : > { %v822_v9 = vld [vmem:[#allocation2 + $0x84] sm:$0x2]  ;;  %v934_v56 = vld [vmem:[#allocation2 + $0x84] sm:$0x1]  ;;  %v7251_v58 = vrot.slane %v1909_v52, 9  ;;  %v2064_v61 = vrot.slane %v2062_v47, 4  ;;  %v550_v62 = vor.u32 %v548_v20, %v547_v46  ;;  %v8464_v12 = vpack.c.bf16 %v251_v24, %v251_v24 }
  0x94   : > { %v1577_v57 = vor.u32 %v1576_v30, %v8441_v49  ;;  %v7180_v37 = vrot.slane %v822_v9, 9  ;;  %1824 = vrot.lane.b32.xlu1 %v7232_v54, %s7976_s25  ;;  %v551_v53 = vrot.slane %v547_v46, 4  ;;  %v555_v1 = vrot.slane %v553_v43, 7  ;;  %v8468_v23 = vld [vmem:[#allocation2 + $0x84] sm:$0xe] }
  0x95   : > { %v1293_v60 = vld [vmem:[#allocation2 + $0x78] sm:$0xf]  ;;  %v556_v3 = vshll.u32 %v8388_v13, 16  ;;  %v762_v7 = vsel %vm8042_vm6, %v550_v62, %v761_v59  ;;  %v562_v36 = vshrl.u32 %v8450_v38, 16  ;;  %v2063_v44 = vsel %vm8123_vm13, %v7251_v58, %v2062_v47  ;;  %v768_v46 = vld [vmem:[#allocation2 + $0x9c] sm:$0xf] }
  0x96   : > { %v1561_v63 = vshrl.u32 %v1293_v60, 16  ;;  %v1564_v2 = vshll.u32 %v1293_v60, 16  ;;  %v935_v40 = vsel %vm8049_vm7, %v7180_v37, %v934_v56  ;;  %v966_v4 = vld [vmem:[#allocation2 + $0x88] sm:$0x8]  ;;  %763 = vst [vmem:[#allocation2 + $0x90] sm:$0xf] %v762_v7 }
  0x97   : > { %936 = vst [vmem:[#allocation2 + $0x84] sm:$0x1] %v935_v40  ;;  %v1297_v5 = vld [vmem:[#allocation2 + $0x88] sm:$0xf]  ;;  %v7198_v22 = vrot.slane %v966_v4, 11  ;;  %v1578_v13 = vrot.slane %v1577_v57, 4  ;;  %v558_v10 = vor.u32 %v556_v3, %v555_v1 }
  0x98   : > { %v8460_v6 = vld [vmem:[#allocation2 + $0x88] sm:$0xf]  ;;  %v1563_v17 = vrot.slane %v1561_v63, 4  ;;  %v1566_v21 = vrot.slane %v1564_v2, 5  ;;  %v1594_v50 = vshll.u32 %v1297_v5, 16  ;;  %2188 = vrot.lane.b32.xlu1 %v7268_v55, %s7975_s24  ;;  %v1598_v27 = vshrl.u32 %v1297_v5, 16 }
  0x99   : > { %v1079_v26 = vld [vmem:[#allocation2 + $0x8c] sm:$0x1]  ;;  %v560_v28 = vrot.slane %v555_v1, 4  ;;  %v1295_v31 = vld [vmem:[#allocation2 + $0x80] sm:$0x1]  ;;  %v2069_v43 = vrot.slane %v8460_v6, 5  ;;  %v559_v45 = vsel %vm8036_vm5, %v551_v53, %v558_v10 }
  0x9a   : > { %v1567_v33 = vor.u32 %v1566_v21, %v1563_v17  ;;  %v1080_v32 = vsel %vm8084_vm10, %v7198_v22, %v1079_v26  ;;  %v8473_v48 = vrot.slane %v1594_v50, 5  ;;  %v1911_v35 = vld [vmem:[#allocation2 + $0x80] sm:$0x1]  ;;  %v1580_v42 = vshll.u32 %v1295_v31, 16  ;;  %764 = vst.msk [vmem:[#allocation2 + $0x94] sm:$0xf] %vm678_vm2, %v559_v45 }
  0x9b   : > { %1081 = vst [vmem:[#allocation2 + $0x8c] sm:$0x1] %v1080_v32  ;;  %v1600_v19 = vrot.slane %v1598_v27, 4  ;;  %v2065_v20 = vrot.slane %v1911_v35, 5  ;;  %v766_v30 = vsel %vm8049_vm7, %v560_v28, %v765_v11  ;;  %v7252_v41 = vrot.slane %v8468_v23, 9  ;;  %v253_v2 = vld [vmem:[%s8023_s23 + $0xd8] sm:$0xff] }
  0x9c   : > { %v1568_v0 = vrot.slane %v1567_v33, 4  ;;  %v1582_v51 = vrot.slane %v1580_v42, 5  ;;  %767 = vst [vmem:[#allocation2 + $0x98] sm:$0x1] %v766_v30  ;;  %v564_v18 = vrot.slane %v562_v36, 7  ;;  %v565_v56 = vshll.u32 %v8450_v38, 16 }
  0x9d   : > { %v2066_v52 = vsel %vm8123_vm13, %v2064_v61, %v2065_v20  ;;  %v1601_v9 = vor.u32 %v1600_v19, %v8473_v48  ;;  %v570_v55 = vshrl.u32 %v8464_v12, 16  ;;  %v2071_v59 = vrot.slane %v2069_v43, 4  ;;  %v823_v24 = vld [vmem:[#allocation2 + $0x90] sm:$0x2]  ;;  %v937_v62 = vld [vmem:[#allocation2 + $0x90] sm:$0x1] }
  0x9e   : > { %v1573_v47 = vsel %vm8140_vm14, %v1568_v0, %v8441_v49  ;;  %v1296_v54 = vld [vmem:[#allocation2 + $0x84] sm:$0xf]  ;;  %v1583_v57 = vsel %vm8140_vm14, %v1578_v13, %v1582_v51  ;;  %v7269_v60 = vcombine.low %v2063_v44, %v2066_v52  ;;  %v7181_v61 = vrot.slane %v823_v24, 9  ;;  %v1915_v52 = vld [vmem:[#allocation2 + $0x90] sm:$0xe] }
  0x9f   : > { %v1585_v37 = vshrl.u32 %v1296_v54, 16  ;;  %v1588_v58 = vshll.u32 %v1296_v54, 16  ;;  %v7233_v34 = vcombine.low %v1573_v47, %v1583_v57  ;;  %v567_v49 = vor.u32 %v565_v56, %v564_v18  ;;  %v772_v19 = vld [vmem:[#allocation2 + $0xa4] sm:$0x1] }
  0xa0   : > { %v572_v63 = vrot.slane %v570_v55, 7  ;;  %v573_v38 = vshll.u32 %v8464_v12, 16  ;;  %v1602_v3 = vrot.slane %v1601_v9, 4  ;;  %v938_v5 = vsel %vm8049_vm7, %v7181_v61, %v937_v62  ;;  %v254_v54 = vld [vmem:[%s8023_s23 + $0xe0] sm:$0xff]  ;;  %v255_v9 = vld [vmem:[%s8023_s23 + $0xe8] sm:$0xff] }
  0xa1   : > { %v1587_v53 = vrot.slane %v1585_v37, 4  ;;  %v1590_v1 = vrot.slane %v1588_v58, 5  ;;  %1826 = vrot.lane.b32.xlu0 %v7233_v34, %s7976_s25  ;;  %v568_v6 = vrot.slane %v564_v18, 4  ;;  %v769_v7 = vsel %vm8042_vm6, %v567_v49, %v768_v46  ;;  %939 = vst [vmem:[#allocation2 + $0x90] sm:$0x1] %v938_v5 }
  0xa2   : > { %v1298_v40 = vld [vmem:[#allocation2 + $0x8c] sm:$0x1]  ;;  %v575_v22 = vor.u32 %v573_v38, %v572_v63  ;;  %770 = vst [vmem:[#allocation2 + $0x9c] sm:$0xf] %v769_v7  ;;  %v2070_v12 = vsel %vm8123_vm13, %v7252_v41, %v2069_v43  ;;  %v967_v50 = vld [vmem:[#allocation2 + $0x94] sm:$0x8]  ;;  %v8504_v26 = vpack.c.bf16 %v253_v2, %v253_v2  ;;  %v7561_v7 = vpack.c.bf16 %v254_v54, %v254_v54 }
  0xa3   : > { %v1914_v4 = vld [vmem:[#allocation2 + $0x8c] sm:$0x1]  ;;  %v1591_v11 = vor.u32 %v1590_v1, %v1587_v53  ;;  %v1604_v17 = vshll.u32 %v1298_v40, 16  ;;  %v1082_v23 = vld [vmem:[#allocation2 + $0x98] sm:$0x1]  ;;  %v7199_v28 = vrot.slane %v967_v50, 11 }
  0xa4   : > { %v2072_v21 = vrot.slane %v1914_v4, 5  ;;  %v1300_v13 = vld [vmem:[#allocation2 + $0x94] sm:$0xf]  ;;  %v579_v33 = vshrl.u32 %v8466_v14, 16  ;;  %v576_v42 = vsel %vm8036_vm5, %v568_v6, %v575_v22  ;;  %v577_v44 = vrot.slane %v572_v63, 4 }
  0xa5   : > { %v1592_v27 = vrot.slane %v1591_v11, 4  ;;  %v1606_v10 = vrot.slane %v1604_v17, 5  ;;  %v8506_v31 = vld [vmem:[#allocation2 + $0x94] sm:$0xf]  ;;  %2190 = vrot.lane.b32.xlu0 %v7269_v60, %s7975_s24  ;;  %v1618_v35 = vshll.u32 %v1300_v13, 16  ;;  %v1622_v36 = vshrl.u32 %v1300_v13, 16 }
  0xa6   : > { %v2073_v32 = vsel %vm8123_vm13, %v2071_v59, %v2072_v21  ;;  %v1083_v0 = vsel %vm8084_vm10, %v7199_v28, %v1082_v23  ;;  %771 = vst.msk [vmem:[#allocation2 + $0xa0] sm:$0xf] %vm678_vm2, %v576_v42  ;;  %v2076_v41 = vrot.slane %v8506_v31, 5  ;;  %v8527_v18 = vrot.slane %v579_v33, 7  ;;  %v775_v61 = vld [vmem:[#allocation2 + $0xa8] sm:$0xf] }
  0xa7   : > { %v1597_v20 = vsel %vm8140_vm14, %v1592_v27, %v8473_v48  ;;  %v1607_v43 = vsel %vm8140_vm14, %v1602_v3, %v1606_v10  ;;  %1084 = vst [vmem:[#allocation2 + $0x98] sm:$0x1] %v1083_v0  ;;  %v8522_v30 = vrot.slane %v1618_v35, 5  ;;  %v1624_v51 = vrot.slane %v1622_v36, 4  ;;  %v779_v23 = vld [vmem:[#allocation2 + $0xb0] sm:$0x1] }
  0xa8   : > { %v7234_v45 = vcombine.low %v1597_v20, %v1607_v43  ;;  %v773_v48 = vsel %vm8049_vm7, %v577_v44, %v772_v19  ;;  %v582_v46 = vshll.u32 %v8466_v14, 16  ;;  %v587_v47 = vshrl.u32 %v8504_v26, 16  ;;  %v1299_v55 = vld [vmem:[#allocation2 + $0x90] sm:$0xf] }
  0xa9   : > { %v7270_v56 = vcombine.low %v2070_v12, %v2073_v32  ;;  %v1625_v57 = vor.u32 %v1624_v51, %v8522_v30  ;;  %774 = vst [vmem:[#allocation2 + $0xa4] sm:$0x1] %v773_v48  ;;  %v824_v37 = vld [vmem:[#allocation2 + $0x9c] sm:$0x2]  ;;  %v940_v58 = vld [vmem:[#allocation2 + $0x9c] sm:$0x1]  ;;  %v8546_v11 = vpack.c.bf16 %v255_v9, %v255_v9 }
  0xaa   : > { %1828 = vrot.lane.b32.xlu1 %v7234_v45, %s7976_s25  ;;  %v1609_v59 = vshrl.u32 %v1299_v55, 16  ;;  %v1612_v24 = vshll.u32 %v1299_v55, 16  ;;  %v7182_v34 = vrot.slane %v824_v37, 9  ;;  %v7253_v60 = vrot.slane %v1915_v52, 9  ;;  %v8540_v4 = vld [vmem:[#allocation2 + $0x9c] sm:$0xe] }
  0xab   : > { %v1626_v62 = vrot.slane %v1625_v57, 4  ;;  %v2078_v14 = vrot.slane %v2076_v41, 4  ;;  %v584_v49 = vor.u32 %v582_v46, %v8527_v18  ;;  %v585_v53 = vrot.slane %v8527_v18, 4  ;;  %v256_v13 = vld [vmem:[%s8023_s23 + $0xf0] sm:$0xff] }
  0xac   : > { %v1611_v1 = vrot.slane %v1609_v59, 4  ;;  %v1614_v63 = vrot.slane %v1612_v24, 5  ;;  %v941_v38 = vsel %vm8049_vm7, %v7182_v34, %v940_v58  ;;  %v589_v2 = vrot.slane %v587_v47, 7  ;;  %v8578_v57 = vpop.permute.xlu1 %2170 }
  0xad   : > { %942 = vst [vmem:[#allocation2 + $0x9c] sm:$0x1] %v941_v38  ;;  %v968_v40 = vld [vmem:[#allocation2 + $0xa0] sm:$0x8]  ;;  %v776_v6 = vsel %vm8042_vm6, %v584_v49, %v775_v61  ;;  %v590_v31 = vshll.u32 %v8504_v26, 16  ;;  %v2077_v0 = vsel %vm8123_vm13, %v7253_v60, %v2076_v41  ;;  %v8557_v44 = vpack.c.bf16 %v256_v13, %v256_v13  ;;  %v257_v49 = vld [vmem:[%s8023_s23 + $0xf8] sm:$0xff] }
  0xae   : > { %2192 = vrot.lane.b32.xlu1 %v7270_v56, %s7975_s24  ;;  %v1303_v3 = vld [vmem:[#allocation2 + $0xa0] sm:$0xf]  ;;  %v1301_v17 = vld [vmem:[#allocation2 + $0x98] sm:$0x1]  ;;  %v1615_v21 = vor.u32 %v1614_v63, %v1611_v1  ;;  %v7200_v22 = vrot.slane %v968_v40, 11  ;;  %v594_v33 = vrot.slane %v589_v2, 4 }
  0xaf   : > { %v8542_v5 = vld [vmem:[#allocation2 + $0xa0] sm:$0xf]  ;;  %v1642_v12 = vshll.u32 %v1303_v3, 16  ;;  %v1646_v50 = vshrl.u32 %v1303_v3, 16  ;;  %777 = vst [vmem:[#allocation2 + $0xa8] sm:$0xf] %v776_v6  ;;  %v592_v52 = vor.u32 %v590_v31, %v589_v2 }
  0xb0   : > { %v1628_v27 = vshll.u32 %v1301_v17, 16  ;;  %v1917_v10 = vld [vmem:[#allocation2 + $0x98] sm:$0x1]  ;;  %v2083_v28 = vrot.slane %v8542_v5, 5  ;;  %v1616_v32 = vrot.slane %v1615_v21, 4  ;;  %v7254_v51 = vrot.slane %v8540_v4, 9 }
  0xb1   : > { %v1085_v35 = vld [vmem:[#allocation2 + $0xa4] sm:$0x1]  ;;  %v8551_v36 = vrot.slane %v1642_v12, 5  ;;  %v1648_v42 = vrot.slane %v1646_v50, 4  ;;  %v2079_v19 = vrot.slane %v1917_v10, 5  ;;  %v780_v46 = vsel %vm8049_vm7, %v594_v33, %v779_v23 }
  0xb2   : > { %v1630_v20 = vrot.slane %v1628_v27, 5  ;;  %v1086_v43 = vsel %vm8084_vm10, %v7200_v22, %v1085_v35  ;;  %v1621_v26 = vsel %vm8140_vm14, %v1616_v32, %v8522_v30  ;;  %v8565_v48 = vpop.permute.xlu0 %1806  ;;  %v596_v47 = vshrl.u32 %v7561_v7, 16  ;;  %781 = vst [vmem:[#allocation2 + $0xb0] sm:$0x1] %v780_v46  ;;  %v782_v38 = vld [vmem:[#allocation2 + $0xb4] sm:$0xf]  ;;  %v8606_v32 = vpop.permute.xlu1 %2172 }
  0xb3   : > { %1087 = vst [vmem:[#allocation2 + $0xa4] sm:$0x1] %v1086_v43  ;;  %v2080_v45 = vsel %vm8123_vm13, %v2078_v14, %v2079_v19  ;;  %v1649_v41 = vor.u32 %v1648_v42, %v8551_v36  ;;  %v8574_v9 = vrot.slane %v2083_v28, 4  ;;  %v593_v56 = vsel %vm8036_vm5, %v585_v53, %v592_v52  ;;  %v786_v17 = vld [vmem:[#allocation2 + $0xbc] sm:$0x1]  ;;  %v7919_v52 = vld [vmem:[#allocation2] sm:$0xff]  }
  0xb4   : > { %v1631_v18 = vsel %vm8140_vm14, %v1626_v62, %v1630_v20  ;;  %v1302_v30 = vld [vmem:[#allocation2 + $0x9c] sm:$0xf]  ;;  %v599_v55 = vshll.u32 %v7561_v7, 16  ;;  %v7271_v59 = vcombine.low %v2077_v0, %v2080_v45  ;;  %778 = vst.msk [vmem:[#allocation2 + $0xac] sm:$0xf] %vm678_vm2, %v593_v56  ;;  %v598_v61 = vrot.slane %v596_v47, 7 }
  0xb5   : > { %v7235_v54 = vcombine.low %v1621_v26, %v1631_v18  ;;  %v1633_v37 = vshrl.u32 %v1302_v30, 16  ;;  %v1636_v58 = vshll.u32 %v1302_v30, 16  ;;  %v604_v62 = vshrl.u32 %v8546_v11, 16  ;;  %v7920_v18 = vld [vmem:[#allocation2 + $0xc] sm:$0xff]   ;;  %v7923_v46 = vld [vmem:[#allocation2 + $0x24] sm:$0xff]   ;;  %v7929_v56 = vld [vmem:[#allocation2 + $0x54] sm:$0xff]  }
  0xb6   : > { %v825_v24 = vld [vmem:[#allocation2 + $0xa8] sm:$0x2]  ;;  %v943_v34 = vld [vmem:[#allocation2 + $0xa8] sm:$0x1]  ;;  %v607_v14 = vshll.u32 %v8546_v11, 16  ;;  %v8585_v63 = vrot.slane %v1649_v41, 4  ;;  %v8588_v40 = vpop.permute.xlu0 %1808  ;;  %v8592_v4 = vor.u32 %v599_v55, %v598_v61  ;;  %v8598_v50 = vpack.c.bf16 %v257_v49, %v257_v49 }
  0xb7   : > { %1830 = vrot.lane.b32.xlu0 %v7235_v54, %s7976_s25  ;;  %v7183_v60 = vrot.slane %v825_v24, 9  ;;  %v1635_v53 = vrot.slane %v1633_v37, 4  ;;  %v1638_v1 = vrot.slane %v1636_v58, 5  ;;  %v613_v2 = vshrl.u32 %v8557_v44, 16  ;;  %v8596_v11 = vld [vmem:[#allocation2 + $0xa8] sm:$0xe] }
  0xb8   : > { %v602_v6 = vrot.slane %v598_v61, 4  ;;  %v8594_v7 = vrot.slane %v604_v62, 7  ;;  %v616_v13 = vshll.u32 %v8557_v44, 16  ;;  %v8612_v42 = vsel %vm8123_vm13, %v7254_v51, %v2083_v28  ;;  %v789_v51 = vld [vmem:[#allocation2 + $0xc0] sm:$0xf]  ;;  %v7921_v41 = vld [vmem:[#allocation2 + $0x18] sm:$0xff]  }
  0xb9   : > { %v944_v3 = vsel %vm8049_vm7, %v7183_v60, %v943_v34  ;;  %v1639_v22 = vor.u32 %v1638_v1, %v1635_v53  ;;  %v8600_v23 = vrot.slane %v613_v2, 7  ;;  %v1088_v19 = vld [vmem:[#allocation2 + $0xb0] sm:$0x1]  ;;  %v783_v20 = vsel %vm8042_vm6, %v8592_v4, %v782_v38  ;;  %v7927_v54 = vld [vmem:[#allocation2 + $0x3c] sm:$0xff]   ;;  %v7928_v30 = vld [vmem:[#allocation2 + $0x48] sm:$0xff]  }
  0xba   : > { %v1304_v21 = vld [vmem:[#allocation2 + $0xa4] sm:$0x1]  ;;  %945 = vst [vmem:[#allocation2 + $0xa8] sm:$0x1] %v944_v3  ;;  %v609_v31 = vor.u32 %v607_v14, %v8594_v7  ;;  %v611_v33 = vrot.slane %v8594_v7, 4  ;;  %v7255_v43 = vrot.slane %v8596_v11, 9  ;;  %v1811_v62 = vpop.permute.xlu0 %1810 }
  0xbb   : > { %v1920_v12 = vld [vmem:[#allocation2 + $0xa4] sm:$0x1]  ;;  %v1652_v27 = vshll.u32 %v1304_v21, 16  ;;  %2194 = vrot.lane.b32.xlu0 %v7271_v59, %s7975_s24  ;;  %v1640_v35 = vrot.slane %v1639_v22, 4  ;;  %v969_v44 = vld [vmem:[#allocation2 + $0xac] sm:$0x8]  ;;  %v618_v28 = vor.u32 %v616_v13, %v8600_v23 }
  0xbc   : > { %v2086_v10 = vrot.slane %v1920_v12, 5  ;;  %v1306_v26 = vld [vmem:[#allocation2 + $0xac] sm:$0xf]  ;;  %v610_v45 = vsel %vm8036_vm5, %v602_v6, %v609_v31  ;;  %784 = vst [vmem:[#allocation2 + $0xb4] sm:$0xf] %v783_v20  ;;  %v787_v5 = vsel %vm8049_vm7, %v611_v33, %v786_v17  ;;  %v7925_v47 = vld [vmem:[#allocation2 + $0x30] sm:$0xff]  }
  0xbd   : > { %v1654_v0 = vrot.slane %v1652_v27, 5  ;;  %v7930_v55 = vld [vmem:[#allocation2 + $0x60] sm:$0xff]   ;;  %v7931_v37 = vld [vmem:[#allocation2 + $0x6c] sm:$0xff]   ;;  %v7932_v58 = vld [vmem:[#allocation2 + $0x78] sm:$0xff]   ;;  %v1645_v59 = vsel %vm8140_vm14, %v1640_v35, %v8551_v36  ;;  %v7201_v34 = vrot.slane %v969_v44, 11  ;;  %v1666_v60 = vshll.u32 %v1306_v26, 16 }
  0xbe   : > { %v8631_v24 = vsel %vm8123_vm13, %v8574_v9, %v2086_v10  ;;  %785 = vst.msk [vmem:[#allocation2 + $0xb8] sm:$0xf] %vm678_vm2, %v610_v45  ;;  %788 = vst [vmem:[#allocation2 + $0xbc] sm:$0x1] %v787_v5  ;;  %v8635_v61 = vld [vmem:[#allocation2 + $0xac] sm:$0xf] }
  0xbf   : > { %807 = vst.msk [vmem:[#allocation2 + $0xd0] sm:$0xf] %vm678_vm2, %v610_v45  ;;  %v1655_v14 = vsel %vm8140_vm14, %v8585_v63, %v1654_v0  ;;  %v1670_v36 = vshrl.u32 %v1306_v26, 16  ;;  %v619_v49 = vrot.slane %v8600_v23, 4  ;;  %v621_v9 = vshrl.u32 %v8598_v50, 16  ;;  %v7933_v53 = vld [vmem:[#allocation2 + $0x84] sm:$0xff]  }
  0xc0   : > { %v7934_v1 = vld [vmem:[#allocation2 + $0x90] sm:$0xff]   ;;  %v7935_v38 = vld [vmem:[#allocation2 + $0x9c] sm:$0xff]   ;;  %v7236_v2 = vcombine.low %v1645_v59, %v1655_v14  ;;  %v1089_v3 = vsel %vm8084_vm10, %v7201_v34, %v1088_v19  ;;  %v8644_v6 = vrot.slane %v1666_v60, 5  ;;  %v624_v17 = vshll.u32 %v8598_v50, 16  ;;  %v793_v21 = vld [vmem:[#allocation2 + $0xc8] sm:$0x1]  ;;  %v1813_v31 = vpop.permute.xlu1 %1812 }
  0xc1   : > { %v804_v22 = vld [vmem:[#allocation2 + $0xcc] sm:$0xf]  ;;  %v808_v12 = vld [vmem:[#allocation2 + $0xd4] sm:$0x1]  ;;  %v7272_v63 = vcombine.low %v8612_v42, %v8631_v24  ;;  %1090 = vst [vmem:[#allocation2 + $0xb0] sm:$0x1] %v1089_v3  ;;  %v790_v50 = vsel %vm8042_vm6, %v618_v28, %v789_v51 }
  0xc2   : > { %v1305_v23 = vld [vmem:[#allocation2 + $0xa8] sm:$0xf]  ;;  %v1672_v13 = vrot.slane %v1670_v36, 4  ;;  %v2090_v27 = vrot.slane %v8635_v61, 5  ;;  %v623_v10 = vrot.slane %v621_v9, 7  ;;  %1832 = vrot.lane.b32.xlu1 %v7236_v2, %s7976_s25  ;;  %vm1244_vm15 = vcmask 31744  }
  0xc3   : > { %v7936_v35 = vld [vmem:[#allocation2 + $0xa8] sm:$0xff]   ;;  %v1657_v19 = vshrl.u32 %v1305_v23, 16  ;;  %v1660_v20 = vshll.u32 %v1305_v23, 16  ;;  %791 = vst [vmem:[#allocation2 + $0xc0] sm:$0xf] %v790_v50  ;;  %vm1860_vm0 = vcmask 64544   ;;  %v805_v51 = vsel %vm8042_vm6, %v8592_v4, %v804_v22 }
  0xc4   : > { %v1673_v0 = vor.u32 %v1672_v13, %v8644_v6  ;;  %v626_v44 = vor.u32 %v624_v17, %v623_v10  ;;  %v628_v42 = vrot.slane %v623_v10, 4  ;;  %1245 = vst.msk [vmem:[#allocation3] sm:$0xff] %vm1244_vm15, %v7919_v52  ;;  %1246 = vst.msk [vmem:[#allocation3 + $0x8] sm:$0xff] %vm1244_vm15, %v7920_v18  ;;  %v826_v5 = vld [vmem:[#allocation2 + $0xb4] sm:$0x2]  ;;  %v809_v52 = vsel %vm8049_vm7, %v611_v33, %v808_v12  ;;  %v2175_v18 = vpop.permute.xlu0 %2174  ;;  %v2177_v7 = vpop.permute.xlu1 %2176 }
  0xc5   : > { %1247 = vst.msk [vmem:[#allocation3 + $0x10] sm:$0xff] %vm1244_vm15, %v7921_v41  ;;  %1248 = vst.msk [vmem:[#allocation3 + $0x18] sm:$0xff] %vm1244_vm15, %v7923_v46  ;;  %v1659_v26 = vrot.slane %v1657_v19, 4  ;;  %v1662_v45 = vrot.slane %v1660_v20, 5  ;;  %v946_v28 = vld [vmem:[#allocation2 + $0xb4] sm:$0x1]  ;;  %v2091_v23 = vsel %vm8123_vm13, %v7255_v43, %v2090_v27 }
  0xc6   : > { %1249 = vst.msk [vmem:[#allocation3 + $0x20] sm:$0xff] %vm1244_vm15, %v7925_v47  ;;  %1250 = vst.msk [vmem:[#allocation3 + $0x28] sm:$0xff] %vm1244_vm15, %v7927_v54  ;;  %v7184_v41 = vrot.slane %v826_v5, 9  ;;  %v970_v46 = vld [vmem:[#allocation2 + $0xb8] sm:$0x8]  ;;  %v627_v47 = vsel %vm8036_vm5, %v619_v49, %v626_v44  ;;  %v794_v54 = vsel %vm8049_vm7, %v628_v42, %v793_v21  ;;  %2196 = vrot.lane.b32.xlu1 %v7272_v63, %s7975_s24  ;;  %vm2224_vm1 = vcmask 97344  }
  0xc7   : > { %1251 = vst.msk [vmem:[#allocation3 + $0x30] sm:$0xff] %vm1244_vm15, %v7928_v30  ;;  %1252 = vst.msk [vmem:[#allocation3 + $0x38] sm:$0xff] %vm1244_vm15, %v7929_v56  ;;  %v7922_v4 = vld [vmem:[%s11493_s1] sm:$0x3f]   ;;  %v8694_v33 = vld [vmem:[%s11493_s1 + $0x8] sm:$0x3f]   ;;  %v1663_v30 = vor.u32 %v1662_v45, %v1659_v26 }
  0xc8   : > { %1253 = vst.msk [vmem:[#allocation3 + $0x40] sm:$0xff] %vm1244_vm15, %v7930_v55  ;;  %1254 = vst.msk [vmem:[#allocation3 + $0x48] sm:$0xff] %vm1244_vm15, %v7931_v37  ;;  %v7202_v56 = vrot.slane %v970_v46, 11  ;;  %v1309_v55 = vld [vmem:[#allocation2 + $0xb8] sm:$0xf]  ;;  %v947_v59 = vsel %vm8049_vm7, %v7184_v41, %v946_v28  ;;  %vm2386_vm3 = vcmask 1045504  }
  0xc9   : > { %1255 = vst.msk [vmem:[#allocation3 + $0x50] sm:$0xff] %vm1244_vm15, %v7932_v58  ;;  %1256 = vst.msk [vmem:[#allocation3 + $0x58] sm:$0xff] %vm1244_vm15, %v7933_v53  ;;  %v8697_v37 = vld [vmem:[#allocation2 + $0xb4] sm:$0xe]  ;;  %v1674_v58 = vrot.slane %v1673_v0, 4  ;;  %v1690_v24 = vshll.u32 %v1309_v55, 16  ;;  %7903 = vmatprep.subr.msk.bf16.mxu0 %vm2386_vm3, %v7922_v4  ;;  %7904 = vmatprep.subr.msk.bf16.mxu1 %vm2386_vm3, %v8694_v33 }
  0xca   : > { %1257 = vst.msk [vmem:[#allocation3 + $0x60] sm:$0xff] %vm1244_vm15, %v7934_v1  ;;  %1258 = vst.msk [vmem:[#allocation3 + $0x68] sm:$0xff] %vm1244_vm15, %v7935_v38  ;;  %v1694_v34 = vshrl.u32 %v1309_v55, 16  ;;  %v8702_v60 = vld [vmem:[#allocation2 + $0xb8] sm:$0xf]  ;;  %v1664_v14 = vrot.slane %v1663_v30, 4 }
  0xcb   : > { %1259 = vst.msk [vmem:[#allocation3 + $0x70] sm:$0xff] %vm1244_vm15, %v7936_v35  ;;  %806 = vst [vmem:[#allocation2 + $0xcc] sm:$0xf] %v805_v51  ;;  %v1923_v49 = vld [vmem:[#allocation2 + $0xb0] sm:$0x1]  ;;  %v7256_v9 = vrot.slane %v8697_v37, 9 }
  0xcc   : > { %1861 = vst.msk [vmem:[#allocation3] sm:$0xff] %vm1860_vm0, %v8565_v48  ;;  %1862 = vst.msk [vmem:[#allocation3 + $0x8] sm:$0xff] %vm1860_vm0, %v8588_v40  ;;  %v1091_v48 = vld [vmem:[#allocation2 + $0xbc] sm:$0x1]  ;;  %v2092_v40 = vrot.slane %v2090_v27, 4  ;;  %v8713_v1 = vrot.slane %v1690_v24, 5  ;;  %v1669_v21 = vsel %vm8140_vm14, %v1664_v14, %v8644_v6 }
  0xcd   : > { %1863 = vst.msk [vmem:[#allocation3 + $0x10] sm:$0xff] %vm1860_vm0, %v1811_v62  ;;  %1864 = vst.msk [vmem:[#allocation3 + $0x18] sm:$0xff] %vm1860_vm0, %v1813_v31  ;;  %v1307_v62 = vld [vmem:[#allocation2 + $0xb0] sm:$0x1]  ;;  %v1092_v36 = vsel %vm8084_vm10, %v7202_v56, %v1091_v48  ;;  %v2093_v38 = vrot.slane %v1923_v49, 5  ;;  %v2097_v2 = vrot.slane %v8702_v60, 5  ;;  %v1815_v26 = vpop.permute.xlu0 %1814 }
  0xce   : > { %810 = vst [vmem:[#allocation2 + $0xd4] sm:$0x1] %v809_v52  ;;  %792 = vst.msk [vmem:[#allocation2 + $0xc4] sm:$0xf] %vm678_vm2, %v627_v47  ;;  %v1676_v53 = vshll.u32 %v1307_v62, 16  ;;  %v2388_v13 = vsel %vm2386_vm3, %v7922_v4, 0 }
  0xcf   : > { %795 = vst [vmem:[#allocation2 + $0xc8] sm:$0x1] %v794_v54  ;;  %2225 = vst.msk [vmem:[#allocation3] sm:$0xff] %vm2224_vm1, %v8578_v57  ;;  %v1696_v57 = vrot.slane %v1694_v34, 4  ;;  %v827_v3 = vld [vmem:[#allocation2 + $0xc0] sm:$0x2]  ;;  %v2094_v19 = vsel %vm8123_vm13, %v2092_v40, %v2093_v38  ;;  %7700 = vmatpush3.bf16.msra.mxu0 %v2388_v13 }
  0xd0   : > { %2226 = vst.msk [vmem:[#allocation3 + $0x8] sm:$0xff] %vm2224_vm1, %v8606_v32  ;;  %2227 = vst.msk [vmem:[#allocation3 + $0x10] sm:$0xff] %vm2224_vm1, %v2175_v18  ;;  %v8718_v32 = vld [vmem:[%s11493_s1 + $0x10] sm:$0x3f]   ;;  %v949_v17 = vld [vmem:[#allocation2 + $0xc0] sm:$0x1]  ;;  %v7273_v40 = vcombine.low %v2091_v23, %v2094_v19 }
  0xd1   : > { %2228 = vst.msk [vmem:[#allocation3 + $0x18] sm:$0xff] %vm2224_vm1, %v2177_v7  ;;  %948 = vst [vmem:[#allocation2 + $0xb4] sm:$0x1] %v947_v59  ;;  %v1678_v22 = vrot.slane %v1676_v53, 5  ;;  %v1697_v12 = vor.u32 %v1696_v57, %v8713_v1  ;;  %v7185_v63 = vrot.slane %v827_v3, 9  ;;  %vm2337_vm4 = vcmask 97280   ;;  %7905 = vmatprep.subr.msk.bf16.mxu0 %vm2386_vm3, %v8718_v32  ;;  %v2179_v62 = vpop.permute.xlu0 %2178 }
  0xd2   : > { %1093 = vst [vmem:[#allocation2 + $0xbc] sm:$0x1] %v1092_v36  ;;  %v828_v6 = vld [vmem:[#allocation2 + $0xcc] sm:$0x2]  ;;  %v972_v10 = vld [vmem:[#allocation2 + $0xd0] sm:$0x8]  ;;  %v8759_v59 = vsel %vm8123_vm13, %v7256_v9, %v2097_v2 }
  0xd3   : > { %v1679_v31 = vsel %vm8140_vm14, %v1674_v58, %v1678_v22  ;;  %v8737_v35 = vrot.slane %v1697_v12, 4  ;;  %v950_v61 = vsel %vm8049_vm7, %v7185_v63, %v949_v17  ;;  %v8743_v0 = vld [vmem:[#allocation2 + $0xc0] sm:$0xe]  ;;  %v7186_v51 = vrot.slane %v828_v6, 9  ;;  %v1315_v18 = vld [vmem:[#allocation2 + $0xd0] sm:$0xf] }
  0xd4   : > { %v7237_v43 = vcombine.low %v1669_v21, %v1679_v31  ;;  %951 = vst [vmem:[#allocation2 + $0xc0] sm:$0x1] %v950_v61  ;;  %v7204_v52 = vrot.slane %v972_v10, 11  ;;  %1865 = vst.msk [vmem:[#allocation3 + $0x20] sm:$0xff] %vm1860_vm0, %v1815_v26  ;;  %v952_v55 = vld [vmem:[#allocation2 + $0xcc] sm:$0x1] }
  0xd5   : > { %v971_v11 = vld [vmem:[#allocation2 + $0xc4] sm:$0x8]  ;;  %v2099_v24 = vrot.slane %v2097_v2, 4  ;;  %v1097_v34 = vld [vmem:[#allocation2 + $0xd4] sm:$0x1]  ;;  %v7257_v49 = vrot.slane %v8743_v0, 9  ;;  %v953_v53 = vsel %vm8049_vm7, %v7186_v51, %v952_v55 }
  0xd6   : > { %v1094_v20 = vld [vmem:[#allocation2 + $0xc8] sm:$0x1]  ;;  %v7203_v27 = vrot.slane %v971_v11, 11  ;;  %v1312_v50 = vld [vmem:[#allocation2 + $0xc4] sm:$0xf]  ;;  %v2314_v42 = vld [vmem:[#allocation3] sm:$0xff]  ;;  %1834 = vrot.lane.b32.xlu0 %v7237_v43, %s7976_s25  ;;  %v1098_v3 = vsel %vm8084_vm10, %v7204_v52, %v1097_v34 }
  0xd7   : > { %v8745_v44 = vld [vmem:[#allocation2 + $0xc4] sm:$0xf]  ;;  %v1714_v5 = vshll.u32 %v1312_v50, 16  ;;  %v1718_v28 = vshrl.u32 %v1312_v50, 16  ;;  %7701 = vmatprep.mubr.msk.bf16.mxu0 %vm2337_vm4, %v2314_v42  ;;  %v8765_v57 = vld [vmem:[#allocation2 + $0xd0] sm:$0xf] }
  0xd8   : > { %v1308_v45 = vld [vmem:[#allocation2 + $0xb4] sm:$0xf]  ;;  %v1095_v54 = vsel %vm8084_vm10, %v7203_v27, %v1094_v20  ;;  %v2104_v56 = vrot.slane %v8745_v44, 5  ;;  %v2315_v60 = vld [vmem:[#allocation3 + $0x8] sm:$0xff]  ;;  %2229 = vst.msk [vmem:[#allocation3 + $0x20] sm:$0xff] %vm2224_vm1, %v2179_v62  ;;  %v8770_v9 = vld [vmem:[#allocation3 + $0x10] sm:$0xff] }
  0xd9   : > { %v1310_v41 = vld [vmem:[#allocation2 + $0xbc] sm:$0x1]  ;;  %v1681_v46 = vshrl.u32 %v1308_v45, 16  ;;  %v1684_v48 = vshll.u32 %v1308_v45, 16  ;;  %1096 = vst [vmem:[#allocation2 + $0xc8] sm:$0x1] %v1095_v54  ;;  %7702 = vmatmul.mubr.msk.bf16.vlgmr.msra.gmra.mrb[0].mxu0 %vm2337_vm4, %v2315_v60  ;;  %7735 = vmatprep.mubr.msk.bf16.mxu1 %vm2337_vm4, %v2315_v60 }
  0xda   : > { %v1926_v47 = vld [vmem:[#allocation2 + $0xbc] sm:$0x1]  ;;  %v1700_v4 = vshll.u32 %v1310_v41, 16  ;;  %v8754_v7 = vrot.slane %v1714_v5, 5  ;;  %v1720_v30 = vrot.slane %v1718_v28, 4  ;;  %2198 = vrot.lane.b32.xlu0 %v7273_v40, %s7975_s24  ;;  %v1738_v17 = vshll.u32 %v1315_v18, 16  ;;  %7705 = vmatprep.mubr.msk.bf16.mxu0 %vm2337_vm4, %v8770_v9 }
  0xdb   : > { %v1683_v37 = vrot.slane %v1681_v46, 4  ;;  %v1686_v58 = vrot.slane %v1684_v48, 5  ;;  %v2100_v2 = vrot.slane %v1926_v47, 5  ;;  %954 = vst [vmem:[#allocation2 + $0xcc] sm:$0x1] %v953_v53  ;;  %v2106_v63 = vrot.slane %v2104_v56, 4 }
  0xdc   : > { %v1702_v14 = vrot.slane %v1700_v4, 5  ;;  %v1721_v36 = vor.u32 %v1720_v30, %v8754_v7  ;;  %v1311_v22 = vld [vmem:[#allocation2 + $0xc0] sm:$0xf]  ;;  %1099 = vst [vmem:[#allocation2 + $0xd4] sm:$0x1] %v1098_v3  ;;  %v1742_v23 = vshrl.u32 %v1315_v18, 16  ;;  %v2105_v40 = vsel %vm8123_vm13, %v7257_v49, %v2104_v56  ;;  %v1817_v4 = vpop.permute.xlu1 %1816 }
  0xdd   : > { %v1687_v38 = vor.u32 %v1686_v58, %v1683_v37  ;;  %v1930_v13 = vld [vmem:[#allocation2 + $0xcc] sm:$0xe]  ;;  %v7937_v6 = vld [vmem:[#allocation2 + $0xb4] sm:$0xff]   ;;  %v1705_v31 = vshrl.u32 %v1311_v22, 16  ;;  %v1708_v19 = vshll.u32 %v1311_v22, 16  ;;  %v8782_v61 = vrot.slane %v1738_v17, 5 }
  0xde   : > { %v1703_v21 = vsel %vm8140_vm14, %v8737_v35, %v1702_v14  ;;  %v1722_v12 = vrot.slane %v1721_v36, 4  ;;  %v1744_v11 = vrot.slane %v1742_v23, 4  ;;  %v2111_v20 = vrot.slane %v8765_v57, 5  ;;  %1260 = vst.msk [vmem:[#allocation3 + $0x78] sm:$0xff] %vm1244_vm15, %v7937_v6  ;;  %v8796_v51 = vld [vmem:[#allocation3 + $0x18] sm:$0xff]  ;;  %v7938_v52 = vld [vmem:[#allocation2 + $0xc0] sm:$0xff]  }
  0xdf   : > { %v1688_v10 = vrot.slane %v1687_v38, 4  ;;  %v3052_v35 = vsel %vm2386_vm3, %v8718_v32, 0  ;;  %v2720_v43 = vsel %vm2386_vm3, %v8694_v33, 0  ;;  %v2101_v50 = vsel %vm8123_vm13, %v2099_v24, %v2100_v2  ;;  %1261 = vst.msk [vmem:[#allocation3 + $0x80] sm:$0xff] %vm1244_vm15, %v7938_v52 }
  0xe0   : > { %v1313_v0 = vld [vmem:[#allocation2 + $0xc8] sm:$0x1]  ;;  %v1707_v42 = vrot.slane %v1705_v31, 4  ;;  %v1710_v26 = vrot.slane %v1708_v19, 5  ;;  %7768 = vmatpush3.bf16.msra.mxu0 %v3052_v35  ;;  %7734 = vmatpush3.bf16.msra.mxu1 %v2720_v43  ;;  %v1745_v33 = vor.u32 %v1744_v11, %v8782_v61  ;;  %v7258_v41 = vrot.slane %v1930_v13, 9  ;;  %1866 = vst.msk [vmem:[#allocation3 + $0x28] sm:$0xff] %vm1860_vm0, %v1817_v4  ;;  %v2181_v38 = vpop.permute.xlu1 %2180 }
  0xe1   : > { %v1693_v27 = vsel %vm8140_vm14, %v1688_v10, %v8713_v1  ;;  %v1929_v45 = vld [vmem:[#allocation2 + $0xc8] sm:$0x1]  ;;  %v1724_v32 = vshll.u32 %v1313_v0, 16  ;;  %v8798_v1 = vld [vmem:[#allocation3 + $0x20] sm:$0xff]  ;;  %v7274_v46 = vcombine.low %v8759_v59, %v2101_v50  ;;  %v2113_v54 = vrot.slane %v2111_v20, 4  ;;  %7706 = vmatmul.mubr.msk.bf16.gmra.mrb[4].mxu0 %vm2337_vm4, %v8796_v51  ;;  %2230 = vst.msk [vmem:[#allocation3 + $0x28] sm:$0xff] %vm2224_vm1, %v2181_v38 }
  0xe2   : > { %v7238_v5 = vcombine.low %v1693_v27, %v1703_v21  ;;  %v2107_v28 = vrot.slane %v1929_v45, 5  ;;  %v1711_v18 = vor.u32 %v1710_v26, %v1707_v42  ;;  %v1314_v47 = vld [vmem:[#allocation2 + $0xcc] sm:$0xf]  ;;  %v1746_v56 = vrot.slane %v1745_v33, 4  ;;  %7709 = vmatprep.mubr.msk.bf16.mxu0 %vm2337_vm4, %v8798_v1  ;;  %v7277_v45 = vld [vmem:[%s11494_s2] ss:$0 sm:$0xff] }
  0xe3   : > { %v1726_v48 = vrot.slane %v1724_v32, 5  ;;  %7736 = vmatmul.mubr.msk.bf16.vlgmr.msra.gmra.mrb[0].mxu1 %vm2337_vm4, %v8770_v9  ;;  %v1316_v37 = vld [vmem:[#allocation2 + $0xd4] sm:$0x1]  ;;  %v1729_v58 = vshrl.u32 %v1314_v47, 16  ;;  %v1732_v59 = vshll.u32 %v1314_v47, 16  ;;  %v2112_v3 = vsel %vm8123_vm13, %v7258_v41, %v2111_v20  ;;  %v7939_v50 = vld [vmem:[#allocation2 + $0xcc] sm:$0xff]  }
  0xe4   : > { %1836 = vrot.lane.b32.xlu1 %v7238_v5, %s7976_s25  ;;  %v1712_v30 = vrot.slane %v1711_v18, 4  ;;  %v2108_v55 = vsel %vm8123_vm13, %v2106_v63, %v2107_v28  ;;  %7739 = vmatprep.mubr.msk.bf16.mxu1 %vm2337_vm4, %v8796_v51  ;;  %v1748_v24 = vshll.u32 %v1316_v37, 16  ;;  %v1932_v34 = vld [vmem:[#allocation2 + $0xd4] sm:$0x1]  ;;  %1262 = vst.msk [vmem:[#allocation3 + $0x88] sm:$0xff] %vm1244_vm15, %v7939_v50  ;;  %2252 = vst.msk [vmem:[#allocation4 + $0x10] sm:$0xff] %vm1244_vm15, %v7277_v45 }
  0xe5   : > { %v1727_v44 = vsel %vm8140_vm14, %v1722_v12, %v1726_v48  ;;  %v1731_v62 = vrot.slane %v1729_v58, 4  ;;  %v1734_v14 = vrot.slane %v1732_v59, 5  ;;  %v2114_v36 = vrot.slane %v1932_v34, 5  ;;  %2250 = vst.msk [vmem:[#allocation4] sm:$0xff] %vm1244_vm15, %v7277_v45  ;;  %2251 = vst.msk [vmem:[#allocation4 + $0x8] sm:$0xff] %vm1244_vm15, %v7277_v45 }
  0xe6   : > { %v1717_v60 = vsel %vm8140_vm14, %v1712_v30, %v8754_v7  ;;  %v7275_v53 = vcombine.low %v2105_v40, %v2108_v55  ;;  %v1750_v57 = vrot.slane %v1748_v24, 5  ;;  %v1819_v23 = vpop.permute.xlu0 %1818  ;;  %2253 = vst.msk [vmem:[#allocation4 + $0x18] sm:$0xff] %vm1244_vm15, %v7277_v45  ;;  %2254 = vst.msk [vmem:[#allocation4 + $0x20] sm:$0xff] %vm1244_vm15, %v7277_v45 }
  0xe7   : > { %v7239_v49 = vcombine.low %v1717_v60, %v1727_v44  ;;  %v1735_v2 = vor.u32 %v1734_v14, %v1731_v62  ;;  %v2115_v17 = vsel %vm8123_vm13, %v2113_v54, %v2114_v36  ;;  %1867 = vst.msk [vmem:[#allocation3 + $0x30] sm:$0xff] %vm1860_vm0, %v1819_v23 }
  0xe8   : > { %2200 = vrot.lane.b32.xlu1 %v7274_v46, %s7975_s24  ;;  %v1751_v21 = vsel %vm8140_vm14, %v1746_v56, %v1750_v57  ;;  %v7276_v22 = vcombine.low %v2112_v3, %v2115_v17  ;;  %v8840_v13 = vld [vmem:[#allocation3 + $0x28] sm:$0xff]  ;;  %2255 = vst.msk [vmem:[#allocation4 + $0x28] sm:$0xff] %vm1244_vm15, %v7277_v45  ;;  %2256 = vst.msk [vmem:[#allocation4 + $0x30] sm:$0xff] %vm1244_vm15, %v7277_v45 }
  0xe9   : > { %1838 = vrot.lane.b32.xlu0 %v7239_v49, %s7976_s25  ;;  %v1736_v7 = vrot.slane %v1735_v2, 4  ;;  %7710 = vmatmul.mubr.msk.bf16.gmra.mrb[8].mxu0 %vm2337_vm4, %v8840_v13  ;;  %2257 = vst.msk [vmem:[#allocation4 + $0x38] sm:$0xff] %vm1244_vm15, %v7277_v45  ;;  %2258 = vst.msk [vmem:[#allocation4 + $0x40] sm:$0xff] %vm1244_vm15, %v7277_v45 }
  0xea   : > { %v2183_v6 = vpop.permute.xlu0 %2182  ;;  %2259 = vst.msk [vmem:[#allocation4 + $0x48] sm:$0xff] %vm1244_vm15, %v7277_v45  ;;  %2260 = vst.msk [vmem:[#allocation4 + $0x50] sm:$0xff] %vm1244_vm15, %v7277_v45 }
  0xeb   : > { %7740 = vmatmul.mubr.msk.bf16.gmra.mrb[4].mxu1 %vm2337_vm4, %v8798_v1  ;;  %v1741_v12 = vsel %vm8140_vm14, %v1736_v7, %v8782_v61  ;;  %2231 = vst.msk [vmem:[#allocation3 + $0x30] sm:$0xff] %vm2224_vm1, %v2183_v6 }
  0xec   : > { %2202 = vrot.lane.b32.xlu1 %v7275_v53, %s7975_s24  ;;  %v7240_v63 = vcombine.low %v1741_v12, %v1751_v21  ;;  %7743 = vmatprep.mubr.msk.bf16.mxu1 %vm2337_vm4, %v8840_v13  ;;  %2261 = vst.msk [vmem:[#allocation4 + $0x58] sm:$0xff] %vm1244_vm15, %v7277_v45  ;;  %2262 = vst.msk [vmem:[#allocation4 + $0x60] sm:$0xff] %vm1244_vm15, %v7277_v45  ;;  %v2283_v36 = vld [vmem:[#allocation4 + $0x8] sm:$0xff] }
  0xed   : > { %2263 = vst.msk [vmem:[#allocation4 + $0x68] sm:$0xff] %vm1244_vm15, %v7277_v45  ;;  %2264 = vst.msk [vmem:[#allocation4 + $0x70] sm:$0xff] %vm1244_vm15, %v7277_v45  ;;  %v2285_v60 = vld [vmem:[#allocation4 + $0x18] sm:$0xff]  ;;  %v2286_v7 = vld [vmem:[#allocation4 + $0x20] sm:$0xff] }
  0xee   : > { %1840 = vrot.lane.b32.xlu0 %v7240_v63, %s7976_s25  ;;  %2265 = vst.msk [vmem:[#allocation4 + $0x78] sm:$0xff] %vm1244_vm15, %v7277_v45  ;;  %2266 = vst.msk [vmem:[#allocation4 + $0x80] sm:$0xff] %vm1244_vm15, %v7277_v45 }
  0xef   : > { %2267 = vst.msk [vmem:[#allocation4 + $0x88] sm:$0xff] %vm1244_vm15, %v7277_v45  ;;  %2268 = vst.msk [vmem:[#allocation4 + $0x90] sm:$0xff] %vm1244_vm15, %v7277_v45  ;;  %v2288_v3 = vld [vmem:[#allocation4 + $0x30] sm:$0xff] }
  0xf0   : > { %2204 = vrot.lane.b32.xlu1 %v7276_v22, %s7975_s24  ;;  %v1821_v10 = vpop.permute.xlu1 %1820  ;;  %2269 = vst.msk [vmem:[#allocation4 + $0x98] sm:$0xff] %vm1244_vm15, %v7277_v45  ;;  %2270 = vst.msk [vmem:[#allocation4 + $0xa0] sm:$0xff] %vm1244_vm15, %v7277_v45  ;;  %v2289_v12 = vld [vmem:[#allocation4 + $0x38] sm:$0xff] }
  0xf1   : > { %1868 = vst.msk [vmem:[#allocation3 + $0x38] sm:$0xff] %vm1860_vm0, %v1821_v10  ;;  %v2287_v10 = vld [vmem:[#allocation4 + $0x28] sm:$0xff] }
  0xf2   : > { %v8849_v31 = vld [vmem:[#allocation3 + $0x30] sm:$0xff]  ;;  %2271 = vst.msk [vmem:[#allocation4 + $0xa8] sm:$0xff] %vm1244_vm15, %v7277_v45  ;;  %2272 = vst.msk [vmem:[#allocation4 + $0xb0] sm:$0xff] %vm1244_vm15, %v7277_v45 }
  0xf3   : > { %7713 = vmatprep.mubr.msk.bf16.mxu0 %vm2337_vm4, %v8849_v31  ;;  %7744 = vmatmul.mubr.msk.bf16.gmra.mrb[8].mxu1 %vm2337_vm4, %v8849_v31  ;;  %2273 = vst.msk [vmem:[#allocation4 + $0xb8] sm:$0xff] %vm1244_vm15, %v7277_v45  ;;  %2274 = vst.msk [vmem:[#allocation4 + $0xc0] sm:$0xff] %vm1244_vm15, %v7277_v45 }
  0xf4   : > { %v2185_v19 = vpop.permute.xlu1 %2184  ;;  %2275 = vst.msk [vmem:[#allocation4 + $0xc8] sm:$0xff] %vm1244_vm15, %v7277_v45  ;;  %2276 = vst.msk [vmem:[#allocation4 + $0xd0] sm:$0xff] %vm1244_vm15, %v7277_v45 }
  0xf5   : > { %2232 = vst.msk [vmem:[#allocation3 + $0x38] sm:$0xff] %vm2224_vm1, %v2185_v19 }
  0xf6   : > { %2277 = vst.msk [vmem:[#allocation4 + $0xd8] sm:$0xff] %vm1244_vm15, %v7277_v45  ;;  %2278 = vst.msk [vmem:[#allocation4 + $0xe0] sm:$0xff] %vm1244_vm15, %v7277_v45 }
  0xf7   : > { %2279 = vst.msk [vmem:[#allocation4 + $0xe8] sm:$0xff] %vm1244_vm15, %v7277_v45  ;;  %2280 = vst.msk [vmem:[#allocation4 + $0xf0] sm:$0xff] %vm1244_vm15, %v7277_v45 }
  0xf8   : > { %2281 = vst.msk [vmem:[#allocation4 + $0xf8] sm:$0xff] %vm1244_vm15, %v7277_v45 }
  0xfc   : > { %v1823_v61 = vpop.permute.xlu0 %1822  ;;  %v8856_v11 = vld [vmem:[#allocation3 + $0x38] sm:$0xff] }
  0xfd   : > { %1869 = vst.msk [vmem:[#allocation3 + $0x40] sm:$0xff] %vm1860_vm0, %v1823_v61  ;;  %7714 = vmatmul.mubr.msk.bf16.gmra.mrb[12].mxu0 %vm2337_vm4, %v8856_v11  ;;  %7747 = vmatprep.mubr.msk.bf16.mxu1 %vm2337_vm4, %v8856_v11 }
 0x100   : > { %v2187_v20 = vpop.permute.xlu0 %2186 }
 0x101   : > { %2233 = vst.msk [vmem:[#allocation3 + $0x40] sm:$0xff] %vm2224_vm1, %v2187_v20 }
 0x106   : > { %v1825_v35 = vpop.permute.xlu1 %1824 }
 0x107   : > { %1870 = vst.msk [vmem:[#allocation3 + $0x48] sm:$0xff] %vm1860_vm0, %v1825_v35 }
 0x108   : > { %v8865_v43 = vld [vmem:[#allocation3 + $0x40] sm:$0xff] }
 0x109   : > { %7717 = vmatprep.mubr.msk.bf16.mxu0 %vm2337_vm4, %v8865_v43  ;;  %7748 = vmatmul.mubr.msk.bf16.gmra.mrb[12].mxu1 %vm2337_vm4, %v8865_v43 }
 0x10a   : > { %v2189_v27 = vpop.permute.xlu1 %2188 }
 0x10b   : > { %2234 = vst.msk [vmem:[#allocation3 + $0x48] sm:$0xff] %vm2224_vm1, %v2189_v27 }
 0x112   : > { %v8873_v0 = vld [vmem:[#allocation3 + $0x48] sm:$0xff] }
 0x113   : > { %v1827_v42 = vpop.permute.xlu0 %1826  ;;  %7718 = vmatmul.mubr.msk.bf16.gmra.mrb[16].mxu0 %vm2337_vm4, %v8873_v0  ;;  %7751 = vmatprep.mubr.msk.bf16.mxu1 %vm2337_vm4, %v8873_v0 }
 0x114   : > { %1871 = vst.msk [vmem:[#allocation3 + $0x50] sm:$0xff] %vm1860_vm0, %v1827_v42 }
 0x117   : > { %v2191_v26 = vpop.permute.xlu0 %2190 }
 0x118   : > { %2235 = vst.msk [vmem:[#allocation3 + $0x50] sm:$0xff] %vm2224_vm1, %v2191_v26 }
 0x11c   : > { %v1829_v5 = vpop.permute.xlu1 %1828 }
 0x11d   : > { %1872 = vst.msk [vmem:[#allocation3 + $0x58] sm:$0xff] %vm1860_vm0, %v1829_v5 }
 0x11f   : > { %v2324_v28 = vld [vmem:[#allocation3 + $0x50] sm:$0xff] }
 0x120   : > { %v2193_v32 = vpop.permute.xlu1 %2192  ;;  %7721 = vmatprep.mubr.msk.bf16.mxu0 %vm2337_vm4, %v2324_v28  ;;  %7752 = vmatmul.mubr.msk.bf16.gmra.mrb[16].mxu1 %vm2337_vm4, %v2324_v28 }
 0x121   : > { %2236 = vst.msk [vmem:[#allocation3 + $0x58] sm:$0xff] %vm2224_vm1, %v2193_v32 }
 0x128   : > { %v2325_v33 = vld [vmem:[#allocation3 + $0x58] sm:$0xff] }
 0x129   : > { %v1831_v52 = vpop.permute.xlu0 %1830  ;;  %7722 = vmatmul.mubr.msk.bf16.gmra.mrb[20].mxu0 %vm2337_vm4, %v2325_v33  ;;  %7755 = vmatprep.mubr.msk.bf16.mxu1 %vm2337_vm4, %v2325_v33 }
 0x12a   : > { %1873 = vst.msk [vmem:[#allocation3 + $0x60] sm:$0xff] %vm1860_vm0, %v1831_v52  ;;  %v2292_v52 = vld [vmem:[#allocation4 + $0x50] sm:$0xff] }
 0x12d   : > { %v2195_v18 = vpop.permute.xlu0 %2194 }
 0x12e   : > { %2237 = vst.msk [vmem:[#allocation3 + $0x60] sm:$0xff] %vm2224_vm1, %v2195_v18 }
 0x134   : > { %v1833_v41 = vpop.permute.xlu1 %1832 }
 0x135   : > { %1874 = vst.msk [vmem:[#allocation3 + $0x68] sm:$0xff] %vm1860_vm0, %v1833_v41  ;;  %v2326_v46 = vld [vmem:[#allocation3 + $0x60] sm:$0xff] }
 0x136   : > { %7725 = vmatprep.mubr.msk.bf16.mxu0 %vm2337_vm4, %v2326_v46  ;;  %7756 = vmatmul.mubr.msk.bf16.gmra.mrb[20].mxu1 %vm2337_vm4, %v2326_v46 }
 0x138   : > { %v2197_v48 = vpop.permute.xlu1 %2196 }
 0x139   : > { %2238 = vst.msk [vmem:[#allocation3 + $0x68] sm:$0xff] %vm2224_vm1, %v2197_v48  ;;  %v2290_v48 = vld [vmem:[#allocation4 + $0x40] sm:$0xff] }
 0x140   : > { %v2327_v40 = vld [vmem:[#allocation3 + $0x68] sm:$0xff] }
 0x141   : > { %7726 = vmatmul.mubr.msk.bf16.gmra.mrb[24].mxu0 %vm2337_vm4, %v2327_v40  ;;  %7759 = vmatprep.mubr.msk.bf16.mxu1 %vm2337_vm4, %v2327_v40 }
 0x148   : > { %v1835_v47 = vpop.permute.xlu0 %1834 }
 0x149   : > { %1875 = vst.msk [vmem:[#allocation3 + $0x70] sm:$0xff] %vm1860_vm0, %v1835_v47 }
 0x14c   : > { %v2199_v54 = vpop.permute.xlu0 %2198 }
 0x14d   : > { %2239 = vst.msk [vmem:[#allocation3 + $0x70] sm:$0xff] %vm2224_vm1, %v2199_v54 }
 0x154   : > { %v2328_v30 = vld [vmem:[#allocation3 + $0x70] sm:$0xff] }
 0x155   : > { %7729 = vmatprep.mubr.msk.bf16.mxu0 %vm2337_vm4, %v2328_v30  ;;  %7760 = vmatmul.mubr.msk.bf16.gmra.mrb[24].mxu1 %vm2337_vm4, %v2328_v30 }
 0x156   : > { %v1837_v4 = vpop.permute.xlu1 %1836 }
 0x157   : > { %1876 = vst.msk [vmem:[#allocation3 + $0x78] sm:$0xff] %vm1860_vm0, %v1837_v4  ;;  %v2293_v4 = vld [vmem:[#allocation4 + $0x58] sm:$0xff] }
 0x15a   : > { %v2201_v55 = vpop.permute.xlu1 %2200 }
 0x15b   : > { %2240 = vst.msk [vmem:[#allocation3 + $0x78] sm:$0xff] %vm2224_vm1, %v2201_v55  ;;  %v1839_v37 = vpop.permute.xlu0 %1838 }
 0x15c   : > { %1877 = vst.msk [vmem:[#allocation3 + $0x80] sm:$0xff] %vm1860_vm0, %v1839_v37 }
 0x15e   : > { %v2203_v58 = vpop.permute.xlu1 %2202 }
 0x15f   : > { %2241 = vst.msk [vmem:[#allocation3 + $0x80] sm:$0xff] %vm2224_vm1, %v2203_v58 }
 0x160   : > { %v1841_v44 = vpop.permute.xlu0 %1840 }
 0x161   : > { %1878 = vst.msk [vmem:[#allocation3 + $0x88] sm:$0xff] %vm1860_vm0, %v1841_v44 }
 0x162   : > { %v2329_v59 = vld [vmem:[#allocation3 + $0x78] sm:$0xff]  ;;  %v2205_v56 = vpop.permute.xlu1 %2204 }
 0x163   : > { %7730 = vmatmul.mubr.msk.bf16.gmra.mrb[28].mxu0 %vm2337_vm4, %v2329_v59  ;;  %7763 = vmatprep.mubr.msk.bf16.mxu1 %vm2337_vm4, %v2329_v59  ;;  %2242 = vst.msk [vmem:[#allocation3 + $0x88] sm:$0xff] %vm2224_vm1, %v2205_v56 }
 0x164   : > { %7769 = vmatprep.mubr.msk.bf16.mxu0 %vm2337_vm4, %v8770_v9 }
 0x166   : > { %v2662_v24 = vld [vmem:[#allocation3 + $0x80] sm:$0xff] }
 0x167   : > { %7764 = vmatmul.mubr.msk.bf16.gmra.mrb[28].mxu1 %vm2337_vm4, %v2662_v24 }
 0x16a   : > { %v2994_v9 = vld [vmem:[#allocation3 + $0x88] sm:$0xff] }
 0x16b   : > { %7770 = vmatmul.mubr.msk.bf16.vlgmr.msra.gmra.mrb[32].mxu0 %vm2337_vm4, %v8796_v51  ;;  %v2284_v51 = vld [vmem:[#allocation4 + $0x10] sm:$0xff] }
 0x16c   : > { %7773 = vmatprep.mubr.msk.bf16.mxu0 %vm2337_vm4, %v8798_v1  ;;  %v2282_v1 = vld [vmem:[#allocation4] sm:$0xff] }
 0x173   : > { %7774 = vmatmul.mubr.msk.bf16.gmra.mrb[36].mxu0 %vm2337_vm4, %v8840_v13 }
 0x174   : > { %7777 = vmatprep.mubr.msk.bf16.mxu0 %vm2337_vm4, %v8849_v31 }
 0x17b   : > { %7778 = vmatmul.mubr.msk.bf16.gmra.mrb[40].mxu0 %vm2337_vm4, %v8856_v11 }
 0x17c   : > { %7781 = vmatprep.mubr.msk.bf16.mxu0 %vm2337_vm4, %v8865_v43 }
 0x183   : > { %7782 = vmatmul.mubr.msk.bf16.gmra.mrb[44].mxu0 %vm2337_vm4, %v8873_v0 }
 0x184   : > { %7785 = vmatprep.mubr.msk.bf16.mxu0 %vm2337_vm4, %v2324_v28 }
 0x18b   : > { %7786 = vmatmul.mubr.msk.bf16.gmra.mrb[48].mxu0 %vm2337_vm4, %v2325_v33 }
 0x18c   : > { %7789 = vmatprep.mubr.msk.bf16.mxu0 %vm2337_vm4, %v2326_v46 }
 0x193   : > { %7790 = vmatmul.mubr.msk.bf16.gmra.mrb[52].mxu0 %vm2337_vm4, %v2327_v40 }
 0x194   : > { %7793 = vmatprep.mubr.msk.bf16.mxu0 %vm2337_vm4, %v2328_v30 }
 0x19b   : > { %7794 = vmatmul.mubr.msk.bf16.gmra.mrb[56].mxu0 %vm2337_vm4, %v2329_v59  ;;  %v2291_v59 = vld [vmem:[#allocation4 + $0x48] sm:$0xff] }
 0x19c   : > { %7797 = vmatprep.mubr.msk.bf16.mxu0 %vm2337_vm4, %v2662_v24 }
 0x1a3   : > { %7798 = vmatmul.mubr.msk.bf16.gmra.mrb[60].mxu0 %vm2337_vm4, %v2994_v9 }
 0x1ac   : > { %v7703_v34 = vpop.f32.mrb[0].mxu0 }
 0x1ad   : > { %v2553_v62 = vadd.f32 %v7703_v34, %v2284_v51  ;;  %v2424_v14 = vpop.f32.mrb[1].mxu0 }
 0x1ae   : > { %v2551_v49 = vadd.f32 %v2424_v14, %v2282_v1  ;;  %v7704_v53 = vpop.f32.mrb[2].mxu0 }
 0x1af   : > { %2585 = vst.msk [vmem:[#allocation4 + $0x10] sm:$0xff] %vm1244_vm15, %v2553_v62  ;;  %v2554_v57 = vadd.f32 %v7704_v53, %v2285_v60  ;;  %v2427_v38 = vpop.f32.mrb[3].mxu0 }
 0x1b0   : > { %2583 = vst.msk [vmem:[#allocation4] sm:$0xff] %vm1244_vm15, %v2551_v49  ;;  %v2552_v2 = vadd.f32 %v2427_v38, %v2283_v36 }
 0x1b1   : > { %2586 = vst.msk [vmem:[#allocation4 + $0x18] sm:$0xff] %vm1244_vm15, %v2554_v57 }
 0x1b2   : > { %2584 = vst.msk [vmem:[#allocation4 + $0x8] sm:$0xff] %vm1244_vm15, %v2552_v2 }
 0x1b4   : > { %v7707_v21 = vpop.f32.mrb[4].mxu0 }
 0x1b5   : > { %v2557_v23 = vadd.f32 %v7707_v21, %v2288_v3  ;;  %v2440_v13 = vpop.f32.mrb[5].mxu0  ;;  %v2294_v21 = vld [vmem:[#allocation4 + $0x60] sm:$0xff] }
 0x1b6   : > { %v7737_v17 = vpop.f32.mrb[0].mxu1  ;;  %v2617_v63 = vld [vmem:[#allocation4 + $0x10] sm:$0xff]  ;;  %v2555_v61 = vadd.f32 %v2440_v13, %v2286_v7  ;;  %v7708_v11 = vpop.f32.mrb[6].mxu0  ;;  %v2295_v13 = vld [vmem:[#allocation4 + $0x68] sm:$0xff] }
 0x1b7   : > { %v2756_v22 = vpop.f32.mrb[1].mxu1  ;;  %v2885_v31 = vadd.f32 %v7737_v17, %v2617_v63  ;;  %v2615_v19 = vld [vmem:[#allocation4] sm:$0xff]  ;;  %2589 = vst.msk [vmem:[#allocation4 + $0x30] sm:$0xff] %vm1244_vm15, %v2557_v23  ;;  %v2558_v27 = vadd.f32 %v7708_v11, %v2289_v12  ;;  %v2443_v50 = vpop.f32.mrb[7].mxu0  ;;  %v2296_v7 = vld [vmem:[#allocation4 + $0x70] sm:$0xff]  ;;  %v2297_v12 = vld [vmem:[#allocation4 + $0x78] sm:$0xff] }
 0x1b8   : > { %v7738_v6 = vpop.f32.mrb[2].mxu1  ;;  %v2883_v35 = vadd.f32 %v2756_v22, %v2615_v19  ;;  %v2618_v43 = vld [vmem:[#allocation4 + $0x18] sm:$0xff]  ;;  %2587 = vst.msk [vmem:[#allocation4 + $0x20] sm:$0xff] %vm1244_vm15, %v2555_v61  ;;  %v2556_v26 = vadd.f32 %v2443_v50, %v2287_v10 }
 0x1b9   : > { %v2759_v20 = vpop.f32.mrb[3].mxu1  ;;  %2917 = vst.msk [vmem:[#allocation4 + $0x10] sm:$0xff] %vm1244_vm15, %v2885_v31  ;;  %v2886_v0 = vadd.f32 %v7738_v6, %v2618_v43  ;;  %v2616_v42 = vld [vmem:[#allocation4 + $0x8] sm:$0xff]  ;;  %2590 = vst.msk [vmem:[#allocation4 + $0x38] sm:$0xff] %vm1244_vm15, %v2558_v27 }
 0x1ba   : > { %2915 = vst.msk [vmem:[#allocation4] sm:$0xff] %vm1244_vm15, %v2883_v35  ;;  %v2884_v45 = vadd.f32 %v2759_v20, %v2616_v42  ;;  %2588 = vst.msk [vmem:[#allocation4 + $0x28] sm:$0xff] %vm1244_vm15, %v2556_v26 }
 0x1bb   : > { %2918 = vst.msk [vmem:[#allocation4 + $0x18] sm:$0xff] %vm1244_vm15, %v2886_v0 }
 0x1bc   : > { %2916 = vst.msk [vmem:[#allocation4 + $0x8] sm:$0xff] %vm1244_vm15, %v2884_v45  ;;  %v7711_v40 = vpop.f32.mrb[8].mxu0 }
 0x1bd   : > { %v2561_v30 = vadd.f32 %v7711_v40, %v2292_v52  ;;  %v2456_v55 = vpop.f32.mrb[9].mxu0 }
 0x1be   : > { %v7741_v5 = vpop.f32.mrb[4].mxu1  ;;  %v2621_v33 = vld [vmem:[#allocation4 + $0x30] sm:$0xff]  ;;  %v2559_v44 = vadd.f32 %v2456_v55, %v2290_v48  ;;  %v7712_v56 = vpop.f32.mrb[10].mxu0  ;;  %v2299_v48 = vld [vmem:[#allocation4 + $0x88] sm:$0xff] }
 0x1bf   : > { %v2772_v32 = vpop.f32.mrb[5].mxu1  ;;  %v2889_v41 = vadd.f32 %v7741_v5, %v2621_v33  ;;  %v2619_v46 = vld [vmem:[#allocation4 + $0x20] sm:$0xff]  ;;  %2593 = vst.msk [vmem:[#allocation4 + $0x50] sm:$0xff] %vm1244_vm15, %v2561_v30  ;;  %v2562_v9 = vadd.f32 %v7712_v56, %v2293_v4  ;;  %v2459_v51 = vpop.f32.mrb[11].mxu0 }
 0x1c0   : > { %v7742_v28 = vpop.f32.mrb[6].mxu1  ;;  %v2887_v47 = vadd.f32 %v2772_v32, %v2619_v46  ;;  %v2622_v54 = vld [vmem:[#allocation4 + $0x38] sm:$0xff]  ;;  %2591 = vst.msk [vmem:[#allocation4 + $0x40] sm:$0xff] %vm1244_vm15, %v2559_v44  ;;  %v2560_v1 = vadd.f32 %v2459_v51, %v2291_v59  ;;  %v2298_v33 = vld [vmem:[#allocation4 + $0x80] sm:$0xff] }
 0x1c1   : > { %v2775_v18 = vpop.f32.mrb[7].mxu1  ;;  %2921 = vst.msk [vmem:[#allocation4 + $0x30] sm:$0xff] %vm1244_vm15, %v2889_v41  ;;  %v2890_v37 = vadd.f32 %v7742_v28, %v2622_v54  ;;  %v2620_v58 = vld [vmem:[#allocation4 + $0x28] sm:$0xff]  ;;  %2594 = vst.msk [vmem:[#allocation4 + $0x58] sm:$0xff] %vm1244_vm15, %v2562_v9  ;;  %v2300_v28 = vld [vmem:[#allocation4 + $0x90] sm:$0xff] }
 0x1c2   : > { %2919 = vst.msk [vmem:[#allocation4 + $0x20] sm:$0xff] %vm1244_vm15, %v2887_v47  ;;  %v2888_v24 = vadd.f32 %v2775_v18, %v2620_v58  ;;  %2592 = vst.msk [vmem:[#allocation4 + $0x48] sm:$0xff] %vm1244_vm15, %v2560_v1  ;;  %v2301_v18 = vld [vmem:[#allocation4 + $0x98] sm:$0xff] }
 0x1c3   : > { %2922 = vst.msk [vmem:[#allocation4 + $0x38] sm:$0xff] %vm1244_vm15, %v2890_v37 }
 0x1c4   : > { %2920 = vst.msk [vmem:[#allocation4 + $0x28] sm:$0xff] %vm1244_vm15, %v2888_v24 }
 0x1c6   : > { %v2625_v34 = vld [vmem:[#allocation4 + $0x50] sm:$0xff]  ;;  %v7745_v62 = vpop.f32.mrb[8].mxu1 }
 0x1c7   : > { %v2623_v60 = vld [vmem:[#allocation4 + $0x40] sm:$0xff]  ;;  %v2893_v36 = vadd.f32 %v7745_v62, %v2625_v34  ;;  %v2788_v49 = vpop.f32.mrb[9].mxu1  ;;  %v2304_v62 = vld [vmem:[#allocation4 + $0xb0] sm:$0xff] }
 0x1c8   : > { %v2626_v14 = vld [vmem:[#allocation4 + $0x58] sm:$0xff]  ;;  %v2891_v57 = vadd.f32 %v2788_v49, %v2623_v60  ;;  %v7746_v38 = vpop.f32.mrb[10].mxu1 }
 0x1c9   : > { %v2624_v53 = vld [vmem:[#allocation4 + $0x48] sm:$0xff]  ;;  %2925 = vst.msk [vmem:[#allocation4 + $0x50] sm:$0xff] %vm1244_vm15, %v2893_v36  ;;  %v2894_v2 = vadd.f32 %v7746_v38, %v2626_v14  ;;  %v2791_v3 = vpop.f32.mrb[11].mxu1  ;;  %v2302_v14 = vld [vmem:[#allocation4 + $0xa0] sm:$0xff]  ;;  %v2305_v49 = vld [vmem:[#allocation4 + $0xb8] sm:$0xff] }
 0x1ca   : > { %2923 = vst.msk [vmem:[#allocation4 + $0x40] sm:$0xff] %vm1244_vm15, %v2891_v57  ;;  %v2892_v17 = vadd.f32 %v2791_v3, %v2624_v53  ;;  %v2303_v38 = vld [vmem:[#allocation4 + $0xa8] sm:$0xff] }
 0x1cb   : > { %2926 = vst.msk [vmem:[#allocation4 + $0x58] sm:$0xff] %vm1244_vm15, %v2894_v2 }
 0x1cc   : > { %2924 = vst.msk [vmem:[#allocation4 + $0x48] sm:$0xff] %vm1244_vm15, %v2892_v17 }
 0x1d0   : > { %v7715_v22 = vpop.f32.mrb[12].mxu0 }
 0x1d1   : > { %v2565_v63 = vadd.f32 %v7715_v22, %v2296_v7  ;;  %v2472_v23 = vpop.f32.mrb[13].mxu0 }
 0x1d2   : > { %v2563_v6 = vadd.f32 %v2472_v23, %v2294_v21  ;;  %v7716_v10 = vpop.f32.mrb[14].mxu0 }
 0x1d3   : > { %2597 = vst.msk [vmem:[#allocation4 + $0x70] sm:$0xff] %vm1244_vm15, %v2565_v63  ;;  %v2566_v31 = vadd.f32 %v7716_v10, %v2297_v12  ;;  %v2475_v19 = vpop.f32.mrb[15].mxu0 }
 0x1d4   : > { %2595 = vst.msk [vmem:[#allocation4 + $0x60] sm:$0xff] %vm1244_vm15, %v2563_v6  ;;  %v2564_v61 = vadd.f32 %v2475_v19, %v2295_v13 }
 0x1d5   : > { %2598 = vst.msk [vmem:[#allocation4 + $0x78] sm:$0xff] %vm1244_vm15, %v2566_v31 }
 0x1d6   : > { %2596 = vst.msk [vmem:[#allocation4 + $0x68] sm:$0xff] %vm1244_vm15, %v2564_v61 }
 0x1da   : > { %v2629_v11 = vld [vmem:[#allocation4 + $0x70] sm:$0xff] }
 0x1db   : > { %v2627_v20 = vld [vmem:[#allocation4 + $0x60] sm:$0xff] }
 0x1dc   : > { %v7749_v35 = vpop.f32.mrb[12].mxu1  ;;  %v2630_v43 = vld [vmem:[#allocation4 + $0x78] sm:$0xff] }
 0x1dd   : > { %v2897_v27 = vadd.f32 %v7749_v35, %v2629_v11  ;;  %v2804_v50 = vpop.f32.mrb[13].mxu1  ;;  %v2628_v0 = vld [vmem:[#allocation4 + $0x68] sm:$0xff]  ;;  %v2308_v35 = vld [vmem:[#allocation4 + $0xd0] sm:$0xff] }
 0x1de   : > { %v2895_v42 = vadd.f32 %v2804_v50, %v2627_v20  ;;  %v7750_v26 = vpop.f32.mrb[14].mxu1  ;;  %v2309_v50 = vld [vmem:[#allocation4 + $0xd8] sm:$0xff] }
 0x1df   : > { %2929 = vst.msk [vmem:[#allocation4 + $0x70] sm:$0xff] %vm1244_vm15, %v2897_v27  ;;  %v2898_v45 = vadd.f32 %v7750_v26, %v2630_v43  ;;  %v2807_v5 = vpop.f32.mrb[15].mxu1  ;;  %v2306_v43 = vld [vmem:[#allocation4 + $0xc0] sm:$0xff]  ;;  %v2307_v26 = vld [vmem:[#allocation4 + $0xc8] sm:$0xff] }
 0x1e0   : > { %2927 = vst.msk [vmem:[#allocation4 + $0x60] sm:$0xff] %vm1244_vm15, %v2895_v42  ;;  %v2896_v32 = vadd.f32 %v2807_v5, %v2628_v0 }
 0x1e1   : > { %2930 = vst.msk [vmem:[#allocation4 + $0x78] sm:$0xff] %vm1244_vm15, %v2898_v45 }
 0x1e2   : > { %2928 = vst.msk [vmem:[#allocation4 + $0x68] sm:$0xff] %vm1244_vm15, %v2896_v32 }
 0x1e6   : > { %v7719_v52 = vpop.f32.mrb[16].mxu0 }
 0x1e7   : > { %v2569_v41 = vadd.f32 %v7719_v52, %v2300_v28  ;;  %v2488_v46 = vpop.f32.mrb[17].mxu0 }
 0x1e8   : > { %v2567_v40 = vadd.f32 %v2488_v46, %v2298_v33  ;;  %v7720_v47 = vpop.f32.mrb[18].mxu0 }
 0x1e9   : > { %2601 = vst.msk [vmem:[#allocation4 + $0x90] sm:$0xff] %vm1244_vm15, %v2569_v41  ;;  %v2570_v54 = vadd.f32 %v7720_v47, %v2301_v18  ;;  %v2491_v4 = vpop.f32.mrb[19].mxu0 }
 0x1ea   : > { %2599 = vst.msk [vmem:[#allocation4 + $0x80] sm:$0xff] %vm1244_vm15, %v2567_v40  ;;  %v2568_v30 = vadd.f32 %v2491_v4, %v2299_v48 }
 0x1eb   : > { %2602 = vst.msk [vmem:[#allocation4 + $0x98] sm:$0xff] %vm1244_vm15, %v2570_v54 }
 0x1ec   : > { %2600 = vst.msk [vmem:[#allocation4 + $0x88] sm:$0xff] %vm1244_vm15, %v2568_v30 }
 0x1f0   : > { %v2633_v55 = vld [vmem:[#allocation4 + $0x90] sm:$0xff] }
 0x1f1   : > { %v2631_v37 = vld [vmem:[#allocation4 + $0x80] sm:$0xff] }
 0x1f2   : > { %v2634_v59 = vld [vmem:[#allocation4 + $0x98] sm:$0xff] }
 0x1f3   : > { %v7753_v58 = vpop.f32.mrb[16].mxu1  ;;  %v2632_v24 = vld [vmem:[#allocation4 + $0x88] sm:$0xff] }
 0x1f4   : > { %v2901_v44 = vadd.f32 %v7753_v58, %v2633_v55  ;;  %v2820_v56 = vpop.f32.mrb[17].mxu1  ;;  %v2312_v58 = vld [vmem:[#allocation4 + $0xf0] sm:$0xff] }
 0x1f5   : > { %v2899_v9 = vadd.f32 %v2820_v56, %v2631_v37  ;;  %v7754_v51 = vpop.f32.mrb[18].mxu1  ;;  %v2313_v56 = vld [vmem:[#allocation4 + $0xf8] sm:$0xff] }
 0x1f6   : > { %2933 = vst.msk [vmem:[#allocation4 + $0x90] sm:$0xff] %vm1244_vm15, %v2901_v44  ;;  %v2902_v1 = vadd.f32 %v7754_v51, %v2634_v59  ;;  %v2823_v34 = vpop.f32.mrb[19].mxu1  ;;  %v2310_v59 = vld [vmem:[#allocation4 + $0xe0] sm:$0xff]  ;;  %v2311_v51 = vld [vmem:[#allocation4 + $0xe8] sm:$0xff] }
 0x1f7   : > { %2931 = vst.msk [vmem:[#allocation4 + $0x80] sm:$0xff] %vm1244_vm15, %v2899_v9  ;;  %v2900_v60 = vadd.f32 %v2823_v34, %v2632_v24 }
 0x1f8   : > { %2934 = vst.msk [vmem:[#allocation4 + $0x98] sm:$0xff] %vm1244_vm15, %v2902_v1 }
 0x1f9   : > { %2932 = vst.msk [vmem:[#allocation4 + $0x88] sm:$0xff] %vm1244_vm15, %v2900_v60 }
 0x1fc   : > { %v7723_v36 = vpop.f32.mrb[20].mxu0 }
 0x1fd   : > { %v2573_v53 = vadd.f32 %v7723_v36, %v2304_v62  ;;  %v2504_v57 = vpop.f32.mrb[21].mxu0 }
 0x1fe   : > { %v2571_v2 = vadd.f32 %v2504_v57, %v2302_v14  ;;  %v7724_v3 = vpop.f32.mrb[22].mxu0 }
 0x1ff   : > { %2605 = vst.msk [vmem:[#allocation4 + $0xb0] sm:$0xff] %vm1244_vm15, %v2573_v53  ;;  %v2574_v17 = vadd.f32 %v7724_v3, %v2305_v49  ;;  %v2507_v7 = vpop.f32.mrb[23].mxu0 }
 0x200   : > { %2603 = vst.msk [vmem:[#allocation4 + $0xa0] sm:$0xff] %vm1244_vm15, %v2571_v2  ;;  %v2572_v21 = vadd.f32 %v2507_v7, %v2303_v38  ;;  %v2949_v38 = vld [vmem:[#allocation4 + $0x10] sm:$0xff] }
 0x201   : > { %2606 = vst.msk [vmem:[#allocation4 + $0xb8] sm:$0xff] %vm1244_vm15, %v2574_v17  ;;  %v2947_v17 = vld [vmem:[#allocation4] sm:$0xff] }
 0x202   : > { %2604 = vst.msk [vmem:[#allocation4 + $0xa8] sm:$0xff] %vm1244_vm15, %v2572_v21 }
 0x206   : > { %v2637_v22 = vld [vmem:[#allocation4 + $0xb0] sm:$0xff] }
 0x207   : > { %v2635_v12 = vld [vmem:[#allocation4 + $0xa0] sm:$0xff] }
 0x208   : > { %v2638_v23 = vld [vmem:[#allocation4 + $0xb8] sm:$0xff] }
 0x209   : > { %v7757_v63 = vpop.f32.mrb[20].mxu1  ;;  %v2636_v10 = vld [vmem:[#allocation4 + $0xa8] sm:$0xff] }
 0x20a   : > { %v2905_v13 = vadd.f32 %v7757_v63, %v2637_v22  ;;  %v2836_v6 = vpop.f32.mrb[21].mxu1 }
 0x20b   : > { %v2903_v31 = vadd.f32 %v2836_v6, %v2635_v12  ;;  %v7758_v19 = vpop.f32.mrb[22].mxu1  ;;  %v2950_v12 = vld [vmem:[#allocation4 + $0x18] sm:$0xff] }
 0x20c   : > { %2937 = vst.msk [vmem:[#allocation4 + $0xb0] sm:$0xff] %vm1244_vm15, %v2905_v13  ;;  %v2906_v61 = vadd.f32 %v7758_v19, %v2638_v23  ;;  %v2839_v11 = vpop.f32.mrb[23].mxu1 }
 0x20d   : > { %2935 = vst.msk [vmem:[#allocation4 + $0xa0] sm:$0xff] %vm1244_vm15, %v2903_v31  ;;  %v2904_v20 = vadd.f32 %v2839_v11, %v2636_v10  ;;  %v2948_v10 = vld [vmem:[#allocation4 + $0x8] sm:$0xff] }
 0x20e   : > { %2938 = vst.msk [vmem:[#allocation4 + $0xb8] sm:$0xff] %vm1244_vm15, %v2906_v61 }
 0x20f   : > { %2936 = vst.msk [vmem:[#allocation4 + $0xa8] sm:$0xff] %vm1244_vm15, %v2904_v20 }
 0x214   : > { %v7727_v27 = vpop.f32.mrb[24].mxu0 }
 0x215   : > { %v2577_v0 = vadd.f32 %v7727_v27, %v2308_v35  ;;  %v2520_v42 = vpop.f32.mrb[25].mxu0  ;;  %v2953_v27 = vld [vmem:[#allocation4 + $0x30] sm:$0xff] }
 0x216   : > { %v2575_v45 = vadd.f32 %v2520_v42, %v2306_v43  ;;  %v7728_v5 = vpop.f32.mrb[26].mxu0  ;;  %v2951_v42 = vld [vmem:[#allocation4 + $0x20] sm:$0xff] }
 0x217   : > { %2609 = vst.msk [vmem:[#allocation4 + $0xd0] sm:$0xff] %vm1244_vm15, %v2577_v0  ;;  %v2578_v32 = vadd.f32 %v7728_v5, %v2309_v50  ;;  %v2523_v28 = vpop.f32.mrb[27].mxu0  ;;  %v2954_v5 = vld [vmem:[#allocation4 + $0x38] sm:$0xff] }
 0x218   : > { %2607 = vst.msk [vmem:[#allocation4 + $0xc0] sm:$0xff] %vm1244_vm15, %v2575_v45  ;;  %v2576_v33 = vadd.f32 %v2523_v28, %v2307_v26 }
 0x219   : > { %2610 = vst.msk [vmem:[#allocation4 + $0xd8] sm:$0xff] %vm1244_vm15, %v2578_v32 }
 0x21a   : > { %2608 = vst.msk [vmem:[#allocation4 + $0xc8] sm:$0xff] %vm1244_vm15, %v2576_v33 }
 0x21e   : > { %v2641_v52 = vld [vmem:[#allocation4 + $0xd0] sm:$0xff] }
 0x21f   : > { %v2639_v18 = vld [vmem:[#allocation4 + $0xc0] sm:$0xff] }
 0x220   : > { %v2642_v46 = vld [vmem:[#allocation4 + $0xd8] sm:$0xff] }
 0x221   : > { %v2640_v47 = vld [vmem:[#allocation4 + $0xc8] sm:$0xff] }
 0x228   : > { %v7761_v41 = vpop.f32.mrb[24].mxu1 }
 0x229   : > { %v2909_v48 = vadd.f32 %v7761_v41, %v2641_v52  ;;  %v2852_v40 = vpop.f32.mrb[25].mxu1  ;;  %v2952_v52 = vld [vmem:[#allocation4 + $0x28] sm:$0xff] }
 0x22a   : > { %v2907_v54 = vadd.f32 %v2852_v40, %v2639_v18  ;;  %v7762_v4 = vpop.f32.mrb[26].mxu1 }
 0x22b   : > { %2941 = vst.msk [vmem:[#allocation4 + $0xd0] sm:$0xff] %vm1244_vm15, %v2909_v48  ;;  %v2910_v30 = vadd.f32 %v7762_v4, %v2642_v46  ;;  %v2855_v55 = vpop.f32.mrb[27].mxu1 }
 0x22c   : > { %2939 = vst.msk [vmem:[#allocation4 + $0xc0] sm:$0xff] %vm1244_vm15, %v2907_v54  ;;  %v2908_v37 = vadd.f32 %v2855_v55, %v2640_v47  ;;  %v2957_v55 = vld [vmem:[#allocation4 + $0x50] sm:$0xff] }
 0x22d   : > { %2942 = vst.msk [vmem:[#allocation4 + $0xd8] sm:$0xff] %vm1244_vm15, %v2910_v30 }
 0x22e   : > { %2940 = vst.msk [vmem:[#allocation4 + $0xc8] sm:$0xff] %vm1244_vm15, %v2908_v37 }
 0x236   : > { %v7731_v44 = vpop.f32.mrb[28].mxu0 }
 0x237   : > { %v2581_v24 = vadd.f32 %v7731_v44, %v2312_v58  ;;  %v2536_v9 = vpop.f32.mrb[29].mxu0  ;;  %v2955_v44 = vld [vmem:[#allocation4 + $0x40] sm:$0xff] }
 0x238   : > { %v2579_v1 = vadd.f32 %v2536_v9, %v2310_v59  ;;  %v7732_v34 = vpop.f32.mrb[30].mxu0 }
 0x239   : > { %2613 = vst.msk [vmem:[#allocation4 + $0xf0] sm:$0xff] %vm1244_vm15, %v2581_v24  ;;  %v2582_v60 = vadd.f32 %v7732_v34, %v2313_v56  ;;  %v2539_v62 = vpop.f32.mrb[31].mxu0 }
 0x23a   : > { %2611 = vst.msk [vmem:[#allocation4 + $0xe0] sm:$0xff] %vm1244_vm15, %v2579_v1  ;;  %v2580_v14 = vadd.f32 %v2539_v62, %v2311_v51  ;;  %v7765_v36 = vpop.f32.mrb[28].mxu1  ;;  %v2958_v51 = vld [vmem:[#allocation4 + $0x58] sm:$0xff] }
 0x23b   : > { %2614 = vst.msk [vmem:[#allocation4 + $0xf8] sm:$0xff] %vm1244_vm15, %v2582_v60  ;;  %v2868_v49 = vpop.f32.mrb[29].mxu1 }
 0x23c   : > { %2612 = vst.msk [vmem:[#allocation4 + $0xe8] sm:$0xff] %vm1244_vm15, %v2580_v14  ;;  %v7766_v53 = vpop.f32.mrb[30].mxu1  ;;  %v2956_v14 = vld [vmem:[#allocation4 + $0x48] sm:$0xff] }
 0x23d   : > { %v2871_v57 = vpop.f32.mrb[31].mxu1 }
 0x23e   : > { %v7771_v2 = vpop.f32.mrb[32].mxu0 }
 0x23f   : > { %v3217_v3 = vadd.f32 %v7771_v2, %v2949_v38  ;;  %v3088_v7 = vpop.f32.mrb[33].mxu0 }
 0x240   : > { %v3215_v21 = vadd.f32 %v3088_v7, %v2947_v17  ;;  %v2645_v22 = vld [vmem:[#allocation4 + $0xf0] sm:$0xff]  ;;  %v7772_v63 = vpop.f32.mrb[34].mxu0 }
 0x241   : > { %3249 = vst.msk [vmem:[#allocation4 + $0x10] sm:$0xff] %vm1244_vm15, %v3217_v3  ;;  %v2913_v23 = vadd.f32 %v7765_v36, %v2645_v22  ;;  %v3218_v13 = vadd.f32 %v7772_v63, %v2950_v12  ;;  %v2643_v6 = vld [vmem:[#allocation4 + $0xe0] sm:$0xff]  ;;  %v3091_v31 = vpop.f32.mrb[35].mxu0  ;;  %v2961_v22 = vld [vmem:[#allocation4 + $0x70] sm:$0xff] }
 0x242   : > { %3247 = vst.msk [vmem:[#allocation4] sm:$0xff] %vm1244_vm15, %v3215_v21  ;;  %v2911_v19 = vadd.f32 %v2868_v49, %v2643_v6  ;;  %v3216_v61 = vadd.f32 %v3091_v31, %v2948_v10  ;;  %v2646_v11 = vld [vmem:[#allocation4 + $0xf8] sm:$0xff] }
 0x243   : > { %2945 = vst.msk [vmem:[#allocation4 + $0xf0] sm:$0xff] %vm1244_vm15, %v2913_v23  ;;  %3250 = vst.msk [vmem:[#allocation4 + $0x18] sm:$0xff] %vm1244_vm15, %v3218_v13  ;;  %v2914_v20 = vadd.f32 %v7766_v53, %v2646_v11  ;;  %v2644_v35 = vld [vmem:[#allocation4 + $0xe8] sm:$0xff]  ;;  %v2959_v13 = vld [vmem:[#allocation4 + $0x60] sm:$0xff] }
 0x244   : > { %2943 = vst.msk [vmem:[#allocation4 + $0xe0] sm:$0xff] %vm1244_vm15, %v2911_v19  ;;  %3248 = vst.msk [vmem:[#allocation4 + $0x8] sm:$0xff] %vm1244_vm15, %v3216_v61  ;;  %v2912_v43 = vadd.f32 %v2871_v57, %v2644_v35  ;;  %v2962_v19 = vld [vmem:[#allocation4 + $0x78] sm:$0xff] }
 0x245   : > { %2946 = vst.msk [vmem:[#allocation4 + $0xf8] sm:$0xff] %vm1244_vm15, %v2914_v20 }
 0x246   : > { %2944 = vst.msk [vmem:[#allocation4 + $0xe8] sm:$0xff] %vm1244_vm15, %v2912_v43  ;;  %v7775_v50 = vpop.f32.mrb[36].mxu0  ;;  %v2960_v43 = vld [vmem:[#allocation4 + $0x68] sm:$0xff] }
 0x247   : > { %v3221_v0 = vadd.f32 %v7775_v50, %v2953_v27  ;;  %v3104_v26 = vpop.f32.mrb[37].mxu0 }
 0x248   : > { %v3219_v45 = vadd.f32 %v3104_v26, %v2951_v42  ;;  %v7776_v32 = vpop.f32.mrb[38].mxu0  ;;  %v9039_v46 = vld [vmem:[#allocation4 + $0x10] sm:$0xff] }
 0x249   : > { %v9035_v28 = vld [vmem:[#allocation4] sm:$0xff]  ;;  %3253 = vst.msk [vmem:[#allocation4 + $0x30] sm:$0xff] %vm1244_vm15, %v3221_v0  ;;  %v3222_v33 = vadd.f32 %v7776_v32, %v2954_v5  ;;  %v3107_v18 = vpop.f32.mrb[39].mxu0  ;;  %v3314_v30 = vsel %vm1244_vm15, %v9039_v46, 0.0 }
 0x24a   : > { %3251 = vst.msk [vmem:[#allocation4 + $0x20] sm:$0xff] %vm1244_vm15, %v3219_v45  ;;  %v3220_v41 = vadd.f32 %v3107_v18, %v2952_v52  ;;  %v3311_v40 = vsel %vm1244_vm15, %v9035_v28, 0.0  ;;  %v9049_v54 = vld [vmem:[#allocation4 + $0x18] sm:$0xff]  ;;  %v2965_v18 = vld [vmem:[#allocation4 + $0x90] sm:$0xff] }
 0x24b   : > { %v9041_v48 = vld [vmem:[#allocation4 + $0x8] sm:$0xff]  ;;  %3254 = vst.msk [vmem:[#allocation4 + $0x38] sm:$0xff] %vm1244_vm15, %v3222_v33  ;;  %v3316_v24 = vsel %vm1244_vm15, %v9049_v54, 0.0 }
 0x24c   : > { %v3312_v47 = vsel %vm1244_vm15, %v9041_v48, 0.0  ;;  %3252 = vst.msk [vmem:[#allocation4 + $0x28] sm:$0xff] %vm1244_vm15, %v3220_v41 }
 0x24d   : > { %v3313_v4 = vadd.f32 %v3312_v47, %v3311_v40 }
 0x24e   : > { %v7779_v37 = vpop.f32.mrb[40].mxu0 }
 0x24f   : > { %v3315_v58 = vadd.f32 %v3314_v30, %v3313_v4  ;;  %v3225_v59 = vadd.f32 %v7779_v37, %v2957_v55  ;;  %v3120_v56 = vpop.f32.mrb[41].mxu0  ;;  %v2963_v4 = vld [vmem:[#allocation4 + $0x80] sm:$0xff] }
 0x250   : > { %v3223_v9 = vadd.f32 %v3120_v56, %v2955_v44  ;;  %v7780_v1 = vpop.f32.mrb[42].mxu0  ;;  %v9061_v57 = vld [vmem:[#allocation4 + $0x30] sm:$0xff] }
 0x251   : > { %v9055_v34 = vld [vmem:[#allocation4 + $0x20] sm:$0xff]  ;;  %v3317_v60 = vadd.f32 %v3316_v24, %v3315_v58  ;;  %3257 = vst.msk [vmem:[#allocation4 + $0x50] sm:$0xff] %vm1244_vm15, %v3225_v59  ;;  %v3226_v62 = vadd.f32 %v7780_v1, %v2958_v51  ;;  %v3123_v36 = vpop.f32.mrb[43].mxu0  ;;  %v3322_v21 = vsel %vm1244_vm15, %v9061_v57, 0.0  ;;  %v2966_v58 = vld [vmem:[#allocation4 + $0x98] sm:$0xff] }
 0x252   : > { %v3318_v49 = vsel %vm1244_vm15, %v9055_v34, 0.0  ;;  %3255 = vst.msk [vmem:[#allocation4 + $0x40] sm:$0xff] %vm1244_vm15, %v3223_v9  ;;  %v3224_v53 = vadd.f32 %v3123_v36, %v2956_v14  ;;  %v9069_v17 = vld [vmem:[#allocation4 + $0x38] sm:$0xff]  ;;  %v2964_v9 = vld [vmem:[#allocation4 + $0x88] sm:$0xff] }
 0x253   : > { %v3319_v38 = vadd.f32 %v3318_v49, %v3317_v60  ;;  %v9063_v2 = vld [vmem:[#allocation4 + $0x28] sm:$0xff]  ;;  %3258 = vst.msk [vmem:[#allocation4 + $0x58] sm:$0xff] %vm1244_vm15, %v3226_v62  ;;  %v3324_v10 = vsel %vm1244_vm15, %v9069_v17, 0.0 }
 0x254   : > { %v3320_v3 = vsel %vm1244_vm15, %v9063_v2, 0.0  ;;  %3256 = vst.msk [vmem:[#allocation4 + $0x48] sm:$0xff] %vm1244_vm15, %v3224_v53 }
 0x255   : > { %v3321_v7 = vadd.f32 %v3320_v3, %v3319_v38 }
 0x256   : > { %v7783_v12 = vpop.f32.mrb[44].mxu0 }
 0x257   : > { %v3323_v63 = vadd.f32 %v3322_v21, %v3321_v7  ;;  %v3229_v23 = vadd.f32 %v7783_v12, %v2961_v22  ;;  %v3136_v6 = vpop.f32.mrb[45].mxu0  ;;  %v2969_v7 = vld [vmem:[#allocation4 + $0xb0] sm:$0xff] }
 0x258   : > { %v3227_v31 = vadd.f32 %v3136_v6, %v2959_v13  ;;  %v7784_v61 = vpop.f32.mrb[46].mxu0  ;;  %v9081_v42 = vld [vmem:[#allocation4 + $0x50] sm:$0xff] }
 0x259   : > { %v9075_v11 = vld [vmem:[#allocation4 + $0x40] sm:$0xff]  ;;  %v3325_v20 = vadd.f32 %v3324_v10, %v3323_v63  ;;  %3261 = vst.msk [vmem:[#allocation4 + $0x70] sm:$0xff] %vm1244_vm15, %v3229_v23  ;;  %v3230_v35 = vadd.f32 %v7784_v61, %v2962_v19  ;;  %v3139_v27 = vpop.f32.mrb[47].mxu0  ;;  %v3330_v52 = vsel %vm1244_vm15, %v9081_v42, 0.0  ;;  %v2970_v10 = vld [vmem:[#allocation4 + $0xb8] sm:$0xff] }
 0x25a   : > { %v3326_v50 = vsel %vm1244_vm15, %v9075_v11, 0.0  ;;  %3259 = vst.msk [vmem:[#allocation4 + $0x60] sm:$0xff] %vm1244_vm15, %v3227_v31  ;;  %v3228_v0 = vadd.f32 %v3139_v27, %v2960_v43  ;;  %v9089_v32 = vld [vmem:[#allocation4 + $0x58] sm:$0xff]  ;;  %v2967_v63 = vld [vmem:[#allocation4 + $0xa0] sm:$0xff] }
 0x25b   : > { %v3327_v26 = vadd.f32 %v3326_v50, %v3325_v20  ;;  %v9083_v45 = vld [vmem:[#allocation4 + $0x48] sm:$0xff]  ;;  %3262 = vst.msk [vmem:[#allocation4 + $0x78] sm:$0xff] %vm1244_vm15, %v3230_v35  ;;  %v3332_v55 = vsel %vm1244_vm15, %v9089_v32, 0.0 }
 0x25c   : > { %v3328_v5 = vsel %vm1244_vm15, %v9083_v45, 0.0  ;;  %3260 = vst.msk [vmem:[#allocation4 + $0x68] sm:$0xff] %vm1244_vm15, %v3228_v0  ;;  %v2968_v35 = vld [vmem:[#allocation4 + $0xa8] sm:$0xff] }
 0x25d   : > { %v3329_v33 = vadd.f32 %v3328_v5, %v3327_v26 }
 0x25e   : > { %v7787_v41 = vpop.f32.mrb[48].mxu0 }
 0x25f   : > { %v3331_v40 = vadd.f32 %v3330_v52, %v3329_v33  ;;  %v3233_v47 = vadd.f32 %v7787_v41, %v2965_v18  ;;  %v3152_v30 = vpop.f32.mrb[49].mxu0 }
 0x260   : > { %v3231_v37 = vadd.f32 %v3152_v30, %v2963_v4  ;;  %v7788_v59 = vpop.f32.mrb[50].mxu0  ;;  %v9101_v62 = vld [vmem:[#allocation4 + $0x70] sm:$0xff] }
 0x261   : > { %v9095_v44 = vld [vmem:[#allocation4 + $0x60] sm:$0xff]  ;;  %v3333_v56 = vadd.f32 %v3332_v55, %v3331_v40  ;;  %3265 = vst.msk [vmem:[#allocation4 + $0x90] sm:$0xff] %vm1244_vm15, %v3233_v47  ;;  %v3234_v24 = vadd.f32 %v7788_v59, %v2966_v58  ;;  %v3155_v51 = vpop.f32.mrb[51].mxu0  ;;  %v3338_v3 = vsel %vm1244_vm15, %v9101_v62, 0.0  ;;  %v2973_v40 = vld [vmem:[#allocation4 + $0xd0] sm:$0xff] }
 0x262   : > { %v3334_v1 = vsel %vm1244_vm15, %v9095_v44, 0.0  ;;  %3263 = vst.msk [vmem:[#allocation4 + $0x80] sm:$0xff] %vm1244_vm15, %v3231_v37  ;;  %v3232_v60 = vadd.f32 %v3155_v51, %v2964_v9  ;;  %v9109_v53 = vld [vmem:[#allocation4 + $0x78] sm:$0xff]  ;;  %v2971_v55 = vld [vmem:[#allocation4 + $0xc0] sm:$0xff] }
 0x263   : > { %v3335_v14 = vadd.f32 %v3334_v1, %v3333_v56  ;;  %v9103_v36 = vld [vmem:[#allocation4 + $0x68] sm:$0xff]  ;;  %3266 = vst.msk [vmem:[#allocation4 + $0x98] sm:$0xff] %vm1244_vm15, %v3234_v24  ;;  %v3340_v13 = vsel %vm1244_vm15, %v9109_v53, 0.0  ;;  %v2974_v56 = vld [vmem:[#allocation4 + $0xd8] sm:$0xff] }
 0x264   : > { %v3336_v49 = vsel %vm1244_vm15, %v9103_v36, 0.0  ;;  %3264 = vst.msk [vmem:[#allocation4 + $0x88] sm:$0xff] %vm1244_vm15, %v3232_v60  ;;  %v2972_v60 = vld [vmem:[#allocation4 + $0xc8] sm:$0xff] }
 0x265   : > { %v3337_v38 = vadd.f32 %v3336_v49, %v3335_v14 }
 0x266   : > { %v7791_v21 = vpop.f32.mrb[52].mxu0 }
 0x267   : > { %v3339_v22 = vadd.f32 %v3338_v3, %v3337_v38  ;;  %v3237_v12 = vadd.f32 %v7791_v21, %v2969_v7  ;;  %v3168_v23 = vpop.f32.mrb[53].mxu0 }
 0x268   : > { %v3235_v6 = vadd.f32 %v3168_v23, %v2967_v63  ;;  %v7792_v31 = vpop.f32.mrb[54].mxu0  ;;  %v9121_v0 = vld [vmem:[#allocation4 + $0x90] sm:$0xff] }
 0x269   : > { %v9115_v19 = vld [vmem:[#allocation4 + $0x80] sm:$0xff]  ;;  %v3341_v61 = vadd.f32 %v3340_v13, %v3339_v22  ;;  %3269 = vst.msk [vmem:[#allocation4 + $0xb0] sm:$0xff] %vm1244_vm15, %v3237_v12  ;;  %v3238_v20 = vadd.f32 %v7792_v31, %v2970_v10  ;;  %v3171_v43 = vpop.f32.mrb[55].mxu0  ;;  %v3346_v41 = vsel %vm1244_vm15, %v9121_v0, 0.0  ;;  %v2977_v13 = vld [vmem:[#allocation4 + $0xf0] sm:$0xff] }
 0x26a   : > { %v3342_v27 = vsel %vm1244_vm15, %v9115_v19, 0.0  ;;  %3267 = vst.msk [vmem:[#allocation4 + $0xa0] sm:$0xff] %vm1244_vm15, %v3235_v6  ;;  %v3236_v50 = vadd.f32 %v3171_v43, %v2968_v35  ;;  %v9129_v52 = vld [vmem:[#allocation4 + $0x98] sm:$0xff] }
 0x26b   : > { %v3343_v26 = vadd.f32 %v3342_v27, %v3341_v61  ;;  %v9123_v5 = vld [vmem:[#allocation4 + $0x88] sm:$0xff]  ;;  %3270 = vst.msk [vmem:[#allocation4 + $0xb8] sm:$0xff] %vm1244_vm15, %v3238_v20  ;;  %v3348_v58 = vsel %vm1244_vm15, %v9129_v52, 0.0  ;;  %v2975_v61 = vld [vmem:[#allocation4 + $0xe0] sm:$0xff]  ;;  %v2978_v27 = vld [vmem:[#allocation4 + $0xf8] sm:$0xff] }
 0x26c   : > { %v3344_v33 = vsel %vm1244_vm15, %v9123_v5, 0.0  ;;  %3268 = vst.msk [vmem:[#allocation4 + $0xa8] sm:$0xff] %vm1244_vm15, %v3236_v50 }
 0x26d   : > { %v3345_v18 = vadd.f32 %v3344_v33, %v3343_v26 }
 0x26e   : > { %v7795_v47 = vpop.f32.mrb[56].mxu0 }
 0x26f   : > { %v3347_v4 = vadd.f32 %v3346_v41, %v3345_v18  ;;  %v3241_v30 = vadd.f32 %v7795_v47, %v2973_v40  ;;  %v3184_v37 = vpop.f32.mrb[57].mxu0  ;;  %v2976_v41 = vld [vmem:[#allocation4 + $0xe8] sm:$0xff] }
 0x270   : > { %v3239_v59 = vadd.f32 %v3184_v37, %v2971_v55  ;;  %v7796_v24 = vpop.f32.mrb[58].mxu0  ;;  %v9141_v3 = vld [vmem:[#allocation4 + $0xb0] sm:$0xff] }
 0x271   : > { %v9135_v9 = vld [vmem:[#allocation4 + $0xa0] sm:$0xff]  ;;  %v3349_v51 = vadd.f32 %v3348_v58, %v3347_v4  ;;  %3273 = vst.msk [vmem:[#allocation4 + $0xd0] sm:$0xff] %vm1244_vm15, %v3241_v30  ;;  %v3242_v1 = vadd.f32 %v7796_v24, %v2974_v56  ;;  %v3187_v14 = vpop.f32.mrb[59].mxu0  ;;  %v3354_v23 = vsel %vm1244_vm15, %v9141_v3, 0.0 }
 0x272   : > { %v3350_v49 = vsel %vm1244_vm15, %v9135_v9, 0.0  ;;  %3271 = vst.msk [vmem:[#allocation4 + $0xc0] sm:$0xff] %vm1244_vm15, %v3239_v59  ;;  %v3240_v38 = vadd.f32 %v3187_v14, %v2972_v60  ;;  %v9149_v12 = vld [vmem:[#allocation4 + $0xb8] sm:$0xff] }
 0x273   : > { %v3351_v7 = vadd.f32 %v3350_v49, %v3349_v51  ;;  %v9143_v21 = vld [vmem:[#allocation4 + $0xa8] sm:$0xff]  ;;  %3274 = vst.msk [vmem:[#allocation4 + $0xd8] sm:$0xff] %vm1244_vm15, %v3242_v1  ;;  %v3356_v35 = vsel %vm1244_vm15, %v9149_v12, 0.0 }
 0x274   : > { %v3352_v22 = vsel %vm1244_vm15, %v9143_v21, 0.0  ;;  %3272 = vst.msk [vmem:[#allocation4 + $0xc8] sm:$0xff] %vm1244_vm15, %v3240_v38 }
 0x275   : > { %v3353_v63 = vadd.f32 %v3352_v22, %v3351_v7 }
 0x276   : > { %v7799_v6 = vpop.f32.mrb[60].mxu0 }
 0x277   : > { %v3355_v10 = vadd.f32 %v3354_v23, %v3353_v63  ;;  %v3245_v31 = vadd.f32 %v7799_v6, %v2977_v13  ;;  %v3200_v20 = vpop.f32.mrb[61].mxu0 }
 0x278   : > { %v3243_v43 = vadd.f32 %v3200_v20, %v2975_v61  ;;  %v7800_v50 = vpop.f32.mrb[62].mxu0  ;;  %v9161_v30 = vld [vmem:[#allocation4 + $0xd0] sm:$0xff] }
 0x279   : > { %v9155_v26 = vld [vmem:[#allocation4 + $0xc0] sm:$0xff]  ;;  %v3357_v33 = vadd.f32 %v3356_v35, %v3355_v10  ;;  %3277 = vst.msk [vmem:[#allocation4 + $0xf0] sm:$0xff] %vm1244_vm15, %v3245_v31  ;;  %v3246_v18 = vadd.f32 %v7800_v50, %v2978_v27  ;;  %v3203_v40 = vpop.f32.mrb[63].mxu0  ;;  %v3362_v24 = vsel %vm1244_vm15, %v9161_v30, 0.0 }
 0x27a   : > { %v3358_v47 = vsel %vm1244_vm15, %v9155_v26, 0.0  ;;  %3275 = vst.msk [vmem:[#allocation4 + $0xe0] sm:$0xff] %vm1244_vm15, %v3243_v43  ;;  %v3244_v4 = vadd.f32 %v3203_v40, %v2976_v41  ;;  %v9169_v59 = vld [vmem:[#allocation4 + $0xd8] sm:$0xff] }
 0x27b   : > { %v3359_v55 = vadd.f32 %v3358_v47, %v3357_v33  ;;  %v9163_v37 = vld [vmem:[#allocation4 + $0xc8] sm:$0xff]  ;;  %3278 = vst.msk [vmem:[#allocation4 + $0xf8] sm:$0xff] %vm1244_vm15, %v3246_v18  ;;  %v3364_v1 = vsel %vm1244_vm15, %v9169_v59, 0.0 }
 0x27c   : > { %v3360_v58 = vsel %vm1244_vm15, %v9163_v37, 0.0  ;;  %3276 = vst.msk [vmem:[#allocation4 + $0xe8] sm:$0xff] %vm1244_vm15, %v3244_v4 }
 0x27d   : > { %v3361_v56 = vadd.f32 %v3360_v58, %v3359_v55 }
 0x27f   : > { %v3363_v51 = vadd.f32 %v3362_v24, %v3361_v56 }
 0x280   : > { %v9179_v38 = vld [vmem:[#allocation4 + $0xf0] sm:$0xff] }
 0x281   : > { %v9175_v60 = vld [vmem:[#allocation4 + $0xe0] sm:$0xff]  ;;  %v3365_v14 = vadd.f32 %v3364_v1, %v3363_v51  ;;  %v3370_v6 = vsel %vm1244_vm15, %v9179_v38, 0.0 }
 0x282   : > { %v3366_v49 = vsel %vm1244_vm15, %v9175_v60, 0.0  ;;  %v9185_v23 = vld [vmem:[#allocation4 + $0xf8] sm:$0xff] }
 0x283   : > { %v3367_v7 = vadd.f32 %v3366_v49, %v3365_v14  ;;  %v9181_v22 = vld [vmem:[#allocation4 + $0xe8] sm:$0xff]  ;;  %v3372_v31 = vsel %vm1244_vm15, %v9185_v23, 0.0 }
 0x284   : > { %v3368_v63 = vsel %vm1244_vm15, %v9181_v22, 0.0 }
 0x285   : > { %v3369_v13 = vadd.f32 %v3368_v63, %v3367_v7 }
 0x287   : > { %v3371_v10 = vadd.f32 %v3370_v6, %v3369_v13 }
 0x289   : > { %v3373_v61 = vadd.f32 %v3372_v31, %v3371_v10 }
 0x28b   : > { %v3374_v20 = vrot.slane %v3373_v61, 4 }
 0x28d   : > { %v3375_v35 = vadd.f32 %v3374_v20, %v3373_v61 }
 0x28f   : > { %v3376_v43 = vrot.slane %v3375_v35, 2 }
 0x291   : > { %v3377_v27 = vadd.f32 %v3376_v43, %v3375_v35 }
 0x293   : > { %v3378_v50 = vrot.slane %v3377_v27, 1 }
 0x295   : > { %v3379_v33 = vadd.f32 %v3378_v50, %v3377_v27 }
 0x297   : > { %v9191_v18 = vmul.f32 0.00390625, %v3379_v33 }
 0x299   : > { %v3381_v41 = vsub.f32 %v9035_v28, %v9191_v18  ;;  %v3382_v40 = vsub.f32 %v9041_v48, %v9191_v18  ;;  %v3383_v47 = vsub.f32 %v9039_v46, %v9191_v18  ;;  %v3384_v4 = vsub.f32 %v9049_v54, %v9191_v18 }
 0x29a   : > { %v3385_v55 = vsub.f32 %v9055_v34, %v9191_v18  ;;  %v3386_v58 = vsub.f32 %v9063_v2, %v9191_v18  ;;  %v3387_v56 = vsub.f32 %v9061_v57, %v9191_v18  ;;  %v3388_v28 = vsub.f32 %v9069_v17, %v9191_v18 }
 0x29b   : > { %v3389_v48 = vsub.f32 %v9075_v11, %v9191_v18  ;;  %v3390_v46 = vsub.f32 %v9083_v45, %v9191_v18  ;;  %v3391_v54 = vsub.f32 %v9081_v42, %v9191_v18  ;;  %v3392_v34 = vsub.f32 %v9089_v32, %v9191_v18  ;;  %3413 = vst.msk [vmem:[#allocation4] sm:$0xff] %vm1244_vm15, %v3381_v41 }
 0x29c   : > { %3414 = vst.msk [vmem:[#allocation4 + $0x8] sm:$0xff] %vm1244_vm15, %v3382_v40  ;;  %3415 = vst.msk [vmem:[#allocation4 + $0x10] sm:$0xff] %vm1244_vm15, %v3383_v47  ;;  %v3393_v57 = vsub.f32 %v9095_v44, %v9191_v18  ;;  %v3394_v2 = vsub.f32 %v9103_v36, %v9191_v18  ;;  %v3395_v17 = vsub.f32 %v9101_v62, %v9191_v18 }
 0x29d   : > { %3416 = vst.msk [vmem:[#allocation4 + $0x18] sm:$0xff] %vm1244_vm15, %v3384_v4  ;;  %v3396_v11 = vsub.f32 %v9109_v53, %v9191_v18  ;;  %3417 = vst.msk [vmem:[#allocation4 + $0x20] sm:$0xff] %vm1244_vm15, %v3385_v55  ;;  %v3397_v42 = vsub.f32 %v9115_v19, %v9191_v18  ;;  %v3398_v45 = vsub.f32 %v9123_v5, %v9191_v18 }
 0x29e   : > { %3418 = vst.msk [vmem:[#allocation4 + $0x28] sm:$0xff] %vm1244_vm15, %v3386_v58  ;;  %3419 = vst.msk [vmem:[#allocation4 + $0x30] sm:$0xff] %vm1244_vm15, %v3387_v56  ;;  %v3399_v32 = vsub.f32 %v9121_v0, %v9191_v18  ;;  %v3400_v44 = vsub.f32 %v9129_v52, %v9191_v18  ;;  %v3401_v62 = vsub.f32 %v9135_v9, %v9191_v18 }
 0x29f   : > { %3420 = vst.msk [vmem:[#allocation4 + $0x38] sm:$0xff] %vm1244_vm15, %v3388_v28  ;;  %3421 = vst.msk [vmem:[#allocation4 + $0x40] sm:$0xff] %vm1244_vm15, %v3389_v48  ;;  %v3402_v36 = vsub.f32 %v9143_v21, %v9191_v18  ;;  %v3403_v53 = vsub.f32 %v9141_v3, %v9191_v18  ;;  %v3404_v19 = vsub.f32 %v9149_v12, %v9191_v18 }
 0x2a0   : > { %3422 = vst.msk [vmem:[#allocation4 + $0x48] sm:$0xff] %vm1244_vm15, %v3390_v46  ;;  %3423 = vst.msk [vmem:[#allocation4 + $0x50] sm:$0xff] %vm1244_vm15, %v3391_v54  ;;  %v3405_v0 = vsub.f32 %v9155_v26, %v9191_v18  ;;  %v3406_v5 = vsub.f32 %v9163_v37, %v9191_v18  ;;  %v3407_v52 = vsub.f32 %v9161_v30, %v9191_v18 }
 0x2a1   : > { %3424 = vst.msk [vmem:[#allocation4 + $0x58] sm:$0xff] %vm1244_vm15, %v3392_v34  ;;  %3425 = vst.msk [vmem:[#allocation4 + $0x60] sm:$0xff] %vm1244_vm15, %v3393_v57  ;;  %v3408_v9 = vsub.f32 %v9169_v59, %v9191_v18  ;;  %v3409_v3 = vsub.f32 %v9175_v60, %v9191_v18  ;;  %v3410_v21 = vsub.f32 %v9181_v22, %v9191_v18 }
 0x2a2   : > { %3426 = vst.msk [vmem:[#allocation4 + $0x68] sm:$0xff] %vm1244_vm15, %v3394_v2  ;;  %3427 = vst.msk [vmem:[#allocation4 + $0x70] sm:$0xff] %vm1244_vm15, %v3395_v17  ;;  %v3411_v12 = vsub.f32 %v9179_v38, %v9191_v18  ;;  %v3412_v26 = vsub.f32 %v9185_v23, %v9191_v18  ;;  %v9289_v30 = vld [vmem:[#allocation4] sm:$0xff] }
 0x2a3   : > { %3428 = vst.msk [vmem:[#allocation4 + $0x78] sm:$0xff] %vm1244_vm15, %v3396_v11  ;;  %3429 = vst.msk [vmem:[#allocation4 + $0x80] sm:$0xff] %vm1244_vm15, %v3397_v42  ;;  %v9291_v37 = vld [vmem:[#allocation4 + $0x8] sm:$0xff]  ;;  %v9293_v59 = vld [vmem:[#allocation4 + $0x10] sm:$0xff]  ;;  %v3477_v51 = vmul.f32 %v9289_v30, %v9289_v30 }
 0x2a4   : > { %3430 = vst.msk [vmem:[#allocation4 + $0x88] sm:$0xff] %vm1244_vm15, %v3398_v45  ;;  %3431 = vst.msk [vmem:[#allocation4 + $0x90] sm:$0xff] %vm1244_vm15, %v3399_v32  ;;  %v9295_v24 = vld [vmem:[#allocation4 + $0x18] sm:$0xff]  ;;  %v3478_v1 = vmul.f32 %v9291_v37, %v9291_v37  ;;  %v3479_v60 = vmul.f32 %v9293_v59, %v9293_v59  ;;  %v9303_v14 = vld [vmem:[#allocation4 + $0x20] sm:$0xff] }
 0x2a5   : > { %3432 = vst.msk [vmem:[#allocation4 + $0x98] sm:$0xff] %vm1244_vm15, %v3400_v44  ;;  %3433 = vst.msk [vmem:[#allocation4 + $0xa0] sm:$0xff] %vm1244_vm15, %v3401_v62  ;;  %v3509_v49 = vsel %vm1244_vm15, %v3477_v51, 0.0  ;;  %v3480_v38 = vmul.f32 %v9295_v24, %v9295_v24  ;;  %v9309_v22 = vld [vmem:[#allocation4 + $0x28] sm:$0xff]  ;;  %v3481_v23 = vmul.f32 %v9303_v14, %v9303_v14  ;;  %v9314_v6 = vld [vmem:[#allocation4 + $0x30] sm:$0xff] }
 0x2a6   : > { %3434 = vst.msk [vmem:[#allocation4 + $0xa8] sm:$0xff] %vm1244_vm15, %v3402_v36  ;;  %3435 = vst.msk [vmem:[#allocation4 + $0xb0] sm:$0xff] %vm1244_vm15, %v3403_v53  ;;  %v3510_v7 = vsel %vm1244_vm15, %v3478_v1, 0.0  ;;  %v3512_v13 = vsel %vm1244_vm15, %v3479_v60, 0.0  ;;  %v3482_v31 = vmul.f32 %v9309_v22, %v9309_v22  ;;  %v9319_v20 = vld [vmem:[#allocation4 + $0x38] sm:$0xff]  ;;  %v3483_v43 = vmul.f32 %v9314_v6, %v9314_v6  ;;  %v9324_v50 = vld [vmem:[#allocation4 + $0x40] sm:$0xff] }
 0x2a7   : > { %3436 = vst.msk [vmem:[#allocation4 + $0xb8] sm:$0xff] %vm1244_vm15, %v3404_v19  ;;  %3437 = vst.msk [vmem:[#allocation4 + $0xc0] sm:$0xff] %vm1244_vm15, %v3405_v0  ;;  %v3511_v63 = vadd.f32 %v3510_v7, %v3509_v49  ;;  %v3514_v61 = vsel %vm1244_vm15, %v3480_v38, 0.0  ;;  %v3516_v27 = vsel %vm1244_vm15, %v3481_v23, 0.0  ;;  %v3484_v18 = vmul.f32 %v9319_v20, %v9319_v20  ;;  %v9329_v40 = vld [vmem:[#allocation4 + $0x48] sm:$0xff]  ;;  %v9334_v58 = vld [vmem:[#allocation4 + $0x50] sm:$0xff] }
 0x2a8   : > { %3438 = vst.msk [vmem:[#allocation4 + $0xc8] sm:$0xff] %vm1244_vm15, %v3406_v5  ;;  %3439 = vst.msk [vmem:[#allocation4 + $0xd0] sm:$0xff] %vm1244_vm15, %v3407_v52  ;;  %v3518_v41 = vsel %vm1244_vm15, %v3482_v31, 0.0  ;;  %v3485_v4 = vmul.f32 %v9324_v50, %v9324_v50  ;;  %v3520_v55 = vsel %vm1244_vm15, %v3483_v43, 0.0  ;;  %v3486_v28 = vmul.f32 %v9329_v40, %v9329_v40  ;;  %v9339_v46 = vld [vmem:[#allocation4 + $0x58] sm:$0xff]  ;;  %v9344_v2 = vld [vmem:[#allocation4 + $0x60] sm:$0xff] }
 0x2a9   : > { %3440 = vst.msk [vmem:[#allocation4 + $0xd8] sm:$0xff] %vm1244_vm15, %v3408_v9  ;;  %3441 = vst.msk [vmem:[#allocation4 + $0xe0] sm:$0xff] %vm1244_vm15, %v3409_v3  ;;  %v3513_v10 = vadd.f32 %v3512_v13, %v3511_v63  ;;  %v3522_v48 = vsel %vm1244_vm15, %v3484_v18, 0.0  ;;  %v3487_v34 = vmul.f32 %v9334_v58, %v9334_v58  ;;  %v3488_v11 = vmul.f32 %v9339_v46, %v9339_v46  ;;  %v9349_v45 = vld [vmem:[#allocation4 + $0x68] sm:$0xff]  ;;  %v9354_v36 = vld [vmem:[#allocation4 + $0x70] sm:$0xff] }
 0x2aa   : > { %3442 = vst.msk [vmem:[#allocation4 + $0xe8] sm:$0xff] %vm1244_vm15, %v3410_v21  ;;  %3443 = vst.msk [vmem:[#allocation4 + $0xf0] sm:$0xff] %vm1244_vm15, %v3411_v12  ;;  %v3524_v57 = vsel %vm1244_vm15, %v3485_v4, 0.0  ;;  %v3526_v42 = vsel %vm1244_vm15, %v3486_v28, 0.0  ;;  %v3489_v44 = vmul.f32 %v9344_v2, %v9344_v2  ;;  %v3490_v19 = vmul.f32 %v9349_v45, %v9349_v45  ;;  %v9359_v5 = vld [vmem:[#allocation4 + $0x78] sm:$0xff]  ;;  %v9364_v21 = vld [vmem:[#allocation4 + $0x80] sm:$0xff] }
 0x2ab   : > { %3444 = vst.msk [vmem:[#allocation4 + $0xf8] sm:$0xff] %vm1244_vm15, %v3412_v26  ;;  %v3515_v35 = vadd.f32 %v3514_v61, %v3513_v10  ;;  %v3528_v62 = vsel %vm1244_vm15, %v3487_v34, 0.0  ;;  %v3530_v0 = vsel %vm1244_vm15, %v3488_v11, 0.0  ;;  %v3491_v9 = vmul.f32 %v9354_v36, %v9354_v36  ;;  %v9369_v1 = vld [vmem:[#allocation4 + $0x88] sm:$0xff]  ;;  %v9374_v7 = vld [vmem:[#allocation4 + $0x90] sm:$0xff] }
 0x2ac   : > { %v3532_v3 = vsel %vm1244_vm15, %v3489_v44, 0.0  ;;  %v3492_v26 = vmul.f32 %v9359_v5, %v9359_v5  ;;  %v3534_v51 = vsel %vm1244_vm15, %v3490_v19, 0.0  ;;  %v3493_v49 = vmul.f32 %v9364_v21, %v9364_v21  ;;  %v9379_v10 = vld [vmem:[#allocation4 + $0x98] sm:$0xff]  ;;  %v9384_v43 = vld [vmem:[#allocation4 + $0xa0] sm:$0xff] }
 0x2ad   : > { %v3517_v33 = vadd.f32 %v3516_v27, %v3515_v35  ;;  %v3536_v38 = vsel %vm1244_vm15, %v3491_v9, 0.0  ;;  %v3494_v23 = vmul.f32 %v9369_v1, %v9369_v1  ;;  %v3495_v61 = vmul.f32 %v9374_v7, %v9374_v7 }
 0x2ae   : > { %v3538_v13 = vsel %vm1244_vm15, %v3492_v26, 0.0  ;;  %v3540_v35 = vsel %vm1244_vm15, %v3493_v49, 0.0  ;;  %v3497_v4 = vmul.f32 %v9384_v43, %v9384_v43  ;;  %v9399_v34 = vld [vmem:[#allocation4 + $0xb8] sm:$0xff] }
 0x2af   : > { %v3519_v47 = vadd.f32 %v3518_v41, %v3517_v33  ;;  %v3496_v33 = vmul.f32 %v9379_v10, %v9379_v10  ;;  %v3542_v18 = vsel %vm1244_vm15, %v3494_v23, 0.0  ;;  %v9389_v41 = vld [vmem:[#allocation4 + $0xa8] sm:$0xff]  ;;  %v3500_v44 = vmul.f32 %v9399_v34, %v9399_v34  ;;  %v9414_v9 = vld [vmem:[#allocation4 + $0xd0] sm:$0xff] }
 0x2b0   : > { %v3548_v11 = vsel %vm1244_vm15, %v3497_v4, 0.0  ;;  %v3503_v49 = vmul.f32 %v9414_v9, %v9414_v9 }
 0x2b1   : > { %v3521_v56 = vadd.f32 %v3520_v55, %v3519_v47  ;;  %v3544_v55 = vsel %vm1244_vm15, %v3495_v61, 0.0  ;;  %v3554_v26 = vsel %vm1244_vm15, %v3500_v44, 0.0  ;;  %v3474_v61 = vld [vmem:[#allocation4 + $0xe8] sm:$0xff] }
 0x2b2   : > { %v3506_v4 = vmul.f32 %v3474_v61, %v3474_v61 }
 0x2b3   : > { %v3523_v54 = vadd.f32 %v3522_v48, %v3521_v56  ;;  %v9394_v56 = vld [vmem:[#allocation4 + $0xb0] sm:$0xff]  ;;  %v3498_v48 = vmul.f32 %v9389_v41, %v9389_v41 }
 0x2b5   : > { %v3525_v17 = vadd.f32 %v3524_v57, %v3523_v54  ;;  %v3546_v54 = vsel %vm1244_vm15, %v3496_v33, 0.0  ;;  %v3560_v33 = vsel %vm1244_vm15, %v3503_v49, 0.0 }
 0x2b7   : > { %v3527_v32 = vadd.f32 %v3526_v42, %v3525_v17  ;;  %v3499_v17 = vmul.f32 %v9394_v56, %v9394_v56  ;;  %v9404_v42 = vld [vmem:[#allocation4 + $0xc0] sm:$0xff] }
 0x2b9   : > { %v3529_v53 = vadd.f32 %v3528_v62, %v3527_v32  ;;  %v3550_v62 = vsel %vm1244_vm15, %v3498_v48, 0.0 }
 0x2bb   : > { %v3531_v52 = vadd.f32 %v3530_v0, %v3529_v53  ;;  %v9409_v53 = vld [vmem:[#allocation4 + $0xc8] sm:$0xff]  ;;  %v3501_v0 = vmul.f32 %v9404_v42, %v9404_v42 }
 0x2bd   : > { %v3533_v12 = vadd.f32 %v3532_v3, %v3531_v52  ;;  %v3552_v52 = vsel %vm1244_vm15, %v3499_v17, 0.0 }
 0x2bf   : > { %v3535_v60 = vadd.f32 %v3534_v51, %v3533_v12  ;;  %v3502_v12 = vmul.f32 %v9409_v53, %v9409_v53  ;;  %v9419_v51 = vld [vmem:[#allocation4 + $0xd8] sm:$0xff] }
 0x2c1   : > { %v3537_v63 = vadd.f32 %v3536_v38, %v3535_v60  ;;  %v3556_v38 = vsel %vm1244_vm15, %v3501_v0, 0.0 }
 0x2c3   : > { %v3539_v31 = vadd.f32 %v3538_v13, %v3537_v63  ;;  %v3473_v63 = vld [vmem:[#allocation4 + $0xe0] sm:$0xff]  ;;  %v3504_v13 = vmul.f32 %v9419_v51, %v9419_v51 }
 0x2c5   : > { %v3541_v27 = vadd.f32 %v3540_v35, %v3539_v31  ;;  %v3558_v31 = vsel %vm1244_vm15, %v3502_v12, 0.0 }
 0x2c7   : > { %v3543_v47 = vadd.f32 %v3542_v18, %v3541_v27  ;;  %v3505_v27 = vmul.f32 %v3473_v63, %v3473_v63  ;;  %v9428_v18 = vld [vmem:[#allocation4 + $0xf0] sm:$0xff] }
 0x2c9   : > { %v3545_v28 = vadd.f32 %v3544_v55, %v3543_v47  ;;  %v3562_v55 = vsel %vm1244_vm15, %v3504_v13, 0.0 }
 0x2cb   : > { %v3547_v57 = vadd.f32 %v3546_v54, %v3545_v28  ;;  %v9431_v28 = vld [vmem:[#allocation4 + $0xf8] sm:$0xff]  ;;  %v3507_v54 = vmul.f32 %v9428_v18, %v9428_v18 }
 0x2cd   : > { %v3549_v32 = vadd.f32 %v3548_v11, %v3547_v57  ;;  %v3564_v57 = vsel %vm1244_vm15, %v3505_v27, 0.0  ;;  %v3508_v11 = vmul.f32 %v9431_v28, %v9431_v28 }
 0x2cf   : > { %v3551_v19 = vadd.f32 %v3550_v62, %v3549_v32  ;;  %v3566_v32 = vsel %vm1244_vm15, %v3506_v4, 0.0  ;;  %v3568_v62 = vsel %vm1244_vm15, %v3507_v54, 0.0  ;;  %v3570_v0 = vsel %vm1244_vm15, %v3508_v11, 0.0 }
 0x2d1   : > { %v3553_v3 = vadd.f32 %v3552_v52, %v3551_v19 }
 0x2d3   : > { %v3555_v60 = vadd.f32 %v3554_v26, %v3553_v3 }
 0x2d5   : > { %v3557_v23 = vadd.f32 %v3556_v38, %v3555_v60 }
 0x2d7   : > { %v3559_v35 = vadd.f32 %v3558_v31, %v3557_v23 }
 0x2d9   : > { %v3561_v47 = vadd.f32 %v3560_v33, %v3559_v35 }
 0x2db   : > { %v3563_v48 = vadd.f32 %v3562_v55, %v3561_v47 }
 0x2dd   : > { %v3565_v17 = vadd.f32 %v3564_v57, %v3563_v48 }
 0x2df   : > { %v3567_v44 = vadd.f32 %v3566_v32, %v3565_v17 }
 0x2e1   : > { %v3569_v19 = vadd.f32 %v3568_v62, %v3567_v44 }
 0x2e3   : > { %v3571_v52 = vadd.f32 %v3570_v0, %v3569_v19  ;;  %v4184_v0 = vld [vmem:[#allocation2 + $0xd4] sm:$0x1] }
 0x2e5   : > { %v3572_v3 = vrot.slane %v3571_v52, 4 }
 0x2e7   : > { %v3573_v12 = vadd.f32 %v3572_v3, %v3571_v52 }
 0x2e9   : > { %v3574_v26 = vrot.slane %v3573_v12, 2 }
 0x2eb   : > { %v3575_v60 = vadd.f32 %v3574_v26, %v3573_v12 }
 0x2ed   : > { %v3576_v49 = vrot.slane %v3575_v60, 1 }
 0x2ef   : > { %v3577_v38 = vadd.f32 %v3576_v49, %v3575_v60 }
 0x2f1   : > { %v3578_v23 = vmul.f32 0.00390625, %v3577_v38 }
 0x2f3   : > { %v3579_v13 = vadd.f32 1e-05, %v3578_v23 }
 0x2f5   : > { %7961 = vrsqrt.f32 %v3579_v13 }
 0x2ff   : > { %v7962_v31 = vpop.eup %7961 }
 0x300   : > { %v3609_v35 = vmul.f32 %v7962_v31, %v3473_v63  ;;  %v3610_v27 = vmul.f32 %v7962_v31, %v3474_v61  ;;  %v9442_v4 = vmul.f32 %v7962_v31, %v9289_v30  ;;  %v9445_v55 = vmul.f32 %v7962_v31, %v9291_v37 }
 0x301   : > { %v3583_v48 = vmul.f32 %v7962_v31, %v9293_v59  ;;  %v3584_v54 = vmul.f32 %v7962_v31, %v9295_v24  ;;  %v9452_v11 = vmul.f32 %v7962_v31, %v9303_v14  ;;  %v9455_v63 = vmul.f32 %v7962_v31, %v9309_v22 }
 0x302   : > { %v3641_v33 = vmax.f32 %v3609_v35, 0.0  ;;  %v3642_v47 = vmax.f32 %v3610_v27, 0.0  ;;  %v9458_v61 = vmul.f32 %v7962_v31, %v9314_v6  ;;  %v9461_v30 = vmul.f32 %v7962_v31, %v9319_v20 }
 0x303   : > { %v9464_v37 = vmul.f32 %v7962_v31, %v9324_v50  ;;  %v9467_v59 = vmul.f32 %v7962_v31, %v9329_v40  ;;  %v9471_v14 = vmul.f32 %v7962_v31, %v9334_v58  ;;  %v9474_v22 = vmul.f32 %v7962_v31, %v9339_v46  ;;  %v4163_v46 = vld [vmem:[#allocation2 + $0xbc] sm:$0x1] }
 0x304   : > { %v9449_v57 = vpack.c.bf16 %v3641_v33, %v3641_v33  ;;  %v7594_v17 = vpack.c.bf16 %v3642_v47, %v3642_v47  ;;  %v9477_v6 = vmul.f32 %v7962_v31, %v9344_v2  ;;  %v9480_v20 = vmul.f32 %v7962_v31, %v9349_v45 }
 0x305   : > { %v9483_v50 = vmul.f32 %v7962_v31, %v9354_v36  ;;  %v9486_v40 = vmul.f32 %v7962_v31, %v9359_v5  ;;  %v9491_v19 = vmul.f32 %v7962_v31, %v9364_v21  ;;  %v9494_v2 = vmul.f32 %v7962_v31, %v9369_v1 }
 0x306   : > { %v3980_v24 = vshrl.u32 %v9449_v57, 16  ;;  %v3988_v32 = vshrl.u32 %v7594_v17, 16  ;;  %v3991_v58 = vshll.u32 %v7594_v17, 16  ;;  %v9497_v45 = vmul.f32 %v7962_v31, %v9374_v7  ;;  %v4173_v17 = vld [vmem:[#allocation2] sm:$0xf] }
 0x307   : > { %v9500_v36 = vmul.f32 %v7962_v31, %v9379_v10  ;;  %v9503_v5 = vmul.f32 %v7962_v31, %v9384_v43  ;;  %v9507_v21 = vmul.f32 %v7962_v31, %v9389_v41  ;;  %v9510_v26 = vmul.f32 %v7962_v31, %v9394_v56 }
 0x308   : > { %v9488_v44 = vrot.slane %v3980_v24, 7  ;;  %v3990_v62 = vrot.slane %v3988_v32, 7  ;;  %v9513_v1 = vmul.f32 %v7962_v31, %v9399_v34  ;;  %v3615_v7 = vmax.f32 %v3583_v48, 0.0 }
 0x309   : > { %v3616_v60 = vmax.f32 %v3584_v54, 0.0  ;;  %v9522_v41 = vmul.f32 %v7962_v31, %v9404_v42  ;;  %v9525_v56 = vmul.f32 %v7962_v31, %v9409_v53  ;;  %v9528_v34 = vmul.f32 %v7962_v31, %v9414_v9 }
 0x30a   : > { %v3986_v52 = vrot.slane %v9488_v44, 4  ;;  %v3993_v3 = vor.u32 %v3991_v58, %v3990_v62  ;;  %v3995_v12 = vrot.slane %v3990_v62, 4  ;;  %v7567_v38 = vpack.c.bf16 %v3615_v7, %v3615_v7  ;;  %v4068_v58 = vld [vmem:[#allocation2 + $0x18] sm:$0xf] }
 0x30b   : > { %v7568_v23 = vpack.c.bf16 %v3616_v60, %v3616_v60  ;;  %v9533_v13 = vmul.f32 %v7962_v31, %v9419_v51  ;;  %v9536_v42 = vmul.f32 %v7962_v31, %v9428_v18  ;;  %v9539_v53 = vmul.f32 %v7962_v31, %v9431_v28 }
 0x30c   : > { %v3994_v10 = vsel %vm8036_vm5, %v3986_v52, %v3993_v3  ;;  %v4164_v43 = vsel %vm8049_vm7, %v3995_v12, %v4163_v46  ;;  %v4185_v49 = vsel %vm8049_vm7, %v3995_v12, %v4184_v0  ;;  %v3983_v9 = vshll.u32 %v9449_v57, 16  ;;  %v4177_v57 = vld [vmem:[#allocation2 + $0x8] sm:$0x1] }
 0x30d   : > { %4162 = vst.msk [vmem:[#allocation2 + $0xb8] sm:$0xf] %vm678_vm2, %v3994_v10  ;;  %4165 = vst [vmem:[#allocation2 + $0xbc] sm:$0x1] %v4164_v43  ;;  %v3759_v35 = vshrl.u32 %v7567_v38, 16  ;;  %v3767_v27 = vshrl.u32 %v7568_v23, 16 }
 0x30e   : > { %4183 = vst.msk [vmem:[#allocation2 + $0xd0] sm:$0xf] %vm678_vm2, %v3994_v10  ;;  %4186 = vst [vmem:[#allocation2 + $0xd4] sm:$0x1] %v4185_v49  ;;  %v3613_v33 = vmax.f32 %v9442_v4, 0.0  ;;  %v3614_v47 = vmax.f32 %v9445_v55, 0.0 }
 0x30f   : > { %v3617_v48 = vmax.f32 %v9452_v11, 0.0  ;;  %v3618_v54 = vmax.f32 %v9455_v63, 0.0  ;;  %v3619_v51 = vmax.f32 %v9458_v61, 0.0  ;;  %v3620_v18 = vmax.f32 %v9461_v30, 0.0  ;;  %v4072_v63 = vld [vmem:[#allocation2 + $0x20] sm:$0x1] }
 0x310   : > { %v3761_v24 = vrot.slane %v3759_v35, 7  ;;  %v3762_v28 = vshll.u32 %v7567_v38, 16  ;;  %v3769_v31 = vrot.slane %v3767_v27, 7  ;;  %v3770_v32 = vshll.u32 %v7568_v23, 16 }
 0x311   : > { %v3621_v62 = vmax.f32 %v9464_v37, 0.0  ;;  %v3622_v4 = vmax.f32 %v9467_v59, 0.0  ;;  %v3623_v55 = vmax.f32 %v9471_v14, 0.0  ;;  %v3624_v11 = vmax.f32 %v9474_v22, 0.0 }
 0x312   : > { %v3764_v46 = vor.u32 %v3762_v28, %v3761_v24  ;;  %v3765_v61 = vrot.slane %v3761_v24, 4  ;;  %v3772_v0 = vor.u32 %v3770_v32, %v3769_v31  ;;  %v3774_v30 = vrot.slane %v3769_v31, 4 }
 0x313   : > { %v3625_v52 = vmax.f32 %v9477_v6, 0.0  ;;  %v3626_v3 = vmax.f32 %v9480_v20, 0.0  ;;  %v3627_v12 = vmax.f32 %v9483_v50, 0.0  ;;  %v3628_v37 = vmax.f32 %v9486_v40, 0.0 }
 0x314   : > { %v3773_v59 = vsel %vm8036_vm5, %v3765_v61, %v3772_v0  ;;  %v4174_v14 = vsel %vm8042_vm6, %v3764_v46, %v4173_v17  ;;  %v4178_v22 = vsel %vm8049_vm7, %v3774_v30, %v4177_v57  ;;  %v3629_v7 = vmax.f32 %v9491_v19, 0.0  ;;  %v4065_v57 = vld [vmem:[#allocation2 + $0x14] sm:$0x1] }
 0x315   : > { %4175 = vst [vmem:[#allocation2] sm:$0xf] %v4174_v14  ;;  %4176 = vst.msk [vmem:[#allocation2 + $0x4] sm:$0xf] %vm678_vm2, %v3773_v59  ;;  %v3630_v60 = vmax.f32 %v9494_v2, 0.0  ;;  %v3631_v10 = vmax.f32 %v9497_v45, 0.0  ;;  %v4069_v35 = vsel %vm8042_vm6, %v3764_v46, %v4068_v58  ;;  %v4073_v27 = vsel %vm8049_vm7, %v3774_v30, %v4072_v63 }
 0x316   : > { %4179 = vst [vmem:[#allocation2 + $0x8] sm:$0x1] %v4178_v22  ;;  %v3632_v43 = vmax.f32 %v9500_v36, 0.0  ;;  %4071 = vst.msk [vmem:[#allocation2 + $0x1c] sm:$0xf] %vm678_vm2, %v3773_v59  ;;  %v7565_v28 = vpack.c.bf16 %v3613_v33, %v3613_v33  ;;  %v7566_v31 = vpack.c.bf16 %v3614_v47, %v3614_v47  ;;  %v9583_v63 = vor.u32 %v3983_v9, %v9488_v44 }
 0x317   : > { %4070 = vst [vmem:[#allocation2 + $0x18] sm:$0xf] %v4069_v35  ;;  %4074 = vst [vmem:[#allocation2 + $0x20] sm:$0x1] %v4073_v27  ;;  %v9585_v59 = vpack.c.bf16 %v3617_v48, %v3617_v48  ;;  %v9587_v33 = vpack.c.bf16 %v3618_v54, %v3618_v54  ;;  %v9589_v47 = vpack.c.bf16 %v3619_v51, %v3619_v51  ;;  %v4061_v22 = vld [vmem:[#allocation2 + $0xc] sm:$0xf] }
 0x318   : > { %v3742_v46 = vshrl.u32 %v7565_v28, 16  ;;  %v3750_v30 = vshrl.u32 %v7566_v31, 16  ;;  %v9591_v14 = vpack.c.bf16 %v3620_v18, %v3620_v18  ;;  %v3745_v27 = vshll.u32 %v7565_v28, 16 }
 0x319   : > { %v3753_v0 = vshll.u32 %v7566_v31, 16  ;;  %v9593_v44 = vpack.c.bf16 %v3621_v62, %v3621_v62  ;;  %v9595_v9 = vpack.c.bf16 %v3622_v4, %v3622_v4  ;;  %v9597_v48 = vpack.c.bf16 %v3623_v55, %v3623_v55 }
 0x31a   : > { %v3744_v35 = vrot.slane %v3742_v46, 7  ;;  %v3752_v61 = vrot.slane %v3750_v30, 7  ;;  %v9599_v54 = vpack.c.bf16 %v3624_v11, %v3624_v11  ;;  %v9610_v11 = vpack.c.bf16 %v3625_v52, %v3625_v52 }
 0x31b   : > { %v9622_v6 = vpack.c.bf16 %v3626_v3, %v3626_v3  ;;  %v9627_v52 = vpack.c.bf16 %v3627_v12, %v3627_v12  ;;  %v9643_v50 = vpack.c.bf16 %v3630_v60, %v3630_v60  ;;  %v9648_v40 = vpack.c.bf16 %v3631_v10, %v3631_v10 }
 0x31c   : > { %v4187_v58 = vld [vmem:[#allocation2] sm:$0x2]  ;;  %v4331_v32 = vld [vmem:[#allocation2 + $0x4] sm:$0x8]  ;;  %v4277_v24 = vld [vmem:[#allocation2] sm:$0x1]  ;;  %v3747_v23 = vor.u32 %v3745_v27, %v3744_v35  ;;  %v3755_v46 = vor.u32 %v3753_v0, %v3752_v61  ;;  %v9653_v19 = vpack.c.bf16 %v3632_v43, %v3632_v43 }
 0x31d   : > { %v7365_v51 = vrot.slane %v4187_v58, 9  ;;  %v7383_v18 = vrot.slane %v4331_v32, 11  ;;  %v4638_v17 = vld [vmem:[#allocation2 + $0x4] sm:$0xf]  ;;  %v4421_v28 = vld [vmem:[#allocation2 + $0x8] sm:$0x1] }
 0x31e   : > { %v4701_v30 = vshll.u32 %v4638_v17, 16  ;;  %v4705_v31 = vshrl.u32 %v4638_v17, 16  ;;  %v3748_v38 = vrot.slane %v3744_v35, 4  ;;  %v3757_v49 = vrot.slane %v3752_v61, 4  ;;  %v4159_v32 = vld [vmem:[#allocation2 + $0xb4] sm:$0xf] }
 0x31f   : > { %v4278_v62 = vsel %vm8049_vm7, %v7365_v51, %v4277_v24  ;;  %v4422_v4 = vsel %vm8084_vm10, %v7383_v18, %v4421_v28  ;;  %v4062_v55 = vsel %vm8042_vm6, %v3747_v23, %v4061_v22  ;;  %v4180_v0 = vld [vmem:[#allocation2 + $0xcc] sm:$0xf]  ;;  %v5249_v23 = vld [vmem:[#allocation2] sm:$0xe]  ;;  %v5250_v20 = vld [vmem:[#allocation2 + $0x4] sm:$0xf]  ;;  %v4160_v45 = vsel %vm8042_vm6, %v9583_v63, %v4159_v32 }
 0x320   : > { %4279 = vst [vmem:[#allocation2] sm:$0x1] %v4278_v62  ;;  %4423 = vst [vmem:[#allocation2 + $0x8] sm:$0x1] %v4422_v4  ;;  %v9612_v17 = vrot.slane %v4701_v30, 5  ;;  %v4707_v61 = vrot.slane %v4705_v31, 4  ;;  %v3756_v24 = vsel %vm8036_vm5, %v3748_v38, %v3755_v46  ;;  %v4066_v58 = vsel %vm8049_vm7, %v3757_v49, %v4065_v57 }
 0x321   : > { %4063 = vst [vmem:[#allocation2 + $0xc] sm:$0xf] %v4062_v55  ;;  %4064 = vst.msk [vmem:[#allocation2 + $0x10] sm:$0xf] %vm678_vm2, %v3756_v24  ;;  %v9632_v38 = vpack.c.bf16 %v3628_v37, %v3628_v37  ;;  %v9637_v49 = vpack.c.bf16 %v3629_v7, %v3629_v7  ;;  %v11537_v12 = vmax.f32 %v9503_v5, 0.0  ;;  %v11538_v2 = vmax.f32 %v9507_v21, 0.0 }
 0x322   : > { %4067 = vst [vmem:[#allocation2 + $0x14] sm:$0x1] %v4066_v58  ;;  %v4708_v3 = vor.u32 %v4707_v61, %v9612_v17  ;;  %v4181_v36 = vsel %vm8042_vm6, %v9583_v63, %v4180_v0  ;;  %v11539_v5 = vmax.f32 %v9510_v26, 0.0  ;;  %v7437_v43 = vrot.slane %v5249_v23, 9  ;;  %4161 = vst [vmem:[#allocation2 + $0xb4] sm:$0xf] %v4160_v45 }
 0x323   : > { %v9658_v37 = vpack.c.bf16 %v11537_v12, %v11537_v12  ;;  %v9663_v7 = vpack.c.bf16 %v11538_v2, %v11538_v2  ;;  %v5359_v21 = vrot.slane %v5250_v20, 5  ;;  %4182 = vst [vmem:[#allocation2 + $0xcc] sm:$0xf] %v4181_v36  ;;  %v3776_v57 = vshrl.u32 %v9585_v59, 16  ;;  %v4189_v16 = vld [vmem:[#allocation2 + $0x18] sm:$0x2] }
 0x324   : > { %v9671_v60 = vrot.slane %v4708_v3, 4  ;;  %v9676_v10 = vpack.c.bf16 %v11539_v5, %v11539_v5  ;;  %v3784_v35 = vshrl.u32 %v9587_v33, 16  ;;  %v3793_v51 = vshrl.u32 %v9589_v47, 16 }
 0x325   : > { %v5361_v63 = vrot.slane %v5359_v21, 4  ;;  %v11540_v31 = vmax.f32 %v9513_v1, 0.0  ;;  %v11541_v4 = vmax.f32 %v9522_v41, 0.0  ;;  %v11543_v32 = vmax.f32 %v9525_v56, 0.0 }
 0x326   : > { %v11545_v61 = vmax.f32 %v9528_v34, 0.0  ;;  %v11547_v2 = vmax.f32 %v9533_v13, 0.0  ;;  %v11549_v56 = vmax.f32 %v9536_v42, 0.0  ;;  %v11551_v34 = vmax.f32 %v9539_v53, 0.0 }
 0x327   : > { %v4637_v46 = vld [vmem:[#allocation2] sm:$0xf]  ;;  %v4639_v28 = vld [vmem:[#allocation2 + $0x8] sm:$0x1]  ;;  %v9688_v62 = vpack.c.bf16 %v11540_v31, %v11540_v31  ;;  %v9693_v55 = vpack.c.bf16 %v11541_v4, %v11541_v4  ;;  %v9698_v0 = vpack.c.bf16 %v11543_v32, %v11543_v32  ;;  %v3912_v26 = vshrl.u32 %v9658_v37, 16 }
 0x328   : > { %v4188_v30 = vld [vmem:[#allocation2 + $0xc] sm:$0x2]  ;;  %v9703_v24 = vpack.c.bf16 %v11545_v61, %v11545_v61  ;;  %v4692_v58 = vshrl.u32 %v4637_v46, 16  ;;  %v4695_v1 = vshll.u32 %v4637_v46, 16  ;;  %v4711_v23 = vshll.u32 %v4639_v28, 16 }
 0x329   : > { %11542 = vst [vmem:[#allocation10_spill] sm:$0xff] %v9693_v55  ;;  %11544 = vst [vmem:[#allocation11_spill] sm:$0xff] %v9698_v0  ;;  %v7366_v20 = vrot.slane %v4188_v30, 9  ;;  %v4280_v3 = vld [vmem:[#allocation2 + $0xc] sm:$0x1]  ;;  %v9708_v45 = vpack.c.bf16 %v11547_v2, %v11547_v2  ;;  %v9713_v36 = vpack.c.bf16 %v11549_v56, %v11549_v56  ;;  %v9718_v5 = vpack.c.bf16 %v11551_v34, %v11551_v34 }
 0x32a   : > { %11546 = vst [vmem:[#allocation12_spill] sm:$0xff] %v9703_v24  ;;  %v4332_v12 = vld [vmem:[#allocation2 + $0x10] sm:$0x8]  ;;  %v5360_v46 = vsel %vm8123_vm13, %v7437_v43, %v5359_v21  ;;  %v4694_v28 = vrot.slane %v4692_v58, 4  ;;  %v4697_v30 = vrot.slane %v4695_v1, 5  ;;  %v4713_v31 = vrot.slane %v4711_v23, 5 }
 0x32b   : > { %v4641_v41 = vld [vmem:[#allocation2 + $0x10] sm:$0xf]  ;;  %11548 = vst [vmem:[#allocation13_spill] sm:$0xff] %v9708_v45  ;;  %11550 = vst [vmem:[#allocation14_spill] sm:$0xff] %v9713_v36  ;;  %v4281_v13 = vsel %vm8049_vm7, %v7366_v20, %v4280_v3  ;;  %v5251_v4 = vld [vmem:[#allocation2 + $0x8] sm:$0x1] }
 0x32c   : > { %11552 = vst [vmem:[#allocation15_spill] sm:$0xff] %v9718_v5  ;;  %4282 = vst [vmem:[#allocation2 + $0xc] sm:$0x1] %v4281_v13  ;;  %v7384_v42 = vrot.slane %v4332_v12, 11  ;;  %v4725_v32 = vshll.u32 %v4641_v41, 16  ;;  %v4729_v61 = vshrl.u32 %v4641_v41, 16  ;;  %v4698_v56 = vor.u32 %v4697_v30, %v4694_v28 }
 0x32d   : > { %v5362_v2 = vrot.slane %v5251_v4, 5  ;;  %v4714_v53 = vsel %vm8140_vm14, %v9671_v60, %v4713_v31  ;;  %v4424_v34 = vld [vmem:[#allocation2 + $0x14] sm:$0x1]  ;;  %v3895_v13 = vshrl.u32 %v9648_v40, 16  ;;  %v3963_v43 = vshrl.u32 %v9703_v24, 16 }
 0x32e   : > { %v4425_v58 = vsel %vm8084_vm10, %v7384_v42, %v4424_v34  ;;  %v9731_v1 = vrot.slane %v4725_v32, 5  ;;  %v4731_v23 = vrot.slane %v4729_v61, 4  ;;  %v4699_v3 = vrot.slane %v4698_v56, 4 }
 0x32f   : > { %v5363_v20 = vsel %vm8123_vm13, %v5361_v63, %v5362_v2  ;;  %4426 = vst [vmem:[#allocation2 + $0x14] sm:$0x1] %v4425_v58  ;;  %v3886_v2 = vshrl.u32 %v9643_v50, 16  ;;  %v3920_v58 = vshrl.u32 %v9663_v7, 16  ;;  %v3997_v63 = vshrl.u32 %v9713_v36, 16 }
 0x330   : > { %v7455_v12 = vcombine.low %v5360_v46, %v5363_v20  ;;  %v4732_v28 = vor.u32 %v4731_v23, %v9731_v1  ;;  %v4704_v4 = vsel %vm8140_vm14, %v4699_v3, %v9612_v17  ;;  %v5252_v17 = vld [vmem:[#allocation2 + $0xc] sm:$0xe]  ;;  %v9791_v18 = vrot.slane %v3776_v57, 7 }
 0x331   : > { %v7419_v32 = vcombine.low %v4704_v4, %v4714_v53  ;;  %v3946_v4 = vshrl.u32 %v9693_v55, 16  ;;  %v3971_v53 = vshrl.u32 %v9708_v45, 16  ;;  %v7438_v60 = vrot.slane %v5252_v17, 9  ;;  %v4333_v45 = vld [vmem:[#allocation2 + $0x1c] sm:$0x8] }
 0x332   : > { %v4733_v61 = vrot.slane %v4732_v28, 4  ;;  %v3878_v28 = vshrl.u32 %v9637_v49, 16  ;;  %v11559_v25 = vshrl.u32 %v9622_v6, 16  ;;  %v9852_v55 = vrot.slane %v3920_v58, 7 }
 0x333   : > { %v4640_v34 = vld [vmem:[#allocation2 + $0xc] sm:$0xf]  ;;  %5177 = vrot.lane.b32.xlu0 %v7419_v32, %s7976_s25  ;;  %v3903_v32 = vshrl.u32 %v9653_v19, 16  ;;  %v7367_v58 = vrot.slane %v4189_v16, 9 }
 0x334   : > { %v4716_v3 = vshrl.u32 %v4640_v34, 16  ;;  %v4719_v46 = vshll.u32 %v4640_v34, 16  ;;  %v9842_v36 = vrot.slane %v3878_v28, 7  ;;  %11564 = vst [vmem:[#allocation18_spill] sm:$0xff] %v9852_v55  ;;  %v9863_v28 = vrot.slane %v3963_v43, 7 }
 0x335   : > { %v9848_v39 = vrot.slane %v3903_v32, 7  ;;  %v9867_v32 = vrot.slane %v3997_v63, 7 }
 0x336   : > { %v4642_v30 = vld [vmem:[#allocation2 + $0x14] sm:$0x1]  ;;  %v4718_v20 = vrot.slane %v4716_v3, 4  ;;  %v4721_v41 = vrot.slane %v4719_v46, 5  ;;  %v3929_v46 = vshrl.u32 %v9676_v10, 16 }
 0x337   : > { %v4735_v34 = vshll.u32 %v4642_v30, 16  ;;  %5537 = vrot.lane.b32.xlu0 %v7455_v12, %s7975_s24  ;;  %v3937_v30 = vshrl.u32 %v9688_v62, 16  ;;  %v3954_v12 = vshrl.u32 %v9698_v0, 16  ;;  %v5254_v42 = vld [vmem:[#allocation2 + $0x14] sm:$0x1]  ;;  %11563 = vst [vmem:[#allocation17_spill] sm:$0xff] %v9848_v39 }
 0x338   : > { %v4722_v27 = vor.u32 %v4721_v41, %v4718_v20  ;;  %v5253_v20 = vld [vmem:[#allocation2 + $0x10] sm:$0xf]  ;;  %v5369_v21 = vrot.slane %v5254_v42, 5  ;;  %v11554_v42 = vshrl.u32 %v9593_v44, 16  ;;  %v11558_v41 = vshrl.u32 %v9610_v11, 16 }
 0x339   : > { %v4737_v3 = vrot.slane %v4735_v34, 5  ;;  %v5366_v56 = vrot.slane %v5253_v20, 5  ;;  %v11555_v20 = vshrl.u32 %v9595_v9, 16  ;;  %v11556_v34 = vshrl.u32 %v9597_v48, 16  ;;  %v4644_v0 = vld [vmem:[#allocation2 + $0x1c] sm:$0xf] }
 0x33a   : > { %v4723_v23 = vrot.slane %v4722_v27, 4  ;;  %v9808_v17 = vrot.slane %v11554_v42, 7  ;;  %v9826_v42 = vrot.slane %v11558_v41, 7  ;;  %v9844_v41 = vrot.slane %v3886_v2, 7 }
 0x33b   : > { %v4738_v22 = vsel %vm8140_vm14, %v4733_v61, %v4737_v3  ;;  %v4005_v3 = vshrl.u32 %v9718_v5, 16  ;;  %v5367_v57 = vsel %vm8123_vm13, %v7438_v60, %v5366_v56  ;;  %v11557_v61 = vshrl.u32 %v9599_v54, 16 }
 0x33c   : > { %v4728_v27 = vsel %vm8140_vm14, %v4723_v23, %v9731_v1  ;;  %v9796_v1 = vrot.slane %v3784_v35, 7  ;;  %v11553_v23 = vshrl.u32 %v9591_v14, 16  ;;  %v9814_v35 = vrot.slane %v11555_v20, 7  ;;  %11562 = vst [vmem:[#allocation16_spill] sm:$0xff] %v9844_v41 }
 0x33d   : > { %v7420_v31 = vcombine.low %v4728_v27, %v4738_v22  ;;  %v9800_v22 = vrot.slane %v3793_v51, 7  ;;  %v9818_v51 = vrot.slane %v11556_v34, 7  ;;  %v9830_v60 = vrot.slane %v11559_v25, 7 }
 0x33e   : > { %v9804_v27 = vrot.slane %v11553_v23, 7  ;;  %v9822_v23 = vrot.slane %v11557_v61, 7  ;;  %v11561_v5 = vshrl.u32 %v9632_v38, 16  ;;  %v9846_v25 = vrot.slane %v3895_v13, 7 }
 0x33f   : > { %5179 = vrot.lane.b32.xlu1 %v7420_v31, %s7976_s25  ;;  %v5368_v31 = vrot.slane %v5366_v56, 4  ;;  %v11560_v56 = vshrl.u32 %v9627_v52, 16  ;;  %v9861_v2 = vrot.slane %v3954_v12, 7  ;;  %v9865_v13 = vrot.slane %v3971_v53, 7 }
 0x340   : > { %v9840_v61 = vrot.slane %v11561_v5, 7  ;;  %v9858_v5 = vrot.slane %v3946_v4, 7  ;;  %v4753_v8 = vshrl.u32 %v4644_v0, 16  ;;  %v11568_v4 = vshll.u32 %v9585_v59, 16 }
 0x341   : > { %v9834_v20 = vrot.slane %v11560_v56, 7  ;;  %v5370_v34 = vsel %vm8123_vm13, %v5368_v31, %v5369_v21  ;;  %v9850_v56 = vrot.slane %v3912_v26, 7  ;;  %v9854_v21 = vrot.slane %v3929_v46, 7  ;;  %11566 = vst [vmem:[#allocation20_spill] sm:$0xff] %v9865_v13 }
 0x342   : > { %v7456_v24 = vcombine.low %v5367_v57, %v5370_v34  ;;  %v9856_v31 = vrot.slane %v3937_v30, 7  ;;  %v9869_v26 = vrot.slane %v4005_v3, 7  ;;  %v7385_v57 = vrot.slane %v4333_v45, 11  ;;  %v4283_v34 = vld [vmem:[#allocation2 + $0x18] sm:$0x1] }
 0x343   : > { %v4749_v46 = vshll.u32 %v4644_v0, 16  ;;  %v4427_v30 = vld [vmem:[#allocation2 + $0x20] sm:$0x1]  ;;  %v11569_v53 = vshll.u32 %v9587_v33, 16  ;;  %v4284_v16 = vsel %vm8049_vm7, %v7367_v58, %v4283_v34  ;;  %v4755_v59 = vrot.slane %v4753_v8, 4 }
 0x344   : > { %11565 = vst [vmem:[#allocation19_spill] sm:$0xff] %v9856_v31  ;;  %5539 = vrot.lane.b32.xlu1 %v7456_v24, %s7975_s24  ;;  %11567 = vst [vmem:[#allocation21_spill] sm:$0xff] %v9869_v26  ;;  %v9874_v24 = vor.u32 %v11568_v4, %v9791_v18  ;;  %v4428_v45 = vsel %vm8084_vm10, %v7385_v57, %v4427_v30  ;;  %v11570_v3 = vshll.u32 %v9589_v47, 16  ;;  %v11571_v58 = vshll.u32 %v9591_v14, 16 }
 0x345   : > { %v9880_v63 = vor.u32 %v11569_v53, %v9796_v1  ;;  %v9886_v12 = vrot.slane %v4749_v46, 5  ;;  %4285 = vst [vmem:[#allocation2 + $0x18] sm:$0x1] %v4284_v16  ;;  %4429 = vst [vmem:[#allocation2 + $0x20] sm:$0x1] %v4428_v45  ;;  %v11572_v46 = vshll.u32 %v9593_v44, 16 }
 0x346   : > { %v9892_v4 = vor.u32 %v11570_v3, %v9800_v22  ;;  %v9898_v34 = vor.u32 %v11571_v58, %v9804_v27  ;;  %v11573_v47 = vshll.u32 %v9595_v9, 16  ;;  %v11574_v45 = vshll.u32 %v9597_v48, 16 }
 0x347   : > { %v9904_v30 = vor.u32 %v11572_v46, %v9808_v17  ;;  %v4756_v16 = vor.u32 %v4755_v59, %v9886_v12  ;;  %v11575_v58 = vshll.u32 %v9599_v54, 16  ;;  %v11577_v48 = vshll.u32 %v9622_v6, 16 }
 0x348   : > { %v9910_v53 = vor.u32 %v11573_v47, %v9814_v35  ;;  %v9917_v3 = vor.u32 %v11574_v45, %v9818_v51  ;;  %v11576_v47 = vshll.u32 %v9610_v11, 16  ;;  %v7940_v11 = vld [vmem:[%s11495_s3] sm:$0x3f]  }
 0x349   : > { %v9923_v46 = vor.u32 %v11575_v58, %v9822_v23  ;;  %v9932_v57 = vrot.slane %v4756_v16, 4  ;;  %v9937_v45 = vor.u32 %v11577_v48, %v9830_v60  ;;  %v11578_v58 = vshll.u32 %v9627_v52, 16  ;;  %7906 = vmatprep.subr.msk.bf16.mxu1 %vm2386_vm3, %v7940_v11 }
 0x34a   : > { %v9929_v59 = vor.u32 %v11576_v47, %v9826_v42  ;;  %v11579_v16 = vshll.u32 %v9632_v38, 16  ;;  %v11580_v48 = vshll.u32 %v9637_v49, 16  ;;  %v11582_v38 = vshll.u32 %v9648_v40, 16 }
 0x34b   : > { %v9943_v9 = vor.u32 %v11578_v58, %v9834_v20  ;;  %v11581_v58 = vshll.u32 %v9643_v50, 16  ;;  %v11584_v52 = vshll.u32 %v9653_v19, 16 }
 0x34c   : > { %v9952_v14 = vor.u32 %v11579_v16, %v9840_v61  ;;  %v9958_v54 = vor.u32 %v11580_v48, %v9842_v36  ;;  %v9970_v16 = vor.u32 %v11582_v38, %v9846_v25  ;;  %v4643_v6 = vld [vmem:[#allocation2 + $0x18] sm:$0xf]  ;;  %v4645_v49 = vld [vmem:[#allocation2 + $0x20] sm:$0x1]  ;;  %v11587_v48 = vshll.u32 %v9663_v7, 16 }
 0x34d   : > { %v9964_v44 = vor.u32 %v11581_v58, %v9844_v41  ;;  %v9977_v8 = vor.u32 %v11584_v52, %v9848_v39  ;;  %v11585_v58 = vshll.u32 %v9658_v37, 16  ;;  %v4740_v40 = vshrl.u32 %v4643_v6, 16 }
 0x34e   : > { %11583 = vst [vmem:[#allocation22_spill] sm:$0xff] %v9970_v16  ;;  %v4743_v38 = vshll.u32 %v4643_v6, 16  ;;  %v4759_v33 = vshll.u32 %v4645_v49, 16  ;;  %v9989_v0 = vor.u32 %v11587_v48, %v9852_v55  ;;  %v11588_v52 = vshll.u32 %v9676_v10, 16  ;;  %v11591_v48 = vld [vmem:[#allocation10_spill] sm:$0xff] }
 0x34f   : > { %v9983_v47 = vor.u32 %v11585_v58, %v9850_v56  ;;  %v4742_v58 = vrot.slane %v4740_v40, 4  ;;  %v11590_v49 = vshll.u32 %v9688_v62, 16  ;;  %v11592_v15 = vshll.u32 %v11591_v48, 16  ;;  %v7941_v40 = vld [vmem:[#allocation2] sm:$0xff]   ;;  %v4089_v16 = vld [vmem:[#allocation2 + $0x3c] sm:$0xf] }
 0x350   : > { %v9995_v50 = vor.u32 %v11588_v52, %v9854_v21  ;;  %v4745_v43 = vrot.slane %v4743_v38, 5  ;;  %v4761_v6 = vrot.slane %v4759_v33, 5  ;;  %v3952_v10 = vrot.slane %v9858_v5, 4  ;;  %v11594_v52 = vld [vmem:[#allocation11_spill] sm:$0xff]  ;;  %v7942_v38 = vld [vmem:[#allocation2 + $0xc] sm:$0xff]   ;;  %4619 = vst.msk [vmem:[#allocation3] sm:$0xff] %vm1244_vm15, %v7941_v40 }
 0x351   : > { %11586 = vst [vmem:[#allocation23_spill] sm:$0xff] %v9983_v47  ;;  %v3942_v11 = vor.u32 %v11590_v49, %v9856_v31  ;;  %v10005_v19 = vor.u32 %v11592_v15, %v9858_v5  ;;  %v7944_v33 = vld [vmem:[#allocation2 + $0x18] sm:$0xff]   ;;  %v4075_v55 = vld [vmem:[#allocation2 + $0x24] sm:$0xf]  ;;  %v4079_v47 = vld [vmem:[#allocation2 + $0x2c] sm:$0x1] }
 0x352   : > { %11589 = vst [vmem:[#allocation24_spill] sm:$0xff] %v9995_v50  ;;  %v11595_v50 = vshll.u32 %v11594_v52, 16  ;;  %v4746_v62 = vor.u32 %v4745_v43, %v4742_v58  ;;  %v4762_v7 = vsel %vm8140_vm14, %v9932_v57, %v4761_v6  ;;  %v11597_v15 = vld [vmem:[#allocation12_spill] sm:$0xff]  ;;  %v3969_v52 = vrot.slane %v9863_v28, 4  ;;  %v11601_v43 = vld [vmem:[#allocation14_spill] sm:$0xff]  ;;  %4620 = vst.msk [vmem:[#allocation3 + $0x8] sm:$0xff] %vm1244_vm15, %v7942_v38 }
 0x353   : > { %11593 = vst [vmem:[#allocation10_spill] sm:$0xff] %v10005_v19  ;;  %v11598_v19 = vshll.u32 %v11597_v15, 16  ;;  %v11602_v58 = vshll.u32 %v11601_v43, 16  ;;  %4621 = vst.msk [vmem:[#allocation3 + $0x10] sm:$0xff] %vm1244_vm15, %v7944_v33  ;;  %v10033_v57 = vld [vmem:[#allocation2 + $0x30] sm:$0xf] }
 0x354   : > { %v3959_v37 = vor.u32 %v11595_v50, %v9861_v2  ;;  %v11599_v50 = vld [vmem:[#allocation13_spill] sm:$0xff]  ;;  %v4003_v6 = vrot.slane %v9867_v32, 4  ;;  %v4100_v40 = vld [vmem:[#allocation2 + $0x50] sm:$0x1]  ;;  %v4093_v48 = vld [vmem:[#allocation2 + $0x44] sm:$0x1] }
 0x355   : > { %v10018_v5 = vor.u32 %v11598_v19, %v9863_v28  ;;  %v11600_v31 = vshll.u32 %v11599_v50, 16  ;;  %v10028_v41 = vor.u32 %v11602_v58, %v9867_v32  ;;  %v4086_v28 = vld [vmem:[#allocation2 + $0x38] sm:$0x1]  ;;  %v4747_v19 = vrot.slane %v4746_v62, 4  ;;  %v10040_v58 = vld [vmem:[#allocation2 + $0x48] sm:$0xf] }
 0x356   : > { %v11606_v38 = vrot.slane %v9791_v18, 4  ;;  %v4076_v32 = vsel %vm8042_vm6, %v9874_v24, %v4075_v55  ;;  %v11610_v43 = vrot.slane %v9800_v22, 4  ;;  %v10061_v18 = vld [vmem:[#allocation2 + $0x54] sm:$0xf]  ;;  %v11612_v24 = vrot.slane %v9818_v51, 4 }
 0x357   : > { %v3976_v39 = vor.u32 %v11600_v31, %v9865_v13  ;;  %11603 = vst [vmem:[#allocation11_spill] sm:$0xff] %v10028_v41  ;;  %v11604_v31 = vld [vmem:[#allocation15_spill] sm:$0xff]  ;;  %v10059_v13 = vld [vmem:[#allocation2 + $0x60] sm:$0xf]  ;;  %v4752_v55 = vsel %vm8140_vm14, %v4747_v19, %v9886_v12  ;;  %4077 = vst [vmem:[#allocation2 + $0x24] sm:$0xf] %v4076_v32  ;;  %v3960_v32 = vsel %vm8036_vm5, %v3952_v10, %v3959_v37 }
 0x358   : > { %v11605_v15 = vshll.u32 %v11604_v31, 16  ;;  %v3790_v41 = vsel %vm8036_vm5, %v11606_v38, %v9880_v63  ;;  %v11609_v31 = vrot.slane %v9796_v1, 4  ;;  %v4114_v63 = vld [vmem:[#allocation2 + $0x68] sm:$0x1]  ;;  %v4107_v38 = vld [vmem:[#allocation2 + $0x5c] sm:$0x1]  ;;  %v4090_v37 = vsel %vm8042_vm6, %v9904_v30, %v4089_v16 }
 0x359   : > { %4078 = vst.msk [vmem:[#allocation2 + $0x28] sm:$0xf] %vm678_vm2, %v3790_v41  ;;  %v11611_v1 = vrot.slane %v9808_v17, 4  ;;  %v10083_v41 = vld [vmem:[#allocation2 + $0x78] sm:$0xf]  ;;  %v11614_v51 = vrot.slane %v9834_v20, 4  ;;  %v4097_v16 = vsel %vm8042_vm6, %v9917_v3, %v10040_v58  ;;  %v4111_v58 = vsel %vm8042_vm6, %v9943_v9, %v10059_v13 }
 0x35a   : > { %v4010_v50 = vor.u32 %v11605_v15, %v9869_v26  ;;  %v4080_v15 = vsel %vm8049_vm7, %v11609_v31, %v4079_v47  ;;  %v3807_v26 = vsel %vm8036_vm5, %v11610_v43, %v9898_v34  ;;  %v3841_v34 = vsel %vm8036_vm5, %v11612_v24, %v9923_v46  ;;  %v10085_v17 = vld [vmem:[#allocation2 + $0x6c] sm:$0xf]  ;;  %v4128_v19 = vld [vmem:[#allocation2 + $0x80] sm:$0x1]  ;;  %v4121_v20 = vld [vmem:[#allocation2 + $0x74] sm:$0x1] }
 0x35b   : > { %4081 = vst [vmem:[#allocation2 + $0x2c] sm:$0x1] %v4080_v15  ;;  %v3824_v22 = vsel %vm8036_vm5, %v11611_v1, %v9910_v53  ;;  %v11613_v47 = vrot.slane %v9826_v42, 4  ;;  %4085 = vst.msk [vmem:[#allocation2 + $0x34] sm:$0xf] %vm678_vm2, %v3807_v26  ;;  %v7421_v53 = vcombine.low %v4752_v55, %v4762_v7  ;;  %v3875_v46 = vsel %vm8036_vm5, %v11614_v51, %v9952_v14  ;;  %v11629_v1 = vld [vmem:[#allocation23_spill] sm:$0xff] }
 0x35c   : > { %v11615_v42 = vrot.slane %v9842_v36, 4  ;;  %v11616_v26 = vrot.slane %v9846_v25, 4  ;;  %4092 = vst.msk [vmem:[#allocation2 + $0x40] sm:$0xf] %vm678_vm2, %v3824_v22  ;;  %4099 = vst.msk [vmem:[#allocation2 + $0x4c] sm:$0xf] %vm678_vm2, %v3841_v34  ;;  %v3977_v31 = vsel %vm8036_vm5, %v3969_v52, %v3976_v39 }
 0x35d   : > { %v3858_v12 = vsel %vm8036_vm5, %v11613_v47, %v9937_v45  ;;  %v10105_v14 = vld [vmem:[#allocation2 + $0x90] sm:$0xf]  ;;  %v10107_v7 = vld [vmem:[#allocation2 + $0x84] sm:$0xf]  ;;  %v11617_v36 = vrot.slane %v9850_v56, 4  ;;  %5181 = vrot.lane.b32.xlu0 %v7421_v53, %s7976_s25  ;;  %v11619_v39 = vrot.slane %v9804_v27, 4 }
 0x35e   : > { %v3892_v45 = vsel %vm8036_vm5, %v11615_v42, %v9964_v44  ;;  %v3909_v43 = vsel %vm8036_vm5, %v11616_v26, %v9977_v8  ;;  %4106 = vst.msk [vmem:[#allocation2 + $0x58] sm:$0xf] %vm678_vm2, %v3858_v12  ;;  %v11618_v44 = vrot.slane %v9854_v21, 4  ;;  %4113 = vst.msk [vmem:[#allocation2 + $0x64] sm:$0xf] %vm678_vm2, %v3875_v46  ;;  %v4011_v21 = vsel %vm8036_vm5, %v4003_v6, %v4010_v50  ;;  %v11630_v53 = vld [vmem:[#allocation18_spill] sm:$0xff] }
 0x35f   : > { %v3926_v25 = vsel %vm8036_vm5, %v11617_v36, %v9989_v0  ;;  %4120 = vst.msk [vmem:[#allocation2 + $0x70] sm:$0xf] %vm678_vm2, %v3892_v45  ;;  %4127 = vst.msk [vmem:[#allocation2 + $0x7c] sm:$0xf] %vm678_vm2, %v3909_v43  ;;  %v4142_v56 = vld [vmem:[#allocation2 + $0x98] sm:$0x1]  ;;  %v4083_v0 = vsel %vm8042_vm6, %v9892_v4, %v10033_v57  ;;  %v4104_v50 = vsel %vm8042_vm6, %v9929_v59, %v10061_v18 }
 0x360   : > { %v3943_v8 = vsel %vm8036_vm5, %v11618_v44, %v3942_v11  ;;  %v4135_v15 = vld [vmem:[#allocation2 + $0x8c] sm:$0x1]  ;;  %v4087_v11 = vsel %vm8049_vm7, %v11619_v39, %v4086_v28  ;;  %4134 = vst.msk [vmem:[#allocation2 + $0x88] sm:$0xf] %vm678_vm2, %v3926_v25  ;;  %4148 = vst.msk [vmem:[#allocation2 + $0xa0] sm:$0xf] %vm678_vm2, %v3960_v32  ;;  %v4118_v18 = vsel %vm8042_vm6, %v9958_v54, %v10085_v17 }
 0x361   : > { %4141 = vst.msk [vmem:[#allocation2 + $0x94] sm:$0xf] %vm678_vm2, %v3943_v8  ;;  %4155 = vst.msk [vmem:[#allocation2 + $0xac] sm:$0xf] %vm678_vm2, %v3977_v31  ;;  %v7943_v4 = vld [vmem:[%s11495_s3 + $0x8] sm:$0x3f]   ;;  %v4132_v22 = vsel %vm8042_vm6, %v11629_v1, %v10107_v7 }
 0x362   : > { %v4152_v27 = vld [vmem:[#allocation2 + $0xa8] sm:$0xf]  ;;  %v4145_v10 = vld [vmem:[#allocation2 + $0x9c] sm:$0xf]  ;;  %v4156_v52 = vld [vmem:[#allocation2 + $0xb0] sm:$0x1]  ;;  %7907 = vmatprep.subr.msk.bf16.mxu0 %vm2386_vm3, %v7943_v4 }
 0x363   : > { %v11620_v57 = vrot.slane %v9814_v35, 4  ;;  %v11621_v28 = vrot.slane %v9822_v23, 4  ;;  %4084 = vst [vmem:[#allocation2 + $0x30] sm:$0xf] %v4083_v0  ;;  %4088 = vst [vmem:[#allocation2 + $0x38] sm:$0x1] %v4087_v11  ;;  %v4153_v31 = vsel %vm8042_vm6, %v10018_v5, %v4152_v27 }
 0x364   : > { %4091 = vst [vmem:[#allocation2 + $0x3c] sm:$0xf] %v4090_v37  ;;  %4169 = vst.msk [vmem:[#allocation2 + $0xc4] sm:$0xf] %vm678_vm2, %v4011_v21  ;;  %v4149_v35 = vld [vmem:[#allocation2 + $0xa4] sm:$0x1] }
 0x365   : > { %v4094_v30 = vsel %vm8049_vm7, %v11620_v57, %v4093_v48  ;;  %v4101_v6 = vsel %vm8049_vm7, %v11621_v28, %v4100_v40  ;;  %v4166_v48 = vld [vmem:[#allocation2 + $0xc0] sm:$0xf]  ;;  %v4170_v33 = vld [vmem:[#allocation2 + $0xc8] sm:$0x1]  ;;  %v11622_v3 = vrot.slane %v9830_v60, 4  ;;  %v11623_v59 = vrot.slane %v9840_v61, 4 }
 0x366   : > { %4095 = vst [vmem:[#allocation2 + $0x44] sm:$0x1] %v4094_v30  ;;  %4098 = vst [vmem:[#allocation2 + $0x48] sm:$0xf] %v4097_v16  ;;  %v11624_v60 = vld [vmem:[#allocation16_spill] sm:$0xff]  ;;  %v11626_v61 = vld [vmem:[#allocation22_spill] sm:$0xff] }
 0x367   : > { %v4108_v23 = vsel %vm8049_vm7, %v11622_v3, %v4107_v38  ;;  %v4115_v40 = vsel %vm8049_vm7, %v11623_v59, %v4114_v63  ;;  %4102 = vst [vmem:[#allocation2 + $0x50] sm:$0x1] %v4101_v6  ;;  %4105 = vst [vmem:[#allocation2 + $0x54] sm:$0xf] %v4104_v50  ;;  %v11625_v38 = vrot.slane %v11624_v60, 4  ;;  %v4125_v9 = vsel %vm8042_vm6, %v11626_v61, %v10083_v41  ;;  %v11627_v63 = vld [vmem:[#allocation17_spill] sm:$0xff] }
 0x368   : > { %v11628_v55 = vrot.slane %v11627_v63, 4  ;;  %v10196_v24 = vld [vmem:[#allocation2 + $0x18] sm:$0xe]  ;;  %v10198_v34 = vld [vmem:[#allocation2 + $0x1c] sm:$0xf]  ;;  %v11632_v46 = vld [vmem:[#allocation24_spill] sm:$0xff] }
 0x369   : > { %v4122_v13 = vsel %vm8049_vm7, %v11625_v38, %v4121_v20  ;;  %v10200_v47 = vld [vmem:[#allocation2 + $0x20] sm:$0x1]  ;;  %4109 = vst [vmem:[#allocation2 + $0x5c] sm:$0x1] %v4108_v23  ;;  %4112 = vst [vmem:[#allocation2 + $0x60] sm:$0xf] %v4111_v58  ;;  %v4139_v42 = vsel %vm8042_vm6, %v11632_v46, %v10105_v14 }
 0x36a   : > { %v4129_v54 = vsel %vm8049_vm7, %v11628_v55, %v4128_v19  ;;  %4116 = vst [vmem:[#allocation2 + $0x68] sm:$0x1] %v4115_v40  ;;  %4119 = vst [vmem:[#allocation2 + $0x6c] sm:$0xf] %v4118_v18  ;;  %v4190_v12 = vld [vmem:[#allocation2 + $0x24] sm:$0x2] }
 0x36b   : > { %v4286_v41 = vld [vmem:[#allocation2 + $0x24] sm:$0x1]  ;;  %v4334_v17 = vld [vmem:[#allocation2 + $0x28] sm:$0x8]  ;;  %v11631_v19 = vrot.slane %v11630_v53, 4  ;;  %v11633_v45 = vld [vmem:[#allocation19_spill] sm:$0xff] }
 0x36c   : > { %v11634_v26 = vrot.slane %v11633_v45, 4  ;;  %v11635_v20 = vld [vmem:[#allocation10_spill] sm:$0xff]  ;;  %4123 = vst [vmem:[#allocation2 + $0x74] sm:$0x1] %v4122_v13  ;;  %4126 = vst [vmem:[#allocation2 + $0x78] sm:$0xf] %v4125_v9 }
 0x36d   : > { %v4136_v51 = vsel %vm8049_vm7, %v11631_v19, %v4135_v15  ;;  %v4146_v7 = vsel %vm8042_vm6, %v11635_v20, %v4145_v10  ;;  %4130 = vst [vmem:[#allocation2 + $0x80] sm:$0x1] %v4129_v54  ;;  %4133 = vst [vmem:[#allocation2 + $0x84] sm:$0xf] %v4132_v22  ;;  %v7368_v36 = vrot.slane %v4190_v12, 9  ;;  %v7386_v25 = vrot.slane %v4334_v17, 11 }
 0x36e   : > { %v4143_v43 = vsel %vm8049_vm7, %v11634_v26, %v4142_v56  ;;  %v4430_v44 = vld [vmem:[#allocation2 + $0x2c] sm:$0x1]  ;;  %v4647_v8 = vld [vmem:[#allocation2 + $0x28] sm:$0xf]  ;;  %v11636_v32 = vrot.slane %v9861_v2, 4  ;;  %v11637_v21 = vld [vmem:[#allocation20_spill] sm:$0xff] }
 0x36f   : > { %4137 = vst [vmem:[#allocation2 + $0x8c] sm:$0x1] %v4136_v51  ;;  %4140 = vst [vmem:[#allocation2 + $0x90] sm:$0xf] %v4139_v42  ;;  %v4773_v56 = vshll.u32 %v4647_v8, 16  ;;  %v4777_v15 = vshrl.u32 %v4647_v8, 16  ;;  %v4287_v4 = vsel %vm8049_vm7, %v7368_v36, %v4286_v41  ;;  %v4431_v10 = vsel %vm8084_vm10, %v7386_v25, %v4430_v44 }
 0x370   : > { %v4150_v14 = vsel %vm8049_vm7, %v11636_v32, %v4149_v35  ;;  %4144 = vst [vmem:[#allocation2 + $0x98] sm:$0x1] %v4143_v43  ;;  %4147 = vst [vmem:[#allocation2 + $0x9c] sm:$0xf] %v4146_v7  ;;  %v11638_v0 = vrot.slane %v11637_v21, 4  ;;  %v11639_v11 = vld [vmem:[#allocation11_spill] sm:$0xff] }
 0x371   : > { %v4167_v2 = vsel %vm8042_vm6, %v11639_v11, %v4166_v48  ;;  %4151 = vst [vmem:[#allocation2 + $0xa4] sm:$0x1] %v4150_v14  ;;  %4154 = vst [vmem:[#allocation2 + $0xa8] sm:$0xf] %v4153_v31  ;;  %v10231_v37 = vld [vmem:[#allocation2 + $0x24] sm:$0xe] }
 0x372   : > { %v4157_v39 = vsel %vm8049_vm7, %v11638_v0, %v4156_v52  ;;  %v10233_v5 = vld [vmem:[#allocation2 + $0x28] sm:$0xf]  ;;  %v7439_v62 = vrot.slane %v10196_v24, 9  ;;  %4168 = vst [vmem:[#allocation2 + $0xc0] sm:$0xf] %v4167_v2  ;;  %v10244_v6 = vrot.slane %v4773_v56, 5 }
 0x373   : > { %v11641_v57 = vld [vmem:[#allocation21_spill] sm:$0xff]  ;;  %4158 = vst [vmem:[#allocation2 + $0xb0] sm:$0x1] %v4157_v39  ;;  %v4335_v16 = vld [vmem:[#allocation2 + $0x34] sm:$0x8]  ;;  %v4779_v50 = vrot.slane %v4777_v15, 4 }
 0x374   : > { %v11642_v30 = vrot.slane %v11641_v57, 4  ;;  %v4650_v28 = vld [vmem:[#allocation2 + $0x34] sm:$0xf]  ;;  %4288 = vst [vmem:[#allocation2 + $0x24] sm:$0x1] %v4287_v4  ;;  %v5373_v35 = vrot.slane %v10198_v34, 5 }
 0x375   : > { %4432 = vst [vmem:[#allocation2 + $0x2c] sm:$0x1] %v4431_v10  ;;  %v5376_v48 = vrot.slane %v10200_v47, 5  ;;  %v4191_v3 = vld [vmem:[#allocation2 + $0x30] sm:$0x2]  ;;  %v5380_v23 = vrot.slane %v10233_v5, 5  ;;  %v4780_v40 = vor.u32 %v4779_v50, %v10244_v6 }
 0x376   : > { %v4171_v52 = vsel %vm8049_vm7, %v11642_v30, %v4170_v33  ;;  %v7369_v33 = vrot.slane %v4191_v3, 9  ;;  %v4289_v58 = vld [vmem:[#allocation2 + $0x30] sm:$0x1]  ;;  %v7387_v59 = vrot.slane %v4335_v16, 11  ;;  %v5375_v18 = vrot.slane %v5373_v35, 4 }
 0x377   : > { %4172 = vst [vmem:[#allocation2 + $0xc8] sm:$0x1] %v4171_v52  ;;  %v4433_v60 = vld [vmem:[#allocation2 + $0x38] sm:$0x1]  ;;  %v4797_v38 = vshll.u32 %v4650_v28, 16  ;;  %v7440_v61 = vrot.slane %v10231_v37, 9  ;;  %v5374_v24 = vsel %vm8123_vm13, %v7439_v62, %v5373_v35 }
 0x378   : > { %v4192_v13 = vld [vmem:[#allocation2 + $0x3c] sm:$0x2]  ;;  %v5382_v9 = vrot.slane %v5380_v23, 4  ;;  %v4290_v63 = vsel %vm8049_vm7, %v7369_v33, %v4289_v58  ;;  %v4434_v55 = vsel %vm8084_vm10, %v7387_v59, %v4433_v60  ;;  %v4336_v54 = vld [vmem:[#allocation2 + $0x40] sm:$0x8]  ;;  %v10255_v1 = vrot.slane %v4780_v40, 4 }
 0x379   : > { %v5377_v34 = vsel %vm8123_vm13, %v5375_v18, %v5376_v48  ;;  %4291 = vst [vmem:[#allocation2 + $0x30] sm:$0x1] %v4290_v63  ;;  %4435 = vst [vmem:[#allocation2 + $0x38] sm:$0x1] %v4434_v55  ;;  %v4801_v47 = vshrl.u32 %v4650_v28, 16  ;;  %v7370_v53 = vrot.slane %v4192_v13, 9  ;;  %v10277_v57 = vsel %vm8123_vm13, %v7440_v61, %v5380_v23 }
 0x37a   : > { %v4292_v12 = vld [vmem:[#allocation2 + $0x3c] sm:$0x1]  ;;  %v4436_v41 = vld [vmem:[#allocation2 + $0x44] sm:$0x1]  ;;  %v7457_v17 = vcombine.low %v5374_v24, %v5377_v34  ;;  %v7388_v19 = vrot.slane %v4336_v54, 11  ;;  %v10261_v42 = vrot.slane %v4797_v38, 5 }
 0x37b   : > { %v4653_v51 = vld [vmem:[#allocation2 + $0x40] sm:$0xf]  ;;  %v5261_v46 = vld [vmem:[#allocation2 + $0x30] sm:$0xe]  ;;  %v4803_v45 = vrot.slane %v4801_v47, 4  ;;  %v4293_v44 = vsel %vm8049_vm7, %v7370_v53, %v4292_v12  ;;  %v7945_v11 = vld [vmem:[#allocation2 + $0x24] sm:$0xff]  }
 0x37c   : > { %v4821_v26 = vshll.u32 %v4653_v51, 16  ;;  %v4825_v43 = vshrl.u32 %v4653_v51, 16  ;;  %v5262_v20 = vld [vmem:[#allocation2 + $0x34] sm:$0xf]  ;;  %v4646_v7 = vld [vmem:[#allocation2 + $0x24] sm:$0xf]  ;;  %5541 = vrot.lane.b32.xlu0 %v7457_v17, %s7975_s24  ;;  %v4437_v8 = vsel %vm8084_vm10, %v7388_v19, %v4436_v41 }
 0x37d   : > { %v4648_v36 = vld [vmem:[#allocation2 + $0x2c] sm:$0x1]  ;;  %v4764_v32 = vshrl.u32 %v4646_v7, 16  ;;  %v4767_v14 = vshll.u32 %v4646_v7, 16  ;;  %4294 = vst [vmem:[#allocation2 + $0x3c] sm:$0x1] %v4293_v44  ;;  %v4804_v4 = vor.u32 %v4803_v45, %v10261_v42 }
 0x37e   : > { %v5260_v25 = vld [vmem:[#allocation2 + $0x2c] sm:$0x1]  ;;  %v4783_v31 = vshll.u32 %v4648_v36, 16  ;;  %4438 = vst [vmem:[#allocation2 + $0x44] sm:$0x1] %v4437_v8  ;;  %v10268_v15 = vrot.slane %v4821_v26, 5 }
 0x37f   : > { %v5383_v56 = vrot.slane %v5260_v25, 5  ;;  %v4827_v21 = vrot.slane %v4825_v43, 4  ;;  %v7441_v0 = vrot.slane %v5261_v46, 9  ;;  %v5387_v39 = vrot.slane %v5262_v20, 5  ;;  %4622 = vst.msk [vmem:[#allocation3 + $0x18] sm:$0xff] %vm1244_vm15, %v7945_v11 }
 0x380   : > { %v4766_v2 = vrot.slane %v4764_v32, 4  ;;  %v4769_v37 = vrot.slane %v4767_v14, 5  ;;  %v4785_v10 = vrot.slane %v4783_v31, 5  ;;  %v4649_v30 = vld [vmem:[#allocation2 + $0x30] sm:$0xf]  ;;  %v4805_v38 = vrot.slane %v4804_v4, 4 }
 0x381   : > { %v10272_v5 = vsel %vm8123_vm13, %v5382_v9, %v5383_v56  ;;  %v4651_v52 = vld [vmem:[#allocation2 + $0x38] sm:$0x1]  ;;  %v7947_v62 = vld [vmem:[#allocation2 + $0x30] sm:$0xff]   ;;  %v4788_v50 = vshrl.u32 %v4649_v30, 16  ;;  %v4791_v35 = vshll.u32 %v4649_v30, 16  ;;  %v4828_v33 = vor.u32 %v4827_v21, %v10268_v15 }
 0x382   : > { %v4770_v16 = vor.u32 %v4769_v37, %v4766_v2  ;;  %v7458_v28 = vcombine.low %v10277_v57, %v10272_v5  ;;  %v5263_v48 = vld [vmem:[#allocation2 + $0x38] sm:$0x1]  ;;  %v4807_v3 = vshll.u32 %v4651_v52, 16  ;;  %v5389_v58 = vrot.slane %v5387_v39, 4  ;;  %v10283_v40 = vld [vmem:[#allocation2 + $0x3c] sm:$0xe] }
 0x383   : > { %v5390_v59 = vrot.slane %v5263_v48, 5  ;;  %4623 = vst.msk [vmem:[#allocation3 + $0x20] sm:$0xff] %vm1244_vm15, %v7947_v62  ;;  %v4790_v18 = vrot.slane %v4788_v50, 4  ;;  %v4793_v60 = vrot.slane %v4791_v35, 5  ;;  %v10286_v13 = vld [vmem:[#allocation2 + $0x40] sm:$0xf]  ;;  %v4786_v61 = vsel %vm8140_vm14, %v10255_v1, %v4785_v10 }
 0x384   : > { %v4771_v23 = vrot.slane %v4770_v16, 4  ;;  %v4809_v9 = vrot.slane %v4807_v3, 5  ;;  %v4652_v63 = vld [vmem:[#allocation2 + $0x3c] sm:$0xf]  ;;  %v10293_v54 = vsel %vm8123_vm13, %v7441_v0, %v5387_v39  ;;  %v4193_v17 = vld [vmem:[#allocation2 + $0x48] sm:$0x2] }
 0x385   : > { %v4654_v55 = vld [vmem:[#allocation2 + $0x44] sm:$0x1]  ;;  %v10297_v24 = vsel %vm8123_vm13, %v5389_v58, %v5390_v59  ;;  %v4794_v47 = vor.u32 %v4793_v60, %v4790_v18  ;;  %v4812_v12 = vshrl.u32 %v4652_v63, 16  ;;  %v4815_v41 = vshll.u32 %v4652_v63, 16  ;;  %v4337_v1 = vld [vmem:[#allocation2 + $0x4c] sm:$0x8] }
 0x386   : > { %v4776_v34 = vsel %vm8140_vm14, %v4771_v23, %v10244_v6  ;;  %v4829_v19 = vrot.slane %v4828_v33, 4  ;;  %v4831_v51 = vshll.u32 %v4654_v55, 16  ;;  %v5394_v46 = vrot.slane %v10286_v13, 5  ;;  %v4656_v45 = vld [vmem:[#allocation2 + $0x4c] sm:$0xf]  ;;  %v7948_v26 = vld [vmem:[#allocation2 + $0x3c] sm:$0xff]  }
 0x387   : > { %v7422_v53 = vcombine.low %v4776_v34, %v4786_v61  ;;  %v4795_v43 = vrot.slane %v4794_v47, 4  ;;  %v4814_v20 = vrot.slane %v4812_v12, 4  ;;  %v4817_v7 = vrot.slane %v4815_v41, 5  ;;  %v5266_v36 = vld [vmem:[#allocation2 + $0x44] sm:$0x1]  ;;  %4624 = vst.msk [vmem:[#allocation3 + $0x28] sm:$0xff] %vm1244_vm15, %v7948_v26 }
 0x388   : > { %v7442_v25 = vrot.slane %v10283_v40, 9  ;;  %v4295_v44 = vld [vmem:[#allocation2 + $0x48] sm:$0x1]  ;;  %v4810_v6 = vsel %vm8140_vm14, %v4805_v38, %v4809_v9  ;;  %v4833_v8 = vrot.slane %v4831_v51, 5  ;;  %v7459_v32 = vcombine.low %v10293_v54, %v10297_v24  ;;  %v4439_v31 = vld [vmem:[#allocation2 + $0x50] sm:$0x1] }
 0x389   : > { %5183 = vrot.lane.b32.xlu1 %v7422_v53, %s7976_s25  ;;  %v7371_v14 = vrot.slane %v4193_v17, 9  ;;  %v4194_v56 = vld [vmem:[#allocation2 + $0x54] sm:$0x2]  ;;  %v4800_v21 = vsel %vm8140_vm14, %v4795_v43, %v10261_v42  ;;  %v4818_v0 = vor.u32 %v4817_v7, %v4814_v20  ;;  %v7389_v39 = vrot.slane %v4337_v1, 11  ;;  %v4338_v2 = vld [vmem:[#allocation2 + $0x58] sm:$0x8] }
 0x38a   : > { %v4845_v11 = vshll.u32 %v4656_v45, 16  ;;  %v4659_v37 = vld [vmem:[#allocation2 + $0x58] sm:$0xf]  ;;  %v7423_v4 = vcombine.low %v4800_v21, %v4810_v6  ;;  %v5396_v10 = vrot.slane %v5394_v46, 4  ;;  %v5397_v30 = vrot.slane %v5266_v36, 5 }
 0x38b   : > { %v4296_v52 = vsel %vm8049_vm7, %v7371_v14, %v4295_v44  ;;  %v5267_v62 = vld [vmem:[#allocation2 + $0x48] sm:$0xe]  ;;  %v5268_v16 = vld [vmem:[#allocation2 + $0x4c] sm:$0xf]  ;;  %v4819_v50 = vrot.slane %v4818_v0, 4  ;;  %v4834_v35 = vsel %vm8140_vm14, %v4829_v19, %v4833_v8  ;;  %v4440_v42 = vsel %vm8084_vm10, %v7389_v39, %v4439_v31 }
 0x38c   : > { %4297 = vst [vmem:[#allocation2 + $0x48] sm:$0x1] %v4296_v52  ;;  %v10321_v48 = vrot.slane %v4845_v11, 5  ;;  %v4298_v3 = vld [vmem:[#allocation2 + $0x54] sm:$0x1]  ;;  %5185 = vrot.lane.b32.xlu0 %v7423_v4, %s7976_s25  ;;  %v4849_v59 = vshrl.u32 %v4656_v45, 16  ;;  %v5398_v47 = vsel %vm8123_vm13, %v5396_v10, %v5397_v30  ;;  %v5395_v17 = vsel %vm8123_vm13, %v7442_v25, %v5394_v46 }
 0x38d   : > { %v4442_v33 = vld [vmem:[#allocation2 + $0x5c] sm:$0x1]  ;;  %v10323_v58 = vld [vmem:[#allocation2 + $0x54] sm:$0xe]  ;;  %5543 = vrot.lane.b32.xlu1 %v7458_v28, %s7975_s24  ;;  %4441 = vst [vmem:[#allocation2 + $0x50] sm:$0x1] %v4440_v42  ;;  %v4824_v38 = vsel %vm8140_vm14, %v4819_v50, %v10268_v15  ;;  %v7460_v36 = vcombine.low %v5395_v17, %v5398_v47 }
 0x38e   : > { %v7372_v40 = vrot.slane %v4194_v56, 9  ;;  %v7390_v23 = vrot.slane %v4338_v2, 11  ;;  %v4869_v18 = vshll.u32 %v4659_v37, 16  ;;  %v10330_v60 = vld [vmem:[#allocation2 + $0x58] sm:$0xf]  ;;  %v4873_v61 = vshrl.u32 %v4659_v37, 16 }
 0x38f   : > { %v7443_v9 = vrot.slane %v5267_v62, 9  ;;  %v5401_v63 = vrot.slane %v5268_v16, 5  ;;  %v4195_v55 = vld [vmem:[#allocation2 + $0x60] sm:$0x2]  ;;  %v7424_v54 = vcombine.low %v4824_v38, %v4834_v35  ;;  %v10335_v5 = vrot.slane %v4849_v59, 4 }
 0x390   : > { %v4299_v57 = vsel %vm8049_vm7, %v7372_v40, %v4298_v3  ;;  %v4443_v28 = vsel %vm8084_vm10, %v7390_v23, %v4442_v33  ;;  %v4339_v24 = vld [vmem:[#allocation2 + $0x64] sm:$0x8]  ;;  %v10343_v15 = vrot.slane %v4869_v18, 5  ;;  %v4875_v12 = vrot.slane %v4873_v61, 4  ;;  %v4301_v41 = vld [vmem:[#allocation2 + $0x60] sm:$0x1]  ;;  %5545 = vrot.lane.b32.xlu0 %v7459_v32, %s7975_s24 }
 0x391   : > { %v4662_v34 = vld [vmem:[#allocation2 + $0x64] sm:$0xf]  ;;  %4300 = vst [vmem:[#allocation2 + $0x54] sm:$0x1] %v4299_v57  ;;  %4444 = vst [vmem:[#allocation2 + $0x5c] sm:$0x1] %v4443_v28  ;;  %5187 = vrot.lane.b32.xlu1 %v7424_v54, %s7976_s25  ;;  %v4852_v6 = vor.u32 %v10335_v5, %v10321_v48  ;;  %v10357_v13 = vsel %vm8123_vm13, %v7443_v9, %v5401_v63 }
 0x392   : > { %v5403_v1 = vrot.slane %v5401_v63, 4  ;;  %v7444_v53 = vrot.slane %v10323_v58, 9  ;;  %v7373_v19 = vrot.slane %v4195_v55, 9  ;;  %v4445_v51 = vld [vmem:[#allocation2 + $0x68] sm:$0x1]  ;;  %v5408_v45 = vrot.slane %v10330_v60, 5 }
 0x393   : > { %v7391_v26 = vrot.slane %v4339_v24, 11  ;;  %v4893_v43 = vshll.u32 %v4662_v34, 16  ;;  %v4897_v20 = vshrl.u32 %v4662_v34, 16  ;;  %v4196_v7 = vld [vmem:[#allocation2 + $0x6c] sm:$0x2]  ;;  %v4876_v56 = vor.u32 %v4875_v12, %v10343_v15 }
 0x394   : > { %v4655_v44 = vld [vmem:[#allocation2 + $0x48] sm:$0xf]  ;;  %v4302_v46 = vsel %vm8049_vm7, %v7373_v19, %v4301_v41  ;;  %v4340_v25 = vld [vmem:[#allocation2 + $0x70] sm:$0x8]  ;;  %v4657_v32 = vld [vmem:[#allocation2 + $0x50] sm:$0x1] }
 0x395   : > { %v10361_v8 = vld [vmem:[#allocation2 + $0x70] sm:$0xf]  ;;  %v4836_v14 = vshrl.u32 %v4655_v44, 16  ;;  %v4839_v31 = vshll.u32 %v4655_v44, 16  ;;  %4303 = vst [vmem:[#allocation2 + $0x60] sm:$0x1] %v4302_v46  ;;  %v4446_v21 = vsel %vm8084_vm10, %v7391_v26, %v4445_v51  ;;  %5547 = vrot.lane.b32.xlu1 %v7460_v36, %s7975_s24 }
 0x396   : > { %v7949_v0 = vld [vmem:[#allocation2 + $0x48] sm:$0xff]   ;;  %v4855_v39 = vshll.u32 %v4657_v32, 16  ;;  %v5269_v11 = vld [vmem:[#allocation2 + $0x50] sm:$0x1]  ;;  %4447 = vst [vmem:[#allocation2 + $0x68] sm:$0x1] %v4446_v21 }
 0x397   : > { %v10367_v2 = vrot.slane %v4893_v43, 5  ;;  %v4899_v37 = vrot.slane %v4897_v20, 4  ;;  %v7374_v4 = vrot.slane %v4196_v7, 9  ;;  %v4838_v10 = vrot.slane %v4836_v14, 4  ;;  %v4304_v62 = vld [vmem:[#allocation2 + $0x6c] sm:$0x1] }
 0x398   : > { %v4841_v30 = vrot.slane %v4839_v31, 5  ;;  %v5404_v52 = vrot.slane %v5269_v11, 5  ;;  %v7392_v16 = vrot.slane %v4340_v25, 11  ;;  %4625 = vst.msk [vmem:[#allocation3 + $0x30] sm:$0xff] %vm1244_vm15, %v7949_v0  ;;  %v4857_v50 = vrot.slane %v4855_v39, 5  ;;  %v7950_v9 = vld [vmem:[#allocation2 + $0x54] sm:$0xff]  }
 0x399   : > { %v4658_v35 = vld [vmem:[#allocation2 + $0x54] sm:$0xf]  ;;  %v4660_v42 = vld [vmem:[#allocation2 + $0x5c] sm:$0x1]  ;;  %v4900_v3 = vor.u32 %v4899_v37, %v10367_v2  ;;  %v4305_v33 = vsel %vm8049_vm7, %v7374_v4, %v4304_v62  ;;  %v4917_v59 = vshll.u32 %v10361_v8, 16  ;;  %v4853_v63 = vrot.slane %v4852_v6, 4 }
 0x39a   : > { %v4842_v40 = vor.u32 %v4841_v30, %v4838_v10  ;;  %v4860_v23 = vshrl.u32 %v4658_v35, 16  ;;  %v4863_v18 = vshll.u32 %v4658_v35, 16  ;;  %v4879_v38 = vshll.u32 %v4660_v42, 16  ;;  %v5272_v61 = vld [vmem:[#allocation2 + $0x5c] sm:$0x1]  ;;  %4626 = vst.msk [vmem:[#allocation3 + $0x38] sm:$0xff] %vm1244_vm15, %v7950_v9 }
 0x39b   : > { %4306 = vst [vmem:[#allocation2 + $0x6c] sm:$0x1] %v4305_v33  ;;  %v4877_v55 = vrot.slane %v4876_v56, 4  ;;  %v5410_v54 = vrot.slane %v5408_v45, 4  ;;  %v5411_v5 = vrot.slane %v5272_v61, 5  ;;  %v4858_v12 = vsel %vm8140_vm14, %v4853_v63, %v4857_v50 }
 0x39c   : > { %v4843_v57 = vrot.slane %v4842_v40, 4  ;;  %v4862_v28 = vrot.slane %v4860_v23, 4  ;;  %v4865_v24 = vrot.slane %v4863_v18, 5  ;;  %v4881_v34 = vrot.slane %v4879_v38, 5  ;;  %v4448_v47 = vld [vmem:[#allocation2 + $0x74] sm:$0x1] }
 0x39d   : > { %v5405_v41 = vsel %vm8123_vm13, %v5403_v1, %v5404_v52  ;;  %v4661_v17 = vld [vmem:[#allocation2 + $0x60] sm:$0xf]  ;;  %v10381_v19 = vrot.slane %v4900_v3, 4  ;;  %v4449_v51 = vsel %vm8084_vm10, %v7392_v16, %v4448_v47  ;;  %v10390_v36 = vsel %vm8123_vm13, %v5410_v54, %v5411_v5  ;;  %v4663_v44 = vld [vmem:[#allocation2 + $0x68] sm:$0x1] }
 0x39e   : > { %v5273_v26 = vld [vmem:[#allocation2 + $0x60] sm:$0xe]  ;;  %v4848_v20 = vsel %vm8140_vm14, %v4843_v57, %v10321_v48  ;;  %v4866_v7 = vor.u32 %v4865_v24, %v4862_v28  ;;  %4450 = vst [vmem:[#allocation2 + $0x74] sm:$0x1] %v4449_v51  ;;  %v10392_v1 = vrot.slane %v4917_v59, 5  ;;  %v4884_v25 = vshrl.u32 %v4661_v17, 16 }
 0x39f   : > { %v7951_v43 = vld [vmem:[#allocation2 + $0x60] sm:$0xff]   ;;  %v7425_v46 = vcombine.low %v4848_v20, %v4858_v12  ;;  %v4887_v32 = vshll.u32 %v4661_v17, 16  ;;  %v4903_v14 = vshll.u32 %v4663_v44, 16  ;;  %v4882_v48 = vsel %vm8140_vm14, %v4877_v55, %v4881_v34  ;;  %v5275_v21 = vld [vmem:[#allocation2 + $0x68] sm:$0x1] }
 0x3a0   : > { %v5274_v6 = vld [vmem:[#allocation2 + $0x64] sm:$0xf]  ;;  %4627 = vst.msk [vmem:[#allocation3 + $0x40] sm:$0xff] %vm1244_vm15, %v7951_v43  ;;  %v4867_v31 = vrot.slane %v4866_v7, 4  ;;  %v4921_v56 = vshrl.u32 %v10361_v8, 16  ;;  %v7445_v0 = vrot.slane %v5273_v26, 9  ;;  %v7461_v8 = vcombine.low %v10357_v13, %v5405_v41 }
 0x3a1   : > { %5189 = vrot.lane.b32.xlu0 %v7425_v46, %s7976_s25  ;;  %v4886_v39 = vrot.slane %v4884_v25, 4  ;;  %v4889_v11 = vrot.slane %v4887_v32, 5  ;;  %v4905_v37 = vrot.slane %v4903_v14, 5  ;;  %v5415_v10 = vrot.slane %v5274_v6, 5  ;;  %v10410_v23 = vld [vmem:[#allocation2 + $0x6c] sm:$0xe] }
 0x3a2   : > { %v4664_v4 = vld [vmem:[#allocation2 + $0x6c] sm:$0xf]  ;;  %v4872_v30 = vsel %vm8140_vm14, %v4867_v31, %v10343_v15  ;;  %v4923_v16 = vrot.slane %v4921_v56, 4  ;;  %v5418_v3 = vrot.slane %v5275_v21, 5  ;;  %v5409_v33 = vsel %vm8123_vm13, %v7444_v53, %v5408_v45  ;;  %v10412_v18 = vld [vmem:[#allocation2 + $0x70] sm:$0xf] }
 0x3a3   : > { %v4908_v52 = vshrl.u32 %v4664_v4, 16  ;;  %v4911_v62 = vshll.u32 %v4664_v4, 16  ;;  %v7952_v50 = vld [vmem:[#allocation2 + $0x6c] sm:$0xff]   ;;  %v7426_v35 = vcombine.low %v4872_v30, %v4882_v48  ;;  %v4890_v42 = vor.u32 %v4889_v11, %v4886_v39  ;;  %v4197_v38 = vld [vmem:[#allocation2 + $0x78] sm:$0x2] }
 0x3a4   : > { %v4924_v15 = vor.u32 %v4923_v16, %v10392_v1  ;;  %4628 = vst.msk [vmem:[#allocation3 + $0x48] sm:$0xff] %vm1244_vm15, %v7952_v50  ;;  %v7462_v58 = vcombine.low %v5409_v33, %v10390_v36  ;;  %v4906_v53 = vsel %vm8140_vm14, %v10381_v19, %v4905_v37  ;;  %v5417_v13 = vrot.slane %v5415_v10, 4  ;;  %v4341_v5 = vld [vmem:[#allocation2 + $0x7c] sm:$0x8]  ;;  %v4307_v12 = vld [vmem:[#allocation2 + $0x78] sm:$0x1] }
 0x3a5   : > { %v4910_v59 = vrot.slane %v4908_v52, 4  ;;  %v4913_v40 = vrot.slane %v4911_v62, 5  ;;  %5191 = vrot.lane.b32.xlu1 %v7426_v35, %s7976_s25  ;;  %5549 = vrot.lane.b32.xlu0 %v7461_v8, %s7975_s24  ;;  %v4891_v60 = vrot.slane %v4890_v42, 4  ;;  %v4666_v45 = vld [vmem:[#allocation2 + $0x74] sm:$0x1]  ;;  %v5416_v54 = vsel %vm8123_vm13, %v7445_v0, %v5415_v10 }
 0x3a6   : > { %v5278_v61 = vld [vmem:[#allocation2 + $0x74] sm:$0x1]  ;;  %v4925_v63 = vrot.slane %v4924_v15, 4  ;;  %v4927_v55 = vshll.u32 %v4666_v45, 16  ;;  %v4668_v57 = vld [vmem:[#allocation2 + $0x7c] sm:$0xf]  ;;  %v5419_v24 = vsel %vm8123_vm13, %v5417_v13, %v5418_v3 }
 0x3a7   : > { %v4914_v9 = vor.u32 %v4913_v40, %v4910_v59  ;;  %v4896_v28 = vsel %vm8140_vm14, %v4891_v60, %v10367_v2  ;;  %v5422_v34 = vrot.slane %v10412_v18, 5  ;;  %v5425_v47 = vrot.slane %v5278_v61, 5  ;;  %v4198_v41 = vld [vmem:[#allocation2 + $0x84] sm:$0x2]  ;;  %v4451_v43 = vld [vmem:[#allocation2 + $0x80] sm:$0x1] }
 0x3a8   : > { %v7427_v17 = vcombine.low %v4896_v28, %v4906_v53  ;;  %v4929_v51 = vrot.slane %v4927_v55, 5  ;;  %v7375_v26 = vrot.slane %v4197_v38, 9  ;;  %v4342_v20 = vld [vmem:[#allocation2 + $0x88] sm:$0x8]  ;;  %v7446_v7 = vrot.slane %v10410_v23, 9 }
 0x3a9   : > { %v4915_v19 = vrot.slane %v4914_v9, 4  ;;  %5551 = vrot.lane.b32.xlu1 %v7462_v58, %s7975_s24  ;;  %v5424_v36 = vrot.slane %v5422_v34, 4  ;;  %v7393_v2 = vrot.slane %v4341_v5, 11  ;;  %v4941_v44 = vshll.u32 %v4668_v57, 16  ;;  %v4671_v6 = vld [vmem:[#allocation2 + $0x88] sm:$0xf] }
 0x3aa   : > { %5193 = vrot.lane.b32.xlu0 %v7427_v17, %s7976_s25  ;;  %v4930_v25 = vsel %vm8140_vm14, %v4925_v63, %v4929_v51  ;;  %v4308_v32 = vsel %vm8049_vm7, %v7375_v26, %v4307_v12  ;;  %v4945_v14 = vshrl.u32 %v4668_v57, 16  ;;  %v5279_v31 = vld [vmem:[#allocation2 + $0x78] sm:$0xe]  ;;  %v5280_v48 = vld [vmem:[#allocation2 + $0x7c] sm:$0xf]  ;;  %v7463_v21 = vcombine.low %v5416_v54, %v5419_v24 }
 0x3ab   : > { %v4920_v46 = vsel %vm8140_vm14, %v4915_v19, %v10392_v1  ;;  %4309 = vst [vmem:[#allocation2 + $0x78] sm:$0x1] %v4308_v32  ;;  %v4452_v0 = vsel %vm8084_vm10, %v7393_v2, %v4451_v43  ;;  %v10441_v39 = vrot.slane %v4941_v44, 5  ;;  %v4310_v11 = vld [vmem:[#allocation2 + $0x84] sm:$0x1]  ;;  %v5426_v4 = vsel %vm8123_vm13, %v5424_v36, %v5425_v47 }
 0x3ac   : > { %v7428_v56 = vcombine.low %v4920_v46, %v4930_v25  ;;  %v4454_v37 = vld [vmem:[#allocation2 + $0x8c] sm:$0x1]  ;;  %v10443_v1 = vld [vmem:[#allocation2 + $0x84] sm:$0xe]  ;;  %4453 = vst [vmem:[#allocation2 + $0x80] sm:$0x1] %v4452_v0  ;;  %v5423_v3 = vsel %vm8123_vm13, %v7446_v7, %v5422_v34 }
 0x3ad   : > { %v4947_v10 = vrot.slane %v4945_v14, 4  ;;  %v7376_v30 = vrot.slane %v4198_v41, 9  ;;  %v7394_v52 = vrot.slane %v4342_v20, 11  ;;  %v4199_v62 = vld [vmem:[#allocation2 + $0x90] sm:$0x2]  ;;  %v4965_v16 = vshll.u32 %v4671_v6, 16 }
 0x3ae   : > { %5195 = vrot.lane.b32.xlu1 %v7428_v56, %s7976_s25  ;;  %v4969_v50 = vshrl.u32 %v4671_v6, 16  ;;  %v7447_v35 = vrot.slane %v5279_v31, 9  ;;  %v5429_v8 = vrot.slane %v5280_v48, 5  ;;  %v4343_v42 = vld [vmem:[#allocation2 + $0x94] sm:$0x8]  ;;  %5553 = vrot.lane.b32.xlu0 %v7463_v21, %s7975_s24  ;;  %v7464_v38 = vcombine.low %v5423_v3, %v5426_v4 }
 0x3af   : > { %v4948_v33 = vor.u32 %v4947_v10, %v10441_v39  ;;  %v4311_v59 = vsel %vm8049_vm7, %v7376_v30, %v4310_v11  ;;  %v4455_v40 = vsel %vm8084_vm10, %v7394_v52, %v4454_v37  ;;  %v10456_v15 = vld [vmem:[#allocation2 + $0x88] sm:$0xf]  ;;  %v4674_v23 = vld [vmem:[#allocation2 + $0x94] sm:$0xf]  ;;  %v4200_v18 = vld [vmem:[#allocation2 + $0x9c] sm:$0x2] }
 0x3b0   : > { %4312 = vst [vmem:[#allocation2 + $0x84] sm:$0x1] %v4311_v59  ;;  %4456 = vst [vmem:[#allocation2 + $0x8c] sm:$0x1] %v4455_v40  ;;  %v10458_v58 = vrot.slane %v4965_v16, 5  ;;  %v4971_v60 = vrot.slane %v4969_v50, 4  ;;  %v10462_v13 = vsel %vm8123_vm13, %v7447_v35, %v5429_v8 }
 0x3b1   : > { %v4313_v53 = vld [vmem:[#allocation2 + $0x90] sm:$0x1]  ;;  %v4457_v45 = vld [vmem:[#allocation2 + $0x98] sm:$0x1]  ;;  %v7448_v61 = vrot.slane %v10443_v1, 9  ;;  %v7377_v9 = vrot.slane %v4199_v62, 9 }
 0x3b2   : > { %v7395_v63 = vrot.slane %v4343_v42, 11  ;;  %v4344_v55 = vld [vmem:[#allocation2 + $0xa0] sm:$0x8]  ;;  %5555 = vrot.lane.b32.xlu1 %v7464_v38, %s7975_s24  ;;  %v5431_v54 = vrot.slane %v5429_v8, 4  ;;  %v4989_v5 = vshll.u32 %v4674_v23, 16  ;;  %v4993_v57 = vshrl.u32 %v4674_v23, 16 }
 0x3b3   : > { %v7378_v28 = vrot.slane %v4200_v18, 9  ;;  %v4316_v24 = vld [vmem:[#allocation2 + $0x9c] sm:$0x1]  ;;  %v4677_v34 = vld [vmem:[#allocation2 + $0xa0] sm:$0xf]  ;;  %v4949_v12 = vrot.slane %v4948_v33, 4  ;;  %v4314_v17 = vsel %vm8049_vm7, %v7377_v9, %v4313_v53  ;;  %v4972_v7 = vor.u32 %v4971_v60, %v10458_v58  ;;  %v5178_v9 = vpop.permute.xlu0 %5177 }
 0x3b4   : > { %v4667_v47 = vld [vmem:[#allocation2 + $0x78] sm:$0xf]  ;;  %v5436_v41 = vrot.slane %v10456_v15, 5  ;;  %v4458_v19 = vsel %vm8084_vm10, %v7395_v63, %v4457_v45  ;;  %v4669_v26 = vld [vmem:[#allocation2 + $0x80] sm:$0x1]  ;;  %v10472_v36 = vrot.slane %v4989_v5, 5 }
 0x3b5   : > { %v7953_v51 = vld [vmem:[#allocation2 + $0x78] sm:$0xff]   ;;  %v4932_v43 = vshrl.u32 %v4667_v47, 16  ;;  %v4935_v20 = vshll.u32 %v4667_v47, 16  ;;  %4315 = vst [vmem:[#allocation2 + $0x90] sm:$0x1] %v4314_v17  ;;  %v4951_v2 = vshll.u32 %v4669_v26, 16  ;;  %v4317_v46 = vsel %vm8049_vm7, %v7378_v28, %v4316_v24 }
 0x3b6   : > { %4459 = vst [vmem:[#allocation2 + $0x98] sm:$0x1] %v4458_v19  ;;  %v5281_v44 = vld [vmem:[#allocation2 + $0x80] sm:$0x1]  ;;  %v4995_v6 = vrot.slane %v4993_v57, 4  ;;  %v7396_v25 = vrot.slane %v4344_v55, 11  ;;  %v10487_v18 = vsel %vm8123_vm13, %v7448_v61, %v5436_v41 }
 0x3b7   : > { %4629 = vst.msk [vmem:[#allocation3 + $0x50] sm:$0xff] %vm1244_vm15, %v7953_v51  ;;  %v4934_v32 = vrot.slane %v4932_v43, 4  ;;  %v4937_v14 = vrot.slane %v4935_v20, 5  ;;  %v5432_v31 = vrot.slane %v5281_v44, 5  ;;  %4318 = vst [vmem:[#allocation2 + $0x9c] sm:$0x1] %v4317_v46 }
 0x3b8   : > { %v4460_v48 = vld [vmem:[#allocation2 + $0xa4] sm:$0x1]  ;;  %v5013_v56 = vshll.u32 %v4677_v34, 16  ;;  %v4953_v21 = vrot.slane %v4951_v2, 5  ;;  %v4672_v11 = vld [vmem:[#allocation2 + $0x8c] sm:$0x1]  ;;  %v4996_v37 = vor.u32 %v4995_v6, %v10472_v36  ;;  %v5538_v6 = vpop.permute.xlu0 %5537 }
 0x3b9   : > { %v4670_v0 = vld [vmem:[#allocation2 + $0x84] sm:$0xf]  ;;  %v4461_v1 = vsel %vm8084_vm10, %v7396_v25, %v4460_v48  ;;  %v5017_v4 = vshrl.u32 %v4677_v34, 16  ;;  %v4938_v10 = vor.u32 %v4937_v14, %v4934_v32  ;;  %v4975_v62 = vshll.u32 %v4672_v11, 16  ;;  %v5284_v16 = vld [vmem:[#allocation2 + $0x8c] sm:$0x1] }
 0x3ba   : > { %v4956_v30 = vshrl.u32 %v4670_v0, 16  ;;  %v4959_v52 = vshll.u32 %v4670_v0, 16  ;;  %4462 = vst [vmem:[#allocation2 + $0xa4] sm:$0x1] %v4461_v1  ;;  %v7954_v50 = vld [vmem:[#allocation2 + $0x84] sm:$0xff]   ;;  %v4973_v35 = vrot.slane %v4972_v7, 4  ;;  %v5433_v8 = vsel %vm8123_vm13, %v5431_v54, %v5432_v31 }
 0x3bb   : > { %v5438_v42 = vrot.slane %v5436_v41, 4  ;;  %v5439_v3 = vrot.slane %v5284_v16, 5  ;;  %v4939_v33 = vrot.slane %v4938_v10, 4  ;;  %v4977_v15 = vrot.slane %v4975_v62, 5  ;;  %4630 = vst.msk [vmem:[#allocation3 + $0x58] sm:$0xff] %vm1244_vm15, %v7954_v50 }
 0x3bc   : > { %v4958_v59 = vrot.slane %v4956_v30, 4  ;;  %v4961_v40 = vrot.slane %v4959_v52, 5  ;;  %v4954_v23 = vsel %vm8140_vm14, %v4949_v12, %v4953_v21  ;;  %v4673_v38 = vld [vmem:[#allocation2 + $0x90] sm:$0xf]  ;;  %v10489_v53 = vrot.slane %v5013_v56, 5  ;;  %5231 = vst.msk [vmem:[#allocation3] sm:$0xff] %vm1860_vm0, %v5178_v9 }
 0x3bd   : > { %v4675_v60 = vld [vmem:[#allocation2 + $0x98] sm:$0x1]  ;;  %v5019_v45 = vrot.slane %v5017_v4, 4  ;;  %v4944_v63 = vsel %vm8140_vm14, %v4939_v33, %v10441_v39  ;;  %v7465_v54 = vcombine.low %v10462_v13, %v5433_v8  ;;  %v10495_v5 = vrot.slane %v4996_v37, 4  ;;  %v10498_v47 = vld [vmem:[#allocation2 + $0x90] sm:$0xe] }
 0x3be   : > { %v4962_v55 = vor.u32 %v4961_v40, %v4958_v59  ;;  %v7429_v57 = vcombine.low %v4944_v63, %v4954_v23  ;;  %v4980_v61 = vshrl.u32 %v4673_v38, 16  ;;  %v4983_v28 = vshll.u32 %v4673_v38, 16  ;;  %v4676_v34 = vld [vmem:[#allocation2 + $0x9c] sm:$0xf]  ;;  %v7955_v12 = vld [vmem:[#allocation2 + $0x90] sm:$0xff]   ;;  %5591 = vst.msk [vmem:[#allocation3] sm:$0xff] %vm2224_vm1, %v5538_v6 }
 0x3bf   : > { %v4999_v24 = vshll.u32 %v4675_v60, 16  ;;  %v5440_v17 = vsel %vm8123_vm13, %v5438_v42, %v5439_v3  ;;  %v5004_v39 = vshrl.u32 %v4676_v34, 16  ;;  %v5007_v19 = vshll.u32 %v4676_v34, 16  ;;  %v5286_v51 = vld [vmem:[#allocation2 + $0x94] sm:$0xf]  ;;  %v7956_v13 = vld [vmem:[#allocation2 + $0x9c] sm:$0xff]  }
 0x3c0   : > { %v4963_v41 = vrot.slane %v4962_v55, 4  ;;  %5197 = vrot.lane.b32.xlu0 %v7429_v57, %s7976_s25  ;;  %v4978_v26 = vsel %vm8140_vm14, %v4973_v35, %v4977_v15  ;;  %v4982_v43 = vrot.slane %v4980_v61, 4  ;;  %v4985_v20 = vrot.slane %v4983_v28, 5  ;;  %v5287_v44 = vld [vmem:[#allocation2 + $0x98] sm:$0x1]  ;;  %4631 = vst.msk [vmem:[#allocation3 + $0x60] sm:$0xff] %vm1244_vm15, %v7955_v12  ;;  %v5180_v57 = vpop.permute.xlu1 %5179 }
 0x3c1   : > { %v4678_v7 = vld [vmem:[#allocation2 + $0xa4] sm:$0x1]  ;;  %v5020_v2 = vor.u32 %v5019_v45, %v10489_v53  ;;  %v5001_v25 = vrot.slane %v4999_v24, 5  ;;  %v5006_v32 = vrot.slane %v5004_v39, 4  ;;  %v5009_v14 = vrot.slane %v5007_v19, 5  ;;  %4632 = vst.msk [vmem:[#allocation3 + $0x68] sm:$0xff] %vm1244_vm15, %v7956_v13 }
 0x3c2   : > { %v4968_v46 = vsel %vm8140_vm14, %v4963_v41, %v10458_v58  ;;  %v10510_v31 = vld [vmem:[#allocation2 + $0xa0] sm:$0xf]  ;;  %v7466_v56 = vcombine.low %v10487_v18, %v5440_v17  ;;  %v4986_v21 = vor.u32 %v4985_v20, %v4982_v43  ;;  %v5023_v0 = vshll.u32 %v4678_v7, 16  ;;  %v10515_v11 = vld [vmem:[#allocation2 + $0x9c] sm:$0xe]  ;;  %5232 = vst.msk [vmem:[#allocation3 + $0x8] sm:$0xff] %vm1860_vm0, %v5180_v57 }
 0x3c3   : > { %v7430_v48 = vcombine.low %v4968_v46, %v4978_v26  ;;  %v4201_v37 = vld [vmem:[#allocation2 + $0xa8] sm:$0x2]  ;;  %v5010_v1 = vor.u32 %v5009_v14, %v5006_v32  ;;  %v7449_v58 = vrot.slane %v10498_v47, 9  ;;  %v5443_v4 = vrot.slane %v5286_v51, 5  ;;  %v5290_v30 = vld [vmem:[#allocation2 + $0xa4] sm:$0x1] }
 0x3c4   : > { %v5446_v10 = vrot.slane %v5287_v44, 5  ;;  %5557 = vrot.lane.b32.xlu0 %v7465_v54, %s7975_s24  ;;  %v4987_v52 = vrot.slane %v4986_v21, 4  ;;  %v5021_v62 = vrot.slane %v5020_v2, 4  ;;  %v5025_v16 = vrot.slane %v5023_v0, 5  ;;  %v4202_v35 = vld [vmem:[#allocation2 + $0xb4] sm:$0x2] }
 0x3c5   : > { %5199 = vrot.lane.b32.xlu1 %v7430_v48, %s7976_s25  ;;  %v5450_v50 = vrot.slane %v10510_v31, 5  ;;  %v5002_v8 = vsel %vm8140_vm14, %v10495_v5, %v5001_v25  ;;  %v5011_v42 = vrot.slane %v5010_v1, 4  ;;  %v5445_v3 = vrot.slane %v5443_v4, 4  ;;  %v4345_v59 = vld [vmem:[#allocation2 + $0xac] sm:$0x8]  ;;  %v5680_v41 = vld [vmem:[#allocation3] sm:$0xff] }
 0x3c6   : > { %v7379_v33 = vrot.slane %v4201_v37, 9  ;;  %v4346_v40 = vld [vmem:[#allocation2 + $0xb8] sm:$0x8]  ;;  %v4992_v23 = vsel %vm8140_vm14, %v4987_v52, %v10472_v36  ;;  %v5026_v18 = vsel %vm8140_vm14, %v5021_v62, %v5025_v16  ;;  %v7450_v38 = vrot.slane %v10515_v11, 9  ;;  %v4319_v45 = vld [vmem:[#allocation2 + $0xa8] sm:$0x1]  ;;  %7803 = vmatprep.mubr.msk.bf16.mxu1 %vm2337_vm4, %v5680_v41 }
 0x3c7   : > { %v10524_v15 = vld [vmem:[#allocation2 + $0xb8] sm:$0xf]  ;;  %v5453_v60 = vrot.slane %v5290_v30, 5  ;;  %v4680_v9 = vld [vmem:[#allocation2 + $0xac] sm:$0xf]  ;;  %v7431_v63 = vcombine.low %v4992_v23, %v5002_v8  ;;  %v5016_v55 = vsel %vm8140_vm14, %v5011_v42, %v10489_v53  ;;  %v5447_v54 = vsel %vm8123_vm13, %v5445_v3, %v5446_v10  ;;  %v5540_v10 = vpop.permute.xlu1 %5539 }
 0x3c8   : > { %v4320_v5 = vsel %vm8049_vm7, %v7379_v33, %v4319_v45  ;;  %v4463_v36 = vld [vmem:[#allocation2 + $0xb0] sm:$0x1]  ;;  %v7432_v61 = vcombine.low %v5016_v55, %v5026_v18  ;;  %v5444_v28 = vsel %vm8123_vm13, %v7449_v58, %v5443_v4  ;;  %v5452_v24 = vrot.slane %v5450_v50, 4  ;;  %v4322_v47 = vld [vmem:[#allocation2 + $0xb4] sm:$0x1]  ;;  %5592 = vst.msk [vmem:[#allocation3 + $0x8] sm:$0xff] %vm2224_vm1, %v5540_v10 }
 0x3c9   : > { %5559 = vrot.lane.b32.xlu1 %v7466_v56, %s7975_s24  ;;  %4321 = vst [vmem:[#allocation2 + $0xa8] sm:$0x1] %v4320_v5  ;;  %v7397_v34 = vrot.slane %v4345_v59, 11  ;;  %v10542_v12 = vld [vmem:[#allocation2 + $0xac] sm:$0xf]  ;;  %5201 = vrot.lane.b32.xlu0 %v7431_v63, %s7976_s25  ;;  %v7467_v17 = vcombine.low %v5444_v28, %v5447_v54  ;;  %v5037_v39 = vshll.u32 %v4680_v9, 16  ;;  %v5451_v31 = vsel %vm8123_vm13, %v7450_v38, %v5450_v50 }
 0x3ca   : > { %v10544_v53 = vld [vmem:[#allocation2 + $0xb8] sm:$0xf]  ;;  %v5041_v19 = vshrl.u32 %v4680_v9, 16  ;;  %v7380_v51 = vrot.slane %v4202_v35, 9  ;;  %v4466_v13 = vld [vmem:[#allocation2 + $0xbc] sm:$0x1]  ;;  %v5454_v20 = vsel %vm8123_vm13, %v5452_v24, %v5453_v60 }
 0x3cb   : > { %v10548_v26 = vld [vmem:[#allocation2 + $0xa8] sm:$0xe]  ;;  %v4203_v43 = vld [vmem:[#allocation2 + $0xc0] sm:$0x2]  ;;  %v4464_v7 = vsel %vm8084_vm10, %v7397_v34, %v4463_v36  ;;  %v7398_v2 = vrot.slane %v4346_v40, 11  ;;  %v5061_v44 = vshll.u32 %v10524_v15, 16  ;;  %v7468_v30 = vcombine.low %v5451_v31, %v5454_v20 }
 0x3cc   : > { %v10559_v6 = vld [vmem:[%s11495_s3 + $0x10] sm:$0x3f]   ;;  %4465 = vst [vmem:[#allocation2 + $0xb0] sm:$0x1] %v4464_v7  ;;  %v10561_v46 = vrot.slane %v5037_v39, 5  ;;  %v5043_v25 = vrot.slane %v5041_v19, 4  ;;  %v4323_v32 = vsel %vm8049_vm7, %v7380_v51, %v4322_v47 }
 0x3cd   : > { %v5065_v14 = vshrl.u32 %v10524_v15, 16  ;;  %5203 = vrot.lane.b32.xlu1 %v7432_v61, %s7976_s25  ;;  %4324 = vst [vmem:[#allocation2 + $0xb4] sm:$0x1] %v4323_v32  ;;  %v4467_v48 = vsel %vm8084_vm10, %v7398_v2, %v4466_v13  ;;  %v10571_v56 = vld [vmem:[#allocation2 + $0xb4] sm:$0xe]  ;;  %5561 = vrot.lane.b32.xlu0 %v7467_v17, %s7975_s24  ;;  %v5457_v11 = vrot.slane %v10542_v12, 5 }
 0x3ce   : > { %v4347_v21 = vld [vmem:[#allocation2 + $0xc4] sm:$0x8]  ;;  %v5044_v0 = vor.u32 %v5043_v25, %v10561_v46  ;;  %4468 = vst [vmem:[#allocation2 + $0xbc] sm:$0x1] %v4467_v48  ;;  %v5464_v37 = vrot.slane %v10544_v53, 5  ;;  %v7451_v52 = vrot.slane %v10548_v26, 9 }
 0x3cf   : > { %v7965_v1 = vld [vmem:[%s11495_s3] sm:$0x3f]   ;;  %v7381_v62 = vrot.slane %v4203_v43, 9  ;;  %v4469_v16 = vld [vmem:[#allocation2 + $0xc8] sm:$0x1]  ;;  %v10583_v8 = vrot.slane %v5061_v44, 5 }
 0x3d0   : > { %v5752_v58 = vsel %vm2386_vm3, %v7965_v1, 0  ;;  %v4325_v4 = vld [vmem:[#allocation2 + $0xc0] sm:$0x1]  ;;  %v4686_v50 = vld [vmem:[#allocation2 + $0xc4] sm:$0xf]  ;;  %v5067_v42 = vrot.slane %v5065_v14, 4  ;;  %v5458_v44 = vsel %vm8123_vm13, %v7451_v52, %v5457_v11 }
 0x3d1   : > { %7802 = vmatpush3.bf16.msra.mxu1 %v5752_v58  ;;  %v4679_v35 = vld [vmem:[#allocation2 + $0xa8] sm:$0xf]  ;;  %v7399_v3 = vrot.slane %v4347_v21, 11  ;;  %5563 = vrot.lane.b32.xlu1 %v7468_v30, %s7975_s24  ;;  %v7452_v15 = vrot.slane %v10571_v56, 9  ;;  %v4326_v23 = vsel %vm8049_vm7, %v7381_v62, %v4325_v4  ;;  %v5045_v18 = vrot.slane %v5044_v0, 4  ;;  %v6011_v13 = vld [vmem:[#allocation3 + $0x8] sm:$0xff] }
 0x3d2   : > { %7908 = vmatprep.subr.msk.bf16.mxu1 %vm2386_vm3, %v10559_v6  ;;  %v7957_v33 = vld [vmem:[#allocation2 + $0xa8] sm:$0xff]   ;;  %v5028_v59 = vshrl.u32 %v4679_v35, 16  ;;  %v5031_v40 = vshll.u32 %v4679_v35, 16  ;;  %v5459_v38 = vrot.slane %v5457_v11, 4  ;;  %v5466_v60 = vrot.slane %v5464_v37, 4  ;;  %7837 = vmatprep.mubr.msk.bf16.mxu0 %vm2337_vm4, %v6011_v13 }
 0x3d3   : > { %4327 = vst [vmem:[#allocation2 + $0xc0] sm:$0x1] %v4326_v23  ;;  %v4470_v45 = vsel %vm8084_vm10, %v7399_v3, %v4469_v16  ;;  %4633 = vst.msk [vmem:[#allocation3 + $0x70] sm:$0xff] %vm1244_vm15, %v7957_v33  ;;  %v4681_v9 = vld [vmem:[#allocation2 + $0xb0] sm:$0x1]  ;;  %v5085_v61 = vshll.u32 %v4686_v50, 16  ;;  %v5068_v39 = vor.u32 %v5067_v42, %v10583_v8 }
 0x3d4   : > { %v5030_v63 = vrot.slane %v5028_v59, 4  ;;  %v5033_v55 = vrot.slane %v5031_v40, 5  ;;  %v5293_v54 = vld [vmem:[#allocation2 + $0xb0] sm:$0x1]  ;;  %4471 = vst [vmem:[#allocation2 + $0xc8] sm:$0x1] %v4470_v45  ;;  %7804 = vmatmul.mubr.msk.bf16.vlgmr.msra.gmra.mrb[32].mxu1 %vm2337_vm4, %v6011_v13 }
 0x3d5   : > { %v5047_v5 = vshll.u32 %v4681_v9, 16  ;;  %v4682_v36 = vld [vmem:[#allocation2 + $0xb4] sm:$0xf]  ;;  %v5460_v57 = vrot.slane %v5293_v54, 5  ;;  %v5089_v28 = vshrl.u32 %v4686_v50, 16  ;;  %v10605_v32 = vrot.slane %v5085_v61, 5 }
 0x3d6   : > { %v5034_v24 = vor.u32 %v5033_v55, %v5030_v63  ;;  %v4684_v34 = vld [vmem:[#allocation2 + $0xbc] sm:$0x1]  ;;  %v5052_v47 = vshrl.u32 %v4682_v36, 16  ;;  %v5055_v12 = vshll.u32 %v4682_v36, 16  ;;  %v10597_v7 = vld [vmem:[#allocation2 + $0xc4] sm:$0xf] }
 0x3d7   : > { %v5296_v41 = vld [vmem:[#allocation2 + $0xbc] sm:$0x1]  ;;  %v5049_v17 = vrot.slane %v5047_v5, 5  ;;  %v5071_v19 = vshll.u32 %v4684_v34, 16  ;;  %v7958_v2 = vld [vmem:[#allocation2 + $0xb4] sm:$0xff]   ;;  %v5461_v25 = vsel %vm8123_vm13, %v5459_v38, %v5460_v57  ;;  %v5091_v14 = vrot.slane %v5089_v28, 4 }
 0x3d8   : > { %v5467_v51 = vrot.slane %v5296_v41, 5  ;;  %v5035_v26 = vrot.slane %v5034_v24, 4  ;;  %v5054_v43 = vrot.slane %v5052_v47, 4  ;;  %v5057_v20 = vrot.slane %v5055_v12, 5  ;;  %v4204_v31 = vld [vmem:[#allocation2 + $0xcc] sm:$0x2] }
 0x3d9   : > { %v4348_v48 = vld [vmem:[#allocation2 + $0xd0] sm:$0x8]  ;;  %v5050_v0 = vsel %vm8140_vm14, %v5045_v18, %v5049_v17  ;;  %v5073_v58 = vrot.slane %v5071_v19, 5  ;;  %4634 = vst.msk [vmem:[#allocation3 + $0x78] sm:$0xff] %vm1244_vm15, %v7958_v2  ;;  %v5069_v30 = vrot.slane %v5068_v39, 4  ;;  %v7469_v35 = vcombine.low %v5458_v44, %v5461_v25 }
 0x3da   : > { %v5040_v21 = vsel %vm8140_vm14, %v5035_v26, %v10561_v46  ;;  %v5058_v1 = vor.u32 %v5057_v20, %v5054_v43  ;;  %v4685_v4 = vld [vmem:[#allocation2 + $0xc0] sm:$0xf]  ;;  %v5468_v42 = vsel %vm8123_vm13, %v5466_v60, %v5467_v51  ;;  %v5092_v40 = vor.u32 %v5091_v14, %v10605_v32  ;;  %v4328_v18 = vld [vmem:[#allocation2 + $0xcc] sm:$0x1]  ;;  %v4472_v38 = vld [vmem:[#allocation2 + $0xd4] sm:$0x1] }
 0x3db   : > { %v7959_v11 = vld [vmem:[#allocation2 + $0xc0] sm:$0xff]   ;;  %v7433_v10 = vcombine.low %v5040_v21, %v5050_v0  ;;  %v4687_v52 = vld [vmem:[#allocation2 + $0xc8] sm:$0x1]  ;;  %v5076_v62 = vshrl.u32 %v4685_v4, 16  ;;  %v5079_v16 = vshll.u32 %v4685_v4, 16  ;;  %v5471_v23 = vrot.slane %v10597_v7, 5  ;;  %v5182_v7 = vpop.permute.xlu0 %5181 }
 0x3dc   : > { %v5059_v50 = vrot.slane %v5058_v1, 4  ;;  %v5095_v46 = vshll.u32 %v4687_v52, 16  ;;  %v5299_v3 = vld [vmem:[#allocation2 + $0xc8] sm:$0x1]  ;;  %4635 = vst.msk [vmem:[#allocation3 + $0x80] sm:$0xff] %vm1244_vm15, %v7959_v11  ;;  %v5074_v60 = vsel %vm8140_vm14, %v5069_v30, %v5073_v58  ;;  %v7382_v55 = vrot.slane %v4204_v31, 9 }
 0x3dd   : > { %5205 = vrot.lane.b32.xlu0 %v7433_v10, %s7976_s25  ;;  %v5078_v33 = vrot.slane %v5076_v62, 4  ;;  %v5081_v59 = vrot.slane %v5079_v16, 5  ;;  %v4689_v45 = vld [vmem:[#allocation2 + $0xd0] sm:$0xf]  ;;  %v5297_v63 = vld [vmem:[#allocation2 + $0xc0] sm:$0xe]  ;;  %v5465_v24 = vsel %vm8123_vm13, %v7452_v15, %v5464_v37 }
 0x3de   : > { %v5064_v9 = vsel %vm8140_vm14, %v5059_v50, %v10583_v8  ;;  %v7400_v54 = vrot.slane %v4348_v48, 11  ;;  %v5301_v5 = vld [vmem:[#allocation2 + $0xd0] sm:$0xf]  ;;  %v5097_v61 = vrot.slane %v5095_v46, 5  ;;  %v5474_v28 = vrot.slane %v5299_v3, 5  ;;  %5233 = vst.msk [vmem:[#allocation3 + $0x10] sm:$0xff] %vm1860_vm0, %v5182_v7 }
 0x3df   : > { %v7434_v36 = vcombine.low %v5064_v9, %v5074_v60  ;;  %v5082_v57 = vor.u32 %v5081_v59, %v5078_v33  ;;  %v4329_v8 = vsel %vm8049_vm7, %v7382_v55, %v4328_v18  ;;  %v7470_v47 = vcombine.low %v5465_v24, %v5468_v42  ;;  %v5300_v51 = vld [vmem:[#allocation2 + $0xcc] sm:$0xe] }
 0x3e0   : > { %v4473_v34 = vsel %vm8084_vm10, %v7400_v54, %v4472_v38  ;;  %v5093_v41 = vrot.slane %v5092_v40, 4  ;;  %v7453_v17 = vrot.slane %v5297_v63, 9  ;;  %4330 = vst [vmem:[#allocation2 + $0xcc] sm:$0x1] %v4329_v8  ;;  %v5473_v53 = vrot.slane %v5471_v23, 4 }
 0x3e1   : > { %5207 = vrot.lane.b32.xlu1 %v7434_v36, %s7976_s25  ;;  %5565 = vrot.lane.b32.xlu0 %v7469_v35, %s7975_s24  ;;  %v5083_v12 = vrot.slane %v5082_v57, 4  ;;  %4474 = vst [vmem:[#allocation2 + $0xd4] sm:$0x1] %v4473_v34  ;;  %v5109_v56 = vshll.u32 %v4689_v45, 16  ;;  %v6084_v37 = vsel %vm2386_vm3, %v7966_v29, 0  ;;  %v6416_v27 = vsel %vm2386_vm3, %v10559_v6, 0 }
 0x3e2   : > { %v5098_v39 = vsel %vm8140_vm14, %v5093_v41, %v5097_v61  ;;  %v5113_v19 = vshrl.u32 %v4689_v45, 16  ;;  %v5478_v13 = vrot.slane %v5301_v5, 5  ;;  %7836 = vmatpush3.bf16.msra.mxu0 %v6084_v37  ;;  %7870 = vmatpush3.bf16.msra.mxu1 %v6416_v27  ;;  %v5475_v43 = vsel %vm8123_vm13, %v5473_v53, %v5474_v28  ;;  %v7473_v28 = vld [vmem:[%s11496_s4] ss:$0 sm:$0xff] }
 0x3e3   : > { %v5088_v15 = vsel %vm8140_vm14, %v5083_v12, %v10605_v32  ;;  %v5472_v6 = vsel %vm8123_vm13, %v7453_v17, %v5471_v23  ;;  %v7454_v20 = vrot.slane %v5300_v51, 9  ;;  %v5111_v44 = vrot.slane %v5109_v56, 5  ;;  %5618 = vst.msk [vmem:[#allocation4 + $0x10] sm:$0xff] %vm1244_vm15, %v7473_v28  ;;  %5616 = vst.msk [vmem:[#allocation4] sm:$0xff] %vm1244_vm15, %v7473_v28 }
 0x3e4   : > { %v7435_v26 = vcombine.low %v5088_v15, %v5098_v39  ;;  %v7471_v2 = vcombine.low %v5472_v6, %v5475_v43  ;;  %v5115_v25 = vrot.slane %v5113_v19, 4  ;;  %v5480_v32 = vrot.slane %v5478_v13, 4  ;;  %5617 = vst.msk [vmem:[#allocation4 + $0x8] sm:$0xff] %vm1244_vm15, %v7473_v28  ;;  %5619 = vst.msk [vmem:[#allocation4 + $0x18] sm:$0xff] %vm1244_vm15, %v7473_v28 }
 0x3e5   : > { %5567 = vrot.lane.b32.xlu1 %v7470_v47, %s7975_s24  ;;  %v5479_v4 = vsel %vm8123_vm13, %v7454_v20, %v5478_v13  ;;  %5620 = vst.msk [vmem:[#allocation4 + $0x20] sm:$0xff] %vm1244_vm15, %v7473_v28  ;;  %5621 = vst.msk [vmem:[#allocation4 + $0x28] sm:$0xff] %vm1244_vm15, %v7473_v28 }
 0x3e6   : > { %5209 = vrot.lane.b32.xlu0 %v7435_v26, %s7976_s25  ;;  %v5116_v52 = vor.u32 %v5115_v25, %v5111_v44  ;;  %5622 = vst.msk [vmem:[#allocation4 + $0x30] sm:$0xff] %vm1244_vm15, %v7473_v28  ;;  %5623 = vst.msk [vmem:[#allocation4 + $0x38] sm:$0xff] %vm1244_vm15, %v7473_v28 }
 0x3e7   : > { %v4688_v14 = vld [vmem:[#allocation2 + $0xcc] sm:$0xf]  ;;  %5624 = vst.msk [vmem:[#allocation4 + $0x40] sm:$0xff] %vm1244_vm15, %v7473_v28  ;;  %5625 = vst.msk [vmem:[#allocation4 + $0x48] sm:$0xff] %vm1244_vm15, %v7473_v28 }
 0x3e8   : > { %v4690_v31 = vld [vmem:[#allocation2 + $0xd4] sm:$0x1]  ;;  %v5100_v21 = vshrl.u32 %v4688_v14, 16  ;;  %v5103_v0 = vshll.u32 %v4688_v14, 16  ;;  %v7960_v11 = vld [vmem:[#allocation2 + $0xcc] sm:$0xff]   ;;  %v5117_v46 = vrot.slane %v5116_v52, 4 }
 0x3e9   : > { %v5302_v48 = vld [vmem:[#allocation2 + $0xd4] sm:$0x1]  ;;  %5569 = vrot.lane.b32.xlu1 %v7471_v2, %s7975_s24  ;;  %v5119_v1 = vshll.u32 %v4690_v31, 16  ;;  %4636 = vst.msk [vmem:[#allocation3 + $0x88] sm:$0xff] %vm1244_vm15, %v7960_v11  ;;  %5626 = vst.msk [vmem:[#allocation4 + $0x50] sm:$0xff] %vm1244_vm15, %v7473_v28 }
 0x3ea   : > { %v5481_v58 = vrot.slane %v5302_v48, 5  ;;  %v5102_v10 = vrot.slane %v5100_v21, 4  ;;  %v5105_v30 = vrot.slane %v5103_v0, 5  ;;  %5627 = vst.msk [vmem:[#allocation4 + $0x58] sm:$0xff] %vm1244_vm15, %v7473_v28  ;;  %5628 = vst.msk [vmem:[#allocation4 + $0x60] sm:$0xff] %vm1244_vm15, %v7473_v28 }
 0x3eb   : > { %v5121_v35 = vrot.slane %v5119_v1, 5  ;;  %5629 = vst.msk [vmem:[#allocation4 + $0x68] sm:$0xff] %vm1244_vm15, %v7473_v28  ;;  %5630 = vst.msk [vmem:[#allocation4 + $0x70] sm:$0xff] %vm1244_vm15, %v7473_v28  ;;  %v5650_v1 = vld [vmem:[#allocation4 + $0x10] sm:$0xff]  ;;  %v5651_v11 = vld [vmem:[#allocation4 + $0x18] sm:$0xff] }
 0x3ec   : > { %v5482_v62 = vsel %vm8123_vm13, %v5480_v32, %v5481_v58  ;;  %v5106_v50 = vor.u32 %v5105_v30, %v5102_v10  ;;  %5631 = vst.msk [vmem:[#allocation4 + $0x78] sm:$0xff] %vm1244_vm15, %v7473_v28  ;;  %5632 = vst.msk [vmem:[#allocation4 + $0x80] sm:$0xff] %vm1244_vm15, %v7473_v28  ;;  %v5648_v58 = vld [vmem:[#allocation4] sm:$0xff]  ;;  %v5649_v52 = vld [vmem:[#allocation4 + $0x8] sm:$0xff] }
 0x3ed   : > { %v7472_v16 = vcombine.low %v5479_v4, %v5482_v62  ;;  %v5122_v33 = vsel %vm8140_vm14, %v5117_v46, %v5121_v35  ;;  %5633 = vst.msk [vmem:[#allocation4 + $0x88] sm:$0xff] %vm1244_vm15, %v7473_v28  ;;  %5634 = vst.msk [vmem:[#allocation4 + $0x90] sm:$0xff] %vm1244_vm15, %v7473_v28 }
 0x3ee   : > { %v5107_v42 = vrot.slane %v5106_v50, 4  ;;  %v5542_v22 = vpop.permute.xlu0 %5541  ;;  %5635 = vst.msk [vmem:[#allocation4 + $0x98] sm:$0xff] %vm1244_vm15, %v7473_v28  ;;  %5636 = vst.msk [vmem:[#allocation4 + $0xa0] sm:$0xff] %vm1244_vm15, %v7473_v28 }
 0x3ef   : > { %5571 = vrot.lane.b32.xlu1 %v7472_v16, %s7975_s24  ;;  %5593 = vst.msk [vmem:[#allocation3 + $0x10] sm:$0xff] %vm2224_vm1, %v5542_v22 }
 0x3f0   : > { %v5112_v3 = vsel %vm8140_vm14, %v5107_v42, %v5111_v44  ;;  %5637 = vst.msk [vmem:[#allocation4 + $0xa8] sm:$0xff] %vm1244_vm15, %v7473_v28  ;;  %5638 = vst.msk [vmem:[#allocation4 + $0xb0] sm:$0xff] %vm1244_vm15, %v7473_v28 }
 0x3f1   : > { %v7436_v59 = vcombine.low %v5112_v3, %v5122_v33  ;;  %5639 = vst.msk [vmem:[#allocation4 + $0xb8] sm:$0xff] %vm1244_vm15, %v7473_v28  ;;  %5640 = vst.msk [vmem:[#allocation4 + $0xc0] sm:$0xff] %vm1244_vm15, %v7473_v28 }
 0x3f2   : > { %5641 = vst.msk [vmem:[#allocation4 + $0xc8] sm:$0xff] %vm1244_vm15, %v7473_v28  ;;  %5642 = vst.msk [vmem:[#allocation4 + $0xd0] sm:$0xff] %vm1244_vm15, %v7473_v28 }
 0x3f3   : > { %5211 = vrot.lane.b32.xlu0 %v7436_v59, %s7976_s25  ;;  %5643 = vst.msk [vmem:[#allocation4 + $0xd8] sm:$0xff] %vm1244_vm15, %v7473_v28  ;;  %5644 = vst.msk [vmem:[#allocation4 + $0xe0] sm:$0xff] %vm1244_vm15, %v7473_v28 }
 0x3f4   : > { %5645 = vst.msk [vmem:[#allocation4 + $0xe8] sm:$0xff] %vm1244_vm15, %v7473_v28  ;;  %5646 = vst.msk [vmem:[#allocation4 + $0xf0] sm:$0xff] %vm1244_vm15, %v7473_v28 }
 0x3f5   : > { %5647 = vst.msk [vmem:[#allocation4 + $0xf8] sm:$0xff] %vm1244_vm15, %v7473_v28 }
 0x3f6   : > { %v10667_v40 = vld [vmem:[#allocation3 + $0x10] sm:$0xff] }
 0x3f7   : > { %7807 = vmatprep.mubr.msk.bf16.mxu1 %vm2337_vm4, %v10667_v40  ;;  %7838 = vmatmul.mubr.msk.bf16.vlgmr.msra.gmra.mrb[64].mxu0 %vm2337_vm4, %v10667_v40 }
 0x3fb   : > { %v5184_v23 = vpop.permute.xlu1 %5183 }
 0x3fc   : > { %5234 = vst.msk [vmem:[#allocation3 + $0x18] sm:$0xff] %vm1860_vm0, %v5184_v23 }
 0x3fe   : > { %v5186_v49 = vpop.permute.xlu0 %5185 }
 0x3ff   : > { %v5544_v18 = vpop.permute.xlu1 %5543  ;;  %5235 = vst.msk [vmem:[#allocation3 + $0x20] sm:$0xff] %vm1860_vm0, %v5186_v49 }
 0x400   : > { %5594 = vst.msk [vmem:[#allocation3 + $0x18] sm:$0xff] %vm2224_vm1, %v5544_v18 }
 0x402   : > { %v5546_v45 = vpop.permute.xlu0 %5545 }
 0x403   : > { %v5188_v38 = vpop.permute.xlu1 %5187  ;;  %5595 = vst.msk [vmem:[#allocation3 + $0x20] sm:$0xff] %vm2224_vm1, %v5546_v45 }
 0x404   : > { %5236 = vst.msk [vmem:[#allocation3 + $0x28] sm:$0xff] %vm1860_vm0, %v5188_v38 }
 0x407   : > { %v5548_v9 = vpop.permute.xlu1 %5547  ;;  %v10678_v60 = vld [vmem:[#allocation3 + $0x18] sm:$0xff] }
 0x408   : > { %5596 = vst.msk [vmem:[#allocation3 + $0x28] sm:$0xff] %vm2224_vm1, %v5548_v9  ;;  %7808 = vmatmul.mubr.msk.bf16.gmra.mrb[36].mxu1 %vm2337_vm4, %v10678_v60  ;;  %7841 = vmatprep.mubr.msk.bf16.mxu0 %vm2337_vm4, %v10678_v60 }
 0x40a   : > { %v10685_v63 = vld [vmem:[#allocation3 + $0x20] sm:$0xff] }
 0x40b   : > { %7811 = vmatprep.mubr.msk.bf16.mxu1 %vm2337_vm4, %v10685_v63  ;;  %7842 = vmatmul.mubr.msk.bf16.gmra.mrb[68].mxu0 %vm2337_vm4, %v10685_v63 }
 0x40f   : > { %v10691_v55 = vld [vmem:[#allocation3 + $0x28] sm:$0xff] }
 0x410   : > { %7812 = vmatmul.mubr.msk.bf16.gmra.mrb[40].mxu1 %vm2337_vm4, %v10691_v55  ;;  %7845 = vmatprep.mubr.msk.bf16.mxu0 %vm2337_vm4, %v10691_v55 }
 0x413   : > { %v5190_v54 = vpop.permute.xlu0 %5189 }
 0x414   : > { %5237 = vst.msk [vmem:[#allocation3 + $0x30] sm:$0xff] %vm1860_vm0, %v5190_v54  ;;  %v5655_v54 = vld [vmem:[#allocation4 + $0x38] sm:$0xff] }
 0x417   : > { %v5192_v5 = vpop.permute.xlu1 %5191  ;;  %v5550_v36 = vpop.permute.xlu0 %5549 }
 0x418   : > { %5238 = vst.msk [vmem:[#allocation3 + $0x38] sm:$0xff] %vm1860_vm0, %v5192_v5 }
 0x419   : > { %5597 = vst.msk [vmem:[#allocation3 + $0x30] sm:$0xff] %vm2224_vm1, %v5550_v36 }
 0x41b   : > { %v5552_v57 = vpop.permute.xlu1 %5551 }
 0x41c   : > { %5598 = vst.msk [vmem:[#allocation3 + $0x38] sm:$0xff] %vm2224_vm1, %v5552_v57  ;;  %v5194_v61 = vpop.permute.xlu0 %5193  ;;  %v5653_v57 = vld [vmem:[#allocation4 + $0x28] sm:$0xff] }
 0x41d   : > { %5239 = vst.msk [vmem:[#allocation3 + $0x40] sm:$0xff] %vm1860_vm0, %v5194_v61 }
 0x420   : > { %v5196_v24 = vpop.permute.xlu1 %5195  ;;  %v10737_v8 = vld [vmem:[#allocation3 + $0x30] sm:$0xff]  ;;  %v5554_v34 = vpop.permute.xlu0 %5553 }
 0x421   : > { %5240 = vst.msk [vmem:[#allocation3 + $0x48] sm:$0xff] %vm1860_vm0, %v5196_v24  ;;  %7815 = vmatprep.mubr.msk.bf16.mxu1 %vm2337_vm4, %v10737_v8  ;;  %7846 = vmatmul.mubr.msk.bf16.gmra.mrb[72].mxu0 %vm2337_vm4, %v10737_v8 }
 0x422   : > { %5599 = vst.msk [vmem:[#allocation3 + $0x40] sm:$0xff] %vm2224_vm1, %v5554_v34 }
 0x423   : > { %v10745_v12 = vld [vmem:[#allocation3 + $0x38] sm:$0xff] }
 0x424   : > { %v5556_v47 = vpop.permute.xlu1 %5555  ;;  %7816 = vmatmul.mubr.msk.bf16.gmra.mrb[44].mxu1 %vm2337_vm4, %v10745_v12  ;;  %7849 = vmatprep.mubr.msk.bf16.mxu0 %vm2337_vm4, %v10745_v12 }
 0x425   : > { %5600 = vst.msk [vmem:[#allocation3 + $0x48] sm:$0xff] %vm2224_vm1, %v5556_v47 }
 0x429   : > { %v10752_v41 = vld [vmem:[#allocation3 + $0x40] sm:$0xff] }
 0x42a   : > { %7819 = vmatprep.mubr.msk.bf16.mxu1 %vm2337_vm4, %v10752_v41  ;;  %7850 = vmatmul.mubr.msk.bf16.gmra.mrb[76].mxu0 %vm2337_vm4, %v10752_v41 }
 0x42c   : > { %v5689_v17 = vld [vmem:[#allocation3 + $0x48] sm:$0xff] }
 0x42d   : > { %7820 = vmatmul.mubr.msk.bf16.gmra.mrb[48].mxu1 %vm2337_vm4, %v5689_v17  ;;  %7853 = vmatprep.mubr.msk.bf16.mxu0 %vm2337_vm4, %v5689_v17 }
 0x432   : > { %v5198_v53 = vpop.permute.xlu0 %5197 }
 0x433   : > { %5241 = vst.msk [vmem:[#allocation3 + $0x50] sm:$0xff] %vm1860_vm0, %v5198_v53  ;;  %v5656_v53 = vld [vmem:[#allocation4 + $0x40] sm:$0xff] }
 0x436   : > { %v5558_v29 = vpop.permute.xlu0 %5557 }
 0x437   : > { %v5200_v56 = vpop.permute.xlu1 %5199  ;;  %5601 = vst.msk [vmem:[#allocation3 + $0x50] sm:$0xff] %vm2224_vm1, %v5558_v29 }
 0x438   : > { %5242 = vst.msk [vmem:[#allocation3 + $0x58] sm:$0xff] %vm1860_vm0, %v5200_v56 }
 0x43b   : > { %v5560_v37 = vpop.permute.xlu1 %5559  ;;  %v5202_v27 = vpop.permute.xlu0 %5201 }
 0x43c   : > { %5602 = vst.msk [vmem:[#allocation3 + $0x58] sm:$0xff] %vm2224_vm1, %v5560_v37  ;;  %v5659_v37 = vld [vmem:[#allocation4 + $0x58] sm:$0xff] }
 0x43d   : > { %5243 = vst.msk [vmem:[#allocation3 + $0x60] sm:$0xff] %vm1860_vm0, %v5202_v27 }
 0x43e   : > { %v5690_v39 = vld [vmem:[#allocation3 + $0x50] sm:$0xff] }
 0x43f   : > { %v5204_v15 = vpop.permute.xlu1 %5203  ;;  %v5562_v19 = vpop.permute.xlu0 %5561  ;;  %7823 = vmatprep.mubr.msk.bf16.mxu1 %vm2337_vm4, %v5690_v39  ;;  %7854 = vmatmul.mubr.msk.bf16.gmra.mrb[80].mxu0 %vm2337_vm4, %v5690_v39 }
 0x440   : > { %5244 = vst.msk [vmem:[#allocation3 + $0x68] sm:$0xff] %vm1860_vm0, %v5204_v15 }
 0x441   : > { %5603 = vst.msk [vmem:[#allocation3 + $0x60] sm:$0xff] %vm2224_vm1, %v5562_v19 }
 0x443   : > { %v5564_v51 = vpop.permute.xlu1 %5563  ;;  %v5691_v13 = vld [vmem:[#allocation3 + $0x58] sm:$0xff] }
 0x444   : > { %5604 = vst.msk [vmem:[#allocation3 + $0x68] sm:$0xff] %vm2224_vm1, %v5564_v51  ;;  %7824 = vmatmul.mubr.msk.bf16.gmra.mrb[52].mxu1 %vm2337_vm4, %v5691_v13  ;;  %7857 = vmatprep.mubr.msk.bf16.mxu0 %vm2337_vm4, %v5691_v13 }
 0x448   : > { %v5692_v26 = vld [vmem:[#allocation3 + $0x60] sm:$0xff] }
 0x449   : > { %7827 = vmatprep.mubr.msk.bf16.mxu1 %vm2337_vm4, %v5692_v26  ;;  %7858 = vmatmul.mubr.msk.bf16.gmra.mrb[84].mxu0 %vm2337_vm4, %v5692_v26 }
 0x44b   : > { %v5693_v43 = vld [vmem:[#allocation3 + $0x68] sm:$0xff] }
 0x44c   : > { %7828 = vmatmul.mubr.msk.bf16.gmra.mrb[56].mxu1 %vm2337_vm4, %v5693_v43  ;;  %7861 = vmatprep.mubr.msk.bf16.mxu0 %vm2337_vm4, %v5693_v43 }
 0x44f   : > { %v5206_v6 = vpop.permute.xlu0 %5205 }
 0x450   : > { %5245 = vst.msk [vmem:[#allocation3 + $0x70] sm:$0xff] %vm1860_vm0, %v5206_v6 }
 0x453   : > { %v5208_v20 = vpop.permute.xlu1 %5207  ;;  %v5566_v7 = vpop.permute.xlu0 %5565 }
 0x454   : > { %5246 = vst.msk [vmem:[#allocation3 + $0x78] sm:$0xff] %vm1860_vm0, %v5208_v20 }
 0x455   : > { %5605 = vst.msk [vmem:[#allocation3 + $0x70] sm:$0xff] %vm2224_vm1, %v5566_v7 }
 0x457   : > { %v5568_v2 = vpop.permute.xlu1 %5567 }
 0x458   : > { %5606 = vst.msk [vmem:[#allocation3 + $0x78] sm:$0xff] %vm2224_vm1, %v5568_v2  ;;  %v5210_v44 = vpop.permute.xlu0 %5209 }
 0x459   : > { %5247 = vst.msk [vmem:[#allocation3 + $0x80] sm:$0xff] %vm1860_vm0, %v5210_v44 }
 0x45b   : > { %v5570_v25 = vpop.permute.xlu1 %5569 }
 0x45c   : > { %v5694_v32 = vld [vmem:[#allocation3 + $0x70] sm:$0xff]  ;;  %5607 = vst.msk [vmem:[#allocation3 + $0x80] sm:$0xff] %vm2224_vm1, %v5570_v25 }
 0x45d   : > { %7831 = vmatprep.mubr.msk.bf16.mxu1 %vm2337_vm4, %v5694_v32  ;;  %7862 = vmatmul.mubr.msk.bf16.gmra.mrb[88].mxu0 %vm2337_vm4, %v5694_v32 }
 0x45f   : > { %v5695_v14 = vld [vmem:[#allocation3 + $0x78] sm:$0xff] }
 0x460   : > { %7832 = vmatmul.mubr.msk.bf16.gmra.mrb[60].mxu1 %vm2337_vm4, %v5695_v14  ;;  %7865 = vmatprep.mubr.msk.bf16.mxu0 %vm2337_vm4, %v5695_v14 }
 0x461   : > { %7871 = vmatprep.mubr.msk.bf16.mxu1 %vm2337_vm4, %v10667_v40  ;;  %v5572_v48 = vpop.permute.xlu1 %5571 }
 0x463   : > { %v6026_v31 = vld [vmem:[#allocation3 + $0x80] sm:$0xff] }
 0x465   : > { %7866 = vmatmul.mubr.msk.bf16.gmra.mrb[92].mxu0 %vm2337_vm4, %v6026_v31  ;;  %v5212_v21 = vpop.permute.xlu0 %5211 }
 0x466   : > { %5248 = vst.msk [vmem:[#allocation3 + $0x88] sm:$0xff] %vm1860_vm0, %v5212_v21 }
 0x467   : > { %5608 = vst.msk [vmem:[#allocation3 + $0x88] sm:$0xff] %vm2224_vm1, %v5572_v48 }
 0x468   : > { %7872 = vmatmul.mubr.msk.bf16.vlgmr.msra.gmra.mrb[64].mxu1 %vm2337_vm4, %v10678_v60  ;;  %v5654_v60 = vld [vmem:[#allocation4 + $0x30] sm:$0xff] }
 0x469   : > { %7875 = vmatprep.mubr.msk.bf16.mxu1 %vm2337_vm4, %v10685_v63  ;;  %v5652_v63 = vld [vmem:[#allocation4 + $0x20] sm:$0xff] }
 0x46e   : > { %v6358_v0 = vld [vmem:[#allocation3 + $0x88] sm:$0xff] }
 0x470   : > { %7876 = vmatmul.mubr.msk.bf16.gmra.mrb[68].mxu1 %vm2337_vm4, %v10691_v55 }
 0x471   : > { %7879 = vmatprep.mubr.msk.bf16.mxu1 %vm2337_vm4, %v10737_v8 }
 0x478   : > { %7880 = vmatmul.mubr.msk.bf16.gmra.mrb[72].mxu1 %vm2337_vm4, %v10745_v12 }
 0x479   : > { %7883 = vmatprep.mubr.msk.bf16.mxu1 %vm2337_vm4, %v10752_v41  ;;  %v5658_v41 = vld [vmem:[#allocation4 + $0x50] sm:$0xff] }
 0x480   : > { %7884 = vmatmul.mubr.msk.bf16.gmra.mrb[76].mxu1 %vm2337_vm4, %v5689_v17 }
 0x481   : > { %7887 = vmatprep.mubr.msk.bf16.mxu1 %vm2337_vm4, %v5690_v39  ;;  %v5657_v39 = vld [vmem:[#allocation4 + $0x48] sm:$0xff] }
 0x488   : > { %7888 = vmatmul.mubr.msk.bf16.gmra.mrb[80].mxu1 %vm2337_vm4, %v5691_v13 }
 0x489   : > { %7891 = vmatprep.mubr.msk.bf16.mxu1 %vm2337_vm4, %v5692_v26 }
 0x490   : > { %7892 = vmatmul.mubr.msk.bf16.gmra.mrb[84].mxu1 %vm2337_vm4, %v5693_v43 }
 0x491   : > { %7895 = vmatprep.mubr.msk.bf16.mxu1 %vm2337_vm4, %v5694_v32 }
 0x498   : > { %7896 = vmatmul.mubr.msk.bf16.gmra.mrb[88].mxu1 %vm2337_vm4, %v5695_v14 }
 0x499   : > { %7899 = vmatprep.mubr.msk.bf16.mxu1 %vm2337_vm4, %v6026_v31 }
 0x4a0   : > { %7900 = vmatmul.mubr.msk.bf16.gmra.mrb[92].mxu1 %vm2337_vm4, %v6358_v0 }
 0x4a7   : > { %v7805_v4 = vpop.f32.mrb[32].mxu1 }
 0x4a8   : > { %v5917_v10 = vadd.f32 %v7805_v4, %v5650_v1  ;;  %v5788_v30 = vpop.f32.mrb[33].mxu1 }
 0x4a9   : > { %v5915_v62 = vadd.f32 %v5788_v30, %v5648_v58  ;;  %v7806_v16 = vpop.f32.mrb[34].mxu1 }
 0x4aa   : > { %5949 = vst.msk [vmem:[#allocation4 + $0x10] sm:$0xff] %vm1244_vm15, %v5917_v10  ;;  %v5918_v50 = vadd.f32 %v7806_v16, %v5651_v11  ;;  %v5791_v35 = vpop.f32.mrb[35].mxu1  ;;  %v5662_v11 = vld [vmem:[#allocation4 + $0x70] sm:$0xff] }
 0x4ab   : > { %5947 = vst.msk [vmem:[#allocation4] sm:$0xff] %vm1244_vm15, %v5915_v62  ;;  %v5916_v42 = vadd.f32 %v5791_v35, %v5649_v52  ;;  %v5660_v52 = vld [vmem:[#allocation4 + $0x60] sm:$0xff]  ;;  %v5663_v35 = vld [vmem:[#allocation4 + $0x78] sm:$0xff] }
 0x4ac   : > { %5950 = vst.msk [vmem:[#allocation4 + $0x18] sm:$0xff] %vm1244_vm15, %v5918_v50 }
 0x4ad   : > { %5948 = vst.msk [vmem:[#allocation4 + $0x8] sm:$0xff] %vm1244_vm15, %v5916_v42 }
 0x4b1   : > { %v5981_v46 = vld [vmem:[#allocation4 + $0x10] sm:$0xff] }
 0x4b2   : > { %v5979_v3 = vld [vmem:[#allocation4] sm:$0xff] }
 0x4b3   : > { %v5982_v59 = vld [vmem:[#allocation4 + $0x18] sm:$0xff] }
 0x4b4   : > { %v5980_v23 = vld [vmem:[#allocation4 + $0x8] sm:$0xff] }
 0x4ca   : > { %v7839_v33 = vpop.f32.mrb[64].mxu0 }
 0x4cb   : > { %v6249_v22 = vadd.f32 %v7839_v33, %v5981_v46  ;;  %v6120_v40 = vpop.f32.mrb[65].mxu0  ;;  %v5661_v33 = vld [vmem:[#allocation4 + $0x68] sm:$0xff] }
 0x4cc   : > { %v6247_v18 = vadd.f32 %v6120_v40, %v5979_v3  ;;  %v7840_v49 = vpop.f32.mrb[66].mxu0 }
 0x4cd   : > { %6281 = vst.msk [vmem:[#allocation4 + $0x10] sm:$0xff] %vm1244_vm15, %v6249_v22  ;;  %v6250_v38 = vadd.f32 %v7840_v49, %v5982_v59  ;;  %v6123_v45 = vpop.f32.mrb[67].mxu0 }
 0x4ce   : > { %6279 = vst.msk [vmem:[#allocation4] sm:$0xff] %vm1244_vm15, %v6247_v18  ;;  %v6248_v9 = vadd.f32 %v6123_v45, %v5980_v23 }
 0x4cf   : > { %6282 = vst.msk [vmem:[#allocation4 + $0x18] sm:$0xff] %vm1244_vm15, %v6250_v38  ;;  %v5666_v38 = vld [vmem:[#allocation4 + $0x90] sm:$0xff] }
 0x4d0   : > { %6280 = vst.msk [vmem:[#allocation4 + $0x8] sm:$0xff] %vm1244_vm15, %v6248_v9  ;;  %v5664_v9 = vld [vmem:[#allocation4 + $0x80] sm:$0xff] }
 0x4db   : > { %v7809_v55 = vpop.f32.mrb[36].mxu1 }
 0x4dc   : > { %v5921_v5 = vadd.f32 %v7809_v55, %v5654_v60  ;;  %v5804_v36 = vpop.f32.mrb[37].mxu1  ;;  %v5667_v55 = vld [vmem:[#allocation4 + $0x98] sm:$0xff] }
 0x4dd   : > { %v5919_v61 = vadd.f32 %v5804_v36, %v5652_v63  ;;  %v7810_v28 = vpop.f32.mrb[38].mxu1 }
 0x4de   : > { %5953 = vst.msk [vmem:[#allocation4 + $0x30] sm:$0xff] %vm1244_vm15, %v5921_v5  ;;  %v5922_v24 = vadd.f32 %v7810_v28, %v5655_v54  ;;  %v5807_v8 = vpop.f32.mrb[39].mxu1  ;;  %v7843_v47 = vpop.f32.mrb[68].mxu0 }
 0x4df   : > { %5951 = vst.msk [vmem:[#allocation4 + $0x20] sm:$0xff] %vm1244_vm15, %v5919_v61  ;;  %v5920_v34 = vadd.f32 %v5807_v8, %v5653_v57  ;;  %v6136_v12 = vpop.f32.mrb[69].mxu0  ;;  %v5665_v57 = vld [vmem:[#allocation4 + $0x88] sm:$0xff] }
 0x4e0   : > { %5954 = vst.msk [vmem:[#allocation4 + $0x38] sm:$0xff] %vm1244_vm15, %v5922_v24  ;;  %v7844_v17 = vpop.f32.mrb[70].mxu0 }
 0x4e1   : > { %5952 = vst.msk [vmem:[#allocation4 + $0x28] sm:$0xff] %vm1244_vm15, %v5920_v34  ;;  %v6139_v56 = vpop.f32.mrb[71].mxu0 }
 0x4e3   : > { %v7813_v29 = vpop.f32.mrb[40].mxu1 }
 0x4e4   : > { %v5925_v27 = vadd.f32 %v7813_v29, %v5658_v41  ;;  %v5820_v15 = vpop.f32.mrb[41].mxu1 }
 0x4e5   : > { %v5985_v19 = vld [vmem:[#allocation4 + $0x30] sm:$0xff]  ;;  %v5923_v51 = vadd.f32 %v5820_v15, %v5656_v53  ;;  %v7814_v13 = vpop.f32.mrb[42].mxu1 }
 0x4e6   : > { %v6253_v26 = vadd.f32 %v7843_v47, %v5985_v19  ;;  %5957 = vst.msk [vmem:[#allocation4 + $0x50] sm:$0xff] %vm1244_vm15, %v5925_v27  ;;  %v5983_v43 = vld [vmem:[#allocation4 + $0x20] sm:$0xff]  ;;  %v5926_v6 = vadd.f32 %v7814_v13, %v5659_v37  ;;  %v5823_v20 = vpop.f32.mrb[43].mxu1 }
 0x4e7   : > { %v6251_v7 = vadd.f32 %v6136_v12, %v5983_v43  ;;  %5955 = vst.msk [vmem:[#allocation4 + $0x40] sm:$0xff] %vm1244_vm15, %v5923_v51  ;;  %v5986_v2 = vld [vmem:[#allocation4 + $0x38] sm:$0xff]  ;;  %v5924_v44 = vadd.f32 %v5823_v20, %v5657_v39  ;;  %v5670_v43 = vld [vmem:[#allocation4 + $0xb0] sm:$0xff] }
 0x4e8   : > { %6285 = vst.msk [vmem:[#allocation4 + $0x30] sm:$0xff] %vm1244_vm15, %v6253_v26  ;;  %v6254_v25 = vadd.f32 %v7844_v17, %v5986_v2  ;;  %5958 = vst.msk [vmem:[#allocation4 + $0x58] sm:$0xff] %vm1244_vm15, %v5926_v6  ;;  %v5984_v32 = vld [vmem:[#allocation4 + $0x28] sm:$0xff] }
 0x4e9   : > { %6283 = vst.msk [vmem:[#allocation4 + $0x20] sm:$0xff] %vm1244_vm15, %v6251_v7  ;;  %v6252_v14 = vadd.f32 %v6139_v56, %v5984_v32  ;;  %5956 = vst.msk [vmem:[#allocation4 + $0x48] sm:$0xff] %vm1244_vm15, %v5924_v44  ;;  %v5668_v7 = vld [vmem:[#allocation4 + $0xa0] sm:$0xff]  ;;  %v5671_v32 = vld [vmem:[#allocation4 + $0xb8] sm:$0xff] }
 0x4ea   : > { %6286 = vst.msk [vmem:[#allocation4 + $0x38] sm:$0xff] %vm1244_vm15, %v6254_v25 }
 0x4eb   : > { %6284 = vst.msk [vmem:[#allocation4 + $0x28] sm:$0xff] %vm1244_vm15, %v6252_v14 }
 0x4ed   : > { %v5989_v31 = vld [vmem:[#allocation4 + $0x50] sm:$0xff] }
 0x4ee   : > { %v5987_v48 = vld [vmem:[#allocation4 + $0x40] sm:$0xff] }
 0x4ef   : > { %v5990_v0 = vld [vmem:[#allocation4 + $0x58] sm:$0xff] }
 0x4f0   : > { %v5988_v4 = vld [vmem:[#allocation4 + $0x48] sm:$0xff] }
 0x4f4   : > { %v7847_v21 = vpop.f32.mrb[72].mxu0 }
 0x4f5   : > { %v6257_v1 = vadd.f32 %v7847_v21, %v5989_v31  ;;  %v6152_v58 = vpop.f32.mrb[73].mxu0  ;;  %v5669_v21 = vld [vmem:[#allocation4 + $0xa8] sm:$0xff] }
 0x4f6   : > { %v6255_v10 = vadd.f32 %v6152_v58, %v5987_v48  ;;  %v7848_v30 = vpop.f32.mrb[74].mxu0 }
 0x4f7   : > { %6289 = vst.msk [vmem:[#allocation4 + $0x50] sm:$0xff] %vm1244_vm15, %v6257_v1  ;;  %v6258_v62 = vadd.f32 %v7848_v30, %v5990_v0  ;;  %v6155_v16 = vpop.f32.mrb[75].mxu0  ;;  %v7817_v50 = vpop.f32.mrb[44].mxu1  ;;  %v5674_v30 = vld [vmem:[#allocation4 + $0xd0] sm:$0xff] }
 0x4f8   : > { %6287 = vst.msk [vmem:[#allocation4 + $0x40] sm:$0xff] %vm1244_vm15, %v6255_v10  ;;  %v6256_v42 = vadd.f32 %v6155_v16, %v5988_v4  ;;  %v5929_v46 = vadd.f32 %v7817_v50, %v5662_v11  ;;  %v5836_v3 = vpop.f32.mrb[45].mxu1 }
 0x4f9   : > { %6290 = vst.msk [vmem:[#allocation4 + $0x58] sm:$0xff] %vm1244_vm15, %v6258_v62  ;;  %v5927_v59 = vadd.f32 %v5836_v3, %v5660_v52  ;;  %v7818_v22 = vpop.f32.mrb[46].mxu1  ;;  %v5672_v62 = vld [vmem:[#allocation4 + $0xc0] sm:$0xff] }
 0x4fa   : > { %6288 = vst.msk [vmem:[#allocation4 + $0x48] sm:$0xff] %vm1244_vm15, %v6256_v42  ;;  %5961 = vst.msk [vmem:[#allocation4 + $0x70] sm:$0xff] %vm1244_vm15, %v5929_v46  ;;  %v5930_v40 = vadd.f32 %v7818_v22, %v5663_v35  ;;  %v5839_v23 = vpop.f32.mrb[47].mxu1  ;;  %v5675_v35 = vld [vmem:[#allocation4 + $0xd8] sm:$0xff] }
 0x4fb   : > { %5959 = vst.msk [vmem:[#allocation4 + $0x60] sm:$0xff] %vm1244_vm15, %v5927_v59  ;;  %v5928_v18 = vadd.f32 %v5839_v23, %v5661_v33  ;;  %v5673_v33 = vld [vmem:[#allocation4 + $0xc8] sm:$0xff] }
 0x4fc   : > { %5962 = vst.msk [vmem:[#allocation4 + $0x78] sm:$0xff] %vm1244_vm15, %v5930_v40 }
 0x4fd   : > { %v7851_v49 = vpop.f32.mrb[76].mxu0  ;;  %5960 = vst.msk [vmem:[#allocation4 + $0x68] sm:$0xff] %vm1244_vm15, %v5928_v18 }
 0x4fe   : > { %v6168_v45 = vpop.f32.mrb[77].mxu0 }
 0x4ff   : > { %v7852_v60 = vpop.f32.mrb[78].mxu0 }
 0x500   : > { %v7821_v63 = vpop.f32.mrb[48].mxu1  ;;  %v6171_v54 = vpop.f32.mrb[79].mxu0 }
 0x501   : > { %v5933_v5 = vadd.f32 %v7821_v63, %v5666_v38  ;;  %v5852_v36 = vpop.f32.mrb[49].mxu1  ;;  %v5993_v61 = vld [vmem:[#allocation4 + $0x70] sm:$0xff] }
 0x502   : > { %v5931_v28 = vadd.f32 %v5852_v36, %v5664_v9  ;;  %v7822_v24 = vpop.f32.mrb[50].mxu1  ;;  %v6261_v8 = vadd.f32 %v7851_v49, %v5993_v61  ;;  %v5991_v34 = vld [vmem:[#allocation4 + $0x60] sm:$0xff] }
 0x503   : > { %5965 = vst.msk [vmem:[#allocation4 + $0x90] sm:$0xff] %vm1244_vm15, %v5933_v5  ;;  %v5934_v47 = vadd.f32 %v7822_v24, %v5667_v55  ;;  %v5855_v12 = vpop.f32.mrb[51].mxu1  ;;  %v6259_v41 = vadd.f32 %v6168_v45, %v5991_v34  ;;  %v5994_v17 = vld [vmem:[#allocation4 + $0x78] sm:$0xff]  ;;  %v5678_v34 = vld [vmem:[#allocation4 + $0xf0] sm:$0xff] }
 0x504   : > { %5963 = vst.msk [vmem:[#allocation4 + $0x80] sm:$0xff] %vm1244_vm15, %v5931_v28  ;;  %v5932_v53 = vadd.f32 %v5855_v12, %v5665_v57  ;;  %6293 = vst.msk [vmem:[#allocation4 + $0x70] sm:$0xff] %vm1244_vm15, %v6261_v8  ;;  %v6262_v56 = vadd.f32 %v7852_v60, %v5994_v17  ;;  %v5992_v29 = vld [vmem:[#allocation4 + $0x68] sm:$0xff] }
 0x505   : > { %5966 = vst.msk [vmem:[#allocation4 + $0x98] sm:$0xff] %vm1244_vm15, %v5934_v47  ;;  %6291 = vst.msk [vmem:[#allocation4 + $0x60] sm:$0xff] %vm1244_vm15, %v6259_v41  ;;  %v6260_v37 = vadd.f32 %v6171_v54, %v5992_v29  ;;  %v5676_v41 = vld [vmem:[#allocation4 + $0xe0] sm:$0xff]  ;;  %v5679_v29 = vld [vmem:[#allocation4 + $0xf8] sm:$0xff] }
 0x506   : > { %5964 = vst.msk [vmem:[#allocation4 + $0x88] sm:$0xff] %vm1244_vm15, %v5932_v53  ;;  %6294 = vst.msk [vmem:[#allocation4 + $0x78] sm:$0xff] %vm1244_vm15, %v6262_v56 }
 0x507   : > { %6292 = vst.msk [vmem:[#allocation4 + $0x68] sm:$0xff] %vm1244_vm15, %v6260_v37 }
 0x50a   : > { %v5997_v27 = vld [vmem:[#allocation4 + $0x90] sm:$0xff] }
 0x50b   : > { %v5995_v15 = vld [vmem:[#allocation4 + $0x80] sm:$0xff] }
 0x50c   : > { %v5998_v19 = vld [vmem:[#allocation4 + $0x98] sm:$0xff] }
 0x50d   : > { %v5996_v26 = vld [vmem:[#allocation4 + $0x88] sm:$0xff] }
 0x512   : > { %v7855_v39 = vpop.f32.mrb[80].mxu0 }
 0x513   : > { %v6265_v51 = vadd.f32 %v7855_v39, %v5997_v27  ;;  %v6184_v13 = vpop.f32.mrb[81].mxu0  ;;  %v5677_v39 = vld [vmem:[#allocation4 + $0xe8] sm:$0xff] }
 0x514   : > { %v6263_v6 = vadd.f32 %v6184_v13, %v5995_v15  ;;  %v7856_v20 = vpop.f32.mrb[82].mxu0 }
 0x515   : > { %6297 = vst.msk [vmem:[#allocation4 + $0x90] sm:$0xff] %vm1244_vm15, %v6265_v51  ;;  %v6266_v2 = vadd.f32 %v7856_v20, %v5998_v19  ;;  %v6187_v44 = vpop.f32.mrb[83].mxu0 }
 0x516   : > { %6295 = vst.msk [vmem:[#allocation4 + $0x80] sm:$0xff] %vm1244_vm15, %v6263_v6  ;;  %v6264_v14 = vadd.f32 %v6187_v44, %v5996_v26  ;;  %v6313_v44 = vld [vmem:[#allocation4 + $0x10] sm:$0xff] }
 0x517   : > { %v7825_v25 = vpop.f32.mrb[52].mxu1  ;;  %6298 = vst.msk [vmem:[#allocation4 + $0x98] sm:$0xff] %vm1244_vm15, %v6266_v2 }
 0x518   : > { %v5937_v31 = vadd.f32 %v7825_v25, %v5670_v43  ;;  %v5868_v48 = vpop.f32.mrb[53].mxu1  ;;  %6296 = vst.msk [vmem:[#allocation4 + $0x88] sm:$0xff] %vm1244_vm15, %v6264_v14  ;;  %v6311_v14 = vld [vmem:[#allocation4] sm:$0xff] }
 0x519   : > { %v5935_v0 = vadd.f32 %v5868_v48, %v5668_v7  ;;  %v7826_v1 = vpop.f32.mrb[54].mxu1 }
 0x51a   : > { %5969 = vst.msk [vmem:[#allocation4 + $0xb0] sm:$0xff] %vm1244_vm15, %v5937_v31  ;;  %v5938_v58 = vadd.f32 %v7826_v1, %v5671_v32  ;;  %v5871_v4 = vpop.f32.mrb[55].mxu1 }
 0x51b   : > { %5967 = vst.msk [vmem:[#allocation4 + $0xa0] sm:$0xff] %vm1244_vm15, %v5935_v0  ;;  %v5936_v11 = vadd.f32 %v5871_v4, %v5669_v21  ;;  %v6314_v0 = vld [vmem:[#allocation4 + $0x18] sm:$0xff] }
 0x51c   : > { %5970 = vst.msk [vmem:[#allocation4 + $0xb8] sm:$0xff] %vm1244_vm15, %v5938_v58  ;;  %v7859_v10 = vpop.f32.mrb[84].mxu0 }
 0x51d   : > { %5968 = vst.msk [vmem:[#allocation4 + $0xa8] sm:$0xff] %vm1244_vm15, %v5936_v11  ;;  %v6200_v52 = vpop.f32.mrb[85].mxu0 }
 0x51e   : > { %v7860_v16 = vpop.f32.mrb[86].mxu0 }
 0x51f   : > { %v7829_v50 = vpop.f32.mrb[56].mxu1  ;;  %v6203_v42 = vpop.f32.mrb[87].mxu0 }
 0x520   : > { %v5941_v46 = vadd.f32 %v7829_v50, %v5674_v30  ;;  %v5884_v3 = vpop.f32.mrb[57].mxu1 }
 0x521   : > { %v6001_v59 = vld [vmem:[#allocation4 + $0xb0] sm:$0xff]  ;;  %v5939_v22 = vadd.f32 %v5884_v3, %v5672_v62  ;;  %v7830_v40 = vpop.f32.mrb[58].mxu1 }
 0x522   : > { %v6269_v23 = vadd.f32 %v7859_v10, %v6001_v59  ;;  %5973 = vst.msk [vmem:[#allocation4 + $0xd0] sm:$0xff] %vm1244_vm15, %v5941_v46  ;;  %v5999_v18 = vld [vmem:[#allocation4 + $0xa0] sm:$0xff]  ;;  %v5942_v49 = vadd.f32 %v7830_v40, %v5675_v35  ;;  %v5887_v38 = vpop.f32.mrb[59].mxu1  ;;  %v6312_v10 = vld [vmem:[#allocation4 + $0x8] sm:$0xff]  ;;  %v6317_v46 = vld [vmem:[#allocation4 + $0x30] sm:$0xff] }
 0x523   : > { %v6267_v45 = vadd.f32 %v6200_v52, %v5999_v18  ;;  %5971 = vst.msk [vmem:[#allocation4 + $0xc0] sm:$0xff] %vm1244_vm15, %v5939_v22  ;;  %v6002_v9 = vld [vmem:[#allocation4 + $0xb8] sm:$0xff]  ;;  %v5940_v60 = vadd.f32 %v5887_v38, %v5673_v33  ;;  %v6315_v59 = vld [vmem:[#allocation4 + $0x20] sm:$0xff] }
 0x524   : > { %6301 = vst.msk [vmem:[#allocation4 + $0xb0] sm:$0xff] %vm1244_vm15, %v6269_v23  ;;  %v6270_v63 = vadd.f32 %v7860_v16, %v6002_v9  ;;  %5974 = vst.msk [vmem:[#allocation4 + $0xd8] sm:$0xff] %vm1244_vm15, %v5942_v49  ;;  %v6000_v55 = vld [vmem:[#allocation4 + $0xa8] sm:$0xff]  ;;  %v6318_v23 = vld [vmem:[#allocation4 + $0x38] sm:$0xff] }
 0x525   : > { %6299 = vst.msk [vmem:[#allocation4 + $0xa0] sm:$0xff] %vm1244_vm15, %v6267_v45  ;;  %v6268_v54 = vadd.f32 %v6203_v42, %v6000_v55  ;;  %5972 = vst.msk [vmem:[#allocation4 + $0xc8] sm:$0xff] %vm1244_vm15, %v5940_v60  ;;  %v6316_v45 = vld [vmem:[#allocation4 + $0x28] sm:$0xff] }
 0x526   : > { %6302 = vst.msk [vmem:[#allocation4 + $0xb8] sm:$0xff] %vm1244_vm15, %v6270_v63 }
 0x527   : > { %6300 = vst.msk [vmem:[#allocation4 + $0xa8] sm:$0xff] %vm1244_vm15, %v6268_v54 }
 0x529   : > { %v6005_v5 = vld [vmem:[#allocation4 + $0xd0] sm:$0xff] }
 0x52a   : > { %v6003_v36 = vld [vmem:[#allocation4 + $0xc0] sm:$0xff] }
 0x52b   : > { %v6006_v61 = vld [vmem:[#allocation4 + $0xd8] sm:$0xff] }
 0x52c   : > { %v6004_v8 = vld [vmem:[#allocation4 + $0xc8] sm:$0xff] }
 0x530   : > { %v7863_v57 = vpop.f32.mrb[88].mxu0 }
 0x531   : > { %v6273_v28 = vadd.f32 %v7863_v57, %v6005_v5  ;;  %v6216_v24 = vpop.f32.mrb[89].mxu0 }
 0x532   : > { %v6271_v47 = vadd.f32 %v6216_v24, %v6003_v36  ;;  %v7864_v12 = vpop.f32.mrb[90].mxu0 }
 0x533   : > { %6305 = vst.msk [vmem:[#allocation4 + $0xd0] sm:$0xff] %vm1244_vm15, %v6273_v28  ;;  %v6274_v17 = vadd.f32 %v7864_v12, %v6006_v61  ;;  %v6219_v53 = vpop.f32.mrb[91].mxu0  ;;  %v7833_v56 = vpop.f32.mrb[60].mxu1  ;;  %v6321_v28 = vld [vmem:[#allocation4 + $0x50] sm:$0xff] }
 0x534   : > { %6303 = vst.msk [vmem:[#allocation4 + $0xc0] sm:$0xff] %vm1244_vm15, %v6271_v47  ;;  %v6272_v37 = vadd.f32 %v6219_v53, %v6004_v8  ;;  %v5945_v27 = vadd.f32 %v7833_v56, %v5678_v34  ;;  %v5900_v15 = vpop.f32.mrb[61].mxu1  ;;  %v6319_v47 = vld [vmem:[#allocation4 + $0x40] sm:$0xff]  ;;  %v6322_v53 = vld [vmem:[#allocation4 + $0x58] sm:$0xff] }
 0x535   : > { %6306 = vst.msk [vmem:[#allocation4 + $0xd8] sm:$0xff] %vm1244_vm15, %v6274_v17  ;;  %v5943_v19 = vadd.f32 %v5900_v15, %v5676_v41  ;;  %v7834_v51 = vpop.f32.mrb[62].mxu1  ;;  %v6320_v15 = vld [vmem:[#allocation4 + $0x48] sm:$0xff] }
 0x536   : > { %6304 = vst.msk [vmem:[#allocation4 + $0xc8] sm:$0xff] %vm1244_vm15, %v6272_v37  ;;  %5977 = vst.msk [vmem:[#allocation4 + $0xf0] sm:$0xff] %vm1244_vm15, %v5945_v27  ;;  %v5946_v13 = vadd.f32 %v7834_v51, %v5679_v29  ;;  %v5903_v26 = vpop.f32.mrb[63].mxu1 }
 0x537   : > { %5975 = vst.msk [vmem:[#allocation4 + $0xe0] sm:$0xff] %vm1244_vm15, %v5943_v19  ;;  %v5944_v43 = vadd.f32 %v5903_v26, %v5677_v39 }
 0x538   : > { %v7867_v6 = vpop.f32.mrb[92].mxu0  ;;  %5978 = vst.msk [vmem:[#allocation4 + $0xf8] sm:$0xff] %vm1244_vm15, %v5946_v13 }
 0x539   : > { %v6232_v20 = vpop.f32.mrb[93].mxu0  ;;  %5976 = vst.msk [vmem:[#allocation4 + $0xe8] sm:$0xff] %vm1244_vm15, %v5944_v43 }
 0x53a   : > { %v7868_v7 = vpop.f32.mrb[94].mxu0 }
 0x53b   : > { %v6235_v2 = vpop.f32.mrb[95].mxu0  ;;  %v7873_v25 = vpop.f32.mrb[64].mxu1 }
 0x53c   : > { %v6581_v32 = vadd.f32 %v7873_v25, %v6313_v44  ;;  %v6452_v31 = vpop.f32.mrb[65].mxu1  ;;  %v6325_v44 = vld [vmem:[#allocation4 + $0x70] sm:$0xff] }
 0x53d   : > { %v6009_v48 = vld [vmem:[#allocation4 + $0xf0] sm:$0xff]  ;;  %v6579_v21 = vadd.f32 %v6452_v31, %v6311_v14  ;;  %v7874_v1 = vpop.f32.mrb[66].mxu1  ;;  %v6323_v31 = vld [vmem:[#allocation4 + $0x60] sm:$0xff] }
 0x53e   : > { %v6277_v58 = vadd.f32 %v7867_v6, %v6009_v48  ;;  %v6007_v4 = vld [vmem:[#allocation4 + $0xe0] sm:$0xff]  ;;  %6613 = vst.msk [vmem:[#allocation4 + $0x10] sm:$0xff] %vm1244_vm15, %v6581_v32  ;;  %v6582_v11 = vadd.f32 %v7874_v1, %v6314_v0  ;;  %v6455_v30 = vpop.f32.mrb[67].mxu1  ;;  %v6326_v1 = vld [vmem:[#allocation4 + $0x78] sm:$0xff] }
 0x53f   : > { %v6275_v52 = vadd.f32 %v6232_v20, %v6007_v4  ;;  %v6010_v62 = vld [vmem:[#allocation4 + $0xf8] sm:$0xff]  ;;  %6611 = vst.msk [vmem:[#allocation4] sm:$0xff] %vm1244_vm15, %v6579_v21  ;;  %v6580_v16 = vadd.f32 %v6455_v30, %v6312_v10  ;;  %v6324_v30 = vld [vmem:[#allocation4 + $0x68] sm:$0xff] }
 0x540   : > { %6309 = vst.msk [vmem:[#allocation4 + $0xf0] sm:$0xff] %vm1244_vm15, %v6277_v58  ;;  %v6278_v50 = vadd.f32 %v7868_v7, %v6010_v62  ;;  %v6008_v35 = vld [vmem:[#allocation4 + $0xe8] sm:$0xff]  ;;  %6614 = vst.msk [vmem:[#allocation4 + $0x18] sm:$0xff] %vm1244_vm15, %v6582_v11 }
 0x541   : > { %6307 = vst.msk [vmem:[#allocation4 + $0xe0] sm:$0xff] %vm1244_vm15, %v6275_v52  ;;  %v6276_v42 = vadd.f32 %v6235_v2, %v6008_v35  ;;  %6612 = vst.msk [vmem:[#allocation4 + $0x8] sm:$0xff] %vm1244_vm15, %v6580_v16 }
 0x542   : > { %6310 = vst.msk [vmem:[#allocation4 + $0xf8] sm:$0xff] %vm1244_vm15, %v6278_v50 }
 0x543   : > { %6308 = vst.msk [vmem:[#allocation4 + $0xe8] sm:$0xff] %vm1244_vm15, %v6276_v42  ;;  %v7877_v3 = vpop.f32.mrb[68].mxu1 }
 0x544   : > { %v6585_v33 = vadd.f32 %v7877_v3, %v6317_v46  ;;  %v6468_v22 = vpop.f32.mrb[69].mxu1 }
 0x545   : > { %v6583_v40 = vadd.f32 %v6468_v22, %v6315_v59  ;;  %v7878_v18 = vpop.f32.mrb[70].mxu1  ;;  %v10884_v63 = vld [vmem:[#allocation4 + $0x10] sm:$0xff] }
 0x546   : > { %v10880_v49 = vld [vmem:[#allocation4] sm:$0xff]  ;;  %6617 = vst.msk [vmem:[#allocation4 + $0x30] sm:$0xff] %vm1244_vm15, %v6585_v33  ;;  %v6586_v38 = vadd.f32 %v7878_v18, %v6318_v23  ;;  %v6471_v9 = vpop.f32.mrb[71].mxu1  ;;  %v6678_v61 = vsel %vm1244_vm15, %v10884_v63, 0.0  ;;  %v6329_v22 = vld [vmem:[#allocation4 + $0x90] sm:$0xff] }
 0x547   : > { %6615 = vst.msk [vmem:[#allocation4 + $0x20] sm:$0xff] %vm1244_vm15, %v6583_v40  ;;  %v6584_v60 = vadd.f32 %v6471_v9, %v6316_v45  ;;  %v6675_v54 = vsel %vm1244_vm15, %v10880_v49, 0.0  ;;  %v10894_v36 = vld [vmem:[#allocation4 + $0x18] sm:$0xff] }
 0x548   : > { %v10886_v55 = vld [vmem:[#allocation4 + $0x8] sm:$0xff]  ;;  %6618 = vst.msk [vmem:[#allocation4 + $0x38] sm:$0xff] %vm1244_vm15, %v6586_v38  ;;  %v6680_v41 = vsel %vm1244_vm15, %v10894_v36, 0.0  ;;  %v6327_v38 = vld [vmem:[#allocation4 + $0x80] sm:$0xff] }
 0x549   : > { %v6676_v5 = vsel %vm1244_vm15, %v10886_v55, 0.0  ;;  %6616 = vst.msk [vmem:[#allocation4 + $0x28] sm:$0xff] %vm1244_vm15, %v6584_v60 }
 0x54a   : > { %v6677_v57 = vadd.f32 %v6676_v5, %v6675_v54  ;;  %v6330_v54 = vld [vmem:[#allocation4 + $0x98] sm:$0xff] }
 0x54b   : > { %v7881_v24 = vpop.f32.mrb[72].mxu1 }
 0x54c   : > { %v6679_v8 = vadd.f32 %v6678_v61, %v6677_v57  ;;  %v6589_v34 = vadd.f32 %v7881_v24, %v6321_v28  ;;  %v6484_v12 = vpop.f32.mrb[73].mxu1  ;;  %v6328_v24 = vld [vmem:[#allocation4 + $0x88] sm:$0xff] }
 0x54d   : > { %v6587_v17 = vadd.f32 %v6484_v12, %v6319_v47  ;;  %v7882_v56 = vpop.f32.mrb[74].mxu1  ;;  %v10906_v13 = vld [vmem:[#allocation4 + $0x30] sm:$0xff] }
 0x54e   : > { %v10900_v29 = vld [vmem:[#allocation4 + $0x20] sm:$0xff]  ;;  %v6681_v37 = vadd.f32 %v6680_v41, %v6679_v8  ;;  %6621 = vst.msk [vmem:[#allocation4 + $0x50] sm:$0xff] %vm1244_vm15, %v6589_v34  ;;  %v6590_v27 = vadd.f32 %v7882_v56, %v6322_v53  ;;  %v6487_v39 = vpop.f32.mrb[75].mxu1  ;;  %v6686_v2 = vsel %vm1244_vm15, %v10906_v13, 0.0 }
 0x54f   : > { %v6682_v19 = vsel %vm1244_vm15, %v10900_v29, 0.0  ;;  %6619 = vst.msk [vmem:[#allocation4 + $0x40] sm:$0xff] %vm1244_vm15, %v6587_v17  ;;  %v6588_v51 = vadd.f32 %v6487_v39, %v6320_v15  ;;  %v10914_v20 = vld [vmem:[#allocation4 + $0x38] sm:$0xff]  ;;  %v6333_v15 = vld [vmem:[#allocation4 + $0xb0] sm:$0xff] }
 0x550   : > { %v6683_v26 = vadd.f32 %v6682_v19, %v6681_v37  ;;  %v10908_v43 = vld [vmem:[#allocation4 + $0x28] sm:$0xff]  ;;  %6622 = vst.msk [vmem:[#allocation4 + $0x58] sm:$0xff] %vm1244_vm15, %v6590_v27  ;;  %v6688_v21 = vsel %vm1244_vm15, %v10914_v20, 0.0 }
 0x551   : > { %v6684_v6 = vsel %vm1244_vm15, %v10908_v43, 0.0  ;;  %6620 = vst.msk [vmem:[#allocation4 + $0x48] sm:$0xff] %vm1244_vm15, %v6588_v51 }
 0x552   : > { %v6685_v7 = vadd.f32 %v6684_v6, %v6683_v26  ;;  %v6331_v26 = vld [vmem:[#allocation4 + $0xa0] sm:$0xff] }
 0x553   : > { %v7885_v25 = vpop.f32.mrb[76].mxu1 }
 0x554   : > { %v6687_v32 = vadd.f32 %v6686_v2, %v6685_v7  ;;  %v6593_v14 = vadd.f32 %v7885_v25, %v6325_v44  ;;  %v6500_v48 = vpop.f32.mrb[77].mxu1  ;;  %v6334_v44 = vld [vmem:[#allocation4 + $0xb8] sm:$0xff] }
 0x555   : > { %v6591_v0 = vadd.f32 %v6500_v48, %v6323_v31  ;;  %v7886_v58 = vpop.f32.mrb[78].mxu1  ;;  %v10926_v50 = vld [vmem:[#allocation4 + $0x50] sm:$0xff]  ;;  %v6332_v48 = vld [vmem:[#allocation4 + $0xa8] sm:$0xff] }
 0x556   : > { %v10920_v4 = vld [vmem:[#allocation4 + $0x40] sm:$0xff]  ;;  %v6689_v11 = vadd.f32 %v6688_v21, %v6687_v32  ;;  %6625 = vst.msk [vmem:[#allocation4 + $0x70] sm:$0xff] %vm1244_vm15, %v6593_v14  ;;  %v6594_v10 = vadd.f32 %v7886_v58, %v6326_v1  ;;  %v6503_v52 = vpop.f32.mrb[79].mxu1  ;;  %v6694_v59 = vsel %vm1244_vm15, %v10926_v50, 0.0 }
 0x557   : > { %v6690_v62 = vsel %vm1244_vm15, %v10920_v4, 0.0  ;;  %6623 = vst.msk [vmem:[#allocation4 + $0x60] sm:$0xff] %vm1244_vm15, %v6591_v0  ;;  %v6592_v16 = vadd.f32 %v6503_v52, %v6324_v30  ;;  %v10934_v3 = vld [vmem:[#allocation4 + $0x58] sm:$0xff] }
 0x558   : > { %v6691_v35 = vadd.f32 %v6690_v62, %v6689_v11  ;;  %v10928_v42 = vld [vmem:[#allocation4 + $0x48] sm:$0xff]  ;;  %6626 = vst.msk [vmem:[#allocation4 + $0x78] sm:$0xff] %vm1244_vm15, %v6594_v10  ;;  %v6696_v9 = vsel %vm1244_vm15, %v10934_v3, 0.0 }
 0x559   : > { %v6692_v46 = vsel %vm1244_vm15, %v10928_v42, 0.0  ;;  %6624 = vst.msk [vmem:[#allocation4 + $0x68] sm:$0xff] %vm1244_vm15, %v6592_v16  ;;  %v6337_v16 = vld [vmem:[#allocation4 + $0xd0] sm:$0xff] }
 0x55a   : > { %v6693_v33 = vadd.f32 %v6692_v46, %v6691_v35 }
 0x55b   : > { %v7889_v40 = vpop.f32.mrb[80].mxu1 }
 0x55c   : > { %v6695_v23 = vadd.f32 %v6694_v59, %v6693_v33  ;;  %v6597_v18 = vadd.f32 %v7889_v40, %v6329_v22  ;;  %v6516_v45 = vpop.f32.mrb[81].mxu1  ;;  %v6335_v59 = vld [vmem:[#allocation4 + $0xc0] sm:$0xff] }
 0x55d   : > { %v6595_v60 = vadd.f32 %v6516_v45, %v6327_v38  ;;  %v7890_v5 = vpop.f32.mrb[82].mxu1  ;;  %v10946_v12 = vld [vmem:[#allocation4 + $0x70] sm:$0xff] }
 0x55e   : > { %v10940_v57 = vld [vmem:[#allocation4 + $0x60] sm:$0xff]  ;;  %v6697_v61 = vadd.f32 %v6696_v9, %v6695_v23  ;;  %6629 = vst.msk [vmem:[#allocation4 + $0x90] sm:$0xff] %vm1244_vm15, %v6597_v18  ;;  %v6598_v28 = vadd.f32 %v7890_v5, %v6330_v54  ;;  %v6519_v8 = vpop.f32.mrb[83].mxu1  ;;  %v6702_v27 = vsel %vm1244_vm15, %v10946_v12, 0.0  ;;  %v6338_v18 = vld [vmem:[#allocation4 + $0xd8] sm:$0xff]  ;;  %v6336_v54 = vld [vmem:[#allocation4 + $0xc8] sm:$0xff] }
 0x55f   : > { %v6698_v34 = vsel %vm1244_vm15, %v10940_v57, 0.0  ;;  %6627 = vst.msk [vmem:[#allocation4 + $0x80] sm:$0xff] %vm1244_vm15, %v6595_v60  ;;  %v6596_v47 = vadd.f32 %v6519_v8, %v6328_v24  ;;  %v10954_v56 = vld [vmem:[#allocation4 + $0x78] sm:$0xff] }
 0x560   : > { %v6699_v41 = vadd.f32 %v6698_v34, %v6697_v61  ;;  %v10948_v17 = vld [vmem:[#allocation4 + $0x68] sm:$0xff]  ;;  %6630 = vst.msk [vmem:[#allocation4 + $0x98] sm:$0xff] %vm1244_vm15, %v6598_v28  ;;  %v6704_v7 = vsel %vm1244_vm15, %v10954_v56, 0.0 }
 0x561   : > { %v6700_v53 = vsel %vm1244_vm15, %v10948_v17, 0.0  ;;  %6628 = vst.msk [vmem:[#allocation4 + $0x88] sm:$0xff] %vm1244_vm15, %v6596_v47 }
 0x562   : > { %v6701_v37 = vadd.f32 %v6700_v53, %v6699_v41 }
 0x563   : > { %v7893_v39 = vpop.f32.mrb[84].mxu1 }
 0x564   : > { %v6703_v19 = vadd.f32 %v6702_v27, %v6701_v37  ;;  %v6601_v51 = vadd.f32 %v7893_v39, %v6333_v15  ;;  %v6532_v6 = vpop.f32.mrb[85].mxu1  ;;  %v6341_v27 = vld [vmem:[#allocation4 + $0xf0] sm:$0xff] }
 0x565   : > { %v6599_v2 = vadd.f32 %v6532_v6, %v6331_v26  ;;  %v7894_v25 = vpop.f32.mrb[86].mxu1  ;;  %v10966_v58 = vld [vmem:[#allocation4 + $0x90] sm:$0xff] }
 0x566   : > { %v10960_v32 = vld [vmem:[#allocation4 + $0x80] sm:$0xff]  ;;  %v6705_v14 = vadd.f32 %v6704_v7, %v6703_v19  ;;  %6633 = vst.msk [vmem:[#allocation4 + $0xb0] sm:$0xff] %vm1244_vm15, %v6601_v51  ;;  %v6602_v31 = vadd.f32 %v7894_v25, %v6334_v44  ;;  %v6535_v21 = vpop.f32.mrb[87].mxu1  ;;  %v6710_v46 = vsel %vm1244_vm15, %v10966_v58, 0.0 }
 0x567   : > { %v6706_v0 = vsel %vm1244_vm15, %v10960_v32, 0.0  ;;  %6631 = vst.msk [vmem:[#allocation4 + $0xa0] sm:$0xff] %vm1244_vm15, %v6599_v2  ;;  %v6600_v1 = vadd.f32 %v6535_v21, %v6332_v48  ;;  %v10974_v52 = vld [vmem:[#allocation4 + $0x98] sm:$0xff]  ;;  %v6339_v51 = vld [vmem:[#allocation4 + $0xe0] sm:$0xff] }
 0x568   : > { %v6707_v11 = vadd.f32 %v6706_v0, %v6705_v14  ;;  %v10968_v10 = vld [vmem:[#allocation4 + $0x88] sm:$0xff]  ;;  %6634 = vst.msk [vmem:[#allocation4 + $0xb8] sm:$0xff] %vm1244_vm15, %v6602_v31  ;;  %v6712_v45 = vsel %vm1244_vm15, %v10974_v52, 0.0  ;;  %v6342_v2 = vld [vmem:[#allocation4 + $0xf8] sm:$0xff] }
 0x569   : > { %v6708_v30 = vsel %vm1244_vm15, %v10968_v10, 0.0  ;;  %6632 = vst.msk [vmem:[#allocation4 + $0xa8] sm:$0xff] %vm1244_vm15, %v6600_v1  ;;  %v6340_v31 = vld [vmem:[#allocation4 + $0xe8] sm:$0xff] }
 0x56a   : > { %v6709_v62 = vadd.f32 %v6708_v30, %v6707_v11 }
 0x56b   : > { %v7897_v35 = vpop.f32.mrb[88].mxu1 }
 0x56c   : > { %v6605_v33 = vadd.f32 %v7897_v35, %v6337_v16  ;;  %v6548_v22 = vpop.f32.mrb[89].mxu1  ;;  %v6711_v40 = vadd.f32 %v6710_v46, %v6709_v62 }
 0x56d   : > { %v6603_v23 = vadd.f32 %v6548_v22, %v6335_v59  ;;  %v7898_v38 = vpop.f32.mrb[90].mxu1  ;;  %v10989_v34 = vld [vmem:[#allocation4 + $0xb0] sm:$0xff] }
 0x56e   : > { %v10980_v9 = vld [vmem:[#allocation4 + $0xa0] sm:$0xff]  ;;  %6637 = vst.msk [vmem:[#allocation4 + $0xd0] sm:$0xff] %vm1244_vm15, %v6605_v33  ;;  %v6606_v60 = vadd.f32 %v7898_v38, %v6338_v18  ;;  %v6551_v5 = vpop.f32.mrb[91].mxu1  ;;  %v6713_v61 = vadd.f32 %v6712_v45, %v6711_v40  ;;  %v6718_v39 = vsel %vm1244_vm15, %v10989_v34, 0.0 }
 0x56f   : > { %6635 = vst.msk [vmem:[#allocation4 + $0xc0] sm:$0xff] %vm1244_vm15, %v6603_v23  ;;  %v6604_v28 = vadd.f32 %v6551_v5, %v6336_v54  ;;  %v6714_v24 = vsel %vm1244_vm15, %v10980_v9, 0.0  ;;  %v10994_v53 = vld [vmem:[#allocation4 + $0xb8] sm:$0xff] }
 0x570   : > { %6638 = vst.msk [vmem:[#allocation4 + $0xd8] sm:$0xff] %vm1244_vm15, %v6606_v60  ;;  %v10987_v8 = vld [vmem:[#allocation4 + $0xa8] sm:$0xff]  ;;  %v6715_v47 = vadd.f32 %v6714_v24, %v6713_v61  ;;  %v6720_v25 = vsel %vm1244_vm15, %v10994_v53, 0.0 }
 0x571   : > { %6636 = vst.msk [vmem:[#allocation4 + $0xc8] sm:$0xff] %vm1244_vm15, %v6604_v28  ;;  %v6716_v41 = vsel %vm1244_vm15, %v10987_v8, 0.0 }
 0x572   : > { %v6717_v37 = vadd.f32 %v6716_v41, %v6715_v47 }
 0x573   : > { %v7901_v15 = vpop.f32.mrb[92].mxu1 }
 0x574   : > { %v6609_v19 = vadd.f32 %v7901_v15, %v6341_v27  ;;  %v6564_v26 = vpop.f32.mrb[93].mxu1  ;;  %v6719_v6 = vadd.f32 %v6718_v39, %v6717_v37 }
 0x575   : > { %v6607_v7 = vadd.f32 %v6564_v26, %v6339_v51  ;;  %v7902_v44 = vpop.f32.mrb[94].mxu1  ;;  %v11009_v62 = vld [vmem:[#allocation4 + $0xd0] sm:$0xff] }
 0x576   : > { %6641 = vst.msk [vmem:[#allocation4 + $0xf0] sm:$0xff] %vm1244_vm15, %v6609_v19  ;;  %v6610_v14 = vadd.f32 %v7902_v44, %v6342_v2  ;;  %v6567_v48 = vpop.f32.mrb[95].mxu1  ;;  %v11001_v21 = vld [vmem:[#allocation4 + $0xc0] sm:$0xff]  ;;  %v6721_v0 = vadd.f32 %v6720_v25, %v6719_v6  ;;  %v6726_v59 = vsel %vm1244_vm15, %v11009_v62, 0.0 }
 0x577   : > { %6639 = vst.msk [vmem:[#allocation4 + $0xe0] sm:$0xff] %vm1244_vm15, %v6607_v7  ;;  %v6608_v1 = vadd.f32 %v6567_v48, %v6340_v31  ;;  %v6722_v11 = vsel %vm1244_vm15, %v11001_v21, 0.0  ;;  %v11014_v46 = vld [vmem:[#allocation4 + $0xd8] sm:$0xff] }
 0x578   : > { %6642 = vst.msk [vmem:[#allocation4 + $0xf8] sm:$0xff] %vm1244_vm15, %v6610_v14  ;;  %v11007_v30 = vld [vmem:[#allocation4 + $0xc8] sm:$0xff]  ;;  %v6723_v16 = vadd.f32 %v6722_v11, %v6721_v0  ;;  %v6728_v40 = vsel %vm1244_vm15, %v11014_v46, 0.0 }
 0x579   : > { %6640 = vst.msk [vmem:[#allocation4 + $0xe8] sm:$0xff] %vm1244_vm15, %v6608_v1  ;;  %v6724_v35 = vsel %vm1244_vm15, %v11007_v30, 0.0 }
 0x57a   : > { %v6725_v33 = vadd.f32 %v6724_v35, %v6723_v16 }
 0x57c   : > { %v6727_v22 = vadd.f32 %v6726_v59, %v6725_v33 }
 0x57d   : > { %v11026_v60 = vld [vmem:[#allocation4 + $0xf0] sm:$0xff] }
 0x57e   : > { %v11020_v23 = vld [vmem:[#allocation4 + $0xe0] sm:$0xff]  ;;  %v6729_v18 = vadd.f32 %v6728_v40, %v6727_v22  ;;  %v6734_v24 = vsel %vm1244_vm15, %v11026_v60, 0.0 }
 0x57f   : > { %v6730_v38 = vsel %vm1244_vm15, %v11020_v23, 0.0  ;;  %v11030_v61 = vld [vmem:[#allocation4 + $0xf8] sm:$0xff] }
 0x580   : > { %v11024_v45 = vld [vmem:[#allocation4 + $0xe8] sm:$0xff]  ;;  %v6731_v54 = vadd.f32 %v6730_v38, %v6729_v18  ;;  %v6736_v41 = vsel %vm1244_vm15, %v11030_v61, 0.0 }
 0x581   : > { %v6732_v5 = vsel %vm1244_vm15, %v11024_v45, 0.0 }
 0x582   : > { %v6733_v28 = vadd.f32 %v6732_v5, %v6731_v54 }
 0x584   : > { %v6735_v47 = vadd.f32 %v6734_v24, %v6733_v28 }
 0x586   : > { %v6737_v37 = vadd.f32 %v6736_v41, %v6735_v47 }
 0x588   : > { %v6738_v27 = vrot.slane %v6737_v37, 4 }
 0x58a   : > { %v6739_v15 = vadd.f32 %v6738_v27, %v6737_v37 }
 0x58c   : > { %v6740_v39 = vrot.slane %v6739_v15, 2 }
 0x58e   : > { %v6741_v19 = vadd.f32 %v6740_v39, %v6739_v15 }
 0x590   : > { %v6742_v51 = vrot.slane %v6741_v19, 1 }
 0x592   : > { %v6743_v26 = vadd.f32 %v6742_v51, %v6741_v19 }
 0x594   : > { %v11036_v6 = vmul.f32 0.00390625, %v6743_v26 }
 0x596   : > { %v6745_v7 = vsub.f32 %v10880_v49, %v11036_v6  ;;  %v6746_v2 = vsub.f32 %v10886_v55, %v11036_v6  ;;  %v6747_v44 = vsub.f32 %v10884_v63, %v11036_v6  ;;  %v6748_v25 = vsub.f32 %v10894_v36, %v11036_v6 }
 0x597   : > { %v6749_v14 = vsub.f32 %v10900_v29, %v11036_v6  ;;  %v6750_v31 = vsub.f32 %v10908_v43, %v11036_v6  ;;  %v6751_v48 = vsub.f32 %v10906_v13, %v11036_v6  ;;  %v6752_v49 = vsub.f32 %v10914_v20, %v11036_v6 }
 0x598   : > { %v6753_v55 = vsub.f32 %v10920_v4, %v11036_v6  ;;  %v6754_v63 = vsub.f32 %v10928_v42, %v11036_v6  ;;  %v6755_v36 = vsub.f32 %v10926_v50, %v11036_v6  ;;  %v6756_v29 = vsub.f32 %v10934_v3, %v11036_v6  ;;  %6777 = vst.msk [vmem:[#allocation4] sm:$0xff] %vm1244_vm15, %v6745_v7 }
 0x599   : > { %6778 = vst.msk [vmem:[#allocation4 + $0x8] sm:$0xff] %vm1244_vm15, %v6746_v2  ;;  %6779 = vst.msk [vmem:[#allocation4 + $0x10] sm:$0xff] %vm1244_vm15, %v6747_v44  ;;  %v6757_v13 = vsub.f32 %v10940_v57, %v11036_v6  ;;  %v6758_v43 = vsub.f32 %v10948_v17, %v11036_v6  ;;  %v6759_v20 = vsub.f32 %v10946_v12, %v11036_v6 }
 0x59a   : > { %6780 = vst.msk [vmem:[#allocation4 + $0x18] sm:$0xff] %vm1244_vm15, %v6748_v25  ;;  %v6760_v4 = vsub.f32 %v10954_v56, %v11036_v6  ;;  %6781 = vst.msk [vmem:[#allocation4 + $0x20] sm:$0xff] %vm1244_vm15, %v6749_v14  ;;  %v6761_v50 = vsub.f32 %v10960_v32, %v11036_v6  ;;  %v6762_v42 = vsub.f32 %v10968_v10, %v11036_v6 }
 0x59b   : > { %6782 = vst.msk [vmem:[#allocation4 + $0x28] sm:$0xff] %vm1244_vm15, %v6750_v31  ;;  %6783 = vst.msk [vmem:[#allocation4 + $0x30] sm:$0xff] %vm1244_vm15, %v6751_v48  ;;  %v6763_v3 = vsub.f32 %v10966_v58, %v11036_v6  ;;  %v6764_v57 = vsub.f32 %v10974_v52, %v11036_v6  ;;  %v6765_v12 = vsub.f32 %v10980_v9, %v11036_v6 }
 0x59c   : > { %6784 = vst.msk [vmem:[#allocation4 + $0x38] sm:$0xff] %vm1244_vm15, %v6752_v49  ;;  %6785 = vst.msk [vmem:[#allocation4 + $0x40] sm:$0xff] %vm1244_vm15, %v6753_v55  ;;  %v6766_v17 = vsub.f32 %v10987_v8, %v11036_v6  ;;  %v6767_v56 = vsub.f32 %v10989_v34, %v11036_v6  ;;  %v6768_v32 = vsub.f32 %v10994_v53, %v11036_v6 }
 0x59d   : > { %6786 = vst.msk [vmem:[#allocation4 + $0x48] sm:$0xff] %vm1244_vm15, %v6754_v63  ;;  %6787 = vst.msk [vmem:[#allocation4 + $0x50] sm:$0xff] %vm1244_vm15, %v6755_v36  ;;  %v6769_v58 = vsub.f32 %v11001_v21, %v11036_v6  ;;  %v6770_v10 = vsub.f32 %v11007_v30, %v11036_v6  ;;  %v6771_v52 = vsub.f32 %v11009_v62, %v11036_v6 }
 0x59e   : > { %6788 = vst.msk [vmem:[#allocation4 + $0x58] sm:$0xff] %vm1244_vm15, %v6756_v29  ;;  %6789 = vst.msk [vmem:[#allocation4 + $0x60] sm:$0xff] %vm1244_vm15, %v6757_v13  ;;  %v6772_v9 = vsub.f32 %v11014_v46, %v11036_v6  ;;  %v6773_v8 = vsub.f32 %v11020_v23, %v11036_v6  ;;  %v6774_v34 = vsub.f32 %v11024_v45, %v11036_v6 }
 0x59f   : > { %6790 = vst.msk [vmem:[#allocation4 + $0x68] sm:$0xff] %vm1244_vm15, %v6758_v43  ;;  %6791 = vst.msk [vmem:[#allocation4 + $0x70] sm:$0xff] %vm1244_vm15, %v6759_v20  ;;  %v6775_v53 = vsub.f32 %v11026_v60, %v11036_v6  ;;  %v6776_v21 = vsub.f32 %v11030_v61, %v11036_v6  ;;  %v11134_v0 = vld [vmem:[#allocation4] sm:$0xff] }
 0x5a0   : > { %6792 = vst.msk [vmem:[#allocation4 + $0x78] sm:$0xff] %vm1244_vm15, %v6760_v4  ;;  %6793 = vst.msk [vmem:[#allocation4 + $0x80] sm:$0xff] %vm1244_vm15, %v6761_v50  ;;  %v11136_v1 = vld [vmem:[#allocation4 + $0x8] sm:$0xff]  ;;  %v11138_v11 = vld [vmem:[#allocation4 + $0x10] sm:$0xff]  ;;  %v6841_v62 = vmul.f32 %v11134_v0, %v11134_v0 }
 0x5a1   : > { %6794 = vst.msk [vmem:[#allocation4 + $0x88] sm:$0xff] %vm1244_vm15, %v6762_v42  ;;  %6795 = vst.msk [vmem:[#allocation4 + $0x90] sm:$0xff] %vm1244_vm15, %v6763_v3  ;;  %v11140_v30 = vld [vmem:[#allocation4 + $0x18] sm:$0xff]  ;;  %v6842_v16 = vmul.f32 %v11136_v1, %v11136_v1  ;;  %v6843_v35 = vmul.f32 %v11138_v11, %v11138_v11  ;;  %v11148_v46 = vld [vmem:[#allocation4 + $0x20] sm:$0xff] }
 0x5a2   : > { %6796 = vst.msk [vmem:[#allocation4 + $0x98] sm:$0xff] %vm1244_vm15, %v6764_v57  ;;  %6797 = vst.msk [vmem:[#allocation4 + $0xa0] sm:$0xff] %vm1244_vm15, %v6765_v12  ;;  %v6873_v33 = vsel %vm1244_vm15, %v6841_v62, 0.0  ;;  %v6844_v59 = vmul.f32 %v11140_v30, %v11140_v30  ;;  %v11154_v40 = vld [vmem:[#allocation4 + $0x28] sm:$0xff]  ;;  %v6845_v18 = vmul.f32 %v11148_v46, %v11148_v46  ;;  %v11159_v45 = vld [vmem:[#allocation4 + $0x30] sm:$0xff] }
 0x5a3   : > { %6798 = vst.msk [vmem:[#allocation4 + $0xa8] sm:$0xff] %vm1244_vm15, %v6766_v17  ;;  %6799 = vst.msk [vmem:[#allocation4 + $0xb0] sm:$0xff] %vm1244_vm15, %v6767_v56  ;;  %v6874_v22 = vsel %vm1244_vm15, %v6842_v16, 0.0  ;;  %v6876_v38 = vsel %vm1244_vm15, %v6843_v35, 0.0  ;;  %v6846_v54 = vmul.f32 %v11154_v40, %v11154_v40  ;;  %v11164_v61 = vld [vmem:[#allocation4 + $0x38] sm:$0xff]  ;;  %v6847_v24 = vmul.f32 %v11159_v45, %v11159_v45  ;;  %v11169_v41 = vld [vmem:[#allocation4 + $0x40] sm:$0xff] }
 0x5a4   : > { %6800 = vst.msk [vmem:[#allocation4 + $0xb8] sm:$0xff] %vm1244_vm15, %v6768_v32  ;;  %6801 = vst.msk [vmem:[#allocation4 + $0xc0] sm:$0xff] %vm1244_vm15, %v6769_v58  ;;  %v6875_v23 = vadd.f32 %v6874_v22, %v6873_v33  ;;  %v6878_v5 = vsel %vm1244_vm15, %v6844_v59, 0.0  ;;  %v6880_v47 = vsel %vm1244_vm15, %v6845_v18, 0.0  ;;  %v6848_v27 = vmul.f32 %v11164_v61, %v11164_v61  ;;  %v11174_v39 = vld [vmem:[#allocation4 + $0x48] sm:$0xff]  ;;  %v11179_v6 = vld [vmem:[#allocation4 + $0x50] sm:$0xff] }
 0x5a5   : > { %6802 = vst.msk [vmem:[#allocation4 + $0xc8] sm:$0xff] %vm1244_vm15, %v6770_v10  ;;  %6803 = vst.msk [vmem:[#allocation4 + $0xd0] sm:$0xff] %vm1244_vm15, %v6771_v52  ;;  %v6882_v15 = vsel %vm1244_vm15, %v6846_v54, 0.0  ;;  %v6849_v51 = vmul.f32 %v11169_v41, %v11169_v41  ;;  %v6884_v26 = vsel %vm1244_vm15, %v6847_v24, 0.0  ;;  %v6850_v2 = vmul.f32 %v11174_v39, %v11174_v39  ;;  %v11184_v25 = vld [vmem:[#allocation4 + $0x58] sm:$0xff]  ;;  %v11189_v49 = vld [vmem:[#allocation4 + $0x60] sm:$0xff] }
 0x5a6   : > { %6804 = vst.msk [vmem:[#allocation4 + $0xd8] sm:$0xff] %vm1244_vm15, %v6772_v9  ;;  %6805 = vst.msk [vmem:[#allocation4 + $0xe0] sm:$0xff] %vm1244_vm15, %v6773_v8  ;;  %v6877_v60 = vadd.f32 %v6876_v38, %v6875_v23  ;;  %v6886_v44 = vsel %vm1244_vm15, %v6848_v27, 0.0  ;;  %v6851_v31 = vmul.f32 %v11179_v6, %v11179_v6  ;;  %v6852_v63 = vmul.f32 %v11184_v25, %v11184_v25  ;;  %v11194_v29 = vld [vmem:[#allocation4 + $0x68] sm:$0xff]  ;;  %v11199_v4 = vld [vmem:[#allocation4 + $0x70] sm:$0xff] }
 0x5a7   : > { %6806 = vst.msk [vmem:[#allocation4 + $0xe8] sm:$0xff] %vm1244_vm15, %v6774_v34  ;;  %6807 = vst.msk [vmem:[#allocation4 + $0xf0] sm:$0xff] %vm1244_vm15, %v6775_v53  ;;  %v6888_v48 = vsel %vm1244_vm15, %v6849_v51, 0.0  ;;  %v6890_v36 = vsel %vm1244_vm15, %v6850_v2, 0.0  ;;  %v6853_v43 = vmul.f32 %v11189_v49, %v11189_v49  ;;  %v6854_v42 = vmul.f32 %v11194_v29, %v11194_v29  ;;  %v11204_v57 = vld [vmem:[#allocation4 + $0x78] sm:$0xff]  ;;  %v11209_v32 = vld [vmem:[#allocation4 + $0x80] sm:$0xff] }
 0x5a8   : > { %6808 = vst.msk [vmem:[#allocation4 + $0xf8] sm:$0xff] %vm1244_vm15, %v6776_v21  ;;  %v6879_v28 = vadd.f32 %v6878_v5, %v6877_v60  ;;  %v6892_v20 = vsel %vm1244_vm15, %v6851_v31, 0.0  ;;  %v6894_v3 = vsel %vm1244_vm15, %v6852_v63, 0.0  ;;  %v6855_v17 = vmul.f32 %v11199_v4, %v11199_v4  ;;  %v11214_v9 = vld [vmem:[#allocation4 + $0x88] sm:$0xff]  ;;  %v11219_v21 = vld [vmem:[#allocation4 + $0x90] sm:$0xff] }
 0x5a9   : > { %v6896_v56 = vsel %vm1244_vm15, %v6853_v43, 0.0  ;;  %v6856_v10 = vmul.f32 %v11204_v57, %v11204_v57  ;;  %v6898_v52 = vsel %vm1244_vm15, %v6854_v42, 0.0  ;;  %v6857_v34 = vmul.f32 %v11209_v32, %v11209_v32  ;;  %v11224_v33 = vld [vmem:[#allocation4 + $0x98] sm:$0xff]  ;;  %v11229_v18 = vld [vmem:[#allocation4 + $0xa0] sm:$0xff] }
 0x5aa   : > { %v6881_v37 = vadd.f32 %v6880_v47, %v6879_v28  ;;  %v6900_v53 = vsel %vm1244_vm15, %v6855_v17, 0.0  ;;  %v6858_v16 = vmul.f32 %v11214_v9, %v11214_v9  ;;  %v6859_v22 = vmul.f32 %v11219_v21, %v11219_v21  ;;  %v11234_v5 = vld [vmem:[#allocation4 + $0xa8] sm:$0xff] }
 0x5ab   : > { %v6902_v35 = vsel %vm1244_vm15, %v6856_v10, 0.0  ;;  %v6904_v23 = vsel %vm1244_vm15, %v6857_v34, 0.0  ;;  %v6860_v60 = vmul.f32 %v11224_v33, %v11224_v33  ;;  %v6861_v24 = vmul.f32 %v11229_v18, %v11229_v18  ;;  %v11244_v51 = vld [vmem:[#allocation4 + $0xb8] sm:$0xff] }
 0x5ac   : > { %v6883_v19 = vadd.f32 %v6882_v15, %v6881_v37  ;;  %v6906_v54 = vsel %vm1244_vm15, %v6858_v16, 0.0  ;;  %v6908_v47 = vsel %vm1244_vm15, %v6859_v22, 0.0  ;;  %v11239_v37 = vld [vmem:[#allocation4 + $0xb0] sm:$0xff]  ;;  %v6862_v15 = vmul.f32 %v11234_v5, %v11234_v5 }
 0x5ad   : > { %v6912_v2 = vsel %vm1244_vm15, %v6861_v24, 0.0  ;;  %v6864_v31 = vmul.f32 %v11244_v51, %v11244_v51  ;;  %v11259_v43 = vld [vmem:[#allocation4 + $0xd0] sm:$0xff] }
 0x5ae   : > { %v6885_v7 = vadd.f32 %v6884_v26, %v6883_v19  ;;  %v6910_v19 = vsel %vm1244_vm15, %v6860_v60, 0.0  ;;  %v6867_v17 = vmul.f32 %v11259_v43, %v11259_v43  ;;  %v11274_v34 = vld [vmem:[#allocation4 + $0xe8] sm:$0xff] }
 0x5af   : > { %v6918_v42 = vsel %vm1244_vm15, %v6864_v31, 0.0  ;;  %v6870_v22 = vmul.f32 %v11274_v34, %v11274_v34 }
 0x5b0   : > { %v6887_v14 = vadd.f32 %v6886_v44, %v6885_v7  ;;  %v6863_v7 = vmul.f32 %v11239_v37, %v11239_v37  ;;  %v11249_v44 = vld [vmem:[#allocation4 + $0xc0] sm:$0xff]  ;;  %v6924_v16 = vsel %vm1244_vm15, %v6867_v17, 0.0 }
 0x5b2   : > { %v6889_v55 = vadd.f32 %v6888_v48, %v6887_v14  ;;  %v6914_v48 = vsel %vm1244_vm15, %v6862_v15, 0.0 }
 0x5b4   : > { %v6891_v13 = vadd.f32 %v6890_v36, %v6889_v55  ;;  %v11254_v55 = vld [vmem:[#allocation4 + $0xc8] sm:$0xff]  ;;  %v6865_v36 = vmul.f32 %v11249_v44, %v11249_v44 }
 0x5b6   : > { %v6893_v50 = vadd.f32 %v6892_v20, %v6891_v13  ;;  %v6916_v13 = vsel %vm1244_vm15, %v6863_v7, 0.0 }
 0x5b8   : > { %v6895_v12 = vadd.f32 %v6894_v3, %v6893_v50  ;;  %v6866_v50 = vmul.f32 %v11254_v55, %v11254_v55  ;;  %v11264_v3 = vld [vmem:[#allocation4 + $0xd8] sm:$0xff] }
 0x5ba   : > { %v6897_v58 = vadd.f32 %v6896_v56, %v6895_v12  ;;  %v6920_v56 = vsel %vm1244_vm15, %v6865_v36, 0.0 }
 0x5bc   : > { %v6899_v8 = vadd.f32 %v6898_v52, %v6897_v58  ;;  %v11269_v58 = vld [vmem:[#allocation4 + $0xe0] sm:$0xff]  ;;  %v6868_v52 = vmul.f32 %v11264_v3, %v11264_v3 }
 0x5be   : > { %v6901_v62 = vadd.f32 %v6900_v53, %v6899_v8  ;;  %v6922_v8 = vsel %vm1244_vm15, %v6866_v50, 0.0 }
 0x5c0   : > { %v6903_v59 = vadd.f32 %v6902_v35, %v6901_v62  ;;  %v6869_v62 = vmul.f32 %v11269_v58, %v11269_v58  ;;  %v11279_v35 = vld [vmem:[#allocation4 + $0xf0] sm:$0xff] }
 0x5c2   : > { %v6905_v38 = vadd.f32 %v6904_v23, %v6903_v59  ;;  %v6926_v23 = vsel %vm1244_vm15, %v6868_v52, 0.0 }
 0x5c4   : > { %v6907_v28 = vadd.f32 %v6906_v54, %v6905_v38  ;;  %v11284_v38 = vld [vmem:[#allocation4 + $0xf8] sm:$0xff]  ;;  %v6871_v54 = vmul.f32 %v11279_v35, %v11279_v35 }
 0x5c6   : > { %v6909_v27 = vadd.f32 %v6908_v47, %v6907_v28  ;;  %v6928_v28 = vsel %vm1244_vm15, %v6869_v62, 0.0  ;;  %v6872_v47 = vmul.f32 %v11284_v38, %v11284_v38 }
 0x5c8   : > { %v6911_v26 = vadd.f32 %v6910_v19, %v6909_v27  ;;  %v6930_v27 = vsel %vm1244_vm15, %v6870_v22, 0.0  ;;  %v6932_v19 = vsel %vm1244_vm15, %v6871_v54, 0.0  ;;  %v6934_v7 = vsel %vm1244_vm15, %v6872_v47, 0.0  ;;  %v6983_v22 = vld [vmem:[%s8023_s23 + $0x30] sm:$0xff]  ;;  %v6986_v54 = vld [vmem:[%s8023_s23 + $0x48] sm:$0xff]  ;;  %v6989_v47 = vld [vmem:[%s8023_s23 + $0x60] sm:$0xff] }
 0x5ca   : > { %v6913_v14 = vadd.f32 %v6912_v2, %v6911_v26 }
 0x5cc   : > { %v6915_v63 = vadd.f32 %v6914_v48, %v6913_v14 }
 0x5ce   : > { %v6917_v20 = vadd.f32 %v6916_v13, %v6915_v63 }
 0x5d0   : > { %v6919_v12 = vadd.f32 %v6918_v42, %v6917_v20 }
 0x5d2   : > { %v6921_v10 = vadd.f32 %v6920_v56, %v6919_v12 }
 0x5d4   : > { %v6923_v53 = vadd.f32 %v6922_v8, %v6921_v10 }
 0x5d6   : > { %v6925_v59 = vadd.f32 %v6924_v16, %v6923_v53 }
 0x5d8   : > { %v6927_v60 = vadd.f32 %v6926_v23, %v6925_v59  ;;  %v6982_v59 = vld [vmem:[%s8023_s23 + $0x28] sm:$0xff]  ;;  %v6984_v23 = vld [vmem:[%s8023_s23 + $0x38] sm:$0xff] }
 0x5da   : > { %v6929_v24 = vadd.f32 %v6928_v28, %v6927_v60  ;;  %v6985_v60 = vld [vmem:[%s8023_s23 + $0x40] sm:$0xff]  ;;  %v6987_v28 = vld [vmem:[%s8023_s23 + $0x50] sm:$0xff] }
 0x5dc   : > { %v6931_v15 = vadd.f32 %v6930_v27, %v6929_v24  ;;  %v6990_v27 = vld [vmem:[%s8023_s23 + $0x68] sm:$0xff] }
 0x5de   : > { %v6933_v26 = vadd.f32 %v6932_v19, %v6931_v15  ;;  %v6991_v15 = vld [vmem:[%s8023_s23 + $0x70] sm:$0xff]  ;;  %v6992_v19 = vld [vmem:[%s8023_s23 + $0x78] sm:$0xff] }
 0x5e0   : > { %v6935_v2 = vadd.f32 %v6934_v7, %v6933_v26  ;;  %v6993_v26 = vld [vmem:[%s8023_s23 + $0x80] sm:$0xff]  ;;  %v6994_v7 = vld [vmem:[%s8023_s23 + $0x88] sm:$0xff] }
 0x5e2   : > { %v6936_v14 = vrot.slane %v6935_v2, 4 }
 0x5e4   : > { %v6937_v31 = vadd.f32 %v6936_v14, %v6935_v2  ;;  %v6995_v2 = vld [vmem:[%s8023_s23 + $0x90] sm:$0xff] }
 0x5e6   : > { %v6938_v48 = vrot.slane %v6937_v31, 2 }
 0x5e8   : > { %v6939_v63 = vadd.f32 %v6938_v48, %v6937_v31 }
 0x5ea   : > { %v6940_v36 = vrot.slane %v6939_v63, 1 }
 0x5ec   : > { %v6941_v13 = vadd.f32 %v6940_v36, %v6939_v63  ;;  %v6998_v63 = vld [vmem:[%s8023_s23 + $0xa8] sm:$0xff] }
 0x5ee   : > { %v6942_v20 = vmul.f32 0.00390625, %v6941_v13 }
 0x5f0   : > { %v6943_v50 = vadd.f32 1e-05, %v6942_v20 }
 0x5f2   : > { %7963 = vrsqrt.f32 %v6943_v50 }
 0x5fc   : > { %v7964_v42 = vpop.eup %7963 }
 0x5fd   : > { %v6945_v12 = vmul.f32 %v7964_v42, %v11134_v0  ;;  %v6946_v17 = vmul.f32 %v7964_v42, %v11136_v1  ;;  %v6947_v56 = vmul.f32 %v7964_v42, %v11138_v11  ;;  %v6948_v10 = vmul.f32 %v7964_v42, %v11140_v30 }
 0x5fe   : > { %v6949_v52 = vmul.f32 %v7964_v42, %v11148_v46  ;;  %v6950_v8 = vmul.f32 %v7964_v42, %v11154_v40  ;;  %v6951_v53 = vmul.f32 %v7964_v42, %v11159_v45  ;;  %v6952_v62 = vmul.f32 %v7964_v42, %v11164_v61 }
 0x5ff   : > { %v6953_v0 = vmul.f32 %v7964_v42, %v11169_v41  ;;  %v6954_v1 = vmul.f32 %v7964_v42, %v11174_v39  ;;  %v6955_v11 = vmul.f32 %v7964_v42, %v11179_v6  ;;  %v6956_v30 = vmul.f32 %v7964_v42, %v11184_v25  ;;  %v6977_v41 = vld [vmem:[%s8023_s23] sm:$0xff]  ;;  %v6978_v39 = vld [vmem:[%s8023_s23 + $0x8] sm:$0xff]  ;;  %v6979_v6 = vld [vmem:[%s8023_s23 + $0x10] sm:$0xff] }
 0x600   : > { %v11307_v46 = vmul.f32 %v7964_v42, %v11189_v49  ;;  %v11310_v40 = vmul.f32 %v7964_v42, %v11194_v29  ;;  %v11313_v45 = vmul.f32 %v7964_v42, %v11199_v4  ;;  %v11316_v61 = vmul.f32 %v7964_v42, %v11204_v57  ;;  %v6980_v25 = vld [vmem:[%s8023_s23 + $0x18] sm:$0xff]  ;;  %v6981_v57 = vld [vmem:[%s8023_s23 + $0x20] sm:$0xff] }
 0x601   : > { %v11323_v16 = vmul.f32 %v7964_v42, %v11209_v32  ;;  %v11326_v49 = vmul.f32 %v7964_v42, %v11214_v9  ;;  %v11329_v29 = vmul.f32 %v7964_v42, %v11219_v21  ;;  %v11332_v4 = vmul.f32 %v7964_v42, %v11224_v33 }
 0x602   : > { %v11339_v32 = vmul.f32 %v7964_v42, %v11229_v18  ;;  %v11342_v9 = vmul.f32 %v7964_v42, %v11234_v5  ;;  %v11345_v21 = vmul.f32 %v7964_v42, %v11239_v37  ;;  %v11348_v33 = vmul.f32 %v7964_v42, %v11244_v51  ;;  %v6988_v51 = vld [vmem:[%s8023_s23 + $0x58] sm:$0xff] }
 0x603   : > { %v11354_v24 = vmul.f32 %v7964_v42, %v11249_v44  ;;  %v11357_v18 = vmul.f32 %v7964_v42, %v11254_v55  ;;  %v11360_v5 = vmul.f32 %v7964_v42, %v11259_v43  ;;  %v11363_v37 = vmul.f32 %v7964_v42, %v11264_v3 }
 0x604   : > { %v11376_v44 = vmul.f32 %v7964_v42, %v11269_v58  ;;  %v11379_v55 = vmul.f32 %v7964_v42, %v11274_v34  ;;  %v11382_v43 = vmul.f32 %v7964_v42, %v11279_v35  ;;  %v11385_v3 = vmul.f32 %v7964_v42, %v11284_v38  ;;  %v6996_v58 = vld [vmem:[%s8023_s23 + $0x98] sm:$0xff]  ;;  %v6997_v35 = vld [vmem:[%s8023_s23 + $0xa0] sm:$0xff]  ;;  %v6999_v38 = vld [vmem:[%s8023_s23 + $0xb0] sm:$0xff] }
 0x605   : > { %v7009_v14 = vadd.f32 %v6977_v41, %v6945_v12  ;;  %v7010_v31 = vadd.f32 %v6978_v39, %v6946_v17  ;;  %v7011_v48 = vadd.f32 %v6979_v6, %v6947_v56  ;;  %v7012_v34 = vadd.f32 %v6980_v25, %v6948_v10  ;;  %v7000_v42 = vld [vmem:[%s8023_s23 + $0xb8] sm:$0xff]  ;;  %v7002_v12 = vld [vmem:[%s8023_s23 + $0xc8] sm:$0xff] }
 0x606   : > { %11644 = vst [vmem:[#allocation9_spill] sm:$0xff] %v11385_v3  ;;  %v7013_v36 = vadd.f32 %v6981_v57, %v6949_v52  ;;  %v7014_v13 = vadd.f32 %v6982_v59, %v6950_v8  ;;  %v7015_v20 = vadd.f32 %v6983_v22, %v6951_v53  ;;  %v7016_v50 = vadd.f32 %v6984_v23, %v6952_v62  ;;  %v7001_v3 = vld [vmem:[%s8023_s23 + $0xc0] sm:$0xff]  ;;  %v7003_v52 = vld [vmem:[%s8023_s23 + $0xd0] sm:$0xff]  ;;  %v7004_v8 = vld [vmem:[%s8023_s23 + $0xd8] sm:$0xff] }
 0x607   : > { %v7017_v17 = vadd.f32 %v6985_v60, %v6953_v0  ;;  %v7018_v56 = vadd.f32 %v6986_v54, %v6954_v1  ;;  %v7019_v10 = vadd.f32 %v6987_v28, %v6955_v11  ;;  %v7020_v41 = vadd.f32 %v6988_v51, %v6956_v30  ;;  %7041 = vst.msk [vmem:[%s11373_s27] sm:$0xff] %vm1244_vm15, %v7009_v14  ;;  %v7005_v53 = vld [vmem:[%s8023_s23 + $0xe0] sm:$0xff]  ;;  %v7006_v30 = vld [vmem:[%s8023_s23 + $0xe8] sm:$0xff] }
 0x608   : > { %7042 = vst.msk [vmem:[%s11373_s27 + $0x8] sm:$0xff] %vm1244_vm15, %v7010_v31  ;;  %7043 = vst.msk [vmem:[%s11373_s27 + $0x10] sm:$0xff] %vm1244_vm15, %v7011_v48  ;;  %v7021_v62 = vadd.f32 %v6989_v47, %v11307_v46  ;;  %v7022_v0 = vadd.f32 %v6990_v27, %v11310_v40  ;;  %v7023_v1 = vadd.f32 %v6991_v15, %v11313_v45  ;;  %v7007_v46 = vld [vmem:[%s8023_s23 + $0xf0] sm:$0xff]  ;;  %v7008_v40 = vld [vmem:[%s8023_s23 + $0xf8] sm:$0xff] }
 0x609   : > { %7044 = vst.msk [vmem:[%s11373_s27 + $0x18] sm:$0xff] %vm1244_vm15, %v7012_v34  ;;  %v7024_v11 = vadd.f32 %v6992_v19, %v11316_v61  ;;  %7045 = vst.msk [vmem:[%s11373_s27 + $0x20] sm:$0xff] %vm1244_vm15, %v7013_v36  ;;  %v7025_v45 = vadd.f32 %v6993_v26, %v11323_v16  ;;  %v7026_v39 = vadd.f32 %v6994_v7, %v11326_v49 }
 0x60a   : > { %7046 = vst.msk [vmem:[%s11373_s27 + $0x28] sm:$0xff] %vm1244_vm15, %v7014_v13  ;;  %7047 = vst.msk [vmem:[%s11373_s27 + $0x30] sm:$0xff] %vm1244_vm15, %v7015_v20  ;;  %v7027_v61 = vadd.f32 %v6995_v2, %v11329_v29  ;;  %v7028_v6 = vadd.f32 %v6996_v58, %v11332_v4  ;;  %v7029_v25 = vadd.f32 %v6997_v35, %v11339_v32 }
 0x60b   : > { %7048 = vst.msk [vmem:[%s11373_s27 + $0x38] sm:$0xff] %vm1244_vm15, %v7016_v50  ;;  %7049 = vst.msk [vmem:[%s11373_s27 + $0x40] sm:$0xff] %vm1244_vm15, %v7017_v17  ;;  %v7030_v16 = vadd.f32 %v6998_v63, %v11342_v9  ;;  %v7031_v49 = vadd.f32 %v6999_v38, %v11345_v21  ;;  %v7032_v29 = vadd.f32 %v7000_v42, %v11348_v33 }
 0x60c   : > { %7050 = vst.msk [vmem:[%s11373_s27 + $0x48] sm:$0xff] %vm1244_vm15, %v7018_v56  ;;  %7051 = vst.msk [vmem:[%s11373_s27 + $0x50] sm:$0xff] %vm1244_vm15, %v7019_v10  ;;  %v7033_v4 = vadd.f32 %v7001_v3, %v11354_v24  ;;  %v7034_v57 = vadd.f32 %v7002_v12, %v11357_v18  ;;  %v7035_v59 = vadd.f32 %v7003_v52, %v11360_v5 }
 0x60d   : > { %7052 = vst.msk [vmem:[%s11373_s27 + $0x58] sm:$0xff] %vm1244_vm15, %v7020_v41  ;;  %7053 = vst.msk [vmem:[%s11373_s27 + $0x60] sm:$0xff] %vm1244_vm15, %v7021_v62  ;;  %v7036_v22 = vadd.f32 %v7004_v8, %v11363_v37  ;;  %v7037_v23 = vadd.f32 %v7005_v53, %v11376_v44  ;;  %v7038_v32 = vadd.f32 %v7006_v30, %v11379_v55  ;;  %v11645_v21 = vld [vmem:[#allocation9_spill] sm:$0xff] }
 0x60e   : > { %7054 = vst.msk [vmem:[%s11373_s27 + $0x68] sm:$0xff] %vm1244_vm15, %v7022_v0  ;;  %7055 = vst.msk [vmem:[%s11373_s27 + $0x70] sm:$0xff] %vm1244_vm15, %v7023_v1  ;;  %v7039_v9 = vadd.f32 %v7007_v46, %v11382_v43  ;;  %v7040_v33 = vadd.f32 %v7008_v40, %v11645_v21 }
 0x60f   : > { %7056 = vst.msk [vmem:[%s11373_s27 + $0x78] sm:$0xff] %vm1244_vm15, %v7024_v11  ;;  %7057 = vst.msk [vmem:[%s11373_s27 + $0x80] sm:$0xff] %vm1244_vm15, %v7025_v45 }
 0x610   : > { %7058 = vst.msk [vmem:[%s11373_s27 + $0x88] sm:$0xff] %vm1244_vm15, %v7026_v39  ;;  %7059 = vst.msk [vmem:[%s11373_s27 + $0x90] sm:$0xff] %vm1244_vm15, %v7027_v61 }
 0x611   : > { %7060 = vst.msk [vmem:[%s11373_s27 + $0x98] sm:$0xff] %vm1244_vm15, %v7028_v6  ;;  %7061 = vst.msk [vmem:[%s11373_s27 + $0xa0] sm:$0xff] %vm1244_vm15, %v7029_v25 }
 0x612   : > { %7062 = vst.msk [vmem:[%s11373_s27 + $0xa8] sm:$0xff] %vm1244_vm15, %v7030_v16  ;;  %7063 = vst.msk [vmem:[%s11373_s27 + $0xb0] sm:$0xff] %vm1244_vm15, %v7031_v49 }
 0x613   : > { %7064 = vst.msk [vmem:[%s11373_s27 + $0xb8] sm:$0xff] %vm1244_vm15, %v7032_v29  ;;  %7065 = vst.msk [vmem:[%s11373_s27 + $0xc0] sm:$0xff] %vm1244_vm15, %v7033_v4 }
 0x614   : > { %7066 = vst.msk [vmem:[%s11373_s27 + $0xc8] sm:$0xff] %vm1244_vm15, %v7034_v57  ;;  %7067 = vst.msk [vmem:[%s11373_s27 + $0xd0] sm:$0xff] %vm1244_vm15, %v7035_v59 }
 0x615   : > { %7068 = vst.msk [vmem:[%s11373_s27 + $0xd8] sm:$0xff] %vm1244_vm15, %v7036_v22  ;;  %7069 = vst.msk [vmem:[%s11373_s27 + $0xe0] sm:$0xff] %vm1244_vm15, %v7037_v23 }
 0x616   : > { %7070 = vst.msk [vmem:[%s11373_s27 + $0xe8] sm:$0xff] %vm1244_vm15, %v7038_v32  ;;  %7071 = vst.msk [vmem:[%s11373_s27 + $0xf0] sm:$0xff] %vm1244_vm15, %v7039_v9 }
 0x617   : > { %7072 = vst.msk [vmem:[%s11373_s27 + $0xf8] sm:$0xff] %vm1244_vm15, %v7040_v33 }
 0x618 PF: > { %s15_s18 = sadd.s32 1, %s7973_s18  }
 0x619   : > { %p12_p4 = scmp.ge.s32.totalorder %s15_s18, 4  }
 0x61b   :  { %14 = sbr.rel (!%p12_p4) target bundleno = 1 (0x1), region = 76 }

</bundles_post_ra>
